<compile_context>
chip_gen: v7x
topology: tpu7x:2x2x1
jax: 0.10.0
libtpu: 0.0.40
codegen_flags: <defaults>
</compile_context>

<pallas_src>
import functools

import jax
import jax.numpy as jnp
from jax import lax
from jax.experimental import pallas as pl
from jax.experimental.pallas import tpu as pltpu


def _pq_kernel(prep_ref, qrep_ref, a_ref, x_ref, o_ref):
    # prep_ref : (d*d, d)    qrep_ref : (d, d*d)
    # a_ref    : (tb, d*d)   x_ref    : (tb, d)    o_ref : (tb, d)
    # y_rep[b, j*d + k] = (Q @ x[b])[k]   -- small MXU matmul, lane dense.
    y_rep = lax.dot_general(
        x_ref[...], qrep_ref[...],
        dimension_numbers=(((1,), (0,)), ((), ())),
        precision=lax.Precision.HIGHEST,
        preferred_element_type=jnp.float32)                    # (tb, d*d)

    # prod[b, j*d + k] = A[b, j, k] * (Q @ x[b])[k]            (VPU, lane dense)
    prod = a_ref[...] * y_rep                                  # (tb, d*d)

    # out[b, i] = sum_{j,k} P[i, j] * A[b, j, k] * (Q @ x[b])[k]
    #           = prod @ Prep     -- MXU matmul, K = d*d.
    o_ref[...] = lax.dot_general(
        prod, prep_ref[...],
        dimension_numbers=(((1,), (0,)), ((), ())),
        precision=lax.Precision.HIGHEST,
        preferred_element_type=jnp.float32).astype(o_ref.dtype)


def _pq_call(Prep, Q_rep, A_flat, x, tb, n_rows, D):
    """Run the kernel over the first `n_rows` rows (n_rows % tb == 0)."""
    DD = D * D
    grid = (n_rows // tb,)
    cost = pl.CostEstimate(
        flops=4 * n_rows * D * D * D,
        transcendentals=0,
        bytes_accessed=4 * (n_rows * DD + 2 * n_rows * D + 2 * D * DD),
    )
    return pl.pallas_call(
        _pq_kernel,
        out_shape=jax.ShapeDtypeStruct((n_rows, D), jnp.float32),
        grid=grid,
        in_specs=[
            pl.BlockSpec((DD, D), lambda i: (0, 0)),      # Prep  (resident)
            pl.BlockSpec((D, DD), lambda i: (0, 0)),      # Q_rep (resident)
            pl.BlockSpec((tb, DD), lambda i: (i, 0)),     # A tile (streamed)
            pl.BlockSpec((tb, D), lambda i: (i, 0)),      # x tile
        ],
        out_specs=pl.BlockSpec((tb, D), lambda i: (i, 0)),
        compiler_params=pltpu.CompilerParams(
            dimension_semantics=("parallel",),
            vmem_limit_bytes=32 * 1024 * 1024,
        ),
        cost_estimate=cost,
    )(Prep, Q_rep, A_flat, x)


def _choose_tb(B, row_bytes, *, tile_budget_bytes=4 * 1024 * 1024, steps_target=8):
    """Batch-tile size from *padded* VMEM bytes; aims for >= steps_target steps."""
    if B * row_bytes <= tile_budget_bytes:
        return B                                   # whole batch in one block
    tb_cap = max(8, ((tile_budget_bytes // row_bytes) // 8) * 8)
    tb = min(tb_cap, pl.cdiv(B, steps_target))
    tb = max(8, (tb // 8) * 8)                     # sublane aligned
    return tb


@functools.partial(jax.jit, static_argnames=("tb",))
def pq_forward(P, Q, A, x, *, tb=None):
    """out[b] = P @ A[b] @ Q @ x[b]  (computed as (A_flat * (x @ Q_rep)) @ Prep)."""
    B, D, D2 = A.shape
    assert D == D2 and P.shape == (D, D) and Q.shape == (D, D) and x.shape == (B, D)

    f32 = jnp.float32
    P = P.astype(f32)
    Q = Q.astype(f32)
    x = x.astype(f32)
    A_flat = A.reshape(B, D * D).astype(f32)       # contiguous -> free under jit

    # Prep[j*D + k, i] = P[i, j] ;  Q_rep[l, j*D + k] = Q[k, l]
    Prep = jnp.kron(P.T, jnp.ones((D, 1), f32))    # (D*D, D)
    Q_rep = jnp.tile(Q.T, (1, D))                  # (D, D*D)

    # Budget with lane-padded bytes (VMEM rows are 128-lane multiples).
    lane_padded = ((D * D + 127) // 128) * 128
    row_bytes = lane_padded * 4

    if tb is None:
        tb = _choose_tb(B, row_bytes)
    else:
        tb = min(tb, B)
        assert tb == B or tb % 8 == 0, "forced tb must divide into sublanes"

    main = (B // tb) * tb
    outs = []
    if main > 0:
        # Full A_flat is passed; only in-bounds blocks [0, main) are accessed,
        # so no HBM copy / pad of A is ever made.
        outs.append(_pq_call(Prep, Q_rep, A_flat, x, tb, main, D))
    rem = B - main
    if rem > 0:
        # Tiny (< tb rows) tail: single-block call on a small slice.
        outs.append(_pq_call(Prep, Q_rep, A_flat[main:], x[main:], rem, rem, D))

    return outs[0] if len(outs) == 1 else jnp.concatenate(outs, axis=0)


def _reference(P, Q, A, x):
    mat = jnp.einsum('ij,bjk,kl->bil', P, A, Q, precision=lax.Precision.HIGHEST)
    return jnp.einsum('bij,bj->bi', mat, x, precision=lax.Precision.HIGHEST)


if __name__ == "__main__":
    B, D = 2, 32
    root = jax.random.PRNGKey(0)
    k_pn, k_qn, k_a, k_x, k_pr, k_qr, k_a2, k_x2 = jax.random.split(root, 8)

    # Parameters exactly as the PyTorch module initializes them:
    #   P = eye(d) + 0.0 * randn(d, d), Q likewise (dense nn.Parameters).
    P = jnp.eye(D, dtype=jnp.float32) + 0.0 * jax.random.normal(k_pn, (D, D), jnp.float32)
    Q = jnp.eye(D, dtype=jnp.float32) + 0.0 * jax.random.normal(k_qn, (D, D), jnp.float32)
    A = jax.random.normal(k_a, (B, D, D), dtype=jnp.float32)
    x = jax.random.normal(k_x, (B, D), dtype=jnp.float32)

    out = jax.block_until_ready(pq_forward(P, Q, A, x))
    ref = _reference(P, Q, A, x)
    assert out.shape == (B, D)
    assert jnp.allclose(out, ref, rtol=1e-4, atol=1e-4)

    # Non-identity P / Q and a batch that exercises the multi-tile + remainder
    # path (grid of 2 blocks of 8 rows, plus a 4-row tail call).
    P2 = jnp.eye(D, dtype=jnp.float32) + 0.1 * jax.random.normal(k_pr, (D, D), jnp.float32)
    Q2 = jnp.eye(D, dtype=jnp.float32) + 0.1 * jax.random.normal(k_qr, (D, D), jnp.float32)
    B2 = 20
    A2 = jax.random.normal(k_a2, (B2, D, D), dtype=jnp.float32)
    x2 = jax.random.normal(k_x2, (B2, D), dtype=jnp.float32)
    out2 = jax.block_until_ready(pq_forward(P2, Q2, A2, x2, tb=8))
    ref2 = _reference(P2, Q2, A2, x2)
    assert out2.shape == (B2, D)
    assert jnp.allclose(out2, ref2, rtol=1e-4, atol=1e-4)

    print("KERNEL_OK")
</pallas_src>

<mosaic_0001>
module attributes {stable_mosaic.version = 11 : i64} {
  func.func @_pq_kernel(%arg0: i32, %arg1: memref<1024x32xf32, #tpu.memory_space<vmem>>, %arg2: memref<32x1024xf32, #tpu.memory_space<vmem>>, %arg3: memref<2x1024xf32, #tpu.memory_space<vmem>>, %arg4: memref<2x32xf32, #tpu.memory_space<vmem>>, %arg5: memref<2x32xf32, #tpu.memory_space<vmem>>) attributes {dimension_semantics = [#tpu.dimension_semantics<parallel>], iteration_bounds = array<i64: 1>, scalar_prefetch = 0 : i64, scratch_operands = 0 : i64, tpu.core_type = #tpu.core_type<tc>, window_params = [{pipeline_mode = #tpu.pipeline_mode<synchronous>, transform_indices = @transform_0, window_bounds = array<i64: 1024, 32>}, {pipeline_mode = #tpu.pipeline_mode<synchronous>, transform_indices = @transform_1, window_bounds = array<i64: 32, 1024>}, {transform_indices = @transform_2, window_bounds = array<i64: 2, 1024>}, {transform_indices = @transform_3, window_bounds = array<i64: 2, 32>}, {transform_indices = @transform_4, window_bounds = array<i64: 2, 32>}]} {
    %c0 = arith.constant 0 : index
    %c0_0 = arith.constant 0 : index
    %0 = vector.load %arg4[%c0, %c0_0] : memref<2x32xf32, #tpu.memory_space<vmem>>, vector<2x32xf32>
    %c0_1 = arith.constant 0 : index
    %c0_2 = arith.constant 0 : index
    %1 = vector.load %arg2[%c0_1, %c0_2] : memref<32x1024xf32, #tpu.memory_space<vmem>>, vector<32x1024xf32>
    %cst = arith.constant dense<0.000000e+00> : vector<2x1024xf32>
    %2 = tpu.matmul %0, %1, %cst {dimension_numbers = #tpu.dot_dimension_numbers<[1], [0], [0], [1], [0, 0, 1, 1], [], []>, precision = #tpu.contract_precision<fp32>} : vector<2x32xf32>, vector<32x1024xf32>, vector<2x1024xf32> -> vector<2x1024xf32>
    %c0_3 = arith.constant 0 : index
    %c0_4 = arith.constant 0 : index
    %3 = vector.load %arg3[%c0_3, %c0_4] : memref<2x1024xf32, #tpu.memory_space<vmem>>, vector<2x1024xf32>
    %4 = arith.mulf %3, %2 : vector<2x1024xf32>
    %c0_5 = arith.constant 0 : index
    %c0_6 = arith.constant 0 : index
    %5 = vector.load %arg1[%c0_5, %c0_6] : memref<1024x32xf32, #tpu.memory_space<vmem>>, vector<1024x32xf32>
    %cst_7 = arith.constant dense<0.000000e+00> : vector<2x32xf32>
    %6 = tpu.matmul %4, %5, %cst_7 {dimension_numbers = #tpu.dot_dimension_numbers<[1], [0], [0], [1], [0, 0, 1, 1], [], []>, precision = #tpu.contract_precision<fp32>} : vector<2x1024xf32>, vector<1024x32xf32>, vector<2x32xf32> -> vector<2x32xf32>
    %c0_8 = arith.constant 0 : index
    %c0_9 = arith.constant 0 : index
    %7 = vector.load %arg5[%c0_8, %c0_9] : memref<2x32xf32, #tpu.memory_space<vmem>>, vector<2x32xf32>
    tpu.vector_store %arg5[%c0_8, %c0_9], %6 {strides = array<i32>} : memref<2x32xf32, #tpu.memory_space<vmem>>, vector<2x32xf32>,
    return
  }
  func.func @transform_0(%arg0: i32) -> (i32, i32) {
    %c0_i32 = arith.constant 0 : i32
    %c0_i32_0 = arith.constant 0 : i32
    %c0_i32_1 = arith.constant 0 : i32
    return %c0_i32, %c0_i32_0 : i32, i32
  }
  func.func @transform_1(%arg0: i32) -> (i32, i32) {
    %c0_i32 = arith.constant 0 : i32
    %c0_i32_0 = arith.constant 0 : i32
    %c0_i32_1 = arith.constant 0 : i32
    return %c0_i32, %c0_i32_0 : i32, i32
  }
  func.func @transform_2(%arg0: i32) -> (i32, i32) {
    %c0_i32 = arith.constant 0 : i32
    %c0_i32_0 = arith.constant 0 : i32
    return %arg0, %c0_i32 : i32, i32
  }
  func.func @transform_3(%arg0: i32) -> (i32, i32) {
    %c0_i32 = arith.constant 0 : i32
    %c0_i32_0 = arith.constant 0 : i32
    return %arg0, %c0_i32 : i32, i32
  }
  func.func @transform_4(%arg0: i32) -> (i32, i32) {
    %c0_i32 = arith.constant 0 : i32
    %c0_i32_0 = arith.constant 0 : i32
    return %arg0, %c0_i32 : i32, i32
  }
}

</mosaic_0001>

<bundles_post_ra>
// kernel: tile.9
= control target key start
LH: loop header
LB: loop body
LE: loop exit
PB: predicated region body
PF: predicated region fallthrough
CT: control target
= control target key end

     0   :  { %vm227_vm0 = vcmask 1041409   ;;  %vm231_vm1 = vcmask 1042434   ;;  %vm235_vm2 = vcmask 1043459   ;;  %vm239_vm3 = vcmask 1044484   ;;  %s4537_s27 = smov 96   ;;  %s4538_s4 = smov 64   ;;  %s8502_s0 = inlined_call_operand.vmem [shape: f32[32,32,32], index: 0, kind: input, shape index: {}]   ;;  %s8503_s1 = inlined_call_operand.vmem [shape: f32[32,1024], index: 1, kind: output, shape index: {}]  }
   0x1   :  { %vm243_vm4 = vcmask 1045509   ;;  %vm247_vm5 = vcmask 1046534   ;;  %vm251_vm6 = vcmask 1047559   ;;  %v3690_v0 = vld [vmem:[%s8502_s0 + $0x103] sm:$0x1]   ;;  %s4539_s14 = smov 32  }
   0x2   :  { %v3691_v1 = vld [vmem:[%s8502_s0 + $0x122] sm:$0x2]   ;;  %v3699_v24 = vld [vmem:[%s8502_s0 + $0x113] sm:$0x1]   ;;  %vm3_vm7 = vcmask 261120   ;;  %vm255_vm8 = vcmask 1048320  }
   0x3   :  { %v3692_v2 = vld [vmem:[%s8502_s0 + $0x141] sm:$0x4]   ;;  %v297_v4 = vsel %vm227_vm0, %v3691_v1, %v3690_v0  ;;  %v3700_v25 = vld [vmem:[%s8502_s0 + $0x132] sm:$0x2]   ;;  %vm1374_vm9 = vcmask 785920   ;;  %vm2493_vm10 = vcmask 523520  }
   0x4   :  { %v3693_v3 = vld [vmem:[%s8502_s0 + $0x160] sm:$0x8]   ;;  %v301_v8 = vsel %vm231_vm1, %v3692_v2, %v297_v4  ;;  %v3701_v26 = vld [vmem:[%s8502_s0 + $0x151] sm:$0x4]   ;;  %v332_v29 = vsel %vm227_vm0, %v3700_v25, %v3699_v24 }
   0x5   :  { %v3694_v5 = vld [vmem:[%s8502_s0 + $0x17f] sm:$0x10]   ;;  %v305_v12 = vsel %vm235_vm2, %v3693_v3, %v301_v8  ;;  %v3702_v30 = vld [vmem:[%s8502_s0 + $0x170] sm:$0x8]   ;;  %v336_v35 = vsel %vm231_vm1, %v3701_v26, %v332_v29 }
   0x6   :  { %v3695_v6 = vld [vmem:[%s8502_s0 + $0x19e] sm:$0x20]   ;;  %v309_v17 = vsel %vm239_vm3, %v3694_v5, %v305_v12  ;;  %v3703_v31 = vld [vmem:[%s8502_s0 + $0x18f] sm:$0x10]   ;;  %v340_v40 = vsel %vm235_vm2, %v3702_v30, %v336_v35 }
   0x7   :  { %v3696_v7 = vld [vmem:[%s8502_s0 + $0x1bd] sm:$0x40]   ;;  %v313_v22 = vsel %vm243_vm4, %v3695_v6, %v309_v17  ;;  %v3704_v32 = vld [vmem:[%s8502_s0 + $0x1ae] sm:$0x20]   ;;  %v344_v45 = vsel %vm239_vm3, %v3703_v31, %v340_v40 }
   0x8   :  { %v3697_v9 = vld [vmem:[%s8502_s0 + $0x1dc] sm:$0x80]   ;;  %v317_v27 = vsel %vm247_vm5, %v3696_v7, %v313_v22  ;;  %v3705_v36 = vld [vmem:[%s8502_s0 + $0x1cd] sm:$0x40]   ;;  %v348_v50 = vsel %vm243_vm4, %v3704_v32, %v344_v45 }
   0x9   :  { %v3673_v10 = vld [vmem:[%s8502_s0 + $0x3] sm:$0x1]   ;;  %v321_v33 = vsel %vm251_vm6, %v3697_v9, %v317_v27  ;;  %v3706_v37 = vld [vmem:[%s8502_s0 + $0x1ec] sm:$0x80]   ;;  %v352_v55 = vsel %vm247_vm5, %v3705_v36, %v348_v50  ;;  %v3753_v50 = vld [vmem:[%s8502_s0 + $0x17] sm:$0x1]  }
   0xa   :  { %v3674_v11 = vld [vmem:[%s8502_s0 + $0x22] sm:$0x2]   ;;  %v3681_v38 = vld [vmem:[%s8502_s0 + $0x13] sm:$0x1]   ;;  %322 = vrot.lane.b32.xlu1 %v321_v33, %s4537_s27  ;;  %v356_v61 = vsel %vm251_vm6, %v3706_v37, %v352_v55 }
   0xb   :  { %v228_v13 = vsel %vm227_vm0, %v3674_v11, %v3673_v10  ;;  %v3675_v14 = vld [vmem:[%s8502_s0 + $0x41] sm:$0x4]   ;;  %v3682_v41 = vld [vmem:[%s8502_s0 + $0x32] sm:$0x2]  }
   0xc   :  { %v3676_v15 = vld [vmem:[%s8502_s0 + $0x60] sm:$0x8]   ;;  %v232_v18 = vsel %vm231_vm1, %v3675_v14, %v228_v13  ;;  %v3683_v42 = vld [vmem:[%s8502_s0 + $0x51] sm:$0x4]   ;;  %v262_v46 = vsel %vm227_vm0, %v3682_v41, %v3681_v38 }
   0xd   :  { %v3677_v16 = vld [vmem:[%s8502_s0 + $0x7f] sm:$0x10]   ;;  %v236_v23 = vsel %vm235_vm2, %v3676_v15, %v232_v18  ;;  %v3684_v43 = vld [vmem:[%s8502_s0 + $0x70] sm:$0x8]   ;;  %v266_v51 = vsel %vm231_vm1, %v3683_v42, %v262_v46 }
   0xe   :  { %v3678_v19 = vld [vmem:[%s8502_s0 + $0x9e] sm:$0x20]   ;;  %v240_v28 = vsel %vm239_vm3, %v3677_v16, %v236_v23  ;;  %v3685_v47 = vld [vmem:[%s8502_s0 + $0x8f] sm:$0x10]   ;;  %v270_v56 = vsel %vm235_vm2, %v3684_v43, %v266_v51  ;;  %357 = vrot.lane.b32.xlu1 %v356_v61, %s4537_s27  ;;  %v3754_v51 = vld [vmem:[%s8502_s0 + $0x36] sm:$0x2]  }
   0xf   :  { %v3679_v20 = vld [vmem:[%s8502_s0 + $0xbd] sm:$0x40]   ;;  %v244_v34 = vsel %vm243_vm4, %v3678_v19, %v240_v28  ;;  %v3686_v48 = vld [vmem:[%s8502_s0 + $0xae] sm:$0x20]   ;;  %v274_v62 = vsel %vm239_vm3, %v3685_v47, %v270_v56  ;;  %v542_v55 = vsel %vm227_vm0, %v3754_v51, %v3753_v50  ;;  %v3756_v56 = vld [vmem:[%s8502_s0 + $0x74] sm:$0x8]  }
  0x10   :  { %v3680_v21 = vld [vmem:[%s8502_s0 + $0xdc] sm:$0x80]   ;;  %v248_v39 = vsel %vm247_vm5, %v3679_v20, %v244_v34  ;;  %v3687_v49 = vld [vmem:[%s8502_s0 + $0xcd] sm:$0x40]   ;;  %v278_v3 = vsel %vm243_vm4, %v3686_v48, %v274_v62  ;;  %v3759_v62 = vld [vmem:[%s8502_s0 + $0xd1] sm:$0x40]  }
  0x11   :  { %v252_v44 = vsel %vm251_vm6, %v3680_v21, %v248_v39  ;;  %v3688_v52 = vld [vmem:[%s8502_s0 + $0xec] sm:$0x80]   ;;  %v3708_v5 = vld [vmem:[%s8502_s0 + $0x203] sm:$0x1]   ;;  %v282_v8 = vsel %vm247_vm5, %v3687_v49, %v278_v3  ;;  %v3745_v3 = vld [vmem:[%s8502_s0 + $0x26] sm:$0x2]  }
  0x12   :  { %253 = vrot.lane.b32.xlu0 %v252_v44, %s4537_s27  ;;  %v3717_v53 = vld [vmem:[%s8502_s0 + $0x213] sm:$0x1]   ;;  %v3709_v6 = vld [vmem:[%s8502_s0 + $0x222] sm:$0x2]   ;;  %v286_v14 = vsel %vm251_vm6, %v3688_v52, %v282_v8  ;;  %v3755_v52 = vld [vmem:[%s8502_s0 + $0x55] sm:$0x4]  }
  0x13   :  { %v3718_v54 = vld [vmem:[%s8502_s0 + $0x232] sm:$0x2]   ;;  %v3710_v7 = vld [vmem:[%s8502_s0 + $0x241] sm:$0x4]   ;;  %v367_v10 = vsel %vm227_vm0, %v3709_v6, %v3708_v5  ;;  %v546_v61 = vsel %vm231_vm1, %v3755_v52, %v542_v55  ;;  %v3747_v5 = vld [vmem:[%s8502_s0 + $0x64] sm:$0x8]  }
  0x14   :  { %v402_v57 = vsel %vm227_vm0, %v3718_v54, %v3717_v53  ;;  %v3719_v58 = vld [vmem:[%s8502_s0 + $0x251] sm:$0x4]   ;;  %v3711_v11 = vld [vmem:[%s8502_s0 + $0x260] sm:$0x8]   ;;  %v371_v16 = vsel %vm231_vm1, %v3710_v7, %v367_v10  ;;  %v3749_v10 = vld [vmem:[%s8502_s0 + $0xa2] sm:$0x20]  }
  0x15   :  { %v3720_v59 = vld [vmem:[%s8502_s0 + $0x270] sm:$0x8]   ;;  %v406_v63 = vsel %vm231_vm1, %v3719_v58, %v402_v57  ;;  %v3712_v12 = vld [vmem:[%s8502_s0 + $0x27f] sm:$0x10]   ;;  %v375_v21 = vsel %vm235_vm2, %v3711_v11, %v371_v16  ;;  %v3757_v57 = vld [vmem:[%s8502_s0 + $0x93] sm:$0x10]  }
  0x16   :  { %v3721_v60 = vld [vmem:[%s8502_s0 + $0x28f] sm:$0x10]   ;;  %v410_v4 = vsel %vm235_vm2, %v3720_v59, %v406_v63  ;;  %v3713_v13 = vld [vmem:[%s8502_s0 + $0x29e] sm:$0x20]   ;;  %287 = vrot.lane.b32.xlu0 %v286_v14, %s4537_s27  ;;  %v379_v26 = vsel %vm239_vm3, %v3712_v12, %v375_v21  ;;  %v3758_v58 = vld [vmem:[%s8502_s0 + $0xb2] sm:$0x20]  }
  0x17   :  { %v3722_v0 = vld [vmem:[%s8502_s0 + $0x2ae] sm:$0x20]   ;;  %v414_v9 = vsel %vm239_vm3, %v3721_v60, %v410_v4  ;;  %v3714_v17 = vld [vmem:[%s8502_s0 + $0x2bd] sm:$0x40]   ;;  %v383_v31 = vsel %vm243_vm4, %v3713_v13, %v379_v26  ;;  %v3760_v63 = vld [vmem:[%s8502_s0 + $0xf0] sm:$0x80]  }
  0x18   :  { %v3723_v1 = vld [vmem:[%s8502_s0 + $0x2cd] sm:$0x40]   ;;  %v418_v15 = vsel %vm243_vm4, %v3722_v0, %v414_v9  ;;  %v3715_v18 = vld [vmem:[%s8502_s0 + $0x2dc] sm:$0x80]   ;;  %v387_v36 = vsel %vm247_vm5, %v3714_v17, %v383_v31  ;;  %v3744_v0 = vld [vmem:[%s8502_s0 + $0x7] sm:$0x1]  }
  0x19   :  { %v3724_v2 = vld [vmem:[%s8502_s0 + $0x2ec] sm:$0x80]   ;;  %v422_v20 = vsel %vm247_vm5, %v3723_v1, %v418_v15  ;;  %v3726_v34 = vld [vmem:[%s8502_s0 + $0x303] sm:$0x1]   ;;  %v391_v42 = vsel %vm251_vm6, %v3715_v18, %v387_v36  ;;  %v3746_v4 = vld [vmem:[%s8502_s0 + $0x45] sm:$0x4]   ;;  %v507_v8 = vsel %vm227_vm0, %v3745_v3, %v3744_v0 }
  0x1a   :  { %v3735_v19 = vld [vmem:[%s8502_s0 + $0x313] sm:$0x1]   ;;  %v426_v25 = vsel %vm251_vm6, %v3724_v2, %v422_v20  ;;  %v3727_v35 = vld [vmem:[%s8502_s0 + $0x322] sm:$0x2]   ;;  %392 = vrot.lane.b32.xlu0 %v391_v42, %s4537_s27  ;;  %v550_v2 = vsel %vm235_vm2, %v3756_v56, %v546_v61  ;;  %v3748_v9 = vld [vmem:[%s8502_s0 + $0x83] sm:$0x10]   ;;  %v511_v13 = vsel %vm231_vm1, %v3746_v4, %v507_v8 }
  0x1b   :  { %v3736_v22 = vld [vmem:[%s8502_s0 + $0x332] sm:$0x2]   ;;  %427 = vrot.lane.b32.xlu1 %v426_v25, %s4537_s27  ;;  %v437_v38 = vsel %vm227_vm0, %v3727_v35, %v3726_v34  ;;  %v3728_v39 = vld [vmem:[%s8502_s0 + $0x341] sm:$0x4]   ;;  %v554_v7 = vsel %vm239_vm3, %v3757_v57, %v550_v2  ;;  %v3750_v11 = vld [vmem:[%s8502_s0 + $0xc1] sm:$0x40]   ;;  %v515_v18 = vsel %vm235_vm2, %v3747_v5, %v511_v13 }
  0x1c   :  { %v3737_v23 = vld [vmem:[%s8502_s0 + $0x351] sm:$0x4]   ;;  %v472_v27 = vsel %vm227_vm0, %v3736_v22, %v3735_v19  ;;  %v3729_v40 = vld [vmem:[%s8502_s0 + $0x360] sm:$0x8]   ;;  %v441_v44 = vsel %vm231_vm1, %v3728_v39, %v437_v38  ;;  %v558_v12 = vsel %vm243_vm4, %v3758_v58, %v554_v7  ;;  %v3751_v14 = vld [vmem:[%s8502_s0 + $0xe0] sm:$0x80]  }
  0x1d   :  { %v3738_v24 = vld [vmem:[%s8502_s0 + $0x370] sm:$0x8]   ;;  %v476_v32 = vsel %vm231_vm1, %v3737_v23, %v472_v27  ;;  %v3730_v41 = vld [vmem:[%s8502_s0 + $0x37f] sm:$0x10]   ;;  %v445_v49 = vsel %vm235_vm2, %v3729_v40, %v441_v44  ;;  %v3771_v15 = vld [vmem:[%s8502_s0 + $0x117] sm:$0x1]   ;;  %v562_v17 = vsel %vm247_vm5, %v3759_v62, %v558_v12 }
  0x1e   :  { %v3739_v28 = vld [vmem:[%s8502_s0 + $0x38f] sm:$0x10]   ;;  %v480_v37 = vsel %vm235_vm2, %v3738_v24, %v476_v32  ;;  %v3731_v45 = vld [vmem:[%s8502_s0 + $0x39e] sm:$0x20]   ;;  %v449_v54 = vsel %vm239_vm3, %v3730_v41, %v445_v49  ;;  %v3772_v16 = vld [vmem:[%s8502_s0 + $0x136] sm:$0x2]   ;;  %v566_v23 = vsel %vm251_vm6, %v3760_v63, %v562_v17  ;;  %v519_v24 = vsel %vm239_vm3, %v3748_v9, %v515_v18 }
  0x1f   :  { %v3740_v29 = vld [vmem:[%s8502_s0 + $0x3ae] sm:$0x20]   ;;  %v484_v43 = vsel %vm239_vm3, %v3739_v28, %v480_v37  ;;  %v3732_v46 = vld [vmem:[%s8502_s0 + $0x3bd] sm:$0x40]   ;;  %v453_v60 = vsel %vm243_vm4, %v3731_v45, %v449_v54  ;;  %v612_v19 = vsel %vm227_vm0, %v3772_v16, %v3771_v15  ;;  %v3773_v20 = vld [vmem:[%s8502_s0 + $0x155] sm:$0x4]  }
  0x20   :  { %v3741_v30 = vld [vmem:[%s8502_s0 + $0x3cd] sm:$0x40]   ;;  %v3733_v47 = vld [vmem:[%s8502_s0 + $0x3dc] sm:$0x80]   ;;  %v488_v48 = vsel %vm243_vm4, %v3740_v29, %v484_v43  ;;  %v457_v1 = vsel %vm247_vm5, %v3732_v46, %v453_v60  ;;  %v3774_v21 = vld [vmem:[%s8502_s0 + $0x174] sm:$0x8]   ;;  %v616_v25 = vsel %vm231_vm1, %v3773_v20, %v612_v19  ;;  %v523_v29 = vsel %vm243_vm4, %v3749_v10, %v519_v24 }
  0x21   :  { %v3742_v33 = vld [vmem:[%s8502_s0 + $0x3ec] sm:$0x80]   ;;  %v492_v53 = vsel %vm247_vm5, %v3741_v30, %v488_v48  ;;  %v461_v6 = vsel %vm251_vm6, %v3733_v47, %v457_v1  ;;  %v3775_v22 = vld [vmem:[%s8502_s0 + $0x193] sm:$0x10]   ;;  %v620_v30 = vsel %vm235_vm2, %v3774_v21, %v616_v25  ;;  %v3762_v31 = vld [vmem:[%s8502_s0 + $0x107] sm:$0x1]   ;;  %v527_v34 = vsel %vm247_vm5, %v3750_v11, %v523_v29 }
  0x22   :  { %v496_v59 = vsel %vm251_vm6, %v3742_v33, %v492_v53  ;;  %462 = vrot.lane.b32.xlu0 %v461_v6, %s4537_s27  ;;  %v3776_v26 = vld [vmem:[%s8502_s0 + $0x1b2] sm:$0x20]   ;;  %v3763_v32 = vld [vmem:[%s8502_s0 + $0x126] sm:$0x2]   ;;  %v624_v35 = vsel %vm239_vm3, %v3775_v22, %v620_v30  ;;  %v531_v40 = vsel %vm251_vm6, %v3751_v14, %v527_v34 }
  0x23   :  { %497 = vrot.lane.b32.xlu1 %v496_v59, %s4537_s27  ;;  %v3777_v27 = vld [vmem:[%s8502_s0 + $0x1d1] sm:$0x40]   ;;  %v3764_v33 = vld [vmem:[%s8502_s0 + $0x145] sm:$0x4]   ;;  %v577_v36 = vsel %vm227_vm0, %v3763_v32, %v3762_v31  ;;  %v628_v41 = vsel %vm243_vm4, %v3776_v26, %v624_v35 }
  0x24   :  { %v3778_v28 = vld [vmem:[%s8502_s0 + $0x1f0] sm:$0x80]   ;;  %v3765_v37 = vld [vmem:[%s8502_s0 + $0x164] sm:$0x8]   ;;  %v581_v42 = vsel %vm231_vm1, %v3764_v33, %v577_v36  ;;  %v632_v46 = vsel %vm247_vm5, %v3777_v27, %v628_v41  ;;  %v3825_v41 = vld [vmem:[%s8502_s0 + $0x1b] sm:$0x1]  }
  0x25   :  { %v3766_v38 = vld [vmem:[%s8502_s0 + $0x183] sm:$0x10]   ;;  %v3789_v45 = vld [vmem:[%s8502_s0 + $0x217] sm:$0x1]   ;;  %v585_v47 = vsel %vm235_vm2, %v3765_v37, %v581_v42  ;;  %v636_v51 = vsel %vm251_vm6, %v3778_v28, %v632_v46  ;;  %v3826_v42 = vld [vmem:[%s8502_s0 + $0x3a] sm:$0x2]  }
  0x26   :  { %v3767_v39 = vld [vmem:[%s8502_s0 + $0x1a2] sm:$0x20]   ;;  %532 = vrot.lane.b32.xlu0 %v531_v40, %s4537_s27  ;;  %v3790_v48 = vld [vmem:[%s8502_s0 + $0x236] sm:$0x2]   ;;  %v589_v52 = vsel %vm239_vm3, %v3766_v38, %v585_v47  ;;  %v3827_v46 = vld [vmem:[%s8502_s0 + $0x59] sm:$0x4]  }
  0x27   :  { %567 = vrot.lane.b32.xlu1 %v566_v23, %s4537_s27  ;;  %v3768_v43 = vld [vmem:[%s8502_s0 + $0x1c1] sm:$0x40]   ;;  %v3791_v49 = vld [vmem:[%s8502_s0 + $0x255] sm:$0x4]   ;;  %v682_v53 = vsel %vm227_vm0, %v3790_v48, %v3789_v45  ;;  %v593_v57 = vsel %vm243_vm4, %v3767_v39, %v589_v52  ;;  %v822_v45 = vsel %vm227_vm0, %v3826_v42, %v3825_v41  ;;  %v3828_v47 = vld [vmem:[%s8502_s0 + $0x78] sm:$0x8]  }
  0x28   :  { %v3769_v44 = vld [vmem:[%s8502_s0 + $0x1e0] sm:$0x80]   ;;  %v3792_v50 = vld [vmem:[%s8502_s0 + $0x274] sm:$0x8]   ;;  %v686_v58 = vsel %vm231_vm1, %v3791_v49, %v682_v53  ;;  %v597_v62 = vsel %vm247_vm5, %v3768_v43, %v593_v57  ;;  %v3829_v48 = vld [vmem:[%s8502_s0 + $0x97] sm:$0x10]  }
  0x29   :  { %v3793_v54 = vld [vmem:[%s8502_s0 + $0x293] sm:$0x10]   ;;  %v3780_v60 = vld [vmem:[%s8502_s0 + $0x207] sm:$0x1]   ;;  %v690_v63 = vsel %vm235_vm2, %v3792_v50, %v686_v58  ;;  %v601_v4 = vsel %vm251_vm6, %v3769_v44, %v597_v62  ;;  %v3830_v52 = vld [vmem:[%s8502_s0 + $0xb6] sm:$0x20]  }
  0x2a   :  { %v3794_v55 = vld [vmem:[%s8502_s0 + $0x2b2] sm:$0x20]   ;;  %v3781_v61 = vld [vmem:[%s8502_s0 + $0x226] sm:$0x2]   ;;  %v694_v5 = vsel %vm239_vm3, %v3793_v54, %v690_v63  ;;  %602 = vrot.lane.b32.xlu0 %v601_v4, %s4537_s27  ;;  %v3831_v53 = vld [vmem:[%s8502_s0 + $0xd5] sm:$0x40]  }
  0x2b   :  { %v3795_v56 = vld [vmem:[%s8502_s0 + $0x2d1] sm:$0x40]   ;;  %637 = vrot.lane.b32.xlu1 %v636_v51, %s4537_s27  ;;  %v647_v0 = vsel %vm227_vm0, %v3781_v61, %v3780_v60  ;;  %v3782_v1 = vld [vmem:[%s8502_s0 + $0x245] sm:$0x4]   ;;  %v698_v10 = vsel %vm243_vm4, %v3794_v55, %v694_v5  ;;  %v826_v51 = vsel %vm231_vm1, %v3827_v46, %v822_v45  ;;  %v3832_v54 = vld [vmem:[%s8502_s0 + $0xf4] sm:$0x80]  }
  0x2c   :  { %v3796_v59 = vld [vmem:[%s8502_s0 + $0x2f0] sm:$0x80]   ;;  %v3783_v2 = vld [vmem:[%s8502_s0 + $0x264] sm:$0x8]   ;;  %v651_v6 = vsel %vm231_vm1, %v3782_v1, %v647_v0  ;;  %v702_v15 = vsel %vm247_vm5, %v3795_v56, %v698_v10  ;;  %v830_v56 = vsel %vm235_vm2, %v3828_v47, %v826_v51  ;;  %v3816_v57 = vld [vmem:[%s8502_s0 + $0xb] sm:$0x1]  }
  0x2d   :  { %v3784_v3 = vld [vmem:[%s8502_s0 + $0x283] sm:$0x10]   ;;  %v655_v11 = vsel %vm235_vm2, %v3783_v2, %v651_v6  ;;  %v3807_v12 = vld [vmem:[%s8502_s0 + $0x317] sm:$0x1]   ;;  %v706_v21 = vsel %vm251_vm6, %v3796_v59, %v702_v15  ;;  %v3817_v58 = vld [vmem:[%s8502_s0 + $0x2a] sm:$0x2]   ;;  %v834_v61 = vsel %vm239_vm3, %v3829_v48, %v830_v56 }
  0x2e   :  { %v3785_v7 = vld [vmem:[%s8502_s0 + $0x2a2] sm:$0x20]   ;;  %v3808_v13 = vld [vmem:[%s8502_s0 + $0x336] sm:$0x2]   ;;  %v659_v16 = vsel %vm239_vm3, %v3784_v3, %v655_v11  ;;  %v3818_v59 = vld [vmem:[%s8502_s0 + $0x49] sm:$0x4]   ;;  %v787_v62 = vsel %vm227_vm0, %v3817_v58, %v3816_v57  ;;  %v838_v3 = vsel %vm243_vm4, %v3830_v52, %v834_v61 }
  0x2f   :  { %v3786_v8 = vld [vmem:[%s8502_s0 + $0x2c1] sm:$0x40]   ;;  %v3809_v14 = vld [vmem:[%s8502_s0 + $0x355] sm:$0x4]   ;;  %v752_v17 = vsel %vm227_vm0, %v3808_v13, %v3807_v12  ;;  %v663_v22 = vsel %vm243_vm4, %v3785_v7, %v659_v16  ;;  %707 = vrot.lane.b32.xlu1 %v706_v21, %s4537_s27  ;;  %v3819_v63 = vld [vmem:[%s8502_s0 + $0x68] sm:$0x8]   ;;  %v791_v4 = vsel %vm231_vm1, %v3818_v59, %v787_v62 }
  0x30   :  { %v3787_v9 = vld [vmem:[%s8502_s0 + $0x2e0] sm:$0x80]   ;;  %v3810_v18 = vld [vmem:[%s8502_s0 + $0x374] sm:$0x8]   ;;  %v756_v23 = vsel %vm231_vm1, %v3809_v14, %v752_v17  ;;  %v667_v27 = vsel %vm247_vm5, %v3786_v8, %v663_v22  ;;  %v3820_v0 = vld [vmem:[%s8502_s0 + $0x87] sm:$0x10]   ;;  %v842_v8 = vsel %vm247_vm5, %v3831_v53, %v838_v3 }
  0x31   :  { %v3811_v19 = vld [vmem:[%s8502_s0 + $0x393] sm:$0x10]   ;;  %v3798_v26 = vld [vmem:[%s8502_s0 + $0x307] sm:$0x1]   ;;  %v760_v28 = vsel %vm235_vm2, %v3810_v18, %v756_v23  ;;  %v671_v32 = vsel %vm251_vm6, %v3787_v9, %v667_v27  ;;  %v3821_v1 = vld [vmem:[%s8502_s0 + $0xa6] sm:$0x20]   ;;  %v795_v9 = vsel %vm235_vm2, %v3819_v63, %v791_v4  ;;  %v846_v13 = vsel %vm251_vm6, %v3832_v54, %v842_v8 }
  0x32   :  { %v3812_v20 = vld [vmem:[%s8502_s0 + $0x3b2] sm:$0x20]   ;;  %v3799_v29 = vld [vmem:[%s8502_s0 + $0x326] sm:$0x2]   ;;  %v764_v33 = vsel %vm239_vm3, %v3811_v19, %v760_v28  ;;  %672 = vrot.lane.b32.xlu0 %v671_v32, %s4537_s27  ;;  %v3822_v5 = vld [vmem:[%s8502_s0 + $0xc5] sm:$0x40]   ;;  %v799_v14 = vsel %vm239_vm3, %v3820_v0, %v795_v9 }
  0x33   :  { %v3813_v24 = vld [vmem:[%s8502_s0 + $0x3d1] sm:$0x40]   ;;  %v3800_v30 = vld [vmem:[%s8502_s0 + $0x345] sm:$0x4]   ;;  %v717_v34 = vsel %vm227_vm0, %v3799_v29, %v3798_v26  ;;  %v768_v38 = vsel %vm243_vm4, %v3812_v20, %v764_v33  ;;  %v3823_v6 = vld [vmem:[%s8502_s0 + $0xe4] sm:$0x80]   ;;  %v803_v19 = vsel %vm243_vm4, %v3821_v1, %v799_v14 }
  0x34   :  { %v3814_v25 = vld [vmem:[%s8502_s0 + $0x3f0] sm:$0x80]   ;;  %v3801_v31 = vld [vmem:[%s8502_s0 + $0x364] sm:$0x8]   ;;  %v721_v39 = vsel %vm231_vm1, %v3800_v30, %v717_v34  ;;  %v772_v43 = vsel %vm247_vm5, %v3813_v24, %v768_v38  ;;  %v3843_v7 = vld [vmem:[%s8502_s0 + $0x11b] sm:$0x1]   ;;  %v807_v24 = vsel %vm247_vm5, %v3822_v5, %v803_v19 }
  0x35   :  { %v3802_v35 = vld [vmem:[%s8502_s0 + $0x383] sm:$0x10]   ;;  %v725_v44 = vsel %vm235_vm2, %v3801_v31, %v721_v39  ;;  %v776_v49 = vsel %vm251_vm6, %v3814_v25, %v772_v43  ;;  %v3844_v10 = vld [vmem:[%s8502_s0 + $0x13a] sm:$0x2]   ;;  %v3834_v22 = vld [vmem:[%s8502_s0 + $0x10b] sm:$0x1]   ;;  %v811_v30 = vsel %vm251_vm6, %v3823_v6, %v807_v24 }
  0x36   :  { %v3803_v36 = vld [vmem:[%s8502_s0 + $0x3a2] sm:$0x20]   ;;  %v729_v50 = vsel %vm239_vm3, %v3802_v35, %v725_v44  ;;  %777 = vrot.lane.b32.xlu1 %v776_v49, %s4537_s27  ;;  %v3845_v11 = vld [vmem:[%s8502_s0 + $0x159] sm:$0x4]   ;;  %v892_v15 = vsel %vm227_vm0, %v3844_v10, %v3843_v7  ;;  %v3835_v23 = vld [vmem:[%s8502_s0 + $0x12a] sm:$0x2]  }
  0x37   :  { %v3804_v37 = vld [vmem:[%s8502_s0 + $0x3c1] sm:$0x40]   ;;  %v733_v55 = vsel %vm243_vm4, %v3803_v36, %v729_v50  ;;  %v3846_v12 = vld [vmem:[%s8502_s0 + $0x178] sm:$0x8]   ;;  %v896_v20 = vsel %vm231_vm1, %v3845_v11, %v892_v15  ;;  %v857_v26 = vsel %vm227_vm0, %v3835_v23, %v3834_v22  ;;  %v3836_v27 = vld [vmem:[%s8502_s0 + $0x149] sm:$0x4]  }
  0x38   :  { %v3805_v40 = vld [vmem:[%s8502_s0 + $0x3e0] sm:$0x80]   ;;  %v737_v60 = vsel %vm247_vm5, %v3804_v37, %v733_v55  ;;  %v3847_v16 = vld [vmem:[%s8502_s0 + $0x197] sm:$0x10]   ;;  %v900_v25 = vsel %vm235_vm2, %v3846_v12, %v896_v20  ;;  %v3837_v28 = vld [vmem:[%s8502_s0 + $0x168] sm:$0x8]   ;;  %v861_v32 = vsel %vm231_vm1, %v3836_v27, %v857_v26 }
  0x39   :  { %v741_v2 = vsel %vm251_vm6, %v3805_v40, %v737_v60  ;;  %v3848_v17 = vld [vmem:[%s8502_s0 + $0x1b6] sm:$0x20]   ;;  %v3838_v29 = vld [vmem:[%s8502_s0 + $0x187] sm:$0x10]   ;;  %v904_v31 = vsel %vm239_vm3, %v3847_v16, %v900_v25  ;;  %v865_v37 = vsel %vm235_vm2, %v3837_v28, %v861_v32 }
  0x3a   :  { %742 = vrot.lane.b32.xlu0 %v741_v2, %s4537_s27  ;;  %v3849_v18 = vld [vmem:[%s8502_s0 + $0x1d5] sm:$0x40]   ;;  %847 = vrot.lane.b32.xlu1 %v846_v13, %s4537_s27  ;;  %v3839_v33 = vld [vmem:[%s8502_s0 + $0x1a6] sm:$0x20]   ;;  %v908_v36 = vsel %vm243_vm4, %v3848_v17, %v904_v31  ;;  %v869_v42 = vsel %vm239_vm3, %v3838_v29, %v865_v37 }
  0x3b   :  { %v3850_v21 = vld [vmem:[%s8502_s0 + $0x1f4] sm:$0x80]   ;;  %v3840_v34 = vld [vmem:[%s8502_s0 + $0x1c5] sm:$0x40]   ;;  %v912_v41 = vsel %vm247_vm5, %v3849_v18, %v908_v36  ;;  %v873_v48 = vsel %vm243_vm4, %v3839_v33, %v869_v42  ;;  %v3897_v33 = vld [vmem:[%s8502_s0 + $0x1f] sm:$0x1]  }
  0x3c   :  { %v3841_v35 = vld [vmem:[%s8502_s0 + $0x1e4] sm:$0x80]   ;;  %v3861_v38 = vld [vmem:[%s8502_s0 + $0x21b] sm:$0x1]   ;;  %v916_v47 = vsel %vm251_vm6, %v3850_v21, %v912_v41  ;;  %v877_v53 = vsel %vm247_vm5, %v3840_v34, %v873_v48  ;;  %v3898_v36 = vld [vmem:[%s8502_s0 + $0x3e] sm:$0x2]  }
  0x3d   :  { %v3862_v39 = vld [vmem:[%s8502_s0 + $0x23a] sm:$0x2]   ;;  %v3852_v52 = vld [vmem:[%s8502_s0 + $0x20b] sm:$0x1]   ;;  %v881_v58 = vsel %vm251_vm6, %v3841_v35, %v877_v53  ;;  %v3899_v37 = vld [vmem:[%s8502_s0 + $0x5d] sm:$0x4]   ;;  %v1102_v41 = vsel %vm227_vm0, %v3898_v36, %v3897_v33 }
  0x3e   :  { %812 = vrot.lane.b32.xlu0 %v811_v30, %s4537_s27  ;;  %v3863_v40 = vld [vmem:[%s8502_s0 + $0x259] sm:$0x4]   ;;  %v962_v43 = vsel %vm227_vm0, %v3862_v39, %v3861_v38  ;;  %917 = vrot.lane.b32.xlu1 %v916_v47, %s4537_s27  ;;  %v3853_v55 = vld [vmem:[%s8502_s0 + $0x22a] sm:$0x2]  }
  0x3f   :  { %v3864_v44 = vld [vmem:[%s8502_s0 + $0x278] sm:$0x8]   ;;  %v966_v49 = vsel %vm231_vm1, %v3863_v40, %v962_v43  ;;  %v3854_v56 = vld [vmem:[%s8502_s0 + $0x249] sm:$0x4]   ;;  %v927_v60 = vsel %vm227_vm0, %v3853_v55, %v3852_v52  ;;  %v3900_v38 = vld [vmem:[%s8502_s0 + $0x7c] sm:$0x8]  }
  0x40   :  { %v3865_v45 = vld [vmem:[%s8502_s0 + $0x297] sm:$0x10]   ;;  %v970_v54 = vsel %vm235_vm2, %v3864_v44, %v966_v49  ;;  %v3855_v57 = vld [vmem:[%s8502_s0 + $0x268] sm:$0x8]   ;;  %v931_v1 = vsel %vm231_vm1, %v3854_v56, %v927_v60  ;;  %v3901_v42 = vld [vmem:[%s8502_s0 + $0x9b] sm:$0x10]  }
  0x41   :  { %v3866_v46 = vld [vmem:[%s8502_s0 + $0x2b6] sm:$0x20]   ;;  %v974_v59 = vsel %vm239_vm3, %v3865_v45, %v970_v54  ;;  %v3856_v61 = vld [vmem:[%s8502_s0 + $0x287] sm:$0x10]   ;;  %v935_v6 = vsel %vm235_vm2, %v3855_v57, %v931_v1  ;;  %v3902_v43 = vld [vmem:[%s8502_s0 + $0xba] sm:$0x20]  }
  0x42   :  { %v3867_v50 = vld [vmem:[%s8502_s0 + $0x2d5] sm:$0x40]   ;;  %v3857_v62 = vld [vmem:[%s8502_s0 + $0x2a6] sm:$0x20]   ;;  %882 = vrot.lane.b32.xlu0 %v881_v58, %s4537_s27  ;;  %v978_v0 = vsel %vm243_vm4, %v3866_v46, %v974_v59  ;;  %v939_v12 = vsel %vm239_vm3, %v3856_v61, %v935_v6  ;;  %v3903_v44 = vld [vmem:[%s8502_s0 + $0xd9] sm:$0x40]   ;;  %v1106_v46 = vsel %vm231_vm1, %v3899_v37, %v1102_v41 }
  0x43   :  { %v3868_v51 = vld [vmem:[%s8502_s0 + $0x2f4] sm:$0x80]   ;;  %v3858_v63 = vld [vmem:[%s8502_s0 + $0x2c5] sm:$0x40]   ;;  %v982_v5 = vsel %vm247_vm5, %v3867_v50, %v978_v0  ;;  %v943_v17 = vsel %vm243_vm4, %v3857_v62, %v939_v12  ;;  %v3904_v47 = vld [vmem:[%s8502_s0 + $0xf8] sm:$0x80]  }
  0x44   :  { %v3859_v2 = vld [vmem:[%s8502_s0 + $0x2e4] sm:$0x80]   ;;  %v3879_v3 = vld [vmem:[%s8502_s0 + $0x31b] sm:$0x1]   ;;  %v986_v11 = vsel %vm251_vm6, %v3868_v51, %v982_v5  ;;  %v947_v22 = vsel %vm247_vm5, %v3858_v63, %v943_v17  ;;  %v3888_v48 = vld [vmem:[%s8502_s0 + $0xf] sm:$0x1]   ;;  %v1110_v51 = vsel %vm235_vm2, %v3900_v38, %v1106_v46 }
  0x45   :  { %v3880_v4 = vld [vmem:[%s8502_s0 + $0x33a] sm:$0x2]   ;;  %987 = vrot.lane.b32.xlu1 %v986_v11, %s4537_s27  ;;  %v3870_v19 = vld [vmem:[%s8502_s0 + $0x30b] sm:$0x1]   ;;  %v951_v28 = vsel %vm251_vm6, %v3859_v2, %v947_v22  ;;  %v3889_v49 = vld [vmem:[%s8502_s0 + $0x2e] sm:$0x2]   ;;  %v1114_v57 = vsel %vm239_vm3, %v3901_v42, %v1110_v51 }
  0x46   :  { %v1032_v7 = vsel %vm227_vm0, %v3880_v4, %v3879_v3  ;;  %v3881_v8 = vld [vmem:[%s8502_s0 + $0x359] sm:$0x4]   ;;  %v3871_v20 = vld [vmem:[%s8502_s0 + $0x32a] sm:$0x2]   ;;  %952 = vrot.lane.b32.xlu0 %v951_v28, %s4537_s27  ;;  %v1067_v52 = vsel %vm227_vm0, %v3889_v49, %v3888_v48  ;;  %v3890_v53 = vld [vmem:[%s8502_s0 + $0x4d] sm:$0x4]   ;;  %v1118_v62 = vsel %vm243_vm4, %v3902_v43, %v1114_v57 }
  0x47   :  { %v3882_v9 = vld [vmem:[%s8502_s0 + $0x378] sm:$0x8]   ;;  %v1036_v13 = vsel %vm231_vm1, %v3881_v8, %v1032_v7  ;;  %v3872_v21 = vld [vmem:[%s8502_s0 + $0x349] sm:$0x4]   ;;  %v997_v24 = vsel %vm227_vm0, %v3871_v20, %v3870_v19  ;;  %v3891_v54 = vld [vmem:[%s8502_s0 + $0x6c] sm:$0x8]   ;;  %v1071_v58 = vsel %vm231_vm1, %v3890_v53, %v1067_v52  ;;  %v1122_v3 = vsel %vm247_vm5, %v3903_v44, %v1118_v62 }
  0x48   :  { %v3883_v10 = vld [vmem:[%s8502_s0 + $0x397] sm:$0x10]   ;;  %v1040_v18 = vsel %vm235_vm2, %v3882_v9, %v1036_v13  ;;  %v3873_v25 = vld [vmem:[%s8502_s0 + $0x368] sm:$0x8]   ;;  %v1001_v30 = vsel %vm231_vm1, %v3872_v21, %v997_v24  ;;  %v3892_v55 = vld [vmem:[%s8502_s0 + $0x8b] sm:$0x10]   ;;  %v1075_v63 = vsel %vm235_vm2, %v3891_v54, %v1071_v58  ;;  %v1126_v9 = vsel %vm251_vm6, %v3904_v47, %v1122_v3 }
  0x49   :  { %v3884_v14 = vld [vmem:[%s8502_s0 + $0x3b6] sm:$0x20]   ;;  %v1044_v23 = vsel %vm239_vm3, %v3883_v10, %v1040_v18  ;;  %v3874_v26 = vld [vmem:[%s8502_s0 + $0x387] sm:$0x10]   ;;  %v1005_v35 = vsel %vm235_vm2, %v3873_v25, %v1001_v30  ;;  %v3893_v59 = vld [vmem:[%s8502_s0 + $0xaa] sm:$0x20]   ;;  %v1079_v4 = vsel %vm239_vm3, %v3892_v55, %v1075_v63 }
  0x4a   :  { %v3885_v15 = vld [vmem:[%s8502_s0 + $0x3d5] sm:$0x40]   ;;  %v3875_v27 = vld [vmem:[%s8502_s0 + $0x3a6] sm:$0x20]   ;;  %v1048_v29 = vsel %vm243_vm4, %v3884_v14, %v1044_v23  ;;  %v1009_v40 = vsel %vm239_vm3, %v3874_v26, %v1005_v35  ;;  %v3894_v60 = vld [vmem:[%s8502_s0 + $0xc9] sm:$0x40]   ;;  %v1083_v10 = vsel %vm243_vm4, %v3893_v59, %v1079_v4 }
  0x4b   :  { %v3886_v16 = vld [vmem:[%s8502_s0 + $0x3f4] sm:$0x80]   ;;  %v3876_v31 = vld [vmem:[%s8502_s0 + $0x3c5] sm:$0x40]   ;;  %v1052_v34 = vsel %vm247_vm5, %v3885_v15, %v1048_v29  ;;  %v1013_v45 = vsel %vm243_vm4, %v3875_v27, %v1009_v40  ;;  %v3895_v61 = vld [vmem:[%s8502_s0 + $0xe8] sm:$0x80]   ;;  %v1087_v15 = vsel %vm247_vm5, %v3894_v60, %v1083_v10 }
  0x4c   :  { %v3877_v32 = vld [vmem:[%s8502_s0 + $0x3e4] sm:$0x80]   ;;  %v1056_v39 = vsel %vm251_vm6, %v3886_v16, %v1052_v34  ;;  %v1017_v50 = vsel %vm247_vm5, %v3876_v31, %v1013_v45  ;;  %v3915_v0 = vld [vmem:[%s8502_s0 + $0x11f] sm:$0x1]   ;;  %v3906_v14 = vld [vmem:[%s8502_s0 + $0x10f] sm:$0x1]   ;;  %v1091_v20 = vsel %vm251_vm6, %v3895_v61, %v1087_v15 }
  0x4d   :  { %1057 = vrot.lane.b32.xlu1 %v1056_v39, %s4537_s27  ;;  %v1021_v56 = vsel %vm251_vm6, %v3877_v32, %v1017_v50  ;;  %v3916_v1 = vld [vmem:[%s8502_s0 + $0x13e] sm:$0x2]   ;;  %v3907_v17 = vld [vmem:[%s8502_s0 + $0x12e] sm:$0x2]  }
  0x4e   :  { %1022 = vrot.lane.b32.xlu0 %v1021_v56, %s4537_s27  ;;  %v3917_v2 = vld [vmem:[%s8502_s0 + $0x15d] sm:$0x4]   ;;  %v1172_v5 = vsel %vm227_vm0, %v3916_v1, %v3915_v0  ;;  %v3908_v18 = vld [vmem:[%s8502_s0 + $0x14d] sm:$0x4]   ;;  %v1137_v22 = vsel %vm227_vm0, %v3907_v17, %v3906_v14 }
  0x4f   :  { %v3918_v6 = vld [vmem:[%s8502_s0 + $0x17c] sm:$0x8]   ;;  %v1176_v11 = vsel %vm231_vm1, %v3917_v2, %v1172_v5  ;;  %v3909_v19 = vld [vmem:[%s8502_s0 + $0x16c] sm:$0x8]   ;;  %v1141_v27 = vsel %vm231_vm1, %v3908_v18, %v1137_v22 }
  0x50   :  { %v3919_v7 = vld [vmem:[%s8502_s0 + $0x19b] sm:$0x10]   ;;  %v1180_v16 = vsel %vm235_vm2, %v3918_v6, %v1176_v11  ;;  %v3910_v23 = vld [vmem:[%s8502_s0 + $0x18b] sm:$0x10]   ;;  %v1145_v32 = vsel %vm235_vm2, %v3909_v19, %v1141_v27  ;;  %v3969_v27 = vld [vmem:[%s8502_s0 + $0x31] sm:$0x2]  }
  0x51   :  { %v3920_v8 = vld [vmem:[%s8502_s0 + $0x1ba] sm:$0x20]   ;;  %1127 = vrot.lane.b32.xlu1 %v1126_v9, %s4537_s27  ;;  %v1184_v21 = vsel %vm239_vm3, %v3919_v7, %v1180_v16  ;;  %v3911_v24 = vld [vmem:[%s8502_s0 + $0x1aa] sm:$0x20]   ;;  %v1149_v38 = vsel %vm239_vm3, %v3910_v23, %v1145_v32  ;;  %v3971_v32 = vld [vmem:[%s8502_s0 + $0x6f] sm:$0x8]  }
  0x52   :  { %v3921_v12 = vld [vmem:[%s8502_s0 + $0x1d9] sm:$0x40]   ;;  %v3912_v25 = vld [vmem:[%s8502_s0 + $0x1c9] sm:$0x40]   ;;  %1092 = vrot.lane.b32.xlu0 %v1091_v20, %s4537_s27  ;;  %v1188_v26 = vsel %vm243_vm4, %v3920_v8, %v1184_v21  ;;  %v1153_v43 = vsel %vm243_vm4, %v3911_v24, %v1149_v38  ;;  %v3974_v38 = vld [vmem:[%s8502_s0 + $0xcc] sm:$0x40]  }
  0x53   :  { %v3922_v13 = vld [vmem:[%s8502_s0 + $0x1f8] sm:$0x80]   ;;  %v3913_v28 = vld [vmem:[%s8502_s0 + $0x1e8] sm:$0x80]   ;;  %v1192_v31 = vsel %vm247_vm5, %v3921_v12, %v1188_v26  ;;  %v1157_v48 = vsel %vm247_vm5, %v3912_v25, %v1153_v43  ;;  %v3968_v26 = vld [vmem:[%s8502_s0 + $0x12] sm:$0x1]  }
  0x54   :  { %v3933_v29 = vld [vmem:[%s8502_s0 + $0x21f] sm:$0x1]   ;;  %v1196_v37 = vsel %vm251_vm6, %v3922_v13, %v1192_v31  ;;  %v3924_v45 = vld [vmem:[%s8502_s0 + $0x20f] sm:$0x1]   ;;  %v1161_v54 = vsel %vm251_vm6, %v3913_v28, %v1157_v48  ;;  %v3970_v28 = vld [vmem:[%s8502_s0 + $0x50] sm:$0x4]   ;;  %v1381_v31 = vsel %vm227_vm0, %v3969_v27, %v3968_v26 }
  0x55   :  { %v3934_v30 = vld [vmem:[%s8502_s0 + $0x23e] sm:$0x2]   ;;  %1197 = vrot.lane.b32.xlu1 %v1196_v37, %s4537_s27  ;;  %v3925_v46 = vld [vmem:[%s8502_s0 + $0x22e] sm:$0x2]   ;;  %v1385_v37 = vsel %vm231_vm1, %v3970_v28, %v1381_v31  ;;  %v3961_v43 = vld [vmem:[%s8502_s0 + $0x21] sm:$0x2]  }
  0x56   :  { %v1242_v33 = vsel %vm227_vm0, %v3934_v30, %v3933_v29  ;;  %v3935_v34 = vld [vmem:[%s8502_s0 + $0x25d] sm:$0x4]   ;;  %v3926_v47 = vld [vmem:[%s8502_s0 + $0x24d] sm:$0x4]   ;;  %v1207_v50 = vsel %vm227_vm0, %v3925_v46, %v3924_v45  ;;  %1162 = vrot.lane.b32.xlu0 %v1161_v54, %s4537_s27  ;;  %v3963_v45 = vld [vmem:[%s8502_s0 + $0x5f] sm:$0x8]  }
  0x57   :  { %v3936_v35 = vld [vmem:[%s8502_s0 + $0x27c] sm:$0x8]   ;;  %v1246_v39 = vsel %vm231_vm1, %v3935_v34, %v1242_v33  ;;  %v3927_v51 = vld [vmem:[%s8502_s0 + $0x26c] sm:$0x8]   ;;  %v1211_v56 = vsel %vm231_vm1, %v3926_v47, %v1207_v50  ;;  %v3972_v33 = vld [vmem:[%s8502_s0 + $0x8e] sm:$0x10]  }
  0x58   :  { %v3937_v36 = vld [vmem:[%s8502_s0 + $0x29b] sm:$0x10]   ;;  %v1250_v44 = vsel %vm235_vm2, %v3936_v35, %v1246_v39  ;;  %v3928_v52 = vld [vmem:[%s8502_s0 + $0x28b] sm:$0x10]   ;;  %v1215_v61 = vsel %vm235_vm2, %v3927_v51, %v1211_v56  ;;  %v3973_v34 = vld [vmem:[%s8502_s0 + $0xad] sm:$0x20]  }
  0x59   :  { %v3938_v40 = vld [vmem:[%s8502_s0 + $0x2ba] sm:$0x20]   ;;  %v1254_v49 = vsel %vm239_vm3, %v3937_v36, %v1250_v44  ;;  %v3929_v53 = vld [vmem:[%s8502_s0 + $0x2aa] sm:$0x20]   ;;  %v1219_v2 = vsel %vm239_vm3, %v3928_v52, %v1215_v61  ;;  %v3975_v39 = vld [vmem:[%s8502_s0 + $0xeb] sm:$0x80]  }
  0x5a   :  { %v3939_v41 = vld [vmem:[%s8502_s0 + $0x2d9] sm:$0x40]   ;;  %v1258_v55 = vsel %vm243_vm4, %v3938_v40, %v1254_v49  ;;  %v3930_v57 = vld [vmem:[%s8502_s0 + $0x2c9] sm:$0x40]   ;;  %v1223_v7 = vsel %vm243_vm4, %v3929_v53, %v1219_v2  ;;  %v3960_v40 = vld [vmem:[%s8502_s0 + $0x2] sm:$0x1]  }
  0x5b   :  { %v3940_v42 = vld [vmem:[%s8502_s0 + $0x2f8] sm:$0x80]   ;;  %v3931_v58 = vld [vmem:[%s8502_s0 + $0x2e8] sm:$0x80]   ;;  %v1262_v60 = vsel %vm247_vm5, %v3939_v41, %v1258_v55  ;;  %v1227_v12 = vsel %vm247_vm5, %v3930_v57, %v1223_v7  ;;  %v3962_v44 = vld [vmem:[%s8502_s0 + $0x40] sm:$0x4]   ;;  %v1347_v48 = vsel %vm227_vm0, %v3961_v43, %v3960_v40 }
  0x5c   :  { %v3951_v59 = vld [vmem:[%s8502_s0 + $0x31f] sm:$0x1]   ;;  %v1266_v1 = vsel %vm251_vm6, %v3940_v42, %v1262_v60  ;;  %v3942_v10 = vld [vmem:[%s8502_s0 + $0x30f] sm:$0x1]   ;;  %v1231_v18 = vsel %vm251_vm6, %v3931_v58, %v1227_v12  ;;  %v1389_v42 = vsel %vm235_vm2, %v3971_v32, %v1385_v37  ;;  %v3964_v49 = vld [vmem:[%s8502_s0 + $0x7e] sm:$0x10]   ;;  %v1351_v53 = vsel %vm231_vm1, %v3962_v44, %v1347_v48 }
  0x5d   :  { %v3952_v62 = vld [vmem:[%s8502_s0 + $0x33e] sm:$0x2]   ;;  %1267 = vrot.lane.b32.xlu1 %v1266_v1, %s4537_s27  ;;  %v3943_v11 = vld [vmem:[%s8502_s0 + $0x32e] sm:$0x2]   ;;  %1232 = vrot.lane.b32.xlu0 %v1231_v18, %s4537_s27  ;;  %v1393_v47 = vsel %vm239_vm3, %v3972_v33, %v1389_v42  ;;  %v1355_v58 = vsel %vm235_vm2, %v3963_v45, %v1351_v53 }
  0x5e   :  { %v3953_v63 = vld [vmem:[%s8502_s0 + $0x35d] sm:$0x4]   ;;  %v1312_v3 = vsel %vm227_vm0, %v3952_v62, %v3951_v59  ;;  %v1277_v14 = vsel %vm227_vm0, %v3943_v11, %v3942_v10  ;;  %v3944_v15 = vld [vmem:[%s8502_s0 + $0x34d] sm:$0x4]   ;;  %v3965_v50 = vld [vmem:[%s8502_s0 + $0x9d] sm:$0x20]   ;;  %v1397_v52 = vsel %vm243_vm4, %v3973_v34, %v1393_v47 }
  0x5f   :  { %v3954_v0 = vld [vmem:[%s8502_s0 + $0x37c] sm:$0x8]   ;;  %v1316_v8 = vsel %vm231_vm1, %v3953_v63, %v1312_v3  ;;  %v3945_v16 = vld [vmem:[%s8502_s0 + $0x36c] sm:$0x8]   ;;  %v1281_v20 = vsel %vm231_vm1, %v3944_v15, %v1277_v14  ;;  %v3966_v51 = vld [vmem:[%s8502_s0 + $0xbc] sm:$0x40]   ;;  %v1401_v57 = vsel %vm247_vm5, %v3974_v38, %v1397_v52 }
  0x60   :  { %v3955_v4 = vld [vmem:[%s8502_s0 + $0x39b] sm:$0x10]   ;;  %v1320_v13 = vsel %vm235_vm2, %v3954_v0, %v1316_v8  ;;  %v3946_v17 = vld [vmem:[%s8502_s0 + $0x38b] sm:$0x10]   ;;  %v1285_v25 = vsel %vm235_vm2, %v3945_v16, %v1281_v20  ;;  %v3967_v54 = vld [vmem:[%s8502_s0 + $0xdb] sm:$0x80]   ;;  %v1405_v63 = vsel %vm251_vm6, %v3975_v39, %v1401_v57  ;;  %v1359_v0 = vsel %vm239_vm3, %v3964_v49, %v1355_v58 }
  0x61   :  { %v3956_v5 = vld [vmem:[%s8502_s0 + $0x3ba] sm:$0x20]   ;;  %v1324_v19 = vsel %vm239_vm3, %v3955_v4, %v1320_v13  ;;  %v3947_v21 = vld [vmem:[%s8502_s0 + $0x3aa] sm:$0x20]   ;;  %v1289_v30 = vsel %vm239_vm3, %v3946_v17, %v1285_v25  ;;  %v3986_v55 = vld [vmem:[%s8502_s0 + $0x112] sm:$0x1]  }
  0x62   :  { %v3957_v6 = vld [vmem:[%s8502_s0 + $0x3d9] sm:$0x40]   ;;  %v3948_v22 = vld [vmem:[%s8502_s0 + $0x3c9] sm:$0x40]   ;;  %v1328_v24 = vsel %vm243_vm4, %v3956_v5, %v1324_v19  ;;  %v1293_v36 = vsel %vm243_vm4, %v3947_v21, %v1289_v30  ;;  %v3987_v56 = vld [vmem:[%s8502_s0 + $0x131] sm:$0x2]   ;;  %v1363_v5 = vsel %vm243_vm4, %v3965_v50, %v1359_v0 }
  0x63   :  { %v3958_v9 = vld [vmem:[%s8502_s0 + $0x3f8] sm:$0x80]   ;;  %v3949_v23 = vld [vmem:[%s8502_s0 + $0x3e8] sm:$0x80]   ;;  %v1332_v29 = vsel %vm247_vm5, %v3957_v6, %v1328_v24  ;;  %v1297_v41 = vsel %vm247_vm5, %v3948_v22, %v1293_v36  ;;  %v1451_v59 = vsel %vm227_vm0, %v3987_v56, %v3986_v55  ;;  %v3988_v60 = vld [vmem:[%s8502_s0 + $0x150] sm:$0x4]   ;;  %v1367_v10 = vsel %vm247_vm5, %v3966_v51, %v1363_v5 }
  0x64   :  { %v1336_v35 = vsel %vm251_vm6, %v3958_v9, %v1332_v29  ;;  %v1301_v46 = vsel %vm251_vm6, %v3949_v23, %v1297_v41  ;;  %v3989_v61 = vld [vmem:[%s8502_s0 + $0x16f] sm:$0x8]   ;;  %v1455_v1 = vsel %vm231_vm1, %v3988_v60, %v1451_v59  ;;  %v3977_v7 = vld [vmem:[%s8502_s0 + $0x102] sm:$0x1]   ;;  %v1371_v16 = vsel %vm251_vm6, %v3967_v54, %v1367_v10 }
  0x65   :  { %1337 = vrot.lane.b32.xlu1 %v1336_v35, %s4537_s27  ;;  %1302 = vrot.lane.b32.xlu0 %v1301_v46, %s4537_s27  ;;  %v3990_v62 = vld [vmem:[%s8502_s0 + $0x18e] sm:$0x10]   ;;  %v1459_v6 = vsel %vm235_vm2, %v3989_v61, %v1455_v1  ;;  %v3978_v8 = vld [vmem:[%s8502_s0 + $0x121] sm:$0x2]  }
  0x66   :  { %v3991_v2 = vld [vmem:[%s8502_s0 + $0x1ad] sm:$0x20]   ;;  %v3979_v9 = vld [vmem:[%s8502_s0 + $0x140] sm:$0x4]   ;;  %v1463_v11 = vsel %vm239_vm3, %v3990_v62, %v1459_v6  ;;  %v1416_v12 = vsel %vm227_vm0, %v3978_v8, %v3977_v7 }
  0x67   :  { %v3992_v3 = vld [vmem:[%s8502_s0 + $0x1cc] sm:$0x40]   ;;  %v3980_v13 = vld [vmem:[%s8502_s0 + $0x15f] sm:$0x8]   ;;  %v1467_v17 = vsel %vm243_vm4, %v3991_v2, %v1463_v11  ;;  %v1420_v18 = vsel %vm231_vm1, %v3979_v9, %v1416_v12 }
  0x68   :  { %v3993_v4 = vld [vmem:[%s8502_s0 + $0x1eb] sm:$0x80]   ;;  %v3981_v14 = vld [vmem:[%s8502_s0 + $0x17e] sm:$0x10]   ;;  %v1471_v22 = vsel %vm247_vm5, %v3992_v3, %v1467_v17  ;;  %v1424_v23 = vsel %vm235_vm2, %v3980_v13, %v1420_v18  ;;  %v4040_v17 = vld [vmem:[%s8502_s0 + $0x16] sm:$0x1]  }
  0x69   :  { %1406 = vrot.lane.b32.xlu1 %v1405_v63, %s4538_s4  ;;  %v3982_v15 = vld [vmem:[%s8502_s0 + $0x19d] sm:$0x20]   ;;  %v4004_v21 = vld [vmem:[%s8502_s0 + $0x212] sm:$0x1]   ;;  %1372 = vrot.lane.b32.xlu0 %v1371_v16, %s4538_s4  ;;  %v1475_v27 = vsel %vm251_vm6, %v3993_v4, %v1471_v22  ;;  %v1428_v28 = vsel %vm239_vm3, %v3981_v14, %v1424_v23 }
  0x6a   :  { %v3983_v19 = vld [vmem:[%s8502_s0 + $0x1bc] sm:$0x40]   ;;  %v4005_v24 = vld [vmem:[%s8502_s0 + $0x231] sm:$0x2]   ;;  %v1432_v33 = vsel %vm243_vm4, %v3982_v15, %v1428_v28  ;;  %v4041_v18 = vld [vmem:[%s8502_s0 + $0x35] sm:$0x2]  }
  0x6b   :  { %v3984_v20 = vld [vmem:[%s8502_s0 + $0x1db] sm:$0x80]   ;;  %v4006_v25 = vld [vmem:[%s8502_s0 + $0x250] sm:$0x4]   ;;  %v1521_v29 = vsel %vm227_vm0, %v4005_v24, %v4004_v21  ;;  %v1436_v38 = vsel %vm247_vm5, %v3983_v19, %v1432_v33  ;;  %v1661_v21 = vsel %vm227_vm0, %v4041_v18, %v4040_v17  ;;  %v4042_v22 = vld [vmem:[%s8502_s0 + $0x54] sm:$0x4]  }
  0x6c   :  { %v4007_v26 = vld [vmem:[%s8502_s0 + $0x26f] sm:$0x8]   ;;  %v1525_v34 = vsel %vm231_vm1, %v4006_v25, %v1521_v29  ;;  %v3995_v36 = vld [vmem:[%s8502_s0 + $0x202] sm:$0x1]   ;;  %v1440_v44 = vsel %vm251_vm6, %v3984_v20, %v1436_v38  ;;  %v4043_v23 = vld [vmem:[%s8502_s0 + $0x73] sm:$0x8]  }
  0x6d   :  { %v4008_v30 = vld [vmem:[%s8502_s0 + $0x28e] sm:$0x10]   ;;  %1476 = vrot.lane.b32.xlu1 %v1475_v27, %s4538_s4  ;;  %v3996_v37 = vld [vmem:[%s8502_s0 + $0x221] sm:$0x2]   ;;  %v1529_v39 = vsel %vm235_vm2, %v4007_v26, %v1525_v34  ;;  %1441 = vrot.lane.b32.xlu0 %v1440_v44, %s4538_s4  ;;  %v1665_v27 = vsel %vm231_vm1, %v4042_v22, %v1661_v21 }
  0x6e   :  { %v4009_v31 = vld [vmem:[%s8502_s0 + $0x2ad] sm:$0x20]   ;;  %v1486_v40 = vsel %vm227_vm0, %v3996_v37, %v3995_v36  ;;  %v3997_v41 = vld [vmem:[%s8502_s0 + $0x240] sm:$0x4]   ;;  %v1533_v45 = vsel %vm239_vm3, %v4008_v30, %v1529_v39  ;;  %v4044_v24 = vld [vmem:[%s8502_s0 + $0x92] sm:$0x10]  }
  0x6f   :  { %v4010_v32 = vld [vmem:[%s8502_s0 + $0x2cc] sm:$0x40]   ;;  %v3998_v42 = vld [vmem:[%s8502_s0 + $0x25f] sm:$0x8]   ;;  %v1490_v46 = vsel %vm231_vm1, %v3997_v41, %v1486_v40  ;;  %v1537_v50 = vsel %vm243_vm4, %v4009_v31, %v1533_v45  ;;  %v4045_v28 = vld [vmem:[%s8502_s0 + $0xb1] sm:$0x20]  }
  0x70   :  { %v4011_v35 = vld [vmem:[%s8502_s0 + $0x2eb] sm:$0x80]   ;;  %v3999_v43 = vld [vmem:[%s8502_s0 + $0x27e] sm:$0x10]   ;;  %v1494_v51 = vsel %vm235_vm2, %v3998_v42, %v1490_v46  ;;  %v1541_v55 = vsel %vm247_vm5, %v4010_v32, %v1537_v50  ;;  %v4046_v29 = vld [vmem:[%s8502_s0 + $0xd0] sm:$0x40]   ;;  %v1669_v32 = vsel %vm235_vm2, %v4043_v23, %v1665_v27 }
  0x71   :  { %v4000_v47 = vld [vmem:[%s8502_s0 + $0x29d] sm:$0x20]   ;;  %v4022_v52 = vld [vmem:[%s8502_s0 + $0x312] sm:$0x1]   ;;  %v1498_v56 = vsel %vm239_vm3, %v3999_v43, %v1494_v51  ;;  %v1545_v61 = vsel %vm251_vm6, %v4011_v35, %v1541_v55  ;;  %v4047_v30 = vld [vmem:[%s8502_s0 + $0xef] sm:$0x80]   ;;  %v1673_v37 = vsel %vm239_vm3, %v4044_v24, %v1669_v32 }
  0x72   :  { %v4001_v48 = vld [vmem:[%s8502_s0 + $0x2bc] sm:$0x40]   ;;  %v4023_v53 = vld [vmem:[%s8502_s0 + $0x331] sm:$0x2]   ;;  %v1502_v62 = vsel %vm243_vm4, %v4000_v47, %v1498_v56  ;;  %1546 = vrot.lane.b32.xlu1 %v1545_v61, %s4538_s4  ;;  %v4031_v33 = vld [vmem:[%s8502_s0 + $0x6] sm:$0x1]   ;;  %v1677_v43 = vsel %vm243_vm4, %v4045_v28, %v1673_v37 }
  0x73   :  { %v4002_v49 = vld [vmem:[%s8502_s0 + $0x2db] sm:$0x80]   ;;  %v4024_v54 = vld [vmem:[%s8502_s0 + $0x350] sm:$0x4]   ;;  %v1591_v57 = vsel %vm227_vm0, %v4023_v53, %v4022_v52  ;;  %v1506_v3 = vsel %vm247_vm5, %v4001_v48, %v1502_v62  ;;  %v4032_v34 = vld [vmem:[%s8502_s0 + $0x25] sm:$0x2]   ;;  %v1681_v48 = vsel %vm247_vm5, %v4046_v29, %v1677_v43 }
  0x74   :  { %v4025_v58 = vld [vmem:[%s8502_s0 + $0x36f] sm:$0x8]   ;;  %v1595_v63 = vsel %vm231_vm1, %v4024_v54, %v1591_v57  ;;  %v4013_v2 = vld [vmem:[%s8502_s0 + $0x302] sm:$0x1]   ;;  %v1510_v8 = vsel %vm251_vm6, %v4002_v49, %v1506_v3  ;;  %v4033_v35 = vld [vmem:[%s8502_s0 + $0x44] sm:$0x4]   ;;  %v1626_v38 = vsel %vm227_vm0, %v4032_v34, %v4031_v33  ;;  %v1685_v53 = vsel %vm251_vm6, %v4047_v30, %v1681_v48 }
  0x75   :  { %v4026_v59 = vld [vmem:[%s8502_s0 + $0x38e] sm:$0x10]   ;;  %v1599_v4 = vsel %vm235_vm2, %v4025_v58, %v1595_v63  ;;  %v4014_v5 = vld [vmem:[%s8502_s0 + $0x321] sm:$0x2]   ;;  %1511 = vrot.lane.b32.xlu0 %v1510_v8, %s4538_s4  ;;  %v4034_v39 = vld [vmem:[%s8502_s0 + $0x63] sm:$0x8]   ;;  %v1630_v44 = vsel %vm231_vm1, %v4033_v35, %v1626_v38 }
  0x76   :  { %v4027_v60 = vld [vmem:[%s8502_s0 + $0x3ad] sm:$0x20]   ;;  %v4015_v6 = vld [vmem:[%s8502_s0 + $0x340] sm:$0x4]   ;;  %v1603_v9 = vsel %vm239_vm3, %v4026_v59, %v1599_v4  ;;  %v1556_v10 = vsel %vm227_vm0, %v4014_v5, %v4013_v2  ;;  %v4035_v40 = vld [vmem:[%s8502_s0 + $0x82] sm:$0x10]   ;;  %v1634_v49 = vsel %vm235_vm2, %v4034_v39, %v1630_v44 }
  0x77   :  { %v4028_v0 = vld [vmem:[%s8502_s0 + $0x3cc] sm:$0x40]   ;;  %v4016_v7 = vld [vmem:[%s8502_s0 + $0x35f] sm:$0x8]   ;;  %v1607_v14 = vsel %vm243_vm4, %v4027_v60, %v1603_v9  ;;  %v1560_v15 = vsel %vm231_vm1, %v4015_v6, %v1556_v10  ;;  %v4036_v41 = vld [vmem:[%s8502_s0 + $0xa1] sm:$0x20]   ;;  %v1638_v54 = vsel %vm239_vm3, %v4035_v40, %v1634_v49 }
  0x78   :  { %v4029_v1 = vld [vmem:[%s8502_s0 + $0x3eb] sm:$0x80]   ;;  %v4017_v11 = vld [vmem:[%s8502_s0 + $0x37e] sm:$0x10]   ;;  %v1611_v19 = vsel %vm247_vm5, %v4028_v0, %v1607_v14  ;;  %v1564_v20 = vsel %vm235_vm2, %v4016_v7, %v1560_v15  ;;  %v4037_v45 = vld [vmem:[%s8502_s0 + $0xc0] sm:$0x40]   ;;  %v1642_v59 = vsel %vm243_vm4, %v4036_v41, %v1638_v54 }
  0x79   :  { %v4018_v12 = vld [vmem:[%s8502_s0 + $0x39d] sm:$0x20]   ;;  %v1615_v25 = vsel %vm251_vm6, %v4029_v1, %v1611_v19  ;;  %v1568_v26 = vsel %vm239_vm3, %v4017_v11, %v1564_v20  ;;  %v4038_v46 = vld [vmem:[%s8502_s0 + $0xdf] sm:$0x80]   ;;  %v4058_v47 = vld [vmem:[%s8502_s0 + $0x116] sm:$0x1]   ;;  %v1646_v0 = vsel %vm247_vm5, %v4037_v45, %v1642_v59 }
  0x7a   :  { %v4019_v13 = vld [vmem:[%s8502_s0 + $0x3bc] sm:$0x40]   ;;  %1616 = vrot.lane.b32.xlu1 %v1615_v25, %s4538_s4  ;;  %v1572_v31 = vsel %vm243_vm4, %v4018_v12, %v1568_v26  ;;  %v4059_v50 = vld [vmem:[%s8502_s0 + $0x135] sm:$0x2]   ;;  %v4049_v62 = vld [vmem:[%s8502_s0 + $0x106] sm:$0x1]   ;;  %v1650_v6 = vsel %vm251_vm6, %v4038_v46, %v1646_v0 }
  0x7b   :  { %v4020_v16 = vld [vmem:[%s8502_s0 + $0x3db] sm:$0x80]   ;;  %v1576_v36 = vsel %vm247_vm5, %v4019_v13, %v1572_v31  ;;  %v4060_v51 = vld [vmem:[%s8502_s0 + $0x154] sm:$0x4]   ;;  %v1731_v55 = vsel %vm227_vm0, %v4059_v50, %v4058_v47  ;;  %v4050_v63 = vld [vmem:[%s8502_s0 + $0x125] sm:$0x2]  }
  0x7c   :  { %v1580_v42 = vsel %vm251_vm6, %v4020_v16, %v1576_v36  ;;  %v4061_v52 = vld [vmem:[%s8502_s0 + $0x173] sm:$0x8]   ;;  %v1735_v60 = vsel %vm231_vm1, %v4060_v51, %v1731_v55  ;;  %v1696_v2 = vsel %vm227_vm0, %v4050_v63, %v4049_v62  ;;  %v4051_v3 = vld [vmem:[%s8502_s0 + $0x144] sm:$0x4]   ;;  %v6019_v45 = vpop.permute.xlu1 %322  }
  0x7d   :  { %1581 = vrot.lane.b32.xlu0 %v1580_v42, %s4538_s4  ;;  %v4062_v56 = vld [vmem:[%s8502_s0 + $0x192] sm:$0x10]   ;;  %v1739_v1 = vsel %vm235_vm2, %v4061_v52, %v1735_v60  ;;  %v4052_v4 = vld [vmem:[%s8502_s0 + $0x163] sm:$0x8]   ;;  %v1700_v8 = vsel %vm231_vm1, %v4051_v3, %v1696_v2 }
  0x7e   :  { %v4063_v57 = vld [vmem:[%s8502_s0 + $0x1b1] sm:$0x20]   ;;  %1686 = vrot.lane.b32.xlu1 %v1685_v53, %s4538_s4  ;;  %v4053_v5 = vld [vmem:[%s8502_s0 + $0x182] sm:$0x10]   ;;  %v1743_v7 = vsel %vm239_vm3, %v4062_v56, %v1739_v1  ;;  %v1704_v13 = vsel %vm235_vm2, %v4052_v4, %v1700_v8 }
  0x7f   :  { %v4064_v58 = vld [vmem:[%s8502_s0 + $0x1d0] sm:$0x40]   ;;  %v4054_v9 = vld [vmem:[%s8502_s0 + $0x1a1] sm:$0x20]   ;;  %v1747_v12 = vsel %vm243_vm4, %v4063_v57, %v1743_v7  ;;  %v1708_v18 = vsel %vm239_vm3, %v4053_v5, %v1704_v13 }
  0x80   :  { %v4065_v61 = vld [vmem:[%s8502_s0 + $0x1ef] sm:$0x80]   ;;  %v4055_v10 = vld [vmem:[%s8502_s0 + $0x1c0] sm:$0x40]   ;;  %v1751_v17 = vsel %vm247_vm5, %v4064_v58, %v1747_v12  ;;  %v1712_v24 = vsel %vm243_vm4, %v4054_v9, %v1708_v18  ;;  %v6083_v12 = vpop.permute.xlu1 %357  }
  0x81   :  { %v4056_v11 = vld [vmem:[%s8502_s0 + $0x1df] sm:$0x80]   ;;  %1651 = vrot.lane.b32.xlu0 %v1650_v6, %s4538_s4  ;;  %v4076_v14 = vld [vmem:[%s8502_s0 + $0x216] sm:$0x1]   ;;  %v1755_v23 = vsel %vm251_vm6, %v4065_v61, %v1751_v17  ;;  %v1716_v29 = vsel %vm247_vm5, %v4055_v10, %v1712_v24  ;;  %v4115_v17 = vld [vmem:[%s8502_s0 + $0x77] sm:$0x8]  }
  0x82   :  { %v4077_v15 = vld [vmem:[%s8502_s0 + $0x235] sm:$0x2]   ;;  %v4067_v28 = vld [vmem:[%s8502_s0 + $0x206] sm:$0x1]   ;;  %1756 = vrot.lane.b32.xlu1 %v1755_v23, %s4538_s4  ;;  %v1720_v34 = vsel %vm251_vm6, %v4056_v11, %v1716_v29  ;;  %v4112_v11 = vld [vmem:[%s8502_s0 + $0x1a] sm:$0x1]  }
  0x83   :  { %v4078_v16 = vld [vmem:[%s8502_s0 + $0x254] sm:$0x4]   ;;  %v1801_v19 = vsel %vm227_vm0, %v4077_v15, %v4076_v14  ;;  %v4068_v31 = vld [vmem:[%s8502_s0 + $0x225] sm:$0x2]   ;;  %v4113_v15 = vld [vmem:[%s8502_s0 + $0x39] sm:$0x2]  }
  0x84   :  { %v4079_v20 = vld [vmem:[%s8502_s0 + $0x273] sm:$0x8]   ;;  %v1805_v25 = vsel %vm231_vm1, %v4078_v16, %v1801_v19  ;;  %v4069_v32 = vld [vmem:[%s8502_s0 + $0x244] sm:$0x4]   ;;  %v1766_v36 = vsel %vm227_vm0, %v4068_v31, %v4067_v28  ;;  %v6045_v58 = vpop.permute.xlu0 %253   ;;  %v4114_v16 = vld [vmem:[%s8502_s0 + $0x58] sm:$0x4]  }
  0x85   :  { %v4080_v21 = vld [vmem:[%s8502_s0 + $0x292] sm:$0x10]   ;;  %v1809_v30 = vsel %vm235_vm2, %v4079_v20, %v1805_v25  ;;  %v4070_v33 = vld [vmem:[%s8502_s0 + $0x263] sm:$0x8]   ;;  %1721 = vrot.lane.b32.xlu0 %v1720_v34, %s4538_s4  ;;  %v1770_v41 = vsel %vm231_vm1, %v4069_v32, %v1766_v36  ;;  %v1941_v20 = vsel %vm227_vm0, %v4113_v15, %v4112_v11  ;;  %v4118_v23 = vld [vmem:[%s8502_s0 + $0xd4] sm:$0x40]  }
  0x86   :  { %v4081_v22 = vld [vmem:[%s8502_s0 + $0x2b1] sm:$0x20]   ;;  %v1813_v35 = vsel %vm239_vm3, %v4080_v21, %v1809_v30  ;;  %v4071_v37 = vld [vmem:[%s8502_s0 + $0x282] sm:$0x10]   ;;  %v1774_v47 = vsel %vm235_vm2, %v4070_v33, %v1770_v41  ;;  %v4116_v21 = vld [vmem:[%s8502_s0 + $0x96] sm:$0x10]   ;;  %v1945_v25 = vsel %vm231_vm1, %v4114_v16, %v1941_v20 }
  0x87   :  { %v4082_v26 = vld [vmem:[%s8502_s0 + $0x2d0] sm:$0x40]   ;;  %v4072_v38 = vld [vmem:[%s8502_s0 + $0x2a1] sm:$0x20]   ;;  %v1817_v40 = vsel %vm243_vm4, %v4081_v22, %v1813_v35  ;;  %v1778_v53 = vsel %vm239_vm3, %v4071_v37, %v1774_v47  ;;  %v4117_v22 = vld [vmem:[%s8502_s0 + $0xb5] sm:$0x20]   ;;  %v1949_v31 = vsel %vm235_vm2, %v4115_v17, %v1945_v25 }
  0x88   :  { %v4083_v27 = vld [vmem:[%s8502_s0 + $0x2ef] sm:$0x80]   ;;  %v4073_v39 = vld [vmem:[%s8502_s0 + $0x2c0] sm:$0x40]   ;;  %v1821_v46 = vsel %vm247_vm5, %v4082_v26, %v1817_v40  ;;  %v1782_v59 = vsel %vm243_vm4, %v4072_v38, %v1778_v53  ;;  %v4119_v26 = vld [vmem:[%s8502_s0 + $0xf3] sm:$0x80]   ;;  %v6121_v29 = vpop.permute.xlu0 %287   ;;  %v1953_v37 = vsel %vm239_vm3, %v4116_v21, %v1949_v31 }
  0x89   :  { %v4074_v42 = vld [vmem:[%s8502_s0 + $0x2df] sm:$0x80]   ;;  %v4094_v43 = vld [vmem:[%s8502_s0 + $0x316] sm:$0x1]   ;;  %v1825_v52 = vsel %vm251_vm6, %v4083_v27, %v1821_v46  ;;  %v1786_v0 = vsel %vm247_vm5, %v4073_v39, %v1782_v59  ;;  %v4103_v27 = vld [vmem:[%s8502_s0 + $0xa] sm:$0x1]  }
  0x8a   :  { %v4095_v44 = vld [vmem:[%s8502_s0 + $0x335] sm:$0x2]   ;;  %1826 = vrot.lane.b32.xlu1 %v1825_v52, %s4538_s4  ;;  %v4085_v61 = vld [vmem:[%s8502_s0 + $0x306] sm:$0x1]   ;;  %v1790_v6 = vsel %vm251_vm6, %v4074_v42, %v1786_v0  ;;  %v4104_v28 = vld [vmem:[%s8502_s0 + $0x29] sm:$0x2]  }
  0x8b   :  { %v1871_v48 = vsel %vm227_vm0, %v4095_v44, %v4094_v43  ;;  %v4096_v49 = vld [vmem:[%s8502_s0 + $0x354] sm:$0x4]   ;;  %v4086_v62 = vld [vmem:[%s8502_s0 + $0x325] sm:$0x2]   ;;  %1791 = vrot.lane.b32.xlu0 %v1790_v6, %s4538_s4  ;;  %v1906_v32 = vsel %vm227_vm0, %v4104_v28, %v4103_v27  ;;  %v4105_v33 = vld [vmem:[%s8502_s0 + $0x48] sm:$0x4]   ;;  %v1957_v43 = vsel %vm243_vm4, %v4117_v22, %v1953_v37 }
  0x8c   :  { %v4097_v50 = vld [vmem:[%s8502_s0 + $0x373] sm:$0x8]   ;;  %v1875_v54 = vsel %vm231_vm1, %v4096_v49, %v1871_v48  ;;  %v4087_v63 = vld [vmem:[%s8502_s0 + $0x344] sm:$0x4]   ;;  %v1836_v2 = vsel %vm227_vm0, %v4086_v62, %v4085_v61  ;;  %v4106_v34 = vld [vmem:[%s8502_s0 + $0x67] sm:$0x8]   ;;  %v1910_v38 = vsel %vm231_vm1, %v4105_v33, %v1906_v32  ;;  %v1961_v49 = vsel %vm247_vm5, %v4118_v23, %v1957_v43  ;;  %v6185_v62 = vpop.permute.xlu0 %392  }
  0x8d   :  { %v4098_v51 = vld [vmem:[%s8502_s0 + $0x392] sm:$0x10]   ;;  %v1879_v60 = vsel %vm235_vm2, %v4097_v50, %v1875_v54  ;;  %v4088_v3 = vld [vmem:[%s8502_s0 + $0x363] sm:$0x8]   ;;  %v1840_v8 = vsel %vm231_vm1, %v4087_v63, %v1836_v2  ;;  %v4107_v35 = vld [vmem:[%s8502_s0 + $0x86] sm:$0x10]   ;;  %v6147_v42 = vpop.permute.xlu1 %427   ;;  %v1914_v44 = vsel %vm235_vm2, %v4106_v34, %v1910_v38 }
  0x8e   :  { %v4099_v55 = vld [vmem:[%s8502_s0 + $0x3b1] sm:$0x20]   ;;  %v1883_v1 = vsel %vm239_vm3, %v4098_v51, %v1879_v60  ;;  %v4089_v4 = vld [vmem:[%s8502_s0 + $0x382] sm:$0x10]   ;;  %v1844_v14 = vsel %vm235_vm2, %v4088_v3, %v1840_v8  ;;  %v4108_v39 = vld [vmem:[%s8502_s0 + $0xa5] sm:$0x20]   ;;  %v1918_v50 = vsel %vm239_vm3, %v4107_v35, %v1914_v44 }
  0x8f   :  { %v4100_v56 = vld [vmem:[%s8502_s0 + $0x3d0] sm:$0x40]   ;;  %v4090_v5 = vld [vmem:[%s8502_s0 + $0x3a1] sm:$0x20]   ;;  %v1887_v7 = vsel %vm243_vm4, %v4099_v55, %v1883_v1  ;;  %v1848_v19 = vsel %vm239_vm3, %v4089_v4, %v1844_v14  ;;  %v4109_v40 = vld [vmem:[%s8502_s0 + $0xc4] sm:$0x40]   ;;  %v1965_v55 = vsel %vm251_vm6, %v4119_v26, %v1961_v49 }
  0x90   :  { %v4101_v57 = vld [vmem:[%s8502_s0 + $0x3ef] sm:$0x80]   ;;  %v4091_v9 = vld [vmem:[%s8502_s0 + $0x3c0] sm:$0x40]   ;;  %v1891_v13 = vsel %vm247_vm5, %v4100_v56, %v1887_v7  ;;  %v1852_v24 = vsel %vm243_vm4, %v4090_v5, %v1848_v19  ;;  %v4110_v41 = vld [vmem:[%s8502_s0 + $0xe3] sm:$0x80]   ;;  %v1922_v56 = vsel %vm243_vm4, %v4108_v39, %v1918_v50 }
  0x91   :  { %v4092_v10 = vld [vmem:[%s8502_s0 + $0x3df] sm:$0x80]   ;;  %v1895_v18 = vsel %vm251_vm6, %v4101_v57, %v1891_v13  ;;  %v1856_v30 = vsel %vm247_vm5, %v4091_v9, %v1852_v24  ;;  %v4130_v46 = vld [vmem:[%s8502_s0 + $0x11a] sm:$0x1]   ;;  %v4121_v61 = vld [vmem:[%s8502_s0 + $0x10a] sm:$0x1]   ;;  %v1926_v63 = vsel %vm247_vm5, %v4109_v40, %v1922_v56 }
  0x92   :  { %1896 = vrot.lane.b32.xlu1 %v1895_v18, %s4538_s4  ;;  %v1860_v36 = vsel %vm251_vm6, %v4092_v10, %v1856_v30  ;;  %v4131_v47 = vld [vmem:[%s8502_s0 + $0x139] sm:$0x2]   ;;  %v4122_v1 = vld [vmem:[%s8502_s0 + $0x129] sm:$0x2]   ;;  %v1930_v4 = vsel %vm251_vm6, %v4110_v41, %v1926_v63 }
  0x93   :  { %1861 = vrot.lane.b32.xlu0 %v1860_v36, %s4538_s4  ;;  %v4132_v48 = vld [vmem:[%s8502_s0 + $0x158] sm:$0x4]   ;;  %v2011_v51 = vsel %vm227_vm0, %v4131_v47, %v4130_v46  ;;  %v4123_v2 = vld [vmem:[%s8502_s0 + $0x148] sm:$0x4]   ;;  %v1976_v6 = vsel %vm227_vm0, %v4122_v1, %v4121_v61 }
  0x94   :  { %v4133_v52 = vld [vmem:[%s8502_s0 + $0x177] sm:$0x8]   ;;  %v2015_v57 = vsel %vm231_vm1, %v4132_v48, %v2011_v51  ;;  %v4124_v3 = vld [vmem:[%s8502_s0 + $0x167] sm:$0x8]   ;;  %v1980_v11 = vsel %vm231_vm1, %v4123_v2, %v1976_v6  ;;  %v6249_v30 = vpop.permute.xlu0 %462  }
  0x95   :  { %v4134_v53 = vld [vmem:[%s8502_s0 + $0x196] sm:$0x10]   ;;  %v2019_v0 = vsel %vm235_vm2, %v4133_v52, %v2015_v57  ;;  %v4125_v7 = vld [vmem:[%s8502_s0 + $0x186] sm:$0x10]   ;;  %v6223_v16 = vpop.permute.xlu1 %497   ;;  %v1984_v18 = vsel %vm235_vm2, %v4124_v3, %v1980_v11 }
  0x96   :  { %v4135_v54 = vld [vmem:[%s8502_s0 + $0x1b5] sm:$0x20]   ;;  %1966 = vrot.lane.b32.xlu1 %v1965_v55, %s4538_s4  ;;  %v2023_v5 = vsel %vm239_vm3, %v4134_v53, %v2019_v0  ;;  %v4126_v8 = vld [vmem:[%s8502_s0 + $0x1a5] sm:$0x20]   ;;  %v1988_v24 = vsel %vm239_vm3, %v4125_v7, %v1984_v18 }
  0x97   :  { %v4136_v59 = vld [vmem:[%s8502_s0 + $0x1d4] sm:$0x40]   ;;  %v4127_v9 = vld [vmem:[%s8502_s0 + $0x1c4] sm:$0x40]   ;;  %1931 = vrot.lane.b32.xlu0 %v1930_v4, %s4538_s4  ;;  %v2027_v10 = vsel %vm243_vm4, %v4135_v54, %v2023_v5  ;;  %v1992_v31 = vsel %vm243_vm4, %v4126_v8, %v1988_v24  ;;  %v4185_v24 = vld [vmem:[%s8502_s0 + $0x3d] sm:$0x2]  }
  0x98   :  { %v4137_v60 = vld [vmem:[%s8502_s0 + $0x1f3] sm:$0x80]   ;;  %v4128_v13 = vld [vmem:[%s8502_s0 + $0x1e3] sm:$0x80]   ;;  %v2031_v17 = vsel %vm247_vm5, %v4136_v59, %v2027_v10  ;;  %v1996_v36 = vsel %vm247_vm5, %v4127_v9, %v1992_v31  ;;  %v6325_v5 = vpop.permute.xlu0 %532   ;;  %v4187_v31 = vld [vmem:[%s8502_s0 + $0x7b] sm:$0x8]  }
  0x99   :  { %v4148_v14 = vld [vmem:[%s8502_s0 + $0x21a] sm:$0x1]   ;;  %v2035_v23 = vsel %vm251_vm6, %v4137_v60, %v2031_v17  ;;  %v4139_v33 = vld [vmem:[%s8502_s0 + $0x20a] sm:$0x1]   ;;  %v2000_v43 = vsel %vm251_vm6, %v4128_v13, %v1996_v36  ;;  %v6287_v50 = vpop.permute.xlu1 %567  }
  0x9a   :  { %v4149_v15 = vld [vmem:[%s8502_s0 + $0x239] sm:$0x2]   ;;  %2036 = vrot.lane.b32.xlu1 %v2035_v23, %s4538_s4  ;;  %v4140_v34 = vld [vmem:[%s8502_s0 + $0x229] sm:$0x2]   ;;  %v4184_v23 = vld [vmem:[%s8502_s0 + $0x1e] sm:$0x1]  }
  0x9b   :  { %v2081_v19 = vsel %vm227_vm0, %v4149_v15, %v4148_v14  ;;  %v4150_v20 = vld [vmem:[%s8502_s0 + $0x258] sm:$0x4]   ;;  %v4141_v35 = vld [vmem:[%s8502_s0 + $0x248] sm:$0x4]   ;;  %v2046_v38 = vsel %vm227_vm0, %v4140_v34, %v4139_v33  ;;  %2001 = vrot.lane.b32.xlu0 %v2000_v43, %s4538_s4  ;;  %v4189_v33 = vld [vmem:[%s8502_s0 + $0xb9] sm:$0x20]  }
  0x9c   :  { %v4151_v21 = vld [vmem:[%s8502_s0 + $0x277] sm:$0x8]   ;;  %v2085_v25 = vsel %vm231_vm1, %v4150_v20, %v2081_v19  ;;  %v4142_v39 = vld [vmem:[%s8502_s0 + $0x267] sm:$0x8]   ;;  %v2050_v46 = vsel %vm231_vm1, %v4141_v35, %v2046_v38  ;;  %v4191_v38 = vld [vmem:[%s8502_s0 + $0xf7] sm:$0x80]  }
  0x9d   :  { %v4152_v22 = vld [vmem:[%s8502_s0 + $0x296] sm:$0x10]   ;;  %v2089_v32 = vsel %vm235_vm2, %v4151_v21, %v2085_v25  ;;  %v4143_v40 = vld [vmem:[%s8502_s0 + $0x286] sm:$0x10]   ;;  %v2054_v52 = vsel %vm235_vm2, %v4142_v39, %v2050_v46  ;;  %v6351_v20 = vpop.permute.xlu1 %637   ;;  %v4186_v25 = vld [vmem:[%s8502_s0 + $0x5c] sm:$0x4]  }
  0x9e   :  { %v4153_v26 = vld [vmem:[%s8502_s0 + $0x2b5] sm:$0x20]   ;;  %v2093_v37 = vsel %vm239_vm3, %v4152_v22, %v2089_v32  ;;  %v4144_v41 = vld [vmem:[%s8502_s0 + $0x2a5] sm:$0x20]   ;;  %v2058_v57 = vsel %vm239_vm3, %v4143_v40, %v2054_v52  ;;  %v4188_v32 = vld [vmem:[%s8502_s0 + $0x9a] sm:$0x10]   ;;  %v6389_v40 = vpop.permute.xlu0 %602  }
  0x9f   :  { %v4154_v27 = vld [vmem:[%s8502_s0 + $0x2d4] sm:$0x40]   ;;  %v2097_v44 = vsel %vm243_vm4, %v4153_v26, %v2093_v37  ;;  %v4145_v47 = vld [vmem:[%s8502_s0 + $0x2c4] sm:$0x40]   ;;  %v2062_v0 = vsel %vm243_vm4, %v4144_v41, %v2058_v57  ;;  %v4190_v37 = vld [vmem:[%s8502_s0 + $0xd8] sm:$0x40]  }
  0xa0   :  { %v4155_v28 = vld [vmem:[%s8502_s0 + $0x2f3] sm:$0x80]   ;;  %v4146_v48 = vld [vmem:[%s8502_s0 + $0x2e3] sm:$0x80]   ;;  %v2101_v51 = vsel %vm247_vm5, %v4154_v27, %v2097_v44  ;;  %v2066_v6 = vsel %vm247_vm5, %v4145_v47, %v2062_v0  ;;  %v4175_v39 = vld [vmem:[%s8502_s0 + $0xe] sm:$0x1]  }
  0xa1   :  { %v4166_v49 = vld [vmem:[%s8502_s0 + $0x31a] sm:$0x1]   ;;  %v2105_v56 = vsel %vm251_vm6, %v4155_v28, %v2101_v51  ;;  %v4157_v3 = vld [vmem:[%s8502_s0 + $0x30a] sm:$0x1]   ;;  %v2070_v13 = vsel %vm251_vm6, %v4146_v48, %v2066_v6  ;;  %v2221_v28 = vsel %vm227_vm0, %v4185_v24, %v4184_v23  ;;  %v4176_v44 = vld [vmem:[%s8502_s0 + $0x2d] sm:$0x2]  }
  0xa2   :  { %v4167_v53 = vld [vmem:[%s8502_s0 + $0x339] sm:$0x2]   ;;  %2106 = vrot.lane.b32.xlu1 %v2105_v56, %s4538_s4  ;;  %v4158_v4 = vld [vmem:[%s8502_s0 + $0x329] sm:$0x2]   ;;  %2071 = vrot.lane.b32.xlu0 %v2070_v13, %s4538_s4  ;;  %v2225_v36 = vsel %vm231_vm1, %v4186_v25, %v2221_v28  ;;  %v2186_v51 = vsel %vm227_vm0, %v4176_v44, %v4175_v39 }
  0xa3   :  { %v4168_v54 = vld [vmem:[%s8502_s0 + $0x358] sm:$0x4]   ;;  %v2151_v59 = vsel %vm227_vm0, %v4167_v53, %v4166_v49  ;;  %v2116_v8 = vsel %vm227_vm0, %v4158_v4, %v4157_v3  ;;  %v4159_v9 = vld [vmem:[%s8502_s0 + $0x348] sm:$0x4]   ;;  %v2229_v43 = vsel %vm235_vm2, %v4187_v31, %v2225_v36  ;;  %v4177_v46 = vld [vmem:[%s8502_s0 + $0x4c] sm:$0x4]  }
  0xa4   :  { %v4169_v55 = vld [vmem:[%s8502_s0 + $0x377] sm:$0x8]   ;;  %v2155_v1 = vsel %vm231_vm1, %v4168_v54, %v2151_v59  ;;  %v4160_v10 = vld [vmem:[%s8502_s0 + $0x367] sm:$0x8]   ;;  %v2120_v15 = vsel %vm231_vm1, %v4159_v9, %v2116_v8  ;;  %v4178_v47 = vld [vmem:[%s8502_s0 + $0x6b] sm:$0x8]   ;;  %v2233_v49 = vsel %vm239_vm3, %v4188_v32, %v2229_v43  ;;  %v2190_v56 = vsel %vm231_vm1, %v4177_v46, %v2186_v51  ;;  %v6453_v13 = vpop.permute.xlu0 %672  }
  0xa5   :  { %v4170_v60 = vld [vmem:[%s8502_s0 + $0x396] sm:$0x10]   ;;  %v2159_v7 = vsel %vm235_vm2, %v4169_v55, %v2155_v1  ;;  %v4161_v11 = vld [vmem:[%s8502_s0 + $0x386] sm:$0x10]   ;;  %v2124_v22 = vsel %vm235_vm2, %v4160_v10, %v2120_v15  ;;  %v4179_v52 = vld [vmem:[%s8502_s0 + $0x8a] sm:$0x10]   ;;  %v2237_v55 = vsel %vm243_vm4, %v4189_v33, %v2233_v49  ;;  %v2194_v0 = vsel %vm235_vm2, %v4178_v47, %v2190_v56 }
  0xa6   :  { %v4171_v61 = vld [vmem:[%s8502_s0 + $0x3b5] sm:$0x20]   ;;  %v2163_v14 = vsel %vm239_vm3, %v4170_v60, %v2159_v7  ;;  %v4162_v17 = vld [vmem:[%s8502_s0 + $0x3a5] sm:$0x20]   ;;  %v2128_v27 = vsel %vm239_vm3, %v4161_v11, %v2124_v22  ;;  %v4180_v53 = vld [vmem:[%s8502_s0 + $0xa9] sm:$0x20]   ;;  %v2198_v7 = vsel %vm239_vm3, %v4179_v52, %v2194_v0 }
  0xa7   :  { %v4172_v63 = vld [vmem:[%s8502_s0 + $0x3d4] sm:$0x40]   ;;  %v4163_v18 = vld [vmem:[%s8502_s0 + $0x3c4] sm:$0x40]   ;;  %v2167_v21 = vsel %vm243_vm4, %v4171_v61, %v2163_v14  ;;  %v2132_v35 = vsel %vm243_vm4, %v4162_v17, %v2128_v27  ;;  %v4181_v54 = vld [vmem:[%s8502_s0 + $0xc8] sm:$0x40]   ;;  %v6427_v61 = vpop.permute.xlu1 %707   ;;  %v2202_v14 = vsel %vm243_vm4, %v4180_v53, %v2198_v7 }
  0xa8   :  { %v4173_v2 = vld [vmem:[%s8502_s0 + $0x3f3] sm:$0x80]   ;;  %v4164_v19 = vld [vmem:[%s8502_s0 + $0x3e3] sm:$0x80]   ;;  %v2171_v26 = vsel %vm247_vm5, %v4172_v63, %v2167_v21  ;;  %v2136_v41 = vsel %vm247_vm5, %v4163_v18, %v2132_v35  ;;  %v4182_v57 = vld [vmem:[%s8502_s0 + $0xe7] sm:$0x80]   ;;  %v2241_v63 = vsel %vm247_vm5, %v4190_v37, %v2237_v55  ;;  %v2206_v21 = vsel %vm247_vm5, %v4181_v54, %v2202_v14 }
  0xa9   :  { %v2175_v34 = vsel %vm251_vm6, %v4173_v2, %v2171_v26  ;;  %v2140_v48 = vsel %vm251_vm6, %v4164_v19, %v2136_v41  ;;  %v4202_v59 = vld [vmem:[%s8502_s0 + $0x11e] sm:$0x1]   ;;  %v2245_v6 = vsel %vm251_vm6, %v4191_v38, %v2241_v63  ;;  %v4193_v17 = vld [vmem:[%s8502_s0 + $0x10e] sm:$0x1]   ;;  %v2210_v27 = vsel %vm251_vm6, %v4182_v57, %v2206_v21 }
  0xaa   :  { %2176 = vrot.lane.b32.xlu1 %v2175_v34, %s4538_s4  ;;  %2141 = vrot.lane.b32.xlu0 %v2140_v48, %s4538_s4  ;;  %v4203_v60 = vld [vmem:[%s8502_s0 + $0x13d] sm:$0x2]   ;;  %v4194_v18 = vld [vmem:[%s8502_s0 + $0x12d] sm:$0x2]  }
  0xab   :  { %v2291_v1 = vsel %vm227_vm0, %v4203_v60, %v4202_v59  ;;  %v4204_v2 = vld [vmem:[%s8502_s0 + $0x15c] sm:$0x4]   ;;  %v4195_v19 = vld [vmem:[%s8502_s0 + $0x14c] sm:$0x4]   ;;  %v2256_v23 = vsel %vm227_vm0, %v4194_v18, %v4193_v17  ;;  %v6491_v35 = vpop.permute.xlu1 %777  }
  0xac   :  { %v4205_v3 = vld [vmem:[%s8502_s0 + $0x17b] sm:$0x8]   ;;  %v2295_v8 = vsel %vm231_vm1, %v4204_v2, %v2291_v1  ;;  %v4196_v24 = vld [vmem:[%s8502_s0 + $0x16b] sm:$0x8]   ;;  %v2260_v31 = vsel %vm231_vm1, %v4195_v19, %v2256_v23  ;;  %v6529_v56 = vpop.permute.xlu0 %742  }
  0xad   :  { %v4206_v4 = vld [vmem:[%s8502_s0 + $0x19a] sm:$0x10]   ;;  %v2299_v15 = vsel %vm235_vm2, %v4205_v3, %v2295_v8  ;;  %v4197_v25 = vld [vmem:[%s8502_s0 + $0x18a] sm:$0x10]   ;;  %v2264_v37 = vsel %vm235_vm2, %v4196_v24, %v2260_v31 }
  0xae   :  { %v4207_v9 = vld [vmem:[%s8502_s0 + $0x1b9] sm:$0x20]   ;;  %2246 = vrot.lane.b32.xlu1 %v2245_v6, %s4538_s4  ;;  %v2303_v22 = vsel %vm239_vm3, %v4206_v4, %v2299_v15  ;;  %v4198_v26 = vld [vmem:[%s8502_s0 + $0x1a9] sm:$0x20]   ;;  %2211 = vrot.lane.b32.xlu0 %v2210_v27, %s4538_s4  ;;  %v2268_v44 = vsel %vm239_vm3, %v4197_v25, %v2264_v37 }
  0xaf   :  { %v4208_v10 = vld [vmem:[%s8502_s0 + $0x1d8] sm:$0x40]   ;;  %v2307_v28 = vsel %vm243_vm4, %v4207_v9, %v2303_v22  ;;  %v4199_v32 = vld [vmem:[%s8502_s0 + $0x1c8] sm:$0x40]   ;;  %v2272_v51 = vsel %vm243_vm4, %v4198_v26, %v2268_v44  ;;  %v6555_v9 = vpop.permute.xlu1 %847  }
  0xb0   :  { %v4209_v11 = vld [vmem:[%s8502_s0 + $0x1f7] sm:$0x80]   ;;  %v4200_v33 = vld [vmem:[%s8502_s0 + $0x1e7] sm:$0x80]   ;;  %v2311_v36 = vsel %vm247_vm5, %v4208_v10, %v2307_v28  ;;  %v2276_v57 = vsel %vm247_vm5, %v4199_v32, %v2272_v51 }
  0xb1   :  { %v4220_v34 = vld [vmem:[%s8502_s0 + $0x21e] sm:$0x1]   ;;  %v2315_v43 = vsel %vm251_vm6, %v4209_v11, %v2311_v36  ;;  %v4211_v54 = vld [vmem:[%s8502_s0 + $0x20e] sm:$0x1]   ;;  %v2280_v2 = vsel %vm251_vm6, %v4200_v33, %v2276_v57  ;;  %v6593_v33 = vpop.permute.xlu0 %812  }
  0xb2   :  { %v4221_v38 = vld [vmem:[%s8502_s0 + $0x23d] sm:$0x2]   ;;  %2316 = vrot.lane.b32.xlu1 %v2315_v43, %s4538_s4  ;;  %v4212_v55 = vld [vmem:[%s8502_s0 + $0x22d] sm:$0x2]   ;;  %2281 = vrot.lane.b32.xlu0 %v2280_v2, %s4538_s4 }
  0xb3   :  { %v4222_v39 = vld [vmem:[%s8502_s0 + $0x25c] sm:$0x4]   ;;  %v2361_v46 = vsel %vm227_vm0, %v4221_v38, %v4220_v34  ;;  %v2326_v60 = vsel %vm227_vm0, %v4212_v55, %v4211_v54  ;;  %v4213_v63 = vld [vmem:[%s8502_s0 + $0x24c] sm:$0x4]   ;;  %v6628_v54 = vpop.permute.xlu1 %917  }
  0xb4   :  { %v4223_v41 = vld [vmem:[%s8502_s0 + $0x27b] sm:$0x8]   ;;  %v2365_v52 = vsel %vm231_vm1, %v4222_v39, %v2361_v46  ;;  %v4214_v0 = vld [vmem:[%s8502_s0 + $0x26b] sm:$0x8]   ;;  %v2330_v4 = vsel %vm231_vm1, %v4213_v63, %v2326_v60  ;;  %v4257_v60 = vld [vmem:[%s8502_s0 + $0x4f] sm:$0x4]  }
  0xb5   :  { %v4224_v47 = vld [vmem:[%s8502_s0 + $0x29a] sm:$0x10]   ;;  %v2369_v59 = vsel %vm235_vm2, %v4223_v41, %v2365_v52  ;;  %v4215_v1 = vld [vmem:[%s8502_s0 + $0x28a] sm:$0x10]   ;;  %v2334_v11 = vsel %vm235_vm2, %v4214_v0, %v2330_v4  ;;  %v4258_v63 = vld [vmem:[%s8502_s0 + $0x6e] sm:$0x8]  }
  0xb6   :  { %v4225_v48 = vld [vmem:[%s8502_s0 + $0x2b9] sm:$0x20]   ;;  %v2373_v3 = vsel %vm239_vm3, %v4224_v47, %v2369_v59  ;;  %v4216_v6 = vld [vmem:[%s8502_s0 + $0x2a9] sm:$0x20]   ;;  %v2338_v19 = vsel %vm239_vm3, %v4215_v1, %v2334_v11  ;;  %v4256_v59 = vld [vmem:[%s8502_s0 + $0x30] sm:$0x2]  }
  0xb7   :  { %v4226_v49 = vld [vmem:[%s8502_s0 + $0x2d8] sm:$0x40]   ;;  %v4217_v7 = vld [vmem:[%s8502_s0 + $0x2c8] sm:$0x40]   ;;  %v2377_v10 = vsel %vm243_vm4, %v4225_v48, %v2373_v3  ;;  %v2342_v26 = vsel %vm243_vm4, %v4216_v6, %v2338_v19  ;;  %v4259_v3 = vld [vmem:[%s8502_s0 + $0x8d] sm:$0x10]  }
  0xb8   :  { %v4227_v53 = vld [vmem:[%s8502_s0 + $0x2f7] sm:$0x80]   ;;  %v4218_v8 = vld [vmem:[%s8502_s0 + $0x2e7] sm:$0x80]   ;;  %v2381_v18 = vsel %vm247_vm5, %v4226_v49, %v2377_v10  ;;  %v2346_v34 = vsel %vm247_vm5, %v4217_v7, %v2342_v26  ;;  %v4260_v4 = vld [vmem:[%s8502_s0 + $0xac] sm:$0x20]   ;;  %v6653_v7 = vpop.permute.xlu0 %882  }
  0xb9   :  { %v4238_v14 = vld [vmem:[%s8502_s0 + $0x31e] sm:$0x1]   ;;  %v2385_v25 = vsel %vm251_vm6, %v4227_v53, %v2381_v18  ;;  %v4229_v32 = vld [vmem:[%s8502_s0 + $0x30e] sm:$0x1]   ;;  %v2350_v41 = vsel %vm251_vm6, %v4218_v8, %v2346_v34  ;;  %v4255_v53 = vld [vmem:[%s8502_s0 + $0x11] sm:$0x1]  }
  0xba   :  { %v4239_v15 = vld [vmem:[%s8502_s0 + $0x33d] sm:$0x2]   ;;  %2386 = vrot.lane.b32.xlu1 %v2385_v25, %s4538_s4  ;;  %v4230_v37 = vld [vmem:[%s8502_s0 + $0x32d] sm:$0x2]   ;;  %2351 = vrot.lane.b32.xlu0 %v2350_v41, %s4538_s4  ;;  %v2500_v2 = vsel %vm227_vm0, %v4256_v59, %v4255_v53 }
  0xbb   :  { %v4240_v17 = vld [vmem:[%s8502_s0 + $0x35c] sm:$0x4]   ;;  %v2431_v21 = vsel %vm227_vm0, %v4239_v15, %v4238_v14  ;;  %v4231_v38 = vld [vmem:[%s8502_s0 + $0x34c] sm:$0x4]   ;;  %v2396_v44 = vsel %vm227_vm0, %v4230_v37, %v4229_v32  ;;  %v4261_v6 = vld [vmem:[%s8502_s0 + $0xcb] sm:$0x40]   ;;  %v2504_v10 = vsel %vm231_vm1, %v4257_v60, %v2500_v2  ;;  %v6691_v32 = vpop.permute.xlu1 %987  }
  0xbc   :  { %v4241_v22 = vld [vmem:[%s8502_s0 + $0x37b] sm:$0x8]   ;;  %v2435_v27 = vsel %vm231_vm1, %v4240_v17, %v2431_v21  ;;  %v4232_v39 = vld [vmem:[%s8502_s0 + $0x36b] sm:$0x8]   ;;  %v2400_v51 = vsel %vm231_vm1, %v4231_v38, %v2396_v44  ;;  %v4262_v11 = vld [vmem:[%s8502_s0 + $0xea] sm:$0x80]   ;;  %v2508_v18 = vsel %vm235_vm2, %v4258_v63, %v2504_v10  ;;  %v6729_v59 = vpop.permute.xlu0 %952  }
  0xbd   :  { %v4242_v23 = vld [vmem:[%s8502_s0 + $0x39a] sm:$0x10]   ;;  %v2439_v36 = vsel %vm235_vm2, %v4241_v22, %v2435_v27  ;;  %v4233_v46 = vld [vmem:[%s8502_s0 + $0x38a] sm:$0x10]   ;;  %v2404_v57 = vsel %vm235_vm2, %v4232_v39, %v2400_v51  ;;  %v4247_v14 = vld [vmem:[%s8502_s0 + $0x1] sm:$0x1]   ;;  %v2512_v25 = vsel %vm239_vm3, %v4259_v3, %v2508_v18 }
  0xbe   :  { %v4243_v24 = vld [vmem:[%s8502_s0 + $0x3b9] sm:$0x20]   ;;  %v2443_v43 = vsel %vm239_vm3, %v4242_v23, %v2439_v36  ;;  %v4234_v47 = vld [vmem:[%s8502_s0 + $0x3a9] sm:$0x20]   ;;  %v2408_v1 = vsel %vm239_vm3, %v4233_v46, %v2404_v57  ;;  %v4248_v15 = vld [vmem:[%s8502_s0 + $0x20] sm:$0x2]   ;;  %v2516_v34 = vsel %vm243_vm4, %v4260_v4, %v2512_v25 }
  0xbf   :  { %v4244_v28 = vld [vmem:[%s8502_s0 + $0x3d8] sm:$0x40]   ;;  %v4235_v48 = vld [vmem:[%s8502_s0 + $0x3c8] sm:$0x40]   ;;  %v2447_v49 = vsel %vm243_vm4, %v4243_v24, %v2443_v43  ;;  %v2412_v8 = vsel %vm243_vm4, %v4234_v47, %v2408_v1  ;;  %v2466_v19 = vsel %vm227_vm0, %v4248_v15, %v4247_v14  ;;  %v4249_v21 = vld [vmem:[%s8502_s0 + $0x3f] sm:$0x4]   ;;  %v2520_v41 = vsel %vm247_vm5, %v4261_v6, %v2516_v34  ;;  %v6755_v14 = vpop.permute.xlu1 %1057  }
  0xc0   :  { %v4245_v31 = vld [vmem:[%s8502_s0 + $0x3f7] sm:$0x80]   ;;  %v4236_v52 = vld [vmem:[%s8502_s0 + $0x3e7] sm:$0x80]   ;;  %v2451_v55 = vsel %vm247_vm5, %v4244_v28, %v2447_v49  ;;  %v2416_v17 = vsel %vm247_vm5, %v4235_v48, %v2412_v8  ;;  %v4250_v22 = vld [vmem:[%s8502_s0 + $0x5e] sm:$0x8]   ;;  %v2470_v26 = vsel %vm231_vm1, %v4249_v21, %v2466_v19  ;;  %v2524_v49 = vsel %vm251_vm6, %v4262_v11, %v2520_v41 }
  0xc1   :  { %v2455_v0 = vsel %vm251_vm6, %v4245_v31, %v2451_v55  ;;  %v4251_v23 = vld [vmem:[%s8502_s0 + $0x7d] sm:$0x10]   ;;  %v2420_v24 = vsel %vm251_vm6, %v4236_v52, %v2416_v17  ;;  %v2474_v36 = vsel %vm235_vm2, %v4250_v22, %v2470_v26  ;;  %v4273_v37 = vld [vmem:[%s8502_s0 + $0x111] sm:$0x1]  }
  0xc2   :  { %2456 = vrot.lane.b32.xlu1 %v2455_v0, %s4538_s4  ;;  %v4252_v27 = vld [vmem:[%s8502_s0 + $0x9c] sm:$0x20]   ;;  %2421 = vrot.lane.b32.xlu0 %v2420_v24, %s4538_s4  ;;  %v4274_v38 = vld [vmem:[%s8502_s0 + $0x130] sm:$0x2]   ;;  %v2478_v43 = vsel %vm239_vm3, %v4251_v23, %v2474_v36 }
  0xc3   :  { %v4253_v28 = vld [vmem:[%s8502_s0 + $0xbb] sm:$0x40]   ;;  %v4275_v39 = vld [vmem:[%s8502_s0 + $0x14f] sm:$0x4]   ;;  %v2570_v44 = vsel %vm227_vm0, %v4274_v38, %v4273_v37  ;;  %v2482_v51 = vsel %vm243_vm4, %v4252_v27, %v2478_v43 }
  0xc4   :  { %v4254_v31 = vld [vmem:[%s8502_s0 + $0xda] sm:$0x80]   ;;  %v4276_v46 = vld [vmem:[%s8502_s0 + $0x16e] sm:$0x8]   ;;  %v2574_v52 = vsel %vm231_vm1, %v4275_v39, %v2570_v44  ;;  %v2486_v60 = vsel %vm247_vm5, %v4253_v28, %v2482_v51  ;;  %v6793_v39 = vpop.permute.xlu0 %1022  }
  0xc5   :  { %v4277_v47 = vld [vmem:[%s8502_s0 + $0x18d] sm:$0x10]   ;;  %v4264_v57 = vld [vmem:[%s8502_s0 + $0x101] sm:$0x1]   ;;  %v2578_v63 = vsel %vm235_vm2, %v4276_v46, %v2574_v52  ;;  %v2490_v3 = vsel %vm251_vm6, %v4254_v31, %v2486_v60 }
  0xc6   :  { %v4278_v48 = vld [vmem:[%s8502_s0 + $0x1ac] sm:$0x20]   ;;  %2525 = vrot.lane.b32.xlu1 %v2524_v49, %s4539_s14  ;;  %v4265_v0 = vld [vmem:[%s8502_s0 + $0x120] sm:$0x2]   ;;  %v2582_v4 = vsel %vm239_vm3, %v4277_v47, %v2578_v63  ;;  %2491 = vrot.lane.b32.xlu0 %v2490_v3, %s4539_s14  ;;  %v6831_v3 = vpop.permute.xlu1 %1127  }
  0xc7   :  { %v4279_v53 = vld [vmem:[%s8502_s0 + $0x1cb] sm:$0x40]   ;;  %v4266_v1 = vld [vmem:[%s8502_s0 + $0x13f] sm:$0x4]   ;;  %v2535_v6 = vsel %vm227_vm0, %v4265_v0, %v4264_v57  ;;  %v2586_v15 = vsel %vm243_vm4, %v4278_v48, %v2582_v4 }
  0xc8   :  { %v4280_v55 = vld [vmem:[%s8502_s0 + $0x1ea] sm:$0x80]   ;;  %v4267_v2 = vld [vmem:[%s8502_s0 + $0x15e] sm:$0x8]   ;;  %v2539_v17 = vsel %vm231_vm1, %v4266_v1, %v2535_v6  ;;  %v2590_v22 = vsel %vm247_vm5, %v4279_v53, %v2586_v15 }
  0xc9   :  { %v4268_v8 = vld [vmem:[%s8502_s0 + $0x17d] sm:$0x10]   ;;  %v4291_v19 = vld [vmem:[%s8502_s0 + $0x211] sm:$0x1]   ;;  %v2543_v23 = vsel %vm235_vm2, %v4267_v2, %v2539_v17  ;;  %v2594_v28 = vsel %vm251_vm6, %v4280_v55, %v2590_v22 }
  0xca   :  { %v4269_v10 = vld [vmem:[%s8502_s0 + $0x19c] sm:$0x20]   ;;  %v4292_v21 = vld [vmem:[%s8502_s0 + $0x230] sm:$0x2]   ;;  %v2547_v31 = vsel %vm239_vm3, %v4268_v8, %v2543_v23  ;;  %2595 = vrot.lane.b32.xlu1 %v2594_v28, %s4539_s14  ;;  %v6857_v23 = vpop.permute.xlu0 %1092  }
  0xcb   :  { %v4270_v11 = vld [vmem:[%s8502_s0 + $0x1bb] sm:$0x40]   ;;  %v2640_v24 = vsel %vm227_vm0, %v4292_v21, %v4291_v19  ;;  %v4293_v25 = vld [vmem:[%s8502_s0 + $0x24f] sm:$0x4]   ;;  %v2551_v41 = vsel %vm243_vm4, %v4269_v10, %v2547_v31 }
  0xcc   :  { %v4271_v18 = vld [vmem:[%s8502_s0 + $0x1da] sm:$0x80]   ;;  %v4294_v26 = vld [vmem:[%s8502_s0 + $0x26e] sm:$0x8]   ;;  %v2644_v34 = vsel %vm231_vm1, %v4293_v25, %v2640_v24  ;;  %v2555_v48 = vsel %vm247_vm5, %v4270_v11, %v2551_v41 }
  0xcd   :  { %v4295_v27 = vld [vmem:[%s8502_s0 + $0x28d] sm:$0x10]   ;;  %v2648_v43 = vsel %vm235_vm2, %v4294_v26, %v2644_v34  ;;  %v4282_v44 = vld [vmem:[%s8502_s0 + $0x201] sm:$0x1]   ;;  %v2559_v57 = vsel %vm251_vm6, %v4271_v18, %v2555_v48 }
  0xce   :  { %v4296_v36 = vld [vmem:[%s8502_s0 + $0x2ac] sm:$0x20]   ;;  %v4283_v46 = vld [vmem:[%s8502_s0 + $0x220] sm:$0x2]   ;;  %v2652_v49 = vsel %vm239_vm3, %v4295_v27, %v2648_v43  ;;  %2560 = vrot.lane.b32.xlu0 %v2559_v57, %s4539_s14  ;;  %v4328_v57 = vld [vmem:[%s8502_s0 + $0x34] sm:$0x2]  }
  0xcf   :  { %v4297_v37 = vld [vmem:[%s8502_s0 + $0x2cb] sm:$0x40]   ;;  %v4284_v47 = vld [vmem:[%s8502_s0 + $0x23f] sm:$0x4]   ;;  %v2605_v51 = vsel %vm227_vm0, %v4283_v46, %v4282_v44  ;;  %v2656_v60 = vsel %vm243_vm4, %v4296_v36, %v2652_v49 }
  0xd0   :  { %v4298_v38 = vld [vmem:[%s8502_s0 + $0x2ea] sm:$0x80]   ;;  %v4285_v52 = vld [vmem:[%s8502_s0 + $0x25e] sm:$0x8]   ;;  %v2609_v63 = vsel %vm231_vm1, %v4284_v47, %v2605_v51  ;;  %v2660_v4 = vsel %vm247_vm5, %v4297_v37, %v2656_v60  ;;  %v6895_v51 = vpop.permute.xlu1 %1197   ;;  %v4329_v60 = vld [vmem:[%s8502_s0 + $0x53] sm:$0x4]  }
  0xd1   :  { %v4286_v53 = vld [vmem:[%s8502_s0 + $0x27d] sm:$0x10]   ;;  %v4309_v2 = vld [vmem:[%s8502_s0 + $0x311] sm:$0x1]   ;;  %v2613_v6 = vsel %vm235_vm2, %v4285_v52, %v2609_v63  ;;  %v2664_v15 = vsel %vm251_vm6, %v4298_v38, %v2660_v4  ;;  %v4331_v4 = vld [vmem:[%s8502_s0 + $0x91] sm:$0x10]  }
  0xd2   :  { %v4287_v55 = vld [vmem:[%s8502_s0 + $0x29c] sm:$0x20]   ;;  %v4310_v8 = vld [vmem:[%s8502_s0 + $0x330] sm:$0x2]   ;;  %v2617_v17 = vsel %vm239_vm3, %v4286_v53, %v2613_v6  ;;  %2665 = vrot.lane.b32.xlu1 %v2664_v15, %s4539_s14  ;;  %v4332_v6 = vld [vmem:[%s8502_s0 + $0xb0] sm:$0x20]  }
  0xd3   :  { %v4288_v0 = vld [vmem:[%s8502_s0 + $0x2bb] sm:$0x40]   ;;  %v4311_v10 = vld [vmem:[%s8502_s0 + $0x34f] sm:$0x4]   ;;  %v2710_v18 = vsel %vm227_vm0, %v4310_v8, %v4309_v2  ;;  %v2621_v24 = vsel %vm243_vm4, %v4287_v55, %v2617_v17  ;;  %v4327_v55 = vld [vmem:[%s8502_s0 + $0x15] sm:$0x1]  }
  0xd4   :  { %v4289_v1 = vld [vmem:[%s8502_s0 + $0x2da] sm:$0x80]   ;;  %v4312_v11 = vld [vmem:[%s8502_s0 + $0x36e] sm:$0x8]   ;;  %v2714_v25 = vsel %vm231_vm1, %v4311_v10, %v2710_v18  ;;  %v2625_v31 = vsel %vm247_vm5, %v4288_v0, %v2621_v24  ;;  %v4330_v2 = vld [vmem:[%s8502_s0 + $0x72] sm:$0x8]  }
  0xd5   :  { %v4313_v19 = vld [vmem:[%s8502_s0 + $0x38d] sm:$0x10]   ;;  %v4300_v27 = vld [vmem:[%s8502_s0 + $0x301] sm:$0x1]   ;;  %v2718_v34 = vsel %vm235_vm2, %v4312_v11, %v2714_v25  ;;  %v2629_v43 = vsel %vm251_vm6, %v4289_v1, %v2625_v31  ;;  %v2780_v1 = vsel %vm227_vm0, %v4328_v57, %v4327_v55  ;;  %v4333_v15 = vld [vmem:[%s8502_s0 + $0xcf] sm:$0x40]  }
  0xd6   :  { %v4314_v21 = vld [vmem:[%s8502_s0 + $0x3ac] sm:$0x20]   ;;  %v4301_v28 = vld [vmem:[%s8502_s0 + $0x320] sm:$0x2]   ;;  %v2722_v44 = vsel %vm239_vm3, %v4313_v19, %v2718_v34  ;;  %2630 = vrot.lane.b32.xlu0 %v2629_v43, %s4539_s14  ;;  %v2784_v11 = vsel %vm231_vm1, %v4329_v60, %v2780_v1  ;;  %v4334_v17 = vld [vmem:[%s8502_s0 + $0xee] sm:$0x80]   ;;  %v6933_v19 = vpop.permute.xlu0 %1162  }
  0xd7   :  { %v4315_v22 = vld [vmem:[%s8502_s0 + $0x3cb] sm:$0x40]   ;;  %v2675_v36 = vsel %vm227_vm0, %v4301_v28, %v4300_v27  ;;  %v4302_v37 = vld [vmem:[%s8502_s0 + $0x33f] sm:$0x4]   ;;  %v2726_v52 = vsel %vm243_vm4, %v4314_v21, %v2722_v44  ;;  %v4318_v18 = vld [vmem:[%s8502_s0 + $0x5] sm:$0x1]  }
  0xd8   :  { %v4316_v26 = vld [vmem:[%s8502_s0 + $0x3ea] sm:$0x80]   ;;  %v4303_v38 = vld [vmem:[%s8502_s0 + $0x35e] sm:$0x8]   ;;  %v2679_v46 = vsel %vm231_vm1, %v4302_v37, %v2675_v36  ;;  %v2730_v63 = vsel %vm247_vm5, %v4315_v22, %v2726_v52  ;;  %v2788_v22 = vsel %vm235_vm2, %v4330_v2, %v2784_v11  ;;  %v4319_v24 = vld [vmem:[%s8502_s0 + $0x24] sm:$0x2]  }
  0xd9   :  { %v4304_v41 = vld [vmem:[%s8502_s0 + $0x37d] sm:$0x10]   ;;  %v2683_v53 = vsel %vm235_vm2, %v4303_v38, %v2679_v46  ;;  %v2734_v8 = vsel %vm251_vm6, %v4316_v26, %v2730_v63  ;;  %v4320_v25 = vld [vmem:[%s8502_s0 + $0x43] sm:$0x4]   ;;  %v2792_v28 = vsel %vm239_vm3, %v4331_v4, %v2788_v22  ;;  %v2745_v31 = vsel %vm227_vm0, %v4319_v24, %v4318_v18  ;;  %v6959_v38 = vpop.permute.xlu1 %1267   ;;  %v4345_v46 = vld [vmem:[%s8502_s0 + $0x115] sm:$0x1]  }
  0xda   :  { %v4305_v47 = vld [vmem:[%s8502_s0 + $0x39c] sm:$0x20]   ;;  %v2687_v0 = vsel %vm239_vm3, %v4304_v41, %v2683_v53  ;;  %2735 = vrot.lane.b32.xlu1 %v2734_v8, %s4539_s14  ;;  %v4321_v26 = vld [vmem:[%s8502_s0 + $0x62] sm:$0x8]   ;;  %v2796_v41 = vsel %vm243_vm4, %v4332_v6, %v2792_v28  ;;  %v2749_v43 = vsel %vm231_vm1, %v4320_v25, %v2745_v31  ;;  %v4347_v53 = vld [vmem:[%s8502_s0 + $0x153] sm:$0x4]   ;;  %v6997_v6 = vpop.permute.xlu0 %1232  }
  0xdb   :  { %v4306_v48 = vld [vmem:[%s8502_s0 + $0x3bb] sm:$0x40]   ;;  %v2691_v10 = vsel %vm243_vm4, %v4305_v47, %v2687_v0  ;;  %v4322_v34 = vld [vmem:[%s8502_s0 + $0x81] sm:$0x10]   ;;  %v4346_v47 = vld [vmem:[%s8502_s0 + $0x134] sm:$0x2]  }
  0xdc   :  { %v4307_v49 = vld [vmem:[%s8502_s0 + $0x3da] sm:$0x80]   ;;  %v2695_v21 = vsel %vm247_vm5, %v4306_v48, %v2691_v10  ;;  %v4323_v36 = vld [vmem:[%s8502_s0 + $0xa0] sm:$0x20]   ;;  %v2800_v48 = vsel %vm247_vm5, %v4333_v15, %v2796_v41  ;;  %v2850_v52 = vsel %vm227_vm0, %v4346_v47, %v4345_v46  ;;  %v4348_v55 = vld [vmem:[%s8502_s0 + $0x172] sm:$0x8]  }
  0xdd   :  { %v2699_v27 = vsel %vm251_vm6, %v4307_v49, %v2695_v21  ;;  %v4324_v37 = vld [vmem:[%s8502_s0 + $0xbf] sm:$0x40]   ;;  %v2753_v49 = vsel %vm235_vm2, %v4321_v26, %v2749_v43  ;;  %v4349_v57 = vld [vmem:[%s8502_s0 + $0x191] sm:$0x10]   ;;  %v2804_v60 = vsel %vm251_vm6, %v4334_v17, %v2800_v48  ;;  %v2854_v0 = vsel %vm231_vm1, %v4347_v53, %v2850_v52  ;;  %v7035_v41 = vpop.permute.xlu1 %1337  }
  0xde   :  { %2700 = vrot.lane.b32.xlu0 %v2699_v27, %s4539_s14  ;;  %v4325_v44 = vld [vmem:[%s8502_s0 + $0xde] sm:$0x80]   ;;  %v2757_v63 = vsel %vm239_vm3, %v4322_v34, %v2753_v49  ;;  %v4350_v1 = vld [vmem:[%s8502_s0 + $0x1b0] sm:$0x20]   ;;  %2805 = vrot.lane.b32.xlu1 %v2804_v60, %s4539_s14  ;;  %v2858_v10 = vsel %vm235_vm2, %v4348_v55, %v2854_v0 }
  0xdf   :  { %v4351_v2 = vld [vmem:[%s8502_s0 + $0x1cf] sm:$0x40]   ;;  %v2761_v8 = vsel %vm243_vm4, %v4323_v36, %v2757_v63  ;;  %v4336_v11 = vld [vmem:[%s8502_s0 + $0x105] sm:$0x1]   ;;  %v2862_v21 = vsel %vm239_vm3, %v4349_v57, %v2858_v10  ;;  %v7061_v63 = vpop.permute.xlu0 %1302  }
  0xe0   :  { %v4352_v4 = vld [vmem:[%s8502_s0 + $0x1ee] sm:$0x80]   ;;  %v4337_v15 = vld [vmem:[%s8502_s0 + $0x124] sm:$0x2]   ;;  %v2765_v18 = vsel %vm247_vm5, %v4324_v37, %v2761_v8  ;;  %v2866_v28 = vsel %vm243_vm4, %v4350_v1, %v2862_v21 }
  0xe1   :  { %v4338_v17 = vld [vmem:[%s8502_s0 + $0x143] sm:$0x4]   ;;  %v2815_v22 = vsel %vm227_vm0, %v4337_v15, %v4336_v11  ;;  %v2769_v27 = vsel %vm251_vm6, %v4325_v44, %v2765_v18  ;;  %v4363_v37 = vld [vmem:[%s8502_s0 + $0x215] sm:$0x1]   ;;  %v2870_v43 = vsel %vm247_vm5, %v4351_v2, %v2866_v28 }
  0xe2   :  { %v4339_v24 = vld [vmem:[%s8502_s0 + $0x162] sm:$0x8]   ;;  %v2819_v31 = vsel %vm231_vm1, %v4338_v17, %v2815_v22  ;;  %2770 = vrot.lane.b32.xlu0 %v2769_v27, %s4539_s14  ;;  %v4364_v46 = vld [vmem:[%s8502_s0 + $0x234] sm:$0x2]   ;;  %v2874_v49 = vsel %vm251_vm6, %v4352_v4, %v2870_v43 }
  0xe3   :  { %v4340_v25 = vld [vmem:[%s8502_s0 + $0x181] sm:$0x10]   ;;  %v2823_v44 = vsel %vm235_vm2, %v4339_v24, %v2819_v31  ;;  %v4365_v47 = vld [vmem:[%s8502_s0 + $0x253] sm:$0x4]   ;;  %v2920_v53 = vsel %vm227_vm0, %v4364_v46, %v4363_v37  ;;  %2875 = vrot.lane.b32.xlu1 %v2874_v49, %s4539_s14  ;;  %v7099_v31 = vpop.permute.xlu1 %1406  }
  0xe4   :  { %v4341_v26 = vld [vmem:[%s8502_s0 + $0x1a0] sm:$0x20]   ;;  %v4366_v48 = vld [vmem:[%s8502_s0 + $0x272] sm:$0x8]   ;;  %v2827_v52 = vsel %vm239_vm3, %v4340_v25, %v2823_v44  ;;  %v2924_v1 = vsel %vm231_vm1, %v4365_v47, %v2920_v53 }
  0xe5   :  { %v4342_v34 = vld [vmem:[%s8502_s0 + $0x1bf] sm:$0x40]   ;;  %v4367_v55 = vld [vmem:[%s8502_s0 + $0x291] sm:$0x10]   ;;  %v2831_v0 = vsel %vm243_vm4, %v4341_v26, %v2827_v52  ;;  %v2928_v11 = vsel %vm235_vm2, %v4366_v48, %v2924_v1 }
  0xe6   :  { %v4343_v36 = vld [vmem:[%s8502_s0 + $0x1de] sm:$0x80]   ;;  %v4368_v57 = vld [vmem:[%s8502_s0 + $0x2b0] sm:$0x20]   ;;  %v2835_v10 = vsel %vm247_vm5, %v4342_v34, %v2831_v0  ;;  %v2932_v24 = vsel %vm239_vm3, %v4367_v55, %v2928_v11 }
  0xe7   :  { %v4369_v60 = vld [vmem:[%s8502_s0 + $0x2cf] sm:$0x40]   ;;  %v4354_v4 = vld [vmem:[%s8502_s0 + $0x205] sm:$0x1]   ;;  %v2839_v22 = vsel %vm251_vm6, %v4343_v36, %v2835_v10  ;;  %v2936_v34 = vsel %vm243_vm4, %v4368_v57, %v2932_v24 }
  0xe8   :  { %v4370_v2 = vld [vmem:[%s8502_s0 + $0x2ee] sm:$0x80]   ;;  %v4355_v8 = vld [vmem:[%s8502_s0 + $0x224] sm:$0x2]   ;;  %2840 = vrot.lane.b32.xlu0 %v2839_v22, %s4539_s14  ;;  %v2940_v46 = vsel %vm247_vm5, %v4369_v60, %v2936_v34 }
  0xe9   :  { %v2885_v15 = vsel %vm227_vm0, %v4355_v8, %v4354_v4  ;;  %v4356_v17 = vld [vmem:[%s8502_s0 + $0x243] sm:$0x4]   ;;  %v4381_v37 = vld [vmem:[%s8502_s0 + $0x315] sm:$0x1]   ;;  %v2944_v55 = vsel %vm251_vm6, %v4370_v2, %v2940_v46  ;;  %v7137_v4 = vpop.permute.xlu0 %1372  }
  0xea   :  { %v4357_v18 = vld [vmem:[%s8502_s0 + $0x262] sm:$0x8]   ;;  %v2889_v25 = vsel %vm231_vm1, %v4356_v17, %v2885_v15  ;;  %v4382_v43 = vld [vmem:[%s8502_s0 + $0x334] sm:$0x2]   ;;  %2945 = vrot.lane.b32.xlu1 %v2944_v55, %s4539_s14 }
  0xeb   :  { %v4358_v21 = vld [vmem:[%s8502_s0 + $0x281] sm:$0x10]   ;;  %v2893_v36 = vsel %vm235_vm2, %v4357_v18, %v2889_v25  ;;  %v4383_v44 = vld [vmem:[%s8502_s0 + $0x353] sm:$0x4]   ;;  %v2990_v48 = vsel %vm227_vm0, %v4382_v43, %v4381_v37  ;;  %v4399_v37 = vld [vmem:[%s8502_s0 + $0x19] sm:$0x1]  }
  0xec   :  { %v4359_v26 = vld [vmem:[%s8502_s0 + $0x2a0] sm:$0x20]   ;;  %v2897_v47 = vsel %vm239_vm3, %v4358_v21, %v2893_v36  ;;  %v4384_v49 = vld [vmem:[%s8502_s0 + $0x372] sm:$0x8]   ;;  %v2994_v60 = vsel %vm231_vm1, %v4383_v44, %v2990_v48  ;;  %v4400_v43 = vld [vmem:[%s8502_s0 + $0x38] sm:$0x2]  }
  0xed   :  { %v4360_v27 = vld [vmem:[%s8502_s0 + $0x2bf] sm:$0x40]   ;;  %v4385_v52 = vld [vmem:[%s8502_s0 + $0x391] sm:$0x10]   ;;  %v2901_v57 = vsel %vm243_vm4, %v4359_v26, %v2897_v47  ;;  %v2998_v10 = vsel %vm235_vm2, %v4384_v49, %v2994_v60  ;;  %v3060_v47 = vsel %vm227_vm0, %v4400_v43, %v4399_v37  ;;  %v4401_v48 = vld [vmem:[%s8502_s0 + $0x57] sm:$0x4]  }
  0xee   :  { %v4361_v28 = vld [vmem:[%s8502_s0 + $0x2de] sm:$0x80]   ;;  %v4386_v53 = vld [vmem:[%s8502_s0 + $0x3b0] sm:$0x20]   ;;  %v2905_v8 = vsel %vm247_vm5, %v4360_v27, %v2901_v57  ;;  %v3002_v21 = vsel %vm239_vm3, %v4385_v52, %v2998_v10  ;;  %v7163_v27 = vpop.permute.xlu1 %1476   ;;  %v4402_v49 = vld [vmem:[%s8502_s0 + $0x76] sm:$0x8]   ;;  %v3064_v57 = vsel %vm231_vm1, %v4401_v48, %v3060_v47 }
  0xef   :  { %v4387_v0 = vld [vmem:[%s8502_s0 + $0x3cf] sm:$0x40]   ;;  %v4372_v2 = vld [vmem:[%s8502_s0 + $0x305] sm:$0x1]   ;;  %v2909_v18 = vsel %vm251_vm6, %v4361_v28, %v2905_v8  ;;  %v3006_v28 = vsel %vm243_vm4, %v4386_v53, %v3002_v21  ;;  %v4403_v52 = vld [vmem:[%s8502_s0 + $0x95] sm:$0x10]   ;;  %v3068_v10 = vsel %vm235_vm2, %v4402_v49, %v3064_v57 }
  0xf0   :  { %v4388_v1 = vld [vmem:[%s8502_s0 + $0x3ee] sm:$0x80]   ;;  %v4373_v11 = vld [vmem:[%s8502_s0 + $0x324] sm:$0x2]   ;;  %2910 = vrot.lane.b32.xlu0 %v2909_v18, %s4539_s14  ;;  %v3010_v44 = vsel %vm247_vm5, %v4387_v0, %v3006_v28  ;;  %v4404_v60 = vld [vmem:[%s8502_s0 + $0xb4] sm:$0x20]   ;;  %v3072_v21 = vsel %vm239_vm3, %v4403_v52, %v3068_v10 }
  0xf1   :  { %v4374_v15 = vld [vmem:[%s8502_s0 + $0x343] sm:$0x4]   ;;  %v2955_v22 = vsel %vm227_vm0, %v4373_v11, %v4372_v2  ;;  %v3014_v53 = vsel %vm251_vm6, %v4388_v1, %v3010_v44  ;;  %v4405_v0 = vld [vmem:[%s8502_s0 + $0xd3] sm:$0x40]   ;;  %v7201_v2 = vpop.permute.xlu0 %1441   ;;  %v4390_v11 = vld [vmem:[%s8502_s0 + $0x9] sm:$0x1]  }
  0xf2   :  { %v4375_v17 = vld [vmem:[%s8502_s0 + $0x362] sm:$0x8]   ;;  %v2959_v34 = vsel %vm231_vm1, %v4374_v15, %v2955_v22  ;;  %v4406_v1 = vld [vmem:[%s8502_s0 + $0xf2] sm:$0x80]   ;;  %3015 = vrot.lane.b32.xlu1 %v3014_v53, %s4539_s14  ;;  %v4391_v15 = vld [vmem:[%s8502_s0 + $0x28] sm:$0x2]  }
  0xf3   :  { %v4376_v24 = vld [vmem:[%s8502_s0 + $0x381] sm:$0x10]   ;;  %v2963_v46 = vsel %vm235_vm2, %v4375_v17, %v2959_v34  ;;  %v4392_v17 = vld [vmem:[%s8502_s0 + $0x47] sm:$0x4]   ;;  %v3025_v22 = vsel %vm227_vm0, %v4391_v15, %v4390_v11  ;;  %v3076_v34 = vsel %vm243_vm4, %v4404_v60, %v3072_v21  ;;  %v4417_v44 = vld [vmem:[%s8502_s0 + $0x119] sm:$0x1]  }
  0xf4   :  { %v4377_v25 = vld [vmem:[%s8502_s0 + $0x3a0] sm:$0x20]   ;;  %v2967_v55 = vsel %vm239_vm3, %v4376_v24, %v2963_v46  ;;  %v4393_v24 = vld [vmem:[%s8502_s0 + $0x66] sm:$0x8]   ;;  %v7239_v46 = vpop.permute.xlu1 %1546   ;;  %v3080_v47 = vsel %vm247_vm5, %v4405_v0, %v3076_v34  ;;  %v4418_v49 = vld [vmem:[%s8502_s0 + $0x138] sm:$0x2]  }
  0xf5   :  { %v4378_v26 = vld [vmem:[%s8502_s0 + $0x3bf] sm:$0x40]   ;;  %v2971_v8 = vsel %vm243_vm4, %v4377_v25, %v2967_v55  ;;  %v4394_v25 = vld [vmem:[%s8502_s0 + $0x85] sm:$0x10]   ;;  %v4419_v52 = vld [vmem:[%s8502_s0 + $0x157] sm:$0x4]   ;;  %v3084_v55 = vsel %vm251_vm6, %v4406_v1, %v3080_v47  ;;  %v3130_v60 = vsel %vm227_vm0, %v4418_v49, %v4417_v44  ;;  %v7265_v10 = vpop.permute.xlu0 %1511  }
  0xf6   :  { %v4379_v36 = vld [vmem:[%s8502_s0 + $0x3de] sm:$0x80]   ;;  %v2975_v18 = vsel %vm247_vm5, %v4378_v26, %v2971_v8  ;;  %v4395_v26 = vld [vmem:[%s8502_s0 + $0xa4] sm:$0x20]   ;;  %v4420_v53 = vld [vmem:[%s8502_s0 + $0x176] sm:$0x8]   ;;  %3085 = vrot.lane.b32.xlu1 %v3084_v55, %s4539_s14  ;;  %v3134_v15 = vsel %vm231_vm1, %v4419_v52, %v3130_v60 }
  0xf7   :  { %v2979_v28 = vsel %vm251_vm6, %v4379_v36, %v2975_v18  ;;  %v3029_v36 = vsel %vm231_vm1, %v4392_v17, %v3025_v22  ;;  %v4396_v37 = vld [vmem:[%s8502_s0 + $0xc3] sm:$0x40]   ;;  %v4421_v0 = vld [vmem:[%s8502_s0 + $0x195] sm:$0x10]  }
  0xf8   :  { %v4397_v43 = vld [vmem:[%s8502_s0 + $0xe2] sm:$0x80]   ;;  %2980 = vrot.lane.b32.xlu0 %v2979_v28, %s4539_s14  ;;  %v3033_v48 = vsel %vm235_vm2, %v4393_v24, %v3029_v36  ;;  %v4422_v1 = vld [vmem:[%s8502_s0 + $0x1b4] sm:$0x20]   ;;  %v3138_v24 = vsel %vm235_vm2, %v4420_v53, %v3134_v15  ;;  %v7303_v49 = vpop.permute.xlu1 %1616  }
  0xf9   :  { %v3037_v57 = vsel %vm239_vm3, %v4394_v25, %v3033_v48  ;;  %v4423_v8 = vld [vmem:[%s8502_s0 + $0x1d3] sm:$0x40]   ;;  %v4408_v18 = vld [vmem:[%s8502_s0 + $0x109] sm:$0x1]  }
  0xfa   :  { %v3041_v11 = vsel %vm243_vm4, %v4395_v26, %v3037_v57  ;;  %v4424_v17 = vld [vmem:[%s8502_s0 + $0x1f2] sm:$0x80]   ;;  %v4409_v21 = vld [vmem:[%s8502_s0 + $0x128] sm:$0x2]  }
  0xfb   :  { %v3045_v22 = vsel %vm247_vm5, %v4396_v37, %v3041_v11  ;;  %v3095_v25 = vsel %vm227_vm0, %v4409_v21, %v4408_v18  ;;  %v4410_v26 = vld [vmem:[%s8502_s0 + $0x147] sm:$0x4]   ;;  %v3142_v37 = vsel %vm239_vm3, %v4421_v0, %v3138_v24  ;;  %v4435_v55 = vld [vmem:[%s8502_s0 + $0x219] sm:$0x1]  }
  0xfc   :  { %v4411_v28 = vld [vmem:[%s8502_s0 + $0x166] sm:$0x8]   ;;  %v3049_v36 = vsel %vm251_vm6, %v4397_v43, %v3045_v22  ;;  %v3099_v43 = vsel %vm231_vm1, %v4410_v26, %v3095_v25  ;;  %v3146_v52 = vsel %vm243_vm4, %v4422_v1, %v3142_v37  ;;  %v4436_v57 = vld [vmem:[%s8502_s0 + $0x238] sm:$0x2]  }
  0xfd   :  { %v4412_v34 = vld [vmem:[%s8502_s0 + $0x185] sm:$0x10]   ;;  %3050 = vrot.lane.b32.xlu0 %v3049_v36, %s4539_s14  ;;  %v3103_v53 = vsel %vm235_vm2, %v4411_v28, %v3099_v43  ;;  %v4437_v60 = vld [vmem:[%s8502_s0 + $0x257] sm:$0x4]   ;;  %v3150_v0 = vsel %vm247_vm5, %v4423_v8, %v3146_v52  ;;  %v3200_v8 = vsel %vm227_vm0, %v4436_v57, %v4435_v55  ;;  %v7341_v28 = vpop.permute.xlu0 %1581  }
  0xfe   :  { %v4413_v44 = vld [vmem:[%s8502_s0 + $0x1a4] sm:$0x20]   ;;  %v3107_v1 = vsel %vm239_vm3, %v4412_v34, %v3103_v53  ;;  %v4438_v11 = vld [vmem:[%s8502_s0 + $0x276] sm:$0x8]   ;;  %v3154_v17 = vsel %vm251_vm6, %v4424_v17, %v3150_v0  ;;  %v3204_v22 = vsel %vm231_vm1, %v4437_v60, %v3200_v8  ;;  %v7367_v60 = vpop.permute.xlu1 %1686  }
  0xff   :  { %v4414_v47 = vld [vmem:[%s8502_s0 + $0x1c3] sm:$0x40]   ;;  %v4439_v15 = vld [vmem:[%s8502_s0 + $0x295] sm:$0x10]   ;;  %v3111_v21 = vsel %vm243_vm4, %v4413_v44, %v3107_v1  ;;  %3155 = vrot.lane.b32.xlu1 %v3154_v17, %s4539_s14  ;;  %v3208_v36 = vsel %vm235_vm2, %v4438_v11, %v3204_v22 }
 0x100   :  { %v4415_v48 = vld [vmem:[%s8502_s0 + $0x1e2] sm:$0x80]   ;;  %v4440_v18 = vld [vmem:[%s8502_s0 + $0x2b4] sm:$0x20]   ;;  %v3115_v34 = vsel %vm247_vm5, %v4414_v47, %v3111_v21 }
 0x101   :  { %v4441_v24 = vld [vmem:[%s8502_s0 + $0x2d3] sm:$0x40]   ;;  %v4426_v26 = vld [vmem:[%s8502_s0 + $0x209] sm:$0x1]   ;;  %v3119_v47 = vsel %vm251_vm6, %v4415_v48, %v3115_v34  ;;  %v3212_v48 = vsel %vm239_vm3, %v4439_v15, %v3208_v36 }
 0x102   :  { %v4442_v25 = vld [vmem:[%s8502_s0 + $0x2f2] sm:$0x80]   ;;  %v4427_v37 = vld [vmem:[%s8502_s0 + $0x228] sm:$0x2]   ;;  %3120 = vrot.lane.b32.xlu0 %v3119_v47, %s4539_s14  ;;  %v3216_v0 = vsel %vm243_vm4, %v4440_v18, %v3212_v48  ;;  %v7405_v47 = vpop.permute.xlu0 %1651  }
 0x103   :  { %v4428_v43 = vld [vmem:[%s8502_s0 + $0x247] sm:$0x4]   ;;  %v3165_v52 = vsel %vm227_vm0, %v4427_v37, %v4426_v26  ;;  %v4453_v11 = vld [vmem:[%s8502_s0 + $0x319] sm:$0x1]   ;;  %v3220_v18 = vsel %vm247_vm5, %v4441_v24, %v3216_v0 }
 0x104   :  { %v4429_v44 = vld [vmem:[%s8502_s0 + $0x266] sm:$0x8]   ;;  %v3169_v1 = vsel %vm231_vm1, %v4428_v43, %v3165_v52  ;;  %v4454_v15 = vld [vmem:[%s8502_s0 + $0x338] sm:$0x2]   ;;  %v3224_v25 = vsel %vm251_vm6, %v4442_v25, %v3220_v18 }
 0x105   :  { %v4430_v53 = vld [vmem:[%s8502_s0 + $0x285] sm:$0x10]   ;;  %v3173_v17 = vsel %vm235_vm2, %v4429_v44, %v3169_v1  ;;  %v3270_v21 = vsel %vm227_vm0, %v4454_v15, %v4453_v11  ;;  %v4455_v22 = vld [vmem:[%s8502_s0 + $0x357] sm:$0x4]   ;;  %3225 = vrot.lane.b32.xlu1 %v3224_v25, %s4539_s14  ;;  %v4471_v25 = vld [vmem:[%s8502_s0 + $0x1d] sm:$0x1]  }
 0x106   :  { %v4431_v55 = vld [vmem:[%s8502_s0 + $0x2a4] sm:$0x20]   ;;  %v4456_v24 = vld [vmem:[%s8502_s0 + $0x376] sm:$0x8]   ;;  %v3177_v34 = vsel %vm239_vm3, %v4430_v53, %v3173_v17  ;;  %v3274_v36 = vsel %vm231_vm1, %v4455_v22, %v3270_v21 }
 0x107   :  { %v4432_v57 = vld [vmem:[%s8502_s0 + $0x2c3] sm:$0x40]   ;;  %v4457_v26 = vld [vmem:[%s8502_s0 + $0x395] sm:$0x10]   ;;  %v3181_v48 = vsel %vm243_vm4, %v4431_v55, %v3177_v34  ;;  %v3278_v52 = vsel %vm235_vm2, %v4456_v24, %v3274_v36  ;;  %v7443_v34 = vpop.permute.xlu1 %1756  }
 0x108   :  { %v4433_v8 = vld [vmem:[%s8502_s0 + $0x2e2] sm:$0x80]   ;;  %v4458_v37 = vld [vmem:[%s8502_s0 + $0x3b4] sm:$0x20]   ;;  %v3185_v57 = vsel %vm247_vm5, %v4432_v57, %v3181_v48  ;;  %v3282_v1 = vsel %vm239_vm3, %v4457_v26, %v3278_v52  ;;  %v4473_v48 = vld [vmem:[%s8502_s0 + $0x5b] sm:$0x4]  }
 0x109   :  { %v4459_v43 = vld [vmem:[%s8502_s0 + $0x3d3] sm:$0x40]   ;;  %v4444_v53 = vld [vmem:[%s8502_s0 + $0x309] sm:$0x1]   ;;  %v3189_v8 = vsel %vm251_vm6, %v4433_v8, %v3185_v57  ;;  %v3286_v21 = vsel %vm243_vm4, %v4458_v37, %v3282_v1  ;;  %v4474_v52 = vld [vmem:[%s8502_s0 + $0x7a] sm:$0x8]  }
 0x10a   :  { %v4460_v44 = vld [vmem:[%s8502_s0 + $0x3f2] sm:$0x80]   ;;  %v4445_v55 = vld [vmem:[%s8502_s0 + $0x328] sm:$0x2]   ;;  %3190 = vrot.lane.b32.xlu0 %v3189_v8, %s4539_s14  ;;  %v3290_v36 = vsel %vm247_vm5, %v4459_v43, %v3286_v21  ;;  %v4472_v43 = vld [vmem:[%s8502_s0 + $0x3c] sm:$0x2]  }
 0x10b   :  { %v4446_v0 = vld [vmem:[%s8502_s0 + $0x347] sm:$0x4]   ;;  %v3235_v11 = vsel %vm227_vm0, %v4445_v55, %v4444_v53  ;;  %v3294_v44 = vsel %vm251_vm6, %v4460_v44, %v3290_v36  ;;  %v3340_v55 = vsel %vm227_vm0, %v4472_v43, %v4471_v25  ;;  %v4476_v57 = vld [vmem:[%s8502_s0 + $0xb8] sm:$0x20]   ;;  %v4462_v8 = vld [vmem:[%s8502_s0 + $0xd] sm:$0x1]  }
 0x10c   :  { %v4447_v15 = vld [vmem:[%s8502_s0 + $0x366] sm:$0x8]   ;;  %v3239_v22 = vsel %vm231_vm1, %v4446_v0, %v3235_v11  ;;  %v4475_v0 = vld [vmem:[%s8502_s0 + $0x99] sm:$0x10]   ;;  %v7469_v11 = vpop.permute.xlu0 %1721   ;;  %3295 = vrot.lane.b32.xlu1 %v3294_v44, %s4539_s14  ;;  %v4463_v21 = vld [vmem:[%s8502_s0 + $0x2c] sm:$0x2]  }
 0x10d   :  { %v4448_v18 = vld [vmem:[%s8502_s0 + $0x385] sm:$0x10]   ;;  %v3243_v37 = vsel %vm235_vm2, %v4447_v15, %v3239_v22  ;;  %v4477_v1 = vld [vmem:[%s8502_s0 + $0xd7] sm:$0x40]   ;;  %v3305_v25 = vsel %vm227_vm0, %v4463_v21, %v4462_v8  ;;  %v4464_v36 = vld [vmem:[%s8502_s0 + $0x4b] sm:$0x4]  }
 0x10e   :  { %v4449_v17 = vld [vmem:[%s8502_s0 + $0x3a4] sm:$0x20]   ;;  %v3247_v53 = vsel %vm239_vm3, %v4448_v18, %v3243_v37  ;;  %v3344_v18 = vsel %vm231_vm1, %v4473_v48, %v3340_v55  ;;  %v4465_v37 = vld [vmem:[%s8502_s0 + $0x6a] sm:$0x8]   ;;  %v3580_v8 = vld [vmem:[%s8502_s0 + $0x20] ss:$4 sm:$0xff]  }
 0x10f   :  { %v4450_v24 = vld [vmem:[%s8502_s0 + $0x3c3] sm:$0x40]   ;;  %v3251_v15 = vsel %vm243_vm4, %v4449_v17, %v3247_v53  ;;  %v4478_v17 = vld [vmem:[%s8502_s0 + $0xf6] sm:$0x80]   ;;  %v4466_v43 = vld [vmem:[%s8502_s0 + $0x89] sm:$0x10]  }
 0x110   :  { %v4451_v26 = vld [vmem:[%s8502_s0 + $0x3e2] sm:$0x80]   ;;  %v3255_v22 = vsel %vm247_vm5, %v4450_v24, %v3251_v15  ;;  %v3348_v24 = vsel %vm235_vm2, %v4474_v52, %v3344_v18  ;;  %v3309_v52 = vsel %vm231_vm1, %v4464_v36, %v3305_v25  ;;  %v4467_v44 = vld [vmem:[%s8502_s0 + $0xa8] sm:$0x20]   ;;  %v2_v18 = vld [vmem:[%s8502_s0] ss:$4 sm:$0xff]  }
 0x111   :  { %v3259_v26 = vsel %vm251_vm6, %v4451_v26, %v3255_v22  ;;  %v3352_v48 = vsel %vm239_vm3, %v4475_v0, %v3348_v24  ;;  %v4468_v53 = vld [vmem:[%s8502_s0 + $0xc7] sm:$0x40]   ;;  %v7507_v0 = vpop.permute.xlu1 %1826   ;;  %v3313_v15 = vsel %vm235_vm2, %v4465_v37, %v3309_v52  ;;  %5 = vst.msk [vmem:[%s8503_s1] ss:$8 sm:$0xf0] %vm3_vm7, %v2_v18  }
 0x112   :  { %v4469_v55 = vld [vmem:[%s8502_s0 + $0xe6] sm:$0x80]   ;;  %3260 = vrot.lane.b32.xlu0 %v3259_v26, %s4539_s14  ;;  %v3356_v57 = vsel %vm243_vm4, %v4476_v57, %v3352_v48  ;;  %v3317_v21 = vsel %vm239_vm3, %v4466_v43, %v3313_v15  ;;  %3582 = vst.msk [vmem:[%s8503_s1 + $0x1] ss:$8 sm:$0xf0] %vm3_vm7, %v3580_v8   ;;  %v7580_v48 = vpop.permute.xlu0 %1791  }
 0x113   :  { %v3360_v1 = vsel %vm247_vm5, %v4477_v1, %v3356_v57  ;;  %v3583_v22 = vld [vmem:[%s8502_s0 + $0x40] ss:$4 sm:$0xff]   ;;  %4 = vst.msk [vmem:[%s8503_s1] ss:$8 sm:$0xf] %vm3_vm7, %v2_v18   ;;  %v3321_v36 = vsel %vm243_vm4, %v4467_v44, %v3317_v21 }
 0x114   :  { %v3586_v24 = vld [vmem:[%s8502_s0 + $0x60] ss:$4 sm:$0xff]   ;;  %3581 = vst.msk [vmem:[%s8503_s1 + $0x1] ss:$8 sm:$0xf] %vm3_vm7, %v3580_v8   ;;  %v3364_v17 = vsel %vm251_vm6, %v4478_v17, %v3360_v1  ;;  %v3325_v52 = vsel %vm247_vm5, %v4468_v53, %v3321_v36 }
 0x115   :  { %v3589_v25 = vld [vmem:[%s8502_s0 + $0x80] ss:$4 sm:$0xff]   ;;  %3585 = vst.msk [vmem:[%s8503_s1 + $0x2] ss:$8 sm:$0xf0] %vm3_vm7, %v3583_v22   ;;  %3365 = vrot.lane.b32.xlu1 %v3364_v17, %s4539_s14  ;;  %v3329_v55 = vsel %vm251_vm6, %v4469_v55, %v3325_v52 }
 0x116   :  { %3588 = vst.msk [vmem:[%s8503_s1 + $0x3] ss:$8 sm:$0xf0] %vm3_vm7, %v3586_v24   ;;  %3591 = vst.msk [vmem:[%s8503_s1 + $0x4] ss:$8 sm:$0xf0] %vm3_vm7, %v3589_v25   ;;  %3330 = vrot.lane.b32.xlu0 %v3329_v55, %s4539_s14 }
 0x117   :  { %v3592_v37 = vld [vmem:[%s8502_s0 + $0xa0] ss:$4 sm:$0xff]   ;;  %3584 = vst.msk [vmem:[%s8503_s1 + $0x2] ss:$8 sm:$0xf] %vm3_vm7, %v3583_v22  }
 0x118   :  { %v3595_v43 = vld [vmem:[%s8502_s0 + $0xc0] ss:$4 sm:$0xff]   ;;  %3587 = vst.msk [vmem:[%s8503_s1 + $0x3] ss:$8 sm:$0xf] %vm3_vm7, %v3586_v24   ;;  %v7722_v24 = vpop.permute.xlu0 %1861  }
 0x119   :  { %v3598_v26 = vld [vmem:[%s8502_s0 + $0xe0] ss:$4 sm:$0xff]   ;;  %3590 = vst.msk [vmem:[%s8503_s1 + $0x4] ss:$8 sm:$0xf] %vm3_vm7, %v3589_v25  }
 0x11a   :  { %3594 = vst.msk [vmem:[%s8503_s1 + $0x5] ss:$8 sm:$0xf0] %vm3_vm7, %v3592_v37   ;;  %3597 = vst.msk [vmem:[%s8503_s1 + $0x6] ss:$8 sm:$0xf0] %vm3_vm7, %v3595_v43  }
 0x11b   :  { %3600 = vst.msk [vmem:[%s8503_s1 + $0x7] ss:$8 sm:$0xf0] %vm3_vm7, %v3598_v26   ;;  %3593 = vst.msk [vmem:[%s8503_s1 + $0x5] ss:$8 sm:$0xf] %vm3_vm7, %v3592_v37  }
 0x11c   :  { %3596 = vst.msk [vmem:[%s8503_s1 + $0x6] ss:$8 sm:$0xf] %vm3_vm7, %v3595_v43   ;;  %3599 = vst.msk [vmem:[%s8503_s1 + $0x7] ss:$8 sm:$0xf] %vm3_vm7, %v3598_v26  }
 0x11d   :  { %v4489_v44 = vld [vmem:[%s8502_s0 + $0x11d] sm:$0x1]   ;;  %3689 = vst.msk [vmem:[%s8503_s1 + $0x20] sm:$0xff] %vm255_vm8, %v6121_v29   ;;  %3761 = vst.msk [vmem:[%s8503_s1 + $0x28] sm:$0xff] %vm255_vm8, %v6287_v50   ;;  %v4483_v15 = vld [vmem:[%s8502_s0 + $0x16a] sm:$0x8]  }
 0x11e   :  { %v4490_v53 = vld [vmem:[%s8502_s0 + $0x13c] sm:$0x2]   ;;  %3833 = vst.msk [vmem:[%s8503_s1 + $0x30] sm:$0xff] %vm255_vm8, %v6555_v9   ;;  %3905 = vst.msk [vmem:[%s8503_s1 + $0x38] sm:$0xff] %vm255_vm8, %v6831_v3   ;;  %v7668_v9 = vpop.permute.xlu1 %1896   ;;  %v4484_v1 = vld [vmem:[%s8502_s0 + $0x189] sm:$0x10]  }
 0x11f   :  { %v4491_v57 = vld [vmem:[%s8502_s0 + $0x15b] sm:$0x4]   ;;  %256 = vst.msk [vmem:[%s8503_s1] sm:$0xff] %vm255_vm8, %v6045_v58   ;;  %3752 = vst.msk [vmem:[%s8503_s1 + $0x8] sm:$0xff] %vm255_vm8, %v6325_v5   ;;  %v3410_v58 = vsel %vm227_vm0, %v4490_v53, %v4489_v44  ;;  %v4485_v21 = vld [vmem:[%s8502_s0 + $0x1a8] sm:$0x20]  }
 0x120   :  { %3824 = vst.msk [vmem:[%s8503_s1 + $0x10] sm:$0xff] %vm255_vm8, %v6593_v33   ;;  %3896 = vst.msk [vmem:[%s8503_s1 + $0x18] sm:$0xff] %vm255_vm8, %v6857_v23   ;;  %v4492_v29 = vld [vmem:[%s8502_s0 + $0x17a] sm:$0x8]   ;;  %v3414_v33 = vsel %vm231_vm1, %v4491_v57, %v3410_v58  ;;  %v4486_v22 = vld [vmem:[%s8502_s0 + $0x1c7] sm:$0x40]  }
 0x121   :  { %v4493_v50 = vld [vmem:[%s8502_s0 + $0x199] sm:$0x10]   ;;  %3976 = vst.msk [vmem:[%s8503_s1 + $0x20] sm:$0xff] %vm1374_vm9, %v7099_v31   ;;  %1375 = vst.msk [vmem:[%s8503_s1] sm:$0xff] %vm1374_vm9, %v7137_v4   ;;  %v4480_v31 = vld [vmem:[%s8502_s0 + $0x10d] sm:$0x1]   ;;  %v3418_v4 = vsel %vm235_vm2, %v4492_v29, %v3414_v33 }
 0x122   :  { %v4494_v5 = vld [vmem:[%s8502_s0 + $0x1b8] sm:$0x20]   ;;  %4048 = vst.msk [vmem:[%s8503_s1 + $0x28] sm:$0xff] %vm1374_vm9, %v7367_v60   ;;  %4039 = vst.msk [vmem:[%s8503_s1 + $0x8] sm:$0xff] %vm1374_vm9, %v7405_v47   ;;  %v4481_v60 = vld [vmem:[%s8502_s0 + $0x12c] sm:$0x2]   ;;  %v3422_v18 = vsel %vm239_vm3, %v4493_v50, %v3418_v4  ;;  %v1967_v33 = vpop.permute.xlu1 %1966  }
 0x123   :  { %v4495_v3 = vld [vmem:[%s8502_s0 + $0x1d7] sm:$0x40]   ;;  %v4482_v47 = vld [vmem:[%s8502_s0 + $0x14b] sm:$0x4]   ;;  %v3375_v8 = vsel %vm227_vm0, %v4481_v60, %v4480_v31  ;;  %v3426_v25 = vsel %vm243_vm4, %v4494_v5, %v3422_v18  ;;  %v3601_v37 = vld [vmem:[%s8502_s0 + $0x100] ss:$4 sm:$0xff]  }
 0x124   :  { %v4496_v23 = vld [vmem:[%s8502_s0 + $0x1f6] sm:$0x80]   ;;  %v3379_v17 = vsel %vm231_vm1, %v4482_v47, %v3375_v8  ;;  %v4487_v36 = vld [vmem:[%s8502_s0 + $0x1e6] sm:$0x80]   ;;  %v3604_v43 = vld [vmem:[%s8502_s0 + $0x120] ss:$4 sm:$0xff]   ;;  %v3430_v26 = vsel %vm247_vm5, %v4495_v3, %v3426_v25 }
 0x125   :  { %v3383_v52 = vsel %vm235_vm2, %v4483_v15, %v3379_v17  ;;  %3603 = vst.msk [vmem:[%s8503_s1 + $0x40] ss:$8 sm:$0xf0] %vm3_vm7, %v3601_v37   ;;  %3606 = vst.msk [vmem:[%s8503_s1 + $0x41] ss:$8 sm:$0xf0] %vm3_vm7, %v3604_v43   ;;  %v3434_v55 = vsel %vm251_vm6, %v4496_v23, %v3430_v26 }
 0x126   :  { %v3607_v44 = vld [vmem:[%s8502_s0 + $0x140] ss:$4 sm:$0xff]   ;;  %3602 = vst.msk [vmem:[%s8503_s1 + $0x40] ss:$8 sm:$0xf] %vm3_vm7, %v3601_v37   ;;  %v3387_v58 = vsel %vm239_vm3, %v4484_v1, %v3383_v52  ;;  %3435 = vrot.lane.b32.xlu1 %v3434_v55, %s4539_s14  ;;  %v2037_v25 = vpop.permute.xlu1 %2036  }
 0x127   :  { %v3610_v53 = vld [vmem:[%s8502_s0 + $0x160] ss:$4 sm:$0xff]   ;;  %3605 = vst.msk [vmem:[%s8503_s1 + $0x41] ss:$8 sm:$0xf] %vm3_vm7, %v3604_v43   ;;  %v3391_v3 = vsel %vm243_vm4, %v4485_v21, %v3387_v58 }
 0x128   :  { %v3613_v57 = vld [vmem:[%s8502_s0 + $0x180] ss:$4 sm:$0xff]   ;;  %3609 = vst.msk [vmem:[%s8503_s1 + $0x42] ss:$8 sm:$0xf0] %vm3_vm7, %v3607_v44   ;;  %v3395_v60 = vsel %vm247_vm5, %v4486_v22, %v3391_v3 }
 0x129   :  { %3612 = vst.msk [vmem:[%s8503_s1 + $0x43] ss:$8 sm:$0xf0] %vm3_vm7, %v3610_v53   ;;  %3615 = vst.msk [vmem:[%s8503_s1 + $0x44] ss:$8 sm:$0xf0] %vm3_vm7, %v3613_v57  }
 0x12a   :  { %v3616_v29 = vld [vmem:[%s8502_s0 + $0x1a0] ss:$4 sm:$0xff]   ;;  %3608 = vst.msk [vmem:[%s8503_s1 + $0x42] ss:$8 sm:$0xf] %vm3_vm7, %v3607_v44  }
 0x12b   :  { %v3619_v50 = vld [vmem:[%s8502_s0 + $0x1c0] ss:$4 sm:$0xff]   ;;  %3611 = vst.msk [vmem:[%s8503_s1 + $0x43] ss:$8 sm:$0xf] %vm3_vm7, %v3610_v53  }
 0x12c   :  { %v3622_v5 = vld [vmem:[%s8502_s0 + $0x1e0] ss:$4 sm:$0xff]   ;;  %3614 = vst.msk [vmem:[%s8503_s1 + $0x44] ss:$8 sm:$0xf] %vm3_vm7, %v3613_v57  }
 0x12d   :  { %3618 = vst.msk [vmem:[%s8503_s1 + $0x45] ss:$8 sm:$0xf0] %vm3_vm7, %v3616_v29   ;;  %3621 = vst.msk [vmem:[%s8503_s1 + $0x46] ss:$8 sm:$0xf0] %vm3_vm7, %v3619_v50  }
 0x12e   :  { %3624 = vst.msk [vmem:[%s8503_s1 + $0x47] ss:$8 sm:$0xf0] %vm3_vm7, %v3622_v5   ;;  %3617 = vst.msk [vmem:[%s8503_s1 + $0x45] ss:$8 sm:$0xf] %vm3_vm7, %v3616_v29  }
 0x12f   :  { %3620 = vst.msk [vmem:[%s8503_s1 + $0x46] ss:$8 sm:$0xf] %vm3_vm7, %v3619_v50   ;;  %3623 = vst.msk [vmem:[%s8503_s1 + $0x47] ss:$8 sm:$0xf] %vm3_vm7, %v3622_v5  }
 0x130   :  { %v4507_v23 = vld [vmem:[%s8502_s0 + $0x21d] sm:$0x1]   ;;  %4120 = vst.msk [vmem:[%s8503_s1 + $0x30] sm:$0xff] %vm1374_vm9, %v1967_v33   ;;  %v4500_v47 = vld [vmem:[%s8502_s0 + $0x24b] sm:$0x4]  }
 0x131   :  { %v4508_v31 = vld [vmem:[%s8502_s0 + $0x23c] sm:$0x2]   ;;  %3707 = vst.msk [vmem:[%s8503_s1 + $0x60] sm:$0xff] %vm255_vm8, %v6083_v12   ;;  %3779 = vst.msk [vmem:[%s8503_s1 + $0x68] sm:$0xff] %vm255_vm8, %v6351_v20   ;;  %v4501_v15 = vld [vmem:[%s8502_s0 + $0x26a] sm:$0x8]  }
 0x132   :  { %v4509_v4 = vld [vmem:[%s8502_s0 + $0x25b] sm:$0x4]   ;;  %3851 = vst.msk [vmem:[%s8503_s1 + $0x70] sm:$0xff] %vm255_vm8, %v6628_v54   ;;  %3923 = vst.msk [vmem:[%s8503_s1 + $0x78] sm:$0xff] %vm255_vm8, %v6895_v51   ;;  %v1932_v54 = vpop.permute.xlu0 %1931   ;;  %v4502_v1 = vld [vmem:[%s8502_s0 + $0x289] sm:$0x10]  }
 0x133   :  { %3698 = vst.msk [vmem:[%s8503_s1 + $0x40] sm:$0xff] %vm255_vm8, %v6019_v45   ;;  %3770 = vst.msk [vmem:[%s8503_s1 + $0x48] sm:$0xff] %vm255_vm8, %v6389_v40   ;;  %v3480_v45 = vsel %vm227_vm0, %v4508_v31, %v4507_v23  ;;  %v4510_v12 = vld [vmem:[%s8502_s0 + $0x27a] sm:$0x8]   ;;  %v4503_v21 = vld [vmem:[%s8502_s0 + $0x2a8] sm:$0x20]  }
 0x134   :  { %3842 = vst.msk [vmem:[%s8503_s1 + $0x50] sm:$0xff] %vm255_vm8, %v6653_v7   ;;  %3914 = vst.msk [vmem:[%s8503_s1 + $0x58] sm:$0xff] %vm255_vm8, %v6933_v19   ;;  %v4511_v20 = vld [vmem:[%s8502_s0 + $0x299] sm:$0x10]   ;;  %v3399_v7 = vsel %vm251_vm6, %v4487_v36, %v3395_v60  ;;  %v3484_v51 = vsel %vm231_vm1, %v4509_v4, %v3480_v45  ;;  %v4504_v22 = vld [vmem:[%s8502_s0 + $0x2c7] sm:$0x40]  }
 0x135   :  { %v4512_v40 = vld [vmem:[%s8502_s0 + $0x2b8] sm:$0x20]   ;;  %3994 = vst.msk [vmem:[%s8503_s1 + $0x60] sm:$0xff] %vm1374_vm9, %v7163_v27   ;;  %3985 = vst.msk [vmem:[%s8503_s1 + $0x40] sm:$0xff] %vm1374_vm9, %v7201_v2   ;;  %v4498_v2 = vld [vmem:[%s8502_s0 + $0x20d] sm:$0x1]  }
 0x136   :  { %v4513_v19 = vld [vmem:[%s8502_s0 + $0x2d7] sm:$0x40]   ;;  %4066 = vst.msk [vmem:[%s8503_s1 + $0x68] sm:$0xff] %vm1374_vm9, %v7443_v34   ;;  %4057 = vst.msk [vmem:[%s8503_s1 + $0x48] sm:$0xff] %vm1374_vm9, %v7469_v11   ;;  %3400 = vrot.lane.b32.xlu0 %v3399_v7, %s4539_s14  ;;  %v3488_v34 = vsel %vm235_vm2, %v4510_v12, %v3484_v51  ;;  %v2002_v3 = vpop.permute.xlu0 %2001  }
 0x137   :  { %v4514_v27 = vld [vmem:[%s8502_s0 + $0x2f6] sm:$0x80]   ;;  %4111 = vst.msk [vmem:[%s8503_s1 + $0x10] sm:$0xff] %vm1374_vm9, %v1932_v54   ;;  %v4499_v11 = vld [vmem:[%s8502_s0 + $0x22c] sm:$0x2]   ;;  %v3492_v18 = vsel %vm239_vm3, %v4511_v20, %v3488_v34  ;;  %4138 = vst.msk [vmem:[%s8503_s1 + $0x70] sm:$0xff] %vm1374_vm9, %v2037_v25  }
 0x138   :  { %v3445_v8 = vsel %vm227_vm0, %v4499_v11, %v4498_v2  ;;  %v3496_v17 = vsel %vm243_vm4, %v4512_v40, %v3492_v18  ;;  %v4505_v37 = vld [vmem:[%s8502_s0 + $0x2e6] sm:$0x80]   ;;  %v3625_v43 = vld [vmem:[%s8502_s0 + $0x200] ss:$4 sm:$0xff]   ;;  %v4525_v31 = vld [vmem:[%s8502_s0 + $0x31d] sm:$0x1]  }
 0x139   :  { %v3449_v36 = vsel %vm231_vm1, %v4500_v47, %v3445_v8  ;;  %v3628_v26 = vld [vmem:[%s8502_s0 + $0x220] ss:$4 sm:$0xff]   ;;  %v3500_v52 = vsel %vm247_vm5, %v4513_v19, %v3496_v17  ;;  %3627 = vst.msk [vmem:[%s8503_s1 + $0x80] ss:$8 sm:$0xf0] %vm3_vm7, %v3625_v43  }
 0x13a   :  { %v3453_v44 = vsel %vm235_vm2, %v4501_v15, %v3449_v36  ;;  %3630 = vst.msk [vmem:[%s8503_s1 + $0x81] ss:$8 sm:$0xf0] %vm3_vm7, %v3628_v26   ;;  %v3631_v53 = vld [vmem:[%s8502_s0 + $0x240] ss:$4 sm:$0xff]   ;;  %v3504_v58 = vsel %vm251_vm6, %v4514_v27, %v3500_v52  ;;  %v2072_v27 = vpop.permute.xlu0 %2071  }
 0x13b   :  { %v3634_v57 = vld [vmem:[%s8502_s0 + $0x260] ss:$4 sm:$0xff]   ;;  %3626 = vst.msk [vmem:[%s8503_s1 + $0x80] ss:$8 sm:$0xf] %vm3_vm7, %v3625_v43   ;;  %v3457_v29 = vsel %vm239_vm3, %v4502_v1, %v3453_v44  ;;  %3505 = vrot.lane.b32.xlu1 %v3504_v58, %s4539_s14 }
 0x13c   :  { %v3637_v55 = vld [vmem:[%s8502_s0 + $0x280] ss:$4 sm:$0xff]   ;;  %3629 = vst.msk [vmem:[%s8503_s1 + $0x81] ss:$8 sm:$0xf] %vm3_vm7, %v3628_v26   ;;  %v3461_v23 = vsel %vm243_vm4, %v4503_v21, %v3457_v29 }
 0x13d   :  { %3633 = vst.msk [vmem:[%s8503_s1 + $0x82] ss:$8 sm:$0xf0] %vm3_vm7, %v3631_v53   ;;  %3636 = vst.msk [vmem:[%s8503_s1 + $0x83] ss:$8 sm:$0xf0] %vm3_vm7, %v3634_v57   ;;  %v3465_v45 = vsel %vm247_vm5, %v4504_v22, %v3461_v23 }
 0x13e   :  { %3639 = vst.msk [vmem:[%s8503_s1 + $0x84] ss:$8 sm:$0xf0] %vm3_vm7, %v3637_v55   ;;  %v3640_v50 = vld [vmem:[%s8502_s0 + $0x2a0] ss:$4 sm:$0xff]  }
 0x13f   :  { %v3643_v5 = vld [vmem:[%s8502_s0 + $0x2c0] ss:$4 sm:$0xff]   ;;  %3632 = vst.msk [vmem:[%s8503_s1 + $0x82] ss:$8 sm:$0xf] %vm3_vm7, %v3631_v53  }
 0x140   :  { %v3646_v33 = vld [vmem:[%s8502_s0 + $0x2e0] ss:$4 sm:$0xff]   ;;  %3635 = vst.msk [vmem:[%s8503_s1 + $0x83] ss:$8 sm:$0xf] %vm3_vm7, %v3634_v57  }
 0x141   :  { %3638 = vst.msk [vmem:[%s8503_s1 + $0x84] ss:$8 sm:$0xf] %vm3_vm7, %v3637_v55   ;;  %3642 = vst.msk [vmem:[%s8503_s1 + $0x85] ss:$8 sm:$0xf0] %vm3_vm7, %v3640_v50  }
 0x142   :  { %3645 = vst.msk [vmem:[%s8503_s1 + $0x86] ss:$8 sm:$0xf0] %vm3_vm7, %v3643_v5   ;;  %3648 = vst.msk [vmem:[%s8503_s1 + $0x87] ss:$8 sm:$0xf0] %vm3_vm7, %v3646_v33  }
 0x143   :  { %3641 = vst.msk [vmem:[%s8503_s1 + $0x85] ss:$8 sm:$0xf] %vm3_vm7, %v3640_v50   ;;  %3644 = vst.msk [vmem:[%s8503_s1 + $0x86] ss:$8 sm:$0xf] %vm3_vm7, %v3643_v5  }
 0x144   :  { %3647 = vst.msk [vmem:[%s8503_s1 + $0x87] ss:$8 sm:$0xf] %vm3_vm7, %v3646_v33   ;;  %v4526_v4 = vld [vmem:[%s8502_s0 + $0x33c] sm:$0x2]  }
 0x145   :  { %v4527_v60 = vld [vmem:[%s8502_s0 + $0x35b] sm:$0x4]   ;;  %4129 = vst.msk [vmem:[%s8503_s1 + $0x50] sm:$0xff] %vm1374_vm9, %v2002_v3   ;;  %v4518_v12 = vld [vmem:[%s8502_s0 + $0x34b] sm:$0x4]  }
 0x146   :  { %3725 = vst.msk [vmem:[%s8503_s1 + $0xa0] sm:$0xff] %vm255_vm8, %v6147_v42   ;;  %3797 = vst.msk [vmem:[%s8503_s1 + $0xa8] sm:$0xff] %vm255_vm8, %v6427_v61   ;;  %v3550_v42 = vsel %vm227_vm0, %v4526_v4, %v4525_v31  ;;  %v4529_v61 = vld [vmem:[%s8502_s0 + $0x399] sm:$0x10]   ;;  %v4519_v20 = vld [vmem:[%s8502_s0 + $0x36a] sm:$0x8]  }
 0x147   :  { %3869 = vst.msk [vmem:[%s8503_s1 + $0xb0] sm:$0xff] %vm255_vm8, %v6691_v32   ;;  %3941 = vst.msk [vmem:[%s8503_s1 + $0xb8] sm:$0xff] %vm255_vm8, %v6959_v38   ;;  %v2107_v32 = vpop.permute.xlu1 %2106   ;;  %v3554_v38 = vsel %vm231_vm1, %v4527_v60, %v3550_v42  ;;  %v4520_v7 = vld [vmem:[%s8502_s0 + $0x389] sm:$0x10]   ;;  %v3649_v47 = vld [vmem:[%s8502_s0 + $0x300] ss:$4 sm:$0xff]  }
 0x148   :  { %3716 = vst.msk [vmem:[%s8503_s1 + $0x80] sm:$0xff] %vm255_vm8, %v6185_v62   ;;  %3788 = vst.msk [vmem:[%s8503_s1 + $0x88] sm:$0xff] %vm255_vm8, %v6453_v13   ;;  %v4528_v62 = vld [vmem:[%s8502_s0 + $0x37a] sm:$0x8]   ;;  %v4521_v51 = vld [vmem:[%s8502_s0 + $0x3a8] sm:$0x20]  }
 0x149   :  { %3860 = vst.msk [vmem:[%s8503_s1 + $0x90] sm:$0xff] %vm255_vm8, %v6729_v59   ;;  %3932 = vst.msk [vmem:[%s8503_s1 + $0x98] sm:$0xff] %vm255_vm8, %v6997_v6   ;;  %v4530_v13 = vld [vmem:[%s8502_s0 + $0x3b8] sm:$0x20]   ;;  %v3469_v59 = vsel %vm251_vm6, %v4505_v37, %v3465_v45  ;;  %v4522_v19 = vld [vmem:[%s8502_s0 + $0x3c7] sm:$0x40]  }
 0x14a   :  { %4012 = vst.msk [vmem:[%s8503_s1 + $0xa0] sm:$0xff] %vm1374_vm9, %v7239_v46   ;;  %4003 = vst.msk [vmem:[%s8503_s1 + $0x80] sm:$0xff] %vm1374_vm9, %v7265_v10   ;;  %v4531_v6 = vld [vmem:[%s8502_s0 + $0x3d7] sm:$0x40]   ;;  %v4516_v10 = vld [vmem:[%s8502_s0 + $0x30d] sm:$0x1]  }
 0x14b   :  { %v4532_v46 = vld [vmem:[%s8502_s0 + $0x3f6] sm:$0x80]   ;;  %4084 = vst.msk [vmem:[%s8503_s1 + $0xa8] sm:$0xff] %vm1374_vm9, %v7507_v0   ;;  %4075 = vst.msk [vmem:[%s8503_s1 + $0x88] sm:$0xff] %vm1374_vm9, %v7580_v48   ;;  %3470 = vrot.lane.b32.xlu0 %v3469_v59, %s4539_s14  ;;  %v3558_v0 = vsel %vm235_vm2, %v4528_v62, %v3554_v38  ;;  %v2177_v26 = vpop.permute.xlu1 %2176  }
 0x14c   :  { %4156 = vst.msk [vmem:[%s8503_s1 + $0xb0] sm:$0xff] %vm1374_vm9, %v2107_v32   ;;  %v4517_v48 = vld [vmem:[%s8502_s0 + $0x32c] sm:$0x2]   ;;  %v3562_v40 = vsel %vm239_vm3, %v4529_v61, %v3558_v0  ;;  %v3652_v15 = vld [vmem:[%s8502_s0 + $0x320] ss:$4 sm:$0xff]   ;;  %4147 = vst.msk [vmem:[%s8503_s1 + $0x90] sm:$0xff] %vm1374_vm9, %v2072_v27  }
 0x14d   :  { %v3515_v54 = vsel %vm227_vm0, %v4517_v48, %v4516_v10  ;;  %v3566_v2 = vsel %vm243_vm4, %v4530_v13, %v3562_v40  ;;  %v4523_v11 = vld [vmem:[%s8502_s0 + $0x3e6] sm:$0x80]   ;;  %3651 = vst.msk [vmem:[%s8503_s1 + $0xc0] ss:$8 sm:$0xf0] %vm3_vm7, %v3649_v47  }
 0x14e   :  { %v3519_v34 = vsel %vm231_vm1, %v4518_v12, %v3515_v54  ;;  %v3570_v18 = vsel %vm247_vm5, %v4531_v6, %v3566_v2  ;;  %3654 = vst.msk [vmem:[%s8503_s1 + $0xc1] ss:$8 sm:$0xf0] %vm3_vm7, %v3652_v15   ;;  %v3655_v1 = vld [vmem:[%s8502_s0 + $0x340] ss:$4 sm:$0xff]  }
 0x14f   :  { %v3523_v8 = vsel %vm235_vm2, %v4519_v20, %v3519_v34  ;;  %v3658_v21 = vld [vmem:[%s8502_s0 + $0x360] ss:$4 sm:$0xff]   ;;  %3650 = vst.msk [vmem:[%s8503_s1 + $0xc0] ss:$8 sm:$0xf] %vm3_vm7, %v3649_v47   ;;  %v3574_v25 = vsel %vm251_vm6, %v4532_v46, %v3570_v18 }
 0x150   :  { %v3661_v22 = vld [vmem:[%s8502_s0 + $0x380] ss:$4 sm:$0xff]   ;;  %3653 = vst.msk [vmem:[%s8503_s1 + $0xc1] ss:$8 sm:$0xf] %vm3_vm7, %v3652_v15   ;;  %v3527_v17 = vsel %vm239_vm3, %v4520_v7, %v3523_v8  ;;  %3575 = vrot.lane.b32.xlu1 %v3574_v25, %s4539_s14 }
 0x151   :  { %3657 = vst.msk [vmem:[%s8503_s1 + $0xc2] ss:$8 sm:$0xf0] %vm3_vm7, %v3655_v1   ;;  %3660 = vst.msk [vmem:[%s8503_s1 + $0xc3] ss:$8 sm:$0xf0] %vm3_vm7, %v3658_v21   ;;  %v3531_v52 = vsel %vm243_vm4, %v4521_v51, %v3527_v17 }
 0x152   :  { %3663 = vst.msk [vmem:[%s8503_s1 + $0xc4] ss:$8 sm:$0xf0] %vm3_vm7, %v3661_v22   ;;  %v3664_v36 = vld [vmem:[%s8502_s0 + $0x3a0] ss:$4 sm:$0xff]   ;;  %v3535_v44 = vsel %vm247_vm5, %v4522_v19, %v3531_v52 }
 0x153   :  { %v3667_v37 = vld [vmem:[%s8502_s0 + $0x3c0] ss:$4 sm:$0xff]   ;;  %3656 = vst.msk [vmem:[%s8503_s1 + $0xc2] ss:$8 sm:$0xf] %vm3_vm7, %v3655_v1  }
 0x154   :  { %v3670_v43 = vld [vmem:[%s8502_s0 + $0x3e0] ss:$4 sm:$0xff]   ;;  %3659 = vst.msk [vmem:[%s8503_s1 + $0xc3] ss:$8 sm:$0xf] %vm3_vm7, %v3658_v21  }
 0x155   :  { %3662 = vst.msk [vmem:[%s8503_s1 + $0xc4] ss:$8 sm:$0xf] %vm3_vm7, %v3661_v22   ;;  %3666 = vst.msk [vmem:[%s8503_s1 + $0xc5] ss:$8 sm:$0xf0] %vm3_vm7, %v3664_v36  }
 0x156   :  { %3669 = vst.msk [vmem:[%s8503_s1 + $0xc6] ss:$8 sm:$0xf0] %vm3_vm7, %v3667_v37   ;;  %3672 = vst.msk [vmem:[%s8503_s1 + $0xc7] ss:$8 sm:$0xf0] %vm3_vm7, %v3670_v43  }
 0x157   :  { %3665 = vst.msk [vmem:[%s8503_s1 + $0xc5] ss:$8 sm:$0xf] %vm3_vm7, %v3664_v36   ;;  %3668 = vst.msk [vmem:[%s8503_s1 + $0xc6] ss:$8 sm:$0xf] %vm3_vm7, %v3667_v37  }
 0x158   :  { %3671 = vst.msk [vmem:[%s8503_s1 + $0xc7] ss:$8 sm:$0xf] %vm3_vm7, %v3670_v43  }
 0x159   :  { %3743 = vst.msk [vmem:[%s8503_s1 + $0xe0] sm:$0xff] %vm255_vm8, %v6223_v16   ;;  %3815 = vst.msk [vmem:[%s8503_s1 + $0xe8] sm:$0xff] %vm255_vm8, %v6491_v35   ;;  %v2142_v16 = vpop.permute.xlu0 %2141   ;;  %v2247_v35 = vpop.permute.xlu1 %2246  }
 0x15a   :  { %3887 = vst.msk [vmem:[%s8503_s1 + $0xf0] sm:$0xff] %vm255_vm8, %v6755_v14   ;;  %3959 = vst.msk [vmem:[%s8503_s1 + $0xf8] sm:$0xff] %vm255_vm8, %v7035_v41  }
 0x15b   :  { %3734 = vst.msk [vmem:[%s8503_s1 + $0xc0] sm:$0xff] %vm255_vm8, %v6249_v30   ;;  %3806 = vst.msk [vmem:[%s8503_s1 + $0xc8] sm:$0xff] %vm255_vm8, %v6529_v56   ;;  %v3539_v30 = vsel %vm251_vm6, %v4523_v11, %v3535_v44 }
 0x15c   :  { %3878 = vst.msk [vmem:[%s8503_s1 + $0xd0] sm:$0xff] %vm255_vm8, %v6793_v39   ;;  %3950 = vst.msk [vmem:[%s8503_s1 + $0xd8] sm:$0xff] %vm255_vm8, %v7061_v63   ;;  %3540 = vrot.lane.b32.xlu0 %v3539_v30, %s4539_s14 }
 0x15d   :  { %4030 = vst.msk [vmem:[%s8503_s1 + $0xe0] sm:$0xff] %vm1374_vm9, %v7303_v49   ;;  %4021 = vst.msk [vmem:[%s8503_s1 + $0xc0] sm:$0xff] %vm1374_vm9, %v7341_v28   ;;  %v2212_v56 = vpop.permute.xlu0 %2211   ;;  %v2317_v14 = vpop.permute.xlu1 %2316  }
 0x15e   :  { %4102 = vst.msk [vmem:[%s8503_s1 + $0xe8] sm:$0xff] %vm1374_vm9, %v7668_v9   ;;  %4093 = vst.msk [vmem:[%s8503_s1 + $0xc8] sm:$0xff] %vm1374_vm9, %v7722_v24  }
 0x15f   :  { %4174 = vst.msk [vmem:[%s8503_s1 + $0xf0] sm:$0xff] %vm1374_vm9, %v2177_v26   ;;  %4165 = vst.msk [vmem:[%s8503_s1 + $0xd0] sm:$0xff] %vm1374_vm9, %v2142_v16  }
 0x160   :  { %4192 = vst.msk [vmem:[%s8503_s1 + $0x38] sm:$0xff] %vm1374_vm9, %v2247_v35   ;;  %4183 = vst.msk [vmem:[%s8503_s1 + $0x18] sm:$0xff] %vm1374_vm9, %v2212_v56  }
 0x161   :  { %4210 = vst.msk [vmem:[%s8503_s1 + $0x78] sm:$0xff] %vm1374_vm9, %v2317_v14   ;;  %v2282_v39 = vpop.permute.xlu0 %2281   ;;  %v2387_v41 = vpop.permute.xlu1 %2386  }
 0x162   :  { %4201 = vst.msk [vmem:[%s8503_s1 + $0x58] sm:$0xff] %vm1374_vm9, %v2282_v39   ;;  %4228 = vst.msk [vmem:[%s8503_s1 + $0xb8] sm:$0xff] %vm1374_vm9, %v2387_v41  }
 0x165   :  { %v2352_v63 = vpop.permute.xlu0 %2351   ;;  %v2457_v49 = vpop.permute.xlu1 %2456  }
 0x166   :  { %4219 = vst.msk [vmem:[%s8503_s1 + $0x98] sm:$0xff] %vm1374_vm9, %v2352_v63   ;;  %4246 = vst.msk [vmem:[%s8503_s1 + $0xf8] sm:$0xff] %vm1374_vm9, %v2457_v49  }
 0x169   :  { %v2422_v28 = vpop.permute.xlu0 %2421   ;;  %v2526_v9 = vpop.permute.xlu1 %2525  }
 0x16a   :  { %4237 = vst.msk [vmem:[%s8503_s1 + $0xd8] sm:$0xff] %vm1374_vm9, %v2422_v28  }
 0x16b   :  { %4263 = vst.msk [vmem:[%s8503_s1 + $0x20] sm:$0xff] %vm2493_vm10, %v2526_v9  }
 0x16d   :  { %v2492_v24 = vpop.permute.xlu0 %2491   ;;  %v2596_v53 = vpop.permute.xlu1 %2595  }
 0x16e   :  { %2494 = vst.msk [vmem:[%s8503_s1] sm:$0xff] %vm2493_vm10, %v2492_v24   ;;  %4281 = vst.msk [vmem:[%s8503_s1 + $0x60] sm:$0xff] %vm2493_vm10, %v2596_v53  }
 0x171   :  { %v2561_v57 = vpop.permute.xlu0 %2560   ;;  %v2666_v55 = vpop.permute.xlu1 %2665  }
 0x172   :  { %4272 = vst.msk [vmem:[%s8503_s1 + $0x40] sm:$0xff] %vm2493_vm10, %v2561_v57   ;;  %4299 = vst.msk [vmem:[%s8503_s1 + $0xa0] sm:$0xff] %vm2493_vm10, %v2666_v55  }
 0x175   :  { %v2631_v58 = vpop.permute.xlu0 %2630   ;;  %v2736_v29 = vpop.permute.xlu1 %2735  }
 0x176   :  { %4290 = vst.msk [vmem:[%s8503_s1 + $0x80] sm:$0xff] %vm2493_vm10, %v2631_v58   ;;  %4317 = vst.msk [vmem:[%s8503_s1 + $0xe0] sm:$0xff] %vm2493_vm10, %v2736_v29  }
 0x179   :  { %v2701_v50 = vpop.permute.xlu0 %2700   ;;  %v2806_v5 = vpop.permute.xlu1 %2805  }
 0x17a   :  { %4308 = vst.msk [vmem:[%s8503_s1 + $0xc0] sm:$0xff] %vm2493_vm10, %v2701_v50   ;;  %4335 = vst.msk [vmem:[%s8503_s1 + $0x28] sm:$0xff] %vm2493_vm10, %v2806_v5  }
 0x17d   :  { %v2771_v33 = vpop.permute.xlu0 %2770   ;;  %v2876_v3 = vpop.permute.xlu1 %2875  }
 0x17e   :  { %4326 = vst.msk [vmem:[%s8503_s1 + $0x8] sm:$0xff] %vm2493_vm10, %v2771_v33   ;;  %4353 = vst.msk [vmem:[%s8503_s1 + $0x68] sm:$0xff] %vm2493_vm10, %v2876_v3  }
 0x181   :  { %v2841_v23 = vpop.permute.xlu0 %2840   ;;  %v2946_v31 = vpop.permute.xlu1 %2945  }
 0x182   :  { %4344 = vst.msk [vmem:[%s8503_s1 + $0x48] sm:$0xff] %vm2493_vm10, %v2841_v23   ;;  %4371 = vst.msk [vmem:[%s8503_s1 + $0xa8] sm:$0xff] %vm2493_vm10, %v2946_v31  }
 0x185   :  { %v2911_v4 = vpop.permute.xlu0 %2910   ;;  %v3016_v60 = vpop.permute.xlu1 %3015  }
 0x186   :  { %4362 = vst.msk [vmem:[%s8503_s1 + $0x88] sm:$0xff] %vm2493_vm10, %v2911_v4   ;;  %4389 = vst.msk [vmem:[%s8503_s1 + $0xe8] sm:$0xff] %vm2493_vm10, %v3016_v60  }
 0x189   :  { %v2981_v45 = vpop.permute.xlu0 %2980   ;;  %v3086_v42 = vpop.permute.xlu1 %3085  }
 0x18a   :  { %4380 = vst.msk [vmem:[%s8503_s1 + $0xc8] sm:$0xff] %vm2493_vm10, %v2981_v45   ;;  %4407 = vst.msk [vmem:[%s8503_s1 + $0x30] sm:$0xff] %vm2493_vm10, %v3086_v42  }
 0x18d   :  { %v3051_v62 = vpop.permute.xlu0 %3050   ;;  %v3156_v61 = vpop.permute.xlu1 %3155  }
 0x18e   :  { %4398 = vst.msk [vmem:[%s8503_s1 + $0x10] sm:$0xff] %vm2493_vm10, %v3051_v62   ;;  %4425 = vst.msk [vmem:[%s8503_s1 + $0x70] sm:$0xff] %vm2493_vm10, %v3156_v61  }
 0x191   :  { %v3121_v13 = vpop.permute.xlu0 %3120   ;;  %v3226_v32 = vpop.permute.xlu1 %3225  }
 0x192   :  { %4416 = vst.msk [vmem:[%s8503_s1 + $0x50] sm:$0xff] %vm2493_vm10, %v3121_v13   ;;  %4443 = vst.msk [vmem:[%s8503_s1 + $0xb0] sm:$0xff] %vm2493_vm10, %v3226_v32  }
 0x195   :  { %v3191_v59 = vpop.permute.xlu0 %3190   ;;  %v3296_v38 = vpop.permute.xlu1 %3295  }
 0x196   :  { %4434 = vst.msk [vmem:[%s8503_s1 + $0x90] sm:$0xff] %vm2493_vm10, %v3191_v59   ;;  %4461 = vst.msk [vmem:[%s8503_s1 + $0xf0] sm:$0xff] %vm2493_vm10, %v3296_v38  }
 0x199   :  { %v3261_v6 = vpop.permute.xlu0 %3260   ;;  %v3366_v46 = vpop.permute.xlu1 %3365  }
 0x19a   :  { %4452 = vst.msk [vmem:[%s8503_s1 + $0xd0] sm:$0xff] %vm2493_vm10, %v3261_v6   ;;  %4479 = vst.msk [vmem:[%s8503_s1 + $0x38] sm:$0xff] %vm2493_vm10, %v3366_v46  }
 0x19d   :  { %v3331_v10 = vpop.permute.xlu0 %3330   ;;  %v3436_v0 = vpop.permute.xlu1 %3435  }
 0x19e   :  { %4470 = vst.msk [vmem:[%s8503_s1 + $0x18] sm:$0xff] %vm2493_vm10, %v3331_v10   ;;  %4497 = vst.msk [vmem:[%s8503_s1 + $0x78] sm:$0xff] %vm2493_vm10, %v3436_v0  }
 0x1a8   :  { %v3401_v48 = vpop.permute.xlu0 %3400  }
 0x1a9   :  { %4488 = vst.msk [vmem:[%s8503_s1 + $0x58] sm:$0xff] %vm2493_vm10, %v3401_v48  }
 0x1ad   :  { %v3506_v12 = vpop.permute.xlu1 %3505  }
 0x1ae   :  { %4515 = vst.msk [vmem:[%s8503_s1 + $0xb8] sm:$0xff] %vm2493_vm10, %v3506_v12  }
 0x1bd   :  { %v3471_v20 = vpop.permute.xlu0 %3470  }
 0x1be   :  { %4506 = vst.msk [vmem:[%s8503_s1 + $0x98] sm:$0xff] %vm2493_vm10, %v3471_v20  }
 0x1c2   :  { %v3576_v40 = vpop.permute.xlu1 %3575  }
 0x1c3   :  { %4533 = vst.msk [vmem:[%s8503_s1 + $0xf8] sm:$0xff] %vm2493_vm10, %v3576_v40  }
 0x1ce   :  { %v3541_v54 = vpop.permute.xlu0 %3540  }
 0x1cf   :  { %4524 = vst.msk [vmem:[%s8503_s1 + $0xd8] sm:$0xff] %vm2493_vm10, %v3541_v54  }

// kernel: pq_forward.1
= control target key start
LH: loop header
LB: loop body
LE: loop exit
PB: predicated region body
PF: predicated region fallthrough
CT: control target
= control target key end

     0   :  { %vm51_vm0 = vcmask 261120   ;;  %v7778_v9 = vmov 0.0   ;;  %s11480_s0 = inlined_call_operand.vmem [shape: f32[1024,32], index: 0, kind: input, shape index: {}]   ;;  %s11481_s1 = inlined_call_operand.vmem [shape: f32[32,1024], index: 1, kind: input, shape index: {}]   ;;  %s11482_s2 = inlined_call_operand.vmem [shape: f32[2,1024], index: 2, kind: input, shape index: {}]   ;;  %s11483_s3 = inlined_call_operand.vmem [shape: f32[2,32], index: 3, kind: input, shape index: {}]   ;;  %s11484_s4 = inlined_call_operand.hbm [shape: f32[2,32], index: 4, kind: output, shape index: {}]  }
   0x1   :  { %v20_v0 = vld [vmem:[%s11481_s1 + $0x8] sm:$0xff]  ;;  %v22_v2 = vld [vmem:[%s11481_s1 + $0x18] sm:$0xff]  ;;  %v19_v7 = vld [vmem:[%s11481_s1] sm:$0xff]  ;;  %127 = vmatprep.mubr.f32.mxu0 %v7778_v9  ;;  %670 = vmatprep.mubr.f32.mxu1 %v7778_v9 }
   0x2   :  { %v28_v1 = vld [vmem:[%s11481_s1 + $0x48] sm:$0xff]  ;;  %v55_v3 = vand.u32 4294901760, %v20_v0  ;;  %v30_v5 = vld [vmem:[%s11481_s1 + $0x58] sm:$0xff]  ;;  %v598_v6 = vand.u32 4294901760, %v22_v2  ;;  %v27_v8 = vld [vmem:[%s11481_s1 + $0x40] sm:$0xff]  ;;  %v57_v11 = vand.u32 4294901760, %v19_v7 }
   0x3   :  { %v59_v4 = vand.u32 4294901760, %v28_v1  ;;  %v602_v10 = vand.u32 4294901760, %v30_v5  ;;  %v61_v12 = vand.u32 4294901760, %v27_v8  ;;  %v21_v13 = vld [vmem:[%s11481_s1 + $0x10] sm:$0xff]  ;;  %v36_v15 = vld [vmem:[%s11481_s1 + $0x88] sm:$0xff]  ;;  %v38_v21 = vld [vmem:[%s11481_s1 + $0x98] sm:$0xff] }
   0x4   :  { %v29_v14 = vld [vmem:[%s11481_s1 + $0x50] sm:$0xff]  ;;  %v7837_v17 = vsub.f32 %v20_v0, %v55_v3  ;;  %v7841_v19 = vsub.f32 %v22_v2, %v598_v6  ;;  %v44_v20 = vld [vmem:[%s11481_s1 + $0xc8] sm:$0xff]  ;;  %v46_v22 = vld [vmem:[%s11481_s1 + $0xd8] sm:$0xff]  ;;  %v7858_v26 = vsub.f32 %v19_v7, %v57_v11  ;;  %v600_v29 = vand.u32 4294901760, %v21_v13 }
   0x5   :  { %v7835_v16 = vpack.c.bf16 %v59_v4, %v55_v3  ;;  %v7839_v18 = vsub.f32 %v28_v1, %v59_v4  ;;  %v7852_v23 = vpack.c.bf16 %v602_v10, %v598_v6  ;;  %v7854_v24 = vsub.f32 %v30_v5, %v602_v10  ;;  %v35_v27 = vld [vmem:[%s11481_s1 + $0x80] sm:$0xff]  ;;  %v37_v37 = vld [vmem:[%s11481_s1 + $0x90] sm:$0xff] }
   0x6   :  { %v7856_v25 = vpack.c.bf16 %v61_v12, %v57_v11  ;;  %v7864_v28 = vsub.f32 %v27_v8, %v61_v12  ;;  %v604_v30 = vand.u32 4294901760, %v29_v14  ;;  %v63_v31 = vand.u32 4294901760, %v36_v15  ;;  %v43_v35 = vld [vmem:[%s11481_s1 + $0xc0] sm:$0xff]  ;;  %v45_v42 = vld [vmem:[%s11481_s1 + $0xd0] sm:$0xff] }
   0x7   :  { %6752 = vmatprep.subr.bf16.mxu0 %v7835_v16  ;;  %6800 = vmatprep.subr.bf16.mxu1 %v7852_v23  ;;  %v67_v32 = vand.u32 4294901760, %v44_v20  ;;  %v606_v33 = vand.u32 4294901760, %v38_v21  ;;  %v610_v34 = vand.u32 4294901760, %v46_v22  ;;  %v65_v36 = vand.u32 4294901760, %v35_v27  ;;  %v18_v43 = vld [vmem:[%s11483_s3] sm:$0x3] }
   0x8   :  { %6754 = vmatpush1.bf16.msra.mxu0 %v7856_v25  ;;  %v7874_v38 = vpack.c.bf16 %v604_v30, %v600_v29  ;;  %v7876_v39 = vsub.f32 %v21_v13, %v600_v29  ;;  %v7878_v40 = vsub.f32 %v29_v14, %v604_v30  ;;  %v7880_v41 = vsub.f32 %v36_v15, %v63_v31 }
   0x9   :  { %v7888_v44 = vpack.c.bf16 %v67_v32, %v63_v31  ;;  %v7890_v45 = vsub.f32 %v44_v20, %v67_v32  ;;  %v7892_v46 = vpack.c.bf16 %v610_v34, %v606_v33  ;;  %v7894_v47 = vsub.f32 %v38_v21, %v606_v33 }
   0xa   :  { %6802 = vmatpush1.bf16.msra.mxu1 %v7874_v38  ;;  %v7897_v48 = vsub.f32 %v46_v22, %v610_v34  ;;  %v69_v49 = vand.u32 4294901760, %v43_v35  ;;  %v7899_v50 = vsub.f32 %v35_v27, %v65_v36  ;;  %v608_v51 = vand.u32 4294901760, %v37_v37 }
   0xb   :  { %6756 = vmatprep.subr.bf16.mxu0 %v7888_v44  ;;  %6804 = vmatprep.subr.bf16.mxu1 %v7892_v46  ;;  %v612_v52 = vand.u32 4294901760, %v45_v42  ;;  %v53_v53 = vsel %vm51_vm0, %v18_v43, 0  ;;  %v141_v54 = vand.u32 4294901760, %v7837_v17  ;;  %v153_v55 = vand.u32 4294901760, %v7839_v18 }
   0xc   :  { %v7906_v56 = vpack.c.bf16 %v69_v49, %v65_v36  ;;  %v7908_v57 = vsub.f32 %v43_v35, %v69_v49  ;;  %v7910_v58 = vsub.f32 %v37_v37, %v608_v51  ;;  %v7912_v59 = vand.u32 4294901760, %v53_v53 }
   0xd   :  { %v7914_v60 = vpack.c.bf16 %v612_v52, %v608_v51  ;;  %v7916_v61 = vsub.f32 %v45_v42, %v612_v52  ;;  %v142_v62 = vsub.f32 %v7837_v17, %v141_v54  ;;  %v154_v63 = vsub.f32 %v7839_v18, %v153_v55 }
   0xe   :  { %6758 = vmatpush1.bf16.msra.mxu0 %v7906_v56  ;;  %v7926_v0 = vsub.f32 %v53_v53, %v7912_v59  ;;  %v684_v1 = vand.u32 4294901760, %v7841_v19  ;;  %v696_v2 = vand.u32 4294901760, %v7854_v24  ;;  %v147_v3 = vand.u32 4294901760, %v7858_v26 }
   0xf   :  { %6806 = vmatpush1.bf16.msra.mxu1 %v7914_v60  ;;  %v143_v4 = vand.u32 4294901760, %v142_v62  ;;  %v155_v5 = vand.u32 4294901760, %v154_v63  ;;  %v159_v6 = vand.u32 4294901760, %v7864_v28  ;;  %v690_v7 = vand.u32 4294901760, %v7876_v39 }
  0x10   :  { %v7935_v8 = vand.u32 4294901760, %v7926_v0  ;;  %v685_v10 = vsub.f32 %v7841_v19, %v684_v1  ;;  %v697_v11 = vsub.f32 %v7854_v24, %v696_v2  ;;  %v148_v12 = vsub.f32 %v7858_v26, %v147_v3 }
  0x11   :  { %v6759_v13 = vpack.c.bf16 %v155_v5, %v143_v4  ;;  %v160_v14 = vsub.f32 %v7864_v28, %v159_v6  ;;  %v691_v15 = vsub.f32 %v7876_v39, %v690_v7  ;;  %v702_v20 = vand.u32 4294901760, %v7878_v40 }
  0x12   :  { %v131_v21 = vsub.f32 %v7926_v0, %v7935_v8  ;;  %v686_v22 = vand.u32 4294901760, %v685_v10  ;;  %v698_v27 = vand.u32 4294901760, %v697_v11  ;;  %v149_v29 = vand.u32 4294901760, %v148_v12 }
  0x13   :  { %6760 = vmatprep.subr.bf16.mxu0 %v6759_v13  ;;  %v161_v30 = vand.u32 4294901760, %v160_v14  ;;  %v692_v31 = vand.u32 4294901760, %v691_v15  ;;  %v703_v32 = vsub.f32 %v7878_v40, %v702_v20  ;;  %v165_v33 = vand.u32 4294901760, %v7880_v41 }
  0x14   :  { %9 = vsyncpa [#allocation3], 0  ;;  %v7959_v34 = vand.u32 4294901760, %v131_v21  ;;  %v6807_v35 = vpack.c.bf16 %v698_v27, %v686_v22  ;;  %v177_v36 = vand.u32 4294901760, %v7890_v45  ;;  %v708_v37 = vand.u32 4294901760, %v7894_v47 }
  0x15   :  { %v6761_v42 = vpack.c.bf16 %v161_v30, %v149_v29  ;;  %v704_v43 = vand.u32 4294901760, %v703_v32  ;;  %v166_v49 = vsub.f32 %v7880_v41, %v165_v33  ;;  %v720_v51 = vand.u32 4294901760, %v7897_v48 }
  0x16   :  { %133 = vmatmul.mubr.f32.vlgmr.msra.gmra.mrb[0].mxu0 %v7959_v34  ;;  %676 = vmatmul.mubr.f32.vlgmr.msra.gmra.mrb[0].mxu1 %v7959_v34  ;;  %v178_v52 = vsub.f32 %v7890_v45, %v177_v36  ;;  %v709_v53 = vsub.f32 %v7894_v47, %v708_v37  ;;  %v171_v62 = vand.u32 4294901760, %v7899_v50  ;;  %v183_v63 = vand.u32 4294901760, %v7908_v57 }
  0x17   :  { %6808 = vmatprep.subr.bf16.mxu1 %v6807_v35  ;;  %6762 = vmatpush1.bf16.msra.mxu0 %v6761_v42  ;;  %v6809_v4 = vpack.c.bf16 %v704_v43, %v692_v31  ;;  %v167_v5 = vand.u32 4294901760, %v166_v49  ;;  %v721_v10 = vsub.f32 %v7897_v48, %v720_v51  ;;  %v714_v11 = vand.u32 4294901760, %v7910_v58 }
  0x18   :  { %v179_v12 = vand.u32 4294901760, %v178_v52  ;;  %v710_v13 = vand.u32 4294901760, %v709_v53  ;;  %v172_v14 = vsub.f32 %v7899_v50, %v171_v62  ;;  %v184_v15 = vsub.f32 %v7908_v57, %v183_v63  ;;  %243 = vmatprep.mubr.f32.mxu0 %v7778_v9  ;;  %786 = vmatprep.mubr.f32.mxu1 %v7778_v9 }
  0x19   :  { %6810 = vmatpush1.bf16.msra.mxu1 %v6809_v4  ;;  %v722_v21 = vand.u32 4294901760, %v721_v10  ;;  %v715_v22 = vsub.f32 %v7910_v58, %v714_v11  ;;  %v726_v27 = vand.u32 4294901760, %v7916_v61  ;;  %v6767_v43 = vpack.c.bf16 %v7839_v18, %v7837_v17 }
  0x1a   :  { %v6763_v29 = vpack.c.bf16 %v179_v12, %v167_v5  ;;  %v173_v30 = vand.u32 4294901760, %v172_v14  ;;  %v185_v31 = vand.u32 4294901760, %v184_v15  ;;  %v6815_v53 = vpack.c.bf16 %v7854_v24, %v7841_v19 }
  0x1b   :  { %v6811_v32 = vpack.c.bf16 %v722_v21, %v710_v13  ;;  %v716_v35 = vand.u32 4294901760, %v715_v22  ;;  %v727_v42 = vsub.f32 %v7916_v61, %v726_v27  ;;  %v6769_v4 = vpack.c.bf16 %v7864_v28, %v7858_v26  ;;  %v24_v21 = vld [vmem:[%s11481_s1 + $0x28] sm:$0xff] }
  0x1c   :  { %6764 = vmatprep.subr.bf16.mxu0 %v6763_v29  ;;  %v6765_v49 = vpack.c.bf16 %v185_v31, %v173_v30  ;;  %v6771_v10 = vpack.c.bf16 %v7890_v45, %v7880_v41  ;;  %v6817_v12 = vpack.c.bf16 %v7878_v40, %v7876_v39  ;;  %v6819_v13 = vpack.c.bf16 %v7897_v48, %v7894_v47  ;;  %v32_v22 = vld [vmem:[%s11481_s1 + $0x68] sm:$0xff]  ;;  %v26_v30 = vld [vmem:[%s11481_s1 + $0x38] sm:$0xff] }
  0x1d   :  { %6812 = vmatprep.subr.bf16.mxu1 %v6811_v32  ;;  %v728_v52 = vand.u32 4294901760, %v727_v42  ;;  %v6773_v14 = vpack.c.bf16 %v7908_v57, %v7899_v50  ;;  %v6821_v15 = vpack.c.bf16 %v7916_v61, %v7910_v58  ;;  %v6783_v29 = vpack.c.bf16 %v153_v55, %v141_v54  ;;  %v34_v31 = vld [vmem:[%s11481_s1 + $0x78] sm:$0xff]  ;;  %v23_v32 = vld [vmem:[%s11481_s1 + $0x20] sm:$0xff]  ;;  %v25_v55 = vld [vmem:[%s11481_s1 + $0x30] sm:$0xff] }
  0x1e   :  { %6766 = vmatpush1.bf16.msra.mxu0 %v6765_v49  ;;  %v1141_v17 = vand.u32 4294901760, %v24_v21  ;;  %v1145_v18 = vand.u32 4294901760, %v32_v22  ;;  %v31_v54 = vld [vmem:[%s11481_s1 + $0x60] sm:$0xff]  ;;  %v6831_v42 = vpack.c.bf16 %v696_v2, %v684_v1  ;;  %v6833_v49 = vpack.c.bf16 %v702_v20, %v690_v7  ;;  %v40_v28 = vld [vmem:[%s11481_s1 + $0xa8] sm:$0xff]  ;;  %v42_v47 = vld [vmem:[%s11481_s1 + $0xb8] sm:$0xff] }
  0x1f   :  { %v6813_v5 = vpack.c.bf16 %v728_v52, %v716_v35  ;;  %6768 = vmatprep.subr.bf16.mxu0 %v6767_v43  ;;  %v33_v35 = vld [vmem:[%s11481_s1 + $0x70] sm:$0xff]  ;;  %v6785_v43 = vpack.c.bf16 %v159_v6, %v147_v3  ;;  %v6787_v52 = vpack.c.bf16 %v177_v36, %v165_v33  ;;  %v6835_v19 = vpack.c.bf16 %v720_v51, %v708_v37  ;;  %v48_v39 = vld [vmem:[%s11481_s1 + $0xe8] sm:$0xff]  ;;  %v50_v50 = vld [vmem:[%s11481_s1 + $0xf8] sm:$0xff] }
  0x20   :  { %v1684_v24 = vand.u32 4294901760, %v26_v30  ;;  %v1688_v26 = vand.u32 4294901760, %v34_v31  ;;  %v1143_v40 = vand.u32 4294901760, %v23_v32  ;;  %v1147_v41 = vand.u32 4294901760, %v31_v54  ;;  %v39_v57 = vld [vmem:[%s11481_s1 + $0xa0] sm:$0xff] }
  0x21   :  { %6814 = vmatpush1.bf16.msra.mxu1 %v6813_v5  ;;  %245 = vmatmul.mubr.f32.vlgmr.msra.gmra.mrb[0].mxu0 %v7912_v59  ;;  %v1686_v1 = vand.u32 4294901760, %v25_v55  ;;  %v1690_v45 = vand.u32 4294901760, %v33_v35  ;;  %v6789_v48 = vpack.c.bf16 %v183_v63, %v171_v62  ;;  %v6837_v2 = vpack.c.bf16 %v726_v27, %v714_v11  ;;  %v47_v51 = vld [vmem:[%s11481_s1 + $0xe0] sm:$0xff] }
  0x22   :  { %6816 = vmatprep.subr.bf16.mxu1 %v6815_v53  ;;  %6770 = vmatpush1.bf16.msra.mxu0 %v6769_v4  ;;  %v8094_v3 = vpack.c.bf16 %v1145_v18, %v1141_v17  ;;  %v8096_v6 = vsub.f32 %v24_v21, %v1141_v17  ;;  %v8098_v7 = vsub.f32 %v32_v22, %v1145_v18  ;;  %v1149_v20 = vand.u32 4294901760, %v40_v28 }
  0x23   :  { %6772 = vmatprep.subr.bf16.mxu0 %v6771_v10  ;;  %331 = vmatprep.mubr.f32.mxu0 %v7778_v9  ;;  %v1153_v33 = vand.u32 4294901760, %v48_v39  ;;  %v8107_v58 = vpack.c.bf16 %v1688_v26, %v1684_v24  ;;  %v8109_v61 = vsub.f32 %v26_v30, %v1684_v24  ;;  %v8111_v36 = vsub.f32 %v34_v31, %v1688_v26 }
  0x24   :  { %788 = vmatmul.mubr.f32.vlgmr.msra.gmra.mrb[0].mxu1 %v7912_v59  ;;  %v1692_v37 = vand.u32 4294901760, %v42_v47  ;;  %v8117_v62 = vpack.c.bf16 %v1147_v41, %v1143_v40  ;;  %v8119_v63 = vsub.f32 %v23_v32, %v1143_v40  ;;  %v8121_v11 = vsub.f32 %v31_v54, %v1147_v41 }
  0x25   :  { %6818 = vmatpush1.bf16.msra.mxu1 %v6817_v12  ;;  %874 = vmatprep.mubr.f32.mxu1 %v7778_v9  ;;  %v8123_v27 = vpack.c.bf16 %v1690_v45, %v1686_v1  ;;  %v8126_v53 = vsub.f32 %v25_v55, %v1686_v1  ;;  %v8128_v4 = vsub.f32 %v33_v35, %v1690_v45  ;;  %v1696_v5 = vand.u32 4294901760, %v50_v50  ;;  %v8133_v12 = vld [vmem:[%s11481_s1 + $0xb0] sm:$0xff] }
  0x26   :  { %6820 = vmatprep.subr.bf16.mxu1 %v6819_v13  ;;  %6774 = vmatpush1.bf16.msra.mxu0 %v6773_v14  ;;  %v1151_v10 = vand.u32 4294901760, %v39_v57  ;;  %v8138_v13 = vld [vmem:[%s11481_s1 + $0xf0] sm:$0xff]  ;;  %v8140_v14 = vpack.c.bf16 %v1153_v33, %v1149_v20  ;;  %v1155_v21 = vand.u32 4294901760, %v47_v51  ;;  %v1227_v22 = vand.u32 4294901760, %v8096_v6 }
  0x27   :  { %6776 = vmatprep.subr.bf16.mxu0 %v7835_v16  ;;  %v8148_v30 = vsub.f32 %v42_v47, %v1692_v37  ;;  %v1239_v31 = vand.u32 4294901760, %v8098_v7  ;;  %v1770_v32 = vand.u32 4294901760, %v8109_v61  ;;  %v1694_v17 = vand.u32 4294901760, %v8133_v12 }
  0x28   :  { %v1698_v18 = vand.u32 4294901760, %v8138_v13  ;;  %v1782_v54 = vand.u32 4294901760, %v8111_v36  ;;  %v1233_v55 = vand.u32 4294901760, %v8119_v63  ;;  %v8159_v35 = vsub.f32 %v50_v50, %v1696_v5 }
  0x29   :  { %6822 = vmatpush1.bf16.msra.mxu1 %v6821_v15  ;;  %334 = vmatmul.mubr.f32.vlgmr.msra.gmra.mrb[0].mxu0 %v7926_v0  ;;  %v8142_v15 = vsub.f32 %v40_v28, %v1149_v20  ;;  %v1240_v24 = vsub.f32 %v8098_v7, %v1239_v31  ;;  %v11488_v40 = vand.u32 4294901760, %v8128_v4  ;;  %v8197_v41 = vsub.f32 %v8133_v12, %v1694_v17 }
  0x2a   :  { %6824 = vmatprep.subr.bf16.mxu1 %v7852_v23  ;;  %6778 = vmatpush1.bf16.msra.mxu0 %v7856_v25  ;;  %v1234_v28 = vsub.f32 %v8119_v63, %v1233_v55  ;;  %v8202_v1 = vsub.f32 %v8138_v13, %v1698_v18  ;;  %v11485_v47 = vand.u32 4294901760, %v8148_v30  ;;  %vm5895_vm1 = vcmask 254976  }
  0x2b   :  { %6780 = vmatprep.subr.bf16.mxu0 %v7888_v44  ;;  %412 = vmatprep.mubr.f32.mxu0 %v7778_v9 }
  0x2c   :  { %877 = vmatmul.mubr.f32.vlgmr.msra.gmra.mrb[0].mxu1 %v7926_v0 }
  0x2d   :  { %6826 = vmatpush1.bf16.msra.mxu1 %v7874_v38  ;;  %955 = vmatprep.mubr.f32.mxu1 %v7778_v9 }
  0x2e   :  { %6828 = vmatprep.subr.bf16.mxu1 %v7892_v46  ;;  %6782 = vmatpush1.bf16.msra.mxu0 %v7906_v56 }
  0x2f   :  { %6784 = vmatprep.subr.bf16.mxu0 %v6783_v29  ;;  %v8146_v29 = vsub.f32 %v48_v39, %v1153_v33  ;;  %v11490_v39 = vand.u32 4294901760, %v8126_v53  ;;  %v1241_v33 = vand.u32 4294901760, %v1240_v24  ;;  %v1812_v24 = vand.u32 4294901760, %v8202_v1 }
  0x31   :  { %6830 = vmatpush1.bf16.msra.mxu1 %v7914_v60  ;;  %416 = vmatmul.mubr.f32.vlgmr.msra.gmra.mrb[0].mxu0 %v7935_v8  ;;  %v1263_v26 = vand.u32 4294901760, %v8146_v29  ;;  %v1813_v12 = vsub.f32 %v8202_v1, %v1812_v24 }
  0x32   :  { %6832 = vmatprep.subr.bf16.mxu1 %v6831_v42  ;;  %6786 = vmatpush1.bf16.msra.mxu0 %v6785_v43  ;;  %v8161_v42 = vsub.f32 %v39_v57, %v1151_v10  ;;  %v1245_v43 = vand.u32 4294901760, %v8121_v11 }
  0x33   :  { %6788 = vmatprep.subr.bf16.mxu0 %v6787_v52  ;;  %510 = vmatprep.mubr.f32.mxu0 %v7778_v9  ;;  %v8168_v52 = vsub.f32 %v47_v51, %v1155_v21  ;;  %v1777_v51 = vsub.f32 %v8126_v53, %v11490_v39 }
  0x34   :  { %959 = vmatmul.mubr.f32.vlgmr.msra.gmra.mrb[0].mxu1 %v7935_v8  ;;  %v1246_v45 = vsub.f32 %v8121_v11, %v1245_v43 }
  0x35   :  { %6834 = vmatpush1.bf16.msra.mxu1 %v6833_v49  ;;  %1053 = vmatprep.mubr.f32.mxu1 %v7778_v9  ;;  %v8166_v49 = vpack.c.bf16 %v1155_v21, %v1151_v10  ;;  %v11489_v20 = vand.u32 4294901760, %v8168_v52  ;;  %v1795_v21 = vsub.f32 %v8148_v30, %v11485_v47 }
  0x36   :  { %6836 = vmatprep.subr.bf16.mxu1 %v6835_v19  ;;  %6790 = vmatpush1.bf16.msra.mxu0 %v6789_v48  ;;  %v1228_v19 = vsub.f32 %v8096_v6, %v1227_v22  ;;  %v11486_v48 = vand.u32 4294901760, %v8159_v35  ;;  %v1247_v10 = vand.u32 4294901760, %v1246_v45 }
  0x37   :  { %6792 = vmatprep.subr.bf16.mxu0 %v7835_v16  ;;  %v8157_v16 = vpack.c.bf16 %v1696_v5, %v1692_v37  ;;  %v1235_v37 = vand.u32 4294901760, %v1234_v28  ;;  %v1789_v5 = vsub.f32 %v8128_v4, %v11488_v40  ;;  %v1778_v40 = vand.u32 4294901760, %v1777_v51 }
  0x38   :  { %v1796_v13 = vand.u32 4294901760, %v1795_v21  ;;  %v8288_v21 = vld [vmem:[%s11480_s0 + $0x80] sm:$0xff] }
  0x39   :  { %6838 = vmatpush1.bf16.msra.mxu1 %v6837_v2  ;;  %512 = vmatmul.mubr.f32.vlgmr.msra.gmra.mrb[0].mxu0 %v7912_v59  ;;  %v11487_v2 = vand.u32 4294901760, %v8161_v42  ;;  %v1790_v39 = vand.u32 4294901760, %v1789_v5  ;;  %v6863_v5 = vpack.c.bf16 %v8098_v7, %v8096_v6 }
  0x3a   :  { %6840 = vmatprep.subr.bf16.mxu1 %v7852_v23  ;;  %6794 = vmatpush1.bf16.msra.mxu0 %v7856_v25  ;;  %v1771_v23 = vsub.f32 %v8109_v61, %v1770_v32  ;;  %v1251_v25 = vand.u32 4294901760, %v8142_v15 }
  0x3b   :  { %6796 = vmatprep.subr.bf16.mxu0 %v7888_v44  ;;  %590 = vmatprep.mubr.f32.mxu0 %v7778_v9  ;;  %v1783_v44 = vsub.f32 %v8111_v36, %v1782_v54 }
  0x3c   :  { %1055 = vmatmul.mubr.f32.vlgmr.msra.gmra.mrb[0].mxu1 %v7912_v59  ;;  %v1772_v50 = vand.u32 4294901760, %v1771_v23  ;;  %v1252_v57 = vsub.f32 %v8142_v15, %v1251_v25  ;;  %v1807_v23 = vsub.f32 %v8159_v35, %v11486_v48  ;;  %v8251_v48 = vpack.c.bf16 %v1698_v18, %v1694_v17 }
  0x3d   :  { %6842 = vmatpush1.bf16.msra.mxu1 %v7874_v38  ;;  %1133 = vmatprep.mubr.f32.mxu1 %v7778_v9  ;;  %v1229_v38 = vand.u32 4294901760, %v1228_v19  ;;  %v1800_v19 = vand.u32 4294901760, %v8197_v41 }
  0x3e   :  { %6844 = vmatprep.subr.bf16.mxu1 %v7892_v46  ;;  %6798 = vmatpush1.bf16.msra.mxu0 %v7906_v56  ;;  %v1264_v46 = vsub.f32 %v8146_v29, %v1263_v26  ;;  %v1784_v56 = vand.u32 4294901760, %v1783_v44  ;;  %v1270_v44 = vsub.f32 %v8168_v52, %v11489_v20  ;;  %v1253_v45 = vand.u32 4294901760, %v1252_v57 }
  0x3f   :  { %6848 = vmatprep.subr.bf16.mxu0 %v8094_v3  ;;  %v6855_v28 = vpack.c.bf16 %v1241_v33, %v1229_v38  ;;  %v6857_v20 = vpack.c.bf16 %v1247_v10, %v1235_v37  ;;  %v1801_v38 = vsub.f32 %v8197_v41, %v1800_v19  ;;  %v1808_v17 = vand.u32 4294901760, %v1807_v23  ;;  %v8293_v23 = vld [vmem:[%s11480_s0 + $0x88] sm:$0xff] }
  0x40   :  { %v1265_v47 = vand.u32 4294901760, %v1264_v46  ;;  %v1271_v33 = vand.u32 4294901760, %v1270_v44  ;;  %v6905_v57 = vpack.c.bf16 %v1790_v39, %v1778_v40  ;;  %v6911_v39 = vpack.c.bf16 %v8111_v36, %v8109_v61 }
  0x41   :  { %6846 = vmatpush1.bf16.msra.mxu1 %v7914_v60  ;;  %592 = vmatmul.mubr.f32.vlgmr.msra.gmra.mrb[0].mxu0 %v7912_v59  ;;  %v1258_v60 = vsub.f32 %v8161_v42, %v11487_v2  ;;  %v6903_v2 = vpack.c.bf16 %v1784_v56, %v1772_v50  ;;  %v1802_v46 = vand.u32 4294901760, %v1801_v38  ;;  %v1814_v56 = vand.u32 4294901760, %v1813_v12  ;;  %v8309_v38 = vld [vmem:[%s11480_s0 + $0x8] sm:$0xff]  ;;  %v8315_v12 = vld [vmem:[%s11480_s0 + $0x90] sm:$0xff] }
  0x42   :  { %6896 = vmatprep.subr.bf16.mxu1 %v8107_v58  ;;  %6850 = vmatpush1.bf16.msra.mxu0 %v8117_v62  ;;  %v6859_v50 = vpack.c.bf16 %v1265_v47, %v1253_v45  ;;  %v6907_v37 = vpack.c.bf16 %v1808_v17, %v1796_v13  ;;  %v6865_v40 = vpack.c.bf16 %v8121_v11, %v8119_v63  ;;  %v2496_v44 = vand.u32 4294901760, %v8288_v21  ;;  %v8304_v45 = vld [vmem:[%s11480_s0] sm:$0xff]  ;;  %v8320_v13 = vld [vmem:[%s11480_s0 + $0x98] sm:$0xff]  ;;  %v8325_v17 = vld [vmem:[%s11480_s0 + $0x10] sm:$0xff] }
  0x43   :  { %6852 = vmatprep.subr.bf16.mxu0 %v8140_v14  ;;  %1213 = vmatprep.mubr.f32.mxu0 %v7778_v9  ;;  %v1259_v18 = vand.u32 4294901760, %v1258_v60  ;;  %v6909_v47 = vpack.c.bf16 %v1814_v56, %v1802_v46  ;;  %v6869_v10 = vpack.c.bf16 %v8168_v52, %v8161_v42  ;;  %v6917_v60 = vpack.c.bf16 %v8202_v1, %v8197_v41  ;;  %v8383_v63 = vld [vmem:[%s11480_s0 + $0xa0] sm:$0xff]  ;;  %v8388_v11 = vld [vmem:[%s11480_s0 + $0xa8] sm:$0xff] }
  0x44   :  { %1135 = vmatmul.mubr.f32.vlgmr.msra.gmra.mrb[0].mxu1 %v7912_v59  ;;  %v2451_v46 = vand.u32 4294901760, %v8309_v38  ;;  %v2502_v6 = vand.u32 4294901760, %v8315_v12  ;;  %v2505_v7 = vand.u32 4294901760, %v8320_v13  ;;  %v6881_v56 = vpack.c.bf16 %v1245_v43, %v1233_v55 }
  0x45   :  { %6898 = vmatpush1.bf16.msra.mxu1 %v8123_v27  ;;  %1756 = vmatprep.mubr.f32.mxu1 %v7778_v9  ;;  %v6861_v51 = vpack.c.bf16 %v1271_v33, %v1259_v18  ;;  %v6879_v18 = vpack.c.bf16 %v1239_v31, %v1227_v22  ;;  %v8338_v33 = vsub.f32 %v8288_v21, %v2496_v44  ;;  %v8353_v22 = vld [vmem:[%s11480_s0 + $0x18] sm:$0xff]  ;;  %v2454_v31 = vand.u32 4294901760, %v8325_v17 }
  0x46   :  { %6900 = vmatprep.subr.bf16.mxu1 %v8157_v16  ;;  %6854 = vmatpush1.bf16.msra.mxu0 %v8166_v49  ;;  %v2457_v36 = vand.u32 4294901760, %v8353_v22  ;;  %v11751_v55 = vand.u32 4294901760, %v8126_v53  ;;  %v11752_v43 = vand.u32 4294901760, %v8128_v4 }
  0x47   :  { %6856 = vmatprep.subr.bf16.mxu0 %v6855_v28  ;;  %v2499_v28 = vand.u32 4294901760, %v8293_v23 }
  0x49   :  { %6902 = vmatpush1.bf16.msra.mxu1 %v8251_v48  ;;  %1219 = vmatmul.mubr.f32.vlgmr.msra.gmra.mrb[2].mxu0 %v7959_v34 }
  0x4a   :  { %6904 = vmatprep.subr.bf16.mxu1 %v6903_v2  ;;  %6858 = vmatpush1.bf16.msra.mxu0 %v6857_v20  ;;  %v6867_v2 = vpack.c.bf16 %v8146_v29, %v8142_v15  ;;  %v6915_v20 = vpack.c.bf16 %v8159_v35, %v8148_v30  ;;  %v8393_v15 = vsub.f32 %v8309_v38, %v2451_v46 }
  0x4b   :  { %6860 = vmatprep.subr.bf16.mxu0 %v6859_v50  ;;  %1329 = vmatprep.mubr.f32.mxu0 %v7778_v9  ;;  %v8343_v50 = vsub.f32 %v8293_v23, %v2499_v28  ;;  %v8398_v29 = vsub.f32 %v8315_v12, %v2502_v6 }
  0x4c   :  { %1762 = vmatmul.mubr.f32.vlgmr.msra.gmra.mrb[2].mxu1 %v7959_v34  ;;  %v6913_v34 = vpack.c.bf16 %v8128_v4, %v8126_v53  ;;  %v8429_v53 = vld [vmem:[%s11480_s0 + $0x20] sm:$0xff]  ;;  %v8434_v4 = vld [vmem:[%s11480_s0 + $0x28] sm:$0xff] }
  0x4d   :  { %6906 = vmatpush1.bf16.msra.mxu1 %v6905_v57  ;;  %1872 = vmatprep.mubr.f32.mxu1 %v7778_v9  ;;  %v2448_v57 = vand.u32 4294901760, %v8304_v45 }
  0x4e   :  { %6908 = vmatprep.subr.bf16.mxu1 %v6907_v37  ;;  %6862 = vmatpush1.bf16.msra.mxu0 %v6861_v51  ;;  %v6883_v37 = vpack.c.bf16 %v1263_v26, %v1251_v25  ;;  %v11492_v51 = vand.u32 4294901760, %v8338_v33  ;;  %v6929_v25 = vpack.c.bf16 %v11752_v43, %v11751_v55  ;;  %v11753_v26 = vand.u32 4294901760, %v8148_v30 }
  0x4f   :  { %6864 = vmatprep.subr.bf16.mxu0 %v6863_v5  ;;  %v11491_v5 = vand.u32 4294901760, %v8343_v50  ;;  %v8377_v61 = vsub.f32 %v8304_v45, %v2448_v57  ;;  %v6933_v43 = vpack.c.bf16 %v1812_v24, %v1800_v19  ;;  %v8486_v24 = vld [vmem:[%s11480_s0 + $0x30] sm:$0xff] }
  0x50   :  { %v2675_v30 = vsub.f32 %v8338_v33, %v11492_v51 }
  0x51   :  { %6910 = vmatpush1.bf16.msra.mxu1 %v6909_v47  ;;  %1331 = vmatmul.mubr.f32.vlgmr.msra.gmra.mrb[2].mxu0 %v7912_v59  ;;  %v11754_v47 = vand.u32 4294901760, %v8159_v35  ;;  %v2682_v35 = vsub.f32 %v8343_v50, %v11491_v5 }
  0x52   :  { %6912 = vmatprep.subr.bf16.mxu1 %v6911_v39  ;;  %6866 = vmatpush1.bf16.msra.mxu0 %v6865_v40  ;;  %v11755_v40 = vand.u32 4294901760, %v8161_v42  ;;  %v11497_v42 = vand.u32 4294901760, %v8377_v61 }
  0x53   :  { %6868 = vmatprep.subr.bf16.mxu0 %v6867_v2  ;;  %1417 = vmatprep.mubr.f32.mxu0 %v7778_v9  ;;  %v6931_v39 = vpack.c.bf16 %v11754_v47, %v11753_v26  ;;  %v11756_v2 = vand.u32 4294901760, %v8168_v52  ;;  %v8447_v52 = vsub.f32 %v8353_v22, %v2457_v36  ;;  %v11499_v26 = vand.u32 4294901760, %v8429_v53 }
  0x54   :  { %1874 = vmatmul.mubr.f32.vlgmr.msra.gmra.mrb[2].mxu1 %v7912_v59 }
  0x55   :  { %6914 = vmatpush1.bf16.msra.mxu1 %v6913_v34  ;;  %1960 = vmatprep.mubr.f32.mxu1 %v7778_v9  ;;  %v6885_v34 = vpack.c.bf16 %v11756_v2, %v11755_v40  ;;  %v2683_v40 = vand.u32 4294901760, %v2682_v35  ;;  %v2563_v2 = vsub.f32 %v8377_v61, %v11497_v42  ;;  %v8514_v35 = vsub.f32 %v8429_v53, %v11499_v26 }
  0x56   :  { %6916 = vmatprep.subr.bf16.mxu1 %v6915_v20  ;;  %6870 = vmatpush1.bf16.msra.mxu0 %v6869_v10  ;;  %v11503_v20 = vand.u32 4294901760, %v8383_v63  ;;  %v11502_v10 = vand.u32 4294901760, %v8388_v11 }
  0x57   :  { %6872 = vmatprep.subr.bf16.mxu0 %v8094_v3  ;;  %v11511_v21 = vand.u32 4294901760, %v8514_v35 }
  0x58   :  { %v8474_v47 = vsub.f32 %v8383_v63, %v11503_v20  ;;  %v8479_v41 = vsub.f32 %v8388_v11, %v11502_v10 }
  0x59   :  { %6918 = vmatpush1.bf16.msra.mxu1 %v6917_v60  ;;  %1420 = vmatmul.mubr.f32.vlgmr.msra.gmra.mrb[2].mxu0 %v7926_v0  ;;  %v8452_v60 = vld [vmem:[%s11480_s0 + $0xb0] sm:$0xff]  ;;  %v2591_v12 = vsub.f32 %v8514_v35, %v11511_v21 }
  0x5a   :  { %6920 = vmatprep.subr.bf16.mxu1 %v8107_v58  ;;  %6874 = vmatpush1.bf16.msra.mxu0 %v8117_v62  ;;  %v11500_v1 = vand.u32 4294901760, %v8452_v60 }
  0x5b   :  { %6876 = vmatprep.subr.bf16.mxu0 %v8140_v14  ;;  %1498 = vmatprep.mubr.f32.mxu0 %v7778_v9 }
  0x5c   :  { %1963 = vmatmul.mubr.f32.vlgmr.msra.gmra.mrb[2].mxu1 %v7926_v0  ;;  %v6927_v0 = vpack.c.bf16 %v1782_v54, %v1770_v32  ;;  %v8403_v32 = vsub.f32 %v8320_v13, %v2505_v7  ;;  %v8408_v54 = vsub.f32 %v8325_v17, %v2454_v31  ;;  %v8530_v42 = vsub.f32 %v8452_v60, %v11500_v1 }
  0x5d   :  { %6922 = vmatpush1.bf16.msra.mxu1 %v8123_v27  ;;  %2041 = vmatprep.mubr.f32.mxu1 %v7778_v9  ;;  %v8546_v1 = vpack.c.bf16 %v2499_v28, %v2496_v44 }
  0x5e   :  { %6924 = vmatprep.subr.bf16.mxu1 %v8157_v16  ;;  %6878 = vmatpush1.bf16.msra.mxu0 %v8166_v49  ;;  %v11496_v55 = vand.u32 4294901760, %v8408_v54  ;;  %11757 = vst [vmem:[#allocation5_spill] sm:$0xff] %v8530_v42  ;;  %v11507_v45 = vand.u32 4294901760, %v8530_v42 }
  0x5f   :  { %6880 = vmatprep.subr.bf16.mxu0 %v6879_v18  ;;  %v8457_v18 = vld [vmem:[%s11480_s0 + $0xb8] sm:$0xff] }
  0x60   :  { %v11501_v19 = vand.u32 4294901760, %v8457_v18 }
  0x61   :  { %6926 = vmatpush1.bf16.msra.mxu1 %v8251_v48  ;;  %1502 = vmatmul.mubr.f32.vlgmr.msra.gmra.mrb[2].mxu0 %v7935_v8 }
  0x62   :  { %6928 = vmatprep.subr.bf16.mxu1 %v6927_v0  ;;  %6882 = vmatpush1.bf16.msra.mxu0 %v6881_v56  ;;  %v11494_v0 = vand.u32 4294901760, %v8393_v15  ;;  %v11493_v56 = vand.u32 4294901760, %v8398_v29 }
  0x63   :  { %6884 = vmatprep.subr.bf16.mxu0 %v6883_v37  ;;  %1596 = vmatprep.mubr.f32.mxu0 %v7778_v9  ;;  %v11495_v37 = vand.u32 4294901760, %v8403_v32 }
  0x64   :  { %2045 = vmatmul.mubr.f32.vlgmr.msra.gmra.mrb[2].mxu1 %v7935_v8  ;;  %v11498_v8 = vand.u32 4294901760, %v8434_v4  ;;  %v2570_v5 = vsub.f32 %v8393_v15, %v11494_v0  ;;  %v2689_v51 = vsub.f32 %v8398_v29, %v11493_v56  ;;  %v2466_v0 = vand.u32 4294901760, %v8486_v24 }
  0x65   :  { %6930 = vmatpush1.bf16.msra.mxu1 %v6929_v25  ;;  %2139 = vmatprep.mubr.f32.mxu1 %v7778_v9  ;;  %v8491_v25 = vld [vmem:[%s11480_s0 + $0x38] sm:$0xff] }
  0x66   :  { %6932 = vmatprep.subr.bf16.mxu1 %v6931_v39  ;;  %6886 = vmatpush1.bf16.msra.mxu0 %v6885_v34  ;;  %v2676_v39 = vand.u32 4294901760, %v2675_v30  ;;  %v11515_v34 = vand.u32 4294901760, %v8447_v52  ;;  %v2577_v30 = vsub.f32 %v8408_v54, %v11496_v55  ;;  %v8519_v56 = vsub.f32 %v8434_v4, %v11498_v8 }
  0x67   :  { %6888 = vmatprep.subr.bf16.mxu0 %v8094_v3  ;;  %v2696_v3 = vsub.f32 %v8403_v32, %v11495_v37  ;;  %v2469_v37 = vand.u32 4294901760, %v8491_v25  ;;  %v11512_v55 = vand.u32 4294901760, %v8479_v41  ;;  %v8535_v8 = vsub.f32 %v8457_v18, %v11501_v19 }
  0x68   :  { %v2584_v26 = vsub.f32 %v8447_v52, %v11515_v34  ;;  %v2571_v19 = vand.u32 4294901760, %v2570_v5  ;;  %v2690_v10 = vand.u32 4294901760, %v2689_v51  ;;  %v11510_v23 = vand.u32 4294901760, %v8519_v56 }
  0x69   :  { %6934 = vmatpush1.bf16.msra.mxu1 %v6933_v43  ;;  %1598 = vmatmul.mubr.f32.vlgmr.msra.gmra.mrb[2].mxu0 %v7912_v59  ;;  %v11513_v43 = vand.u32 4294901760, %v8474_v47  ;;  %11758 = vst [vmem:[#allocation6_spill] sm:$0xff] %v8535_v8  ;;  %v2697_v20 = vand.u32 4294901760, %v2696_v3  ;;  %v8562_v44 = vsub.f32 %v8486_v24, %v2466_v0  ;;  %v8567_v28 = vsub.f32 %v8491_v25, %v2469_v37  ;;  %v2290_v25 = vld [vmem:[%s11480_s0 + $0x78] sm:$0xff] }
  0x6a   :  { %6936 = vmatprep.subr.bf16.mxu1 %v8107_v58  ;;  %6890 = vmatpush1.bf16.msra.mxu0 %v8117_v62  ;;  %v6975_v58 = vpack.c.bf16 %v2683_v40, %v2676_v39  ;;  %v2564_v62 = vand.u32 4294901760, %v2563_v2  ;;  %v11506_v38 = vand.u32 4294901760, %v8535_v8  ;;  %v2585_v51 = vand.u32 4294901760, %v2584_v26 }
  0x6b   :  { %6892 = vmatprep.subr.bf16.mxu0 %v8140_v14  ;;  %1676 = vmatprep.mubr.f32.mxu0 %v7778_v9  ;;  %v8553_v14 = vpack.c.bf16 %v2451_v46, %v2448_v57  ;;  %11759 = vst [vmem:[#allocation7_spill] sm:$0xff] %v8562_v44  ;;  %11760 = vst [vmem:[#allocation8_spill] sm:$0xff] %v8567_v28  ;;  %v2578_v57 = vand.u32 4294901760, %v2577_v30  ;;  %v6979_v46 = vpack.c.bf16 %v2697_v20, %v2690_v10 }
  0x6c   :  { %2141 = vmatmul.mubr.f32.vlgmr.msra.gmra.mrb[2].mxu1 %v7912_v59  ;;  %v8590_v5 = vpack.c.bf16 %v2457_v36, %v2454_v31  ;;  %v2598_v13 = vsub.f32 %v8519_v56, %v11510_v23  ;;  %v11504_v17 = vand.u32 4294901760, %v8567_v28  ;;  %v2724_v31 = vsub.f32 %v8535_v8, %v11506_v38 }
  0x6d   :  { %6938 = vmatpush1.bf16.msra.mxu1 %v8123_v27  ;;  %2219 = vmatprep.mubr.f32.mxu1 %v7778_v9  ;;  %v2703_v9 = vsub.f32 %v8474_v47, %v11513_v43  ;;  %v2710_v27 = vsub.f32 %v8479_v41, %v11512_v55  ;;  %v6981_v36 = vpack.c.bf16 %v2585_v51, %v2578_v57  ;;  %v2592_v20 = vand.u32 4294901760, %v2591_v12  ;;  %v8638_v51 = vld [vmem:[%s11480_s0 + $0x48] sm:$0xff] }
  0x6e   :  { %6940 = vmatprep.subr.bf16.mxu1 %v8157_v16  ;;  %6894 = vmatpush1.bf16.msra.mxu0 %v8166_v49  ;;  %v8584_v16 = vpack.c.bf16 %v2505_v7, %v2502_v6  ;;  %v6977_v49 = vpack.c.bf16 %v2571_v19, %v2564_v62  ;;  %v11505_v6 = vand.u32 4294901760, %v8562_v44  ;;  %v2599_v10 = vand.u32 4294901760, %v2598_v13 }
  0x6f   :  { %6944 = vmatprep.subr.bf16.mxu0 %v8546_v1  ;;  %v2704_v7 = vand.u32 4294901760, %v2703_v9  ;;  %v2711_v22 = vand.u32 4294901760, %v2710_v27  ;;  %v2612_v19 = vsub.f32 %v8567_v28, %v11504_v17  ;;  %v2725_v2 = vand.u32 4294901760, %v2724_v31  ;;  %v8621_v9 = vld [vmem:[%s11480_s0 + $0xc0] sm:$0xff]  ;;  %v8626_v27 = vld [vmem:[%s11480_s0 + $0xc8] sm:$0xff] }
  0x70   :  { %v2605_v26 = vsub.f32 %v8562_v44, %v11505_v6  ;;  %v2520_v57 = vand.u32 4294901760, %v8621_v9  ;;  %v11520_v13 = vand.u32 4294901760, %v8638_v51 }
  0x71   :  { %6942 = vmatpush1.bf16.msra.mxu1 %v8251_v48  ;;  %1678 = vmatmul.mubr.f32.vlgmr.msra.gmra.mrb[2].mxu0 %v7912_v59  ;;  %v2717_v48 = vsub.f32 %v8530_v42, %v11507_v45  ;;  %v6983_v39 = vpack.c.bf16 %v2711_v22, %v2704_v7  ;;  %v2613_v30 = vand.u32 4294901760, %v2612_v19 }
  0x72   :  { %6976 = vmatprep.subr.bf16.mxu1 %v6975_v58  ;;  %6946 = vmatpush3.bf16.msra.mxu0 %v8553_v14  ;;  %v2606_v3 = vand.u32 4294901760, %v2605_v26  ;;  %v8645_v7 = vsub.f32 %v8621_v9, %v2520_v57  ;;  %v8660_v31 = vsub.f32 %v8638_v51, %v11520_v13 }
  0x73   :  { %6948 = vmatprep.subr.bf16.mxu0 %v8584_v16  ;;  %v2718_v40 = vand.u32 4294901760, %v2717_v48 }
  0x74   :  { %2221 = vmatmul.mubr.f32.vlgmr.msra.gmra.mrb[2].mxu1 %v7912_v59  ;;  %v6985_v59 = vpack.c.bf16 %v2599_v10, %v2592_v20  ;;  %v6989_v62 = vpack.c.bf16 %v2613_v30, %v2606_v3  ;;  %v8670_v20 = vld [vmem:[%s11480_s0 + $0xd8] sm:$0xff]  ;;  %v11508_v10 = vand.u32 4294901760, %v8645_v7  ;;  %v11517_v3 = vand.u32 4294901760, %v8660_v31 }
  0x75   :  { %6978 = vmatpush3.bf16.msra.mxu1 %v6977_v49  ;;  %v6987_v58 = vpack.c.bf16 %v2725_v2, %v2718_v40  ;;  %v11527_v49 = vand.u32 4294901760, %v8626_v27  ;;  %v8679_v40 = vld [vmem:[%s11480_s0 + $0x50] sm:$0xff]  ;;  %v8684_v2 = vld [vmem:[%s11480_s0 + $0x58] sm:$0xff] }
  0x76   :  { %6980 = vmatprep.subr.bf16.mxu1 %v6979_v46  ;;  %6950 = vmatpush3.bf16.msra.mxu0 %v8590_v5  ;;  %v8633_v46 = vld [vmem:[%s11480_s0 + $0x40] sm:$0xff]  ;;  %v11519_v30 = vand.u32 4294901760, %v8679_v40  ;;  %v11781_v8 = vand.u32 4294901760, %v8679_v40 }
  0x77   :  { %v11521_v12 = vand.u32 4294901760, %v8633_v46  ;;  %v8650_v22 = vsub.f32 %v8626_v27, %v11527_v49  ;;  %v11774_v9 = vand.u32 4294901760, %v8633_v46 }
  0x79   :  { %6982 = vmatpush3.bf16.msra.mxu1 %v6981_v36  ;;  %11761 = vst [vmem:[#allocation9_spill] sm:$0xff] %v8650_v22  ;;  %v8655_v48 = vsub.f32 %v8633_v46, %v11521_v12  ;;  %v8665_v36 = vld [vmem:[%s11480_s0 + $0xd0] sm:$0xff]  ;;  %v11509_v26 = vand.u32 4294901760, %v8650_v22 }
  0x7a   :  { %6984 = vmatprep.subr.bf16.mxu1 %v6983_v39  ;;  %v11518_v19 = vand.u32 4294901760, %v8665_v36  ;;  %v11516_v39 = vand.u32 4294901760, %v8670_v20 }
  0x7b   :  { %v2738_v17 = vsub.f32 %v8650_v22, %v11509_v26  ;;  %v8715_v26 = vsub.f32 %v8679_v40, %v11519_v30  ;;  %v11764_v30 = vand.u32 4294901760, %v8388_v11 }
  0x7c   :  { %v8699_v6 = vsub.f32 %v8665_v36, %v11518_v19  ;;  %v8704_v38 = vsub.f32 %v8670_v20, %v11516_v39  ;;  %v11763_v19 = vand.u32 4294901760, %v8383_v63 }
  0x7d   :  { %6986 = vmatpush3.bf16.msra.mxu1 %v6985_v59  ;;  %v11514_v59 = vand.u32 4294901760, %v8655_v48  ;;  %v2739_v55 = vand.u32 4294901760, %v2738_v17  ;;  %v8739_v17 = vld [vmem:[%s11480_s0 + $0xe8] sm:$0xff] }
  0x7e   :  { %6988 = vmatprep.subr.bf16.mxu1 %v6987_v58  ;;  %v11525_v58 = vand.u32 4294901760, %v8684_v2  ;;  %v11524_v43 = vand.u32 4294901760, %v8699_v6  ;;  %v8729_v13 = vpack.c.bf16 %v11764_v30, %v11763_v19 }
  0x7f   :  { %v2619_v45 = vsub.f32 %v8655_v48, %v11514_v59  ;;  %v11523_v59 = vand.u32 4294901760, %v8704_v38 }
  0x80   :  { %v8720_v23 = vsub.f32 %v8684_v2, %v11525_v58  ;;  %6952 = vmatprep.subr.bf16.mxu0 %v8729_v13  ;;  %v8793_v58 = vld [vmem:[%s11480_s0 + $0x70] sm:$0xff] }
  0x81   :  { %6990 = vmatpush3.bf16.msra.mxu1 %v6989_v62  ;;  %v2731_v62 = vsub.f32 %v8645_v7, %v11508_v10  ;;  %v2626_v10 = vsub.f32 %v8660_v31, %v11517_v3  ;;  %v2620_v34 = vand.u32 4294901760, %v2619_v45  ;;  %v11522_v3 = vand.u32 4294901760, %v8715_v26 }
  0x82   :  { %11762 = vst [vmem:[#allocation10_spill] sm:$0xff] %v8720_v23  ;;  %v11765_v45 = vand.u32 4294901760, %v8429_v53 }
  0x83   :  { %v2732_v21 = vand.u32 4294901760, %v2731_v62  ;;  %v2627_v39 = vand.u32 4294901760, %v2626_v10  ;;  %v8734_v62 = vld [vmem:[%s11480_s0 + $0xe0] sm:$0xff]  ;;  %v11766_v10 = vand.u32 4294901760, %v8434_v4  ;;  %v2633_v53 = vsub.f32 %v8715_v26, %v11522_v3 }
  0x84   :  { %v11526_v4 = vand.u32 4294901760, %v8720_v23  ;;  %v2532_v30 = vand.u32 4294901760, %v8734_v62  ;;  %v11767_v3 = vand.u32 4294901760, %v8452_v60 }
  0x85   :  { %v6991_v12 = vpack.c.bf16 %v2739_v55, %v2732_v21  ;;  %v8745_v63 = vpack.c.bf16 %v11766_v10, %v11765_v45  ;;  %v6993_v11 = vpack.c.bf16 %v2627_v39, %v2620_v34  ;;  %v2745_v55 = vsub.f32 %v8699_v6, %v11524_v43  ;;  %v8761_v34 = vld [vmem:[%s11480_s0 + $0x60] sm:$0xff]  ;;  %v8769_v45 = vld [vmem:[%s11480_s0 + $0x68] sm:$0xff]  ;;  %v8774_v10 = vld [vmem:[%s11480_s0 + $0xf0] sm:$0xff] }
  0x86   :  { %v2752_v21 = vsub.f32 %v8704_v38, %v11523_v59  ;;  %v2640_v59 = vsub.f32 %v8720_v23, %v11526_v4  ;;  %v8788_v43 = vld [vmem:[%s11480_s0 + $0xf8] sm:$0xff]  ;;  %v2484_v4 = vand.u32 4294901760, %v8761_v34  ;;  %v2487_v49 = vand.u32 4294901760, %v8769_v45 }
  0x87   :  { %6992 = vmatprep.subr.bf16.mxu1 %v6991_v12  ;;  %6954 = vmatpush3.bf16.msra.mxu0 %v8745_v63  ;;  %v2746_v19 = vand.u32 4294901760, %v2745_v55  ;;  %v2535_v12 = vand.u32 4294901760, %v8739_v17  ;;  %v2541_v24 = vand.u32 4294901760, %v8788_v43 }
  0x88   :  { %6994 = vmatpush3.bf16.msra.mxu1 %v6993_v11  ;;  %v2753_v39 = vand.u32 4294901760, %v2752_v21  ;;  %v11768_v11 = vand.u32 4294901760, %v8457_v18  ;;  %v2634_v21 = vand.u32 4294901760, %v2633_v53  ;;  %v8799_v18 = vpack.c.bf16 %v2469_v37, %v2466_v0 }
  0x89   :  { %v8805_v53 = vsub.f32 %v8739_v17, %v2535_v12  ;;  %v11771_v17 = vand.u32 4294901760, %v8626_v27  ;;  %v8829_v37 = vsub.f32 %v8769_v45, %v2487_v49  ;;  %v11775_v27 = vand.u32 4294901760, %v8638_v51 }
  0x8a   :  { %v8780_v55 = vpack.c.bf16 %v11768_v11, %v11767_v3  ;;  %v6995_v60 = vpack.c.bf16 %v2753_v39, %v2746_v19  ;;  %11769 = vst [vmem:[#allocation11_spill] sm:$0xff] %v8799_v18  ;;  %v8802_v3 = vsub.f32 %v8734_v62, %v2532_v30  ;;  %v2641_v11 = vand.u32 4294901760, %v2640_v59 }
  0x8b   :  { %11770 = vst [vmem:[#allocation12_spill] sm:$0xff] %v8805_v53  ;;  %v2538_v19 = vand.u32 4294901760, %v8774_v10  ;;  %v2490_v59 = vand.u32 4294901760, %v8793_v58  ;;  %v8823_v39 = vpack.c.bf16 %v11771_v17, %v2520_v57  ;;  %v11773_v44 = vand.u32 4294901760, %v8805_v53 }
  0x8c   :  { %6956 = vmatprep.subr.bf16.mxu0 %v8780_v55  ;;  %6996 = vmatprep.subr.bf16.mxu1 %v6995_v60  ;;  %v11532_v0 = vand.u32 4294901760, %v8802_v3  ;;  %v6997_v62 = vpack.c.bf16 %v2641_v11, %v2634_v21  ;;  %v8826_v60 = vsub.f32 %v8761_v34, %v2484_v4  ;;  %v8841_v57 = vpack.c.bf16 %v11775_v27, %v11774_v9 }
  0x8d   :  { %6958 = vmatpush3.bf16.msra.mxu0 %v8799_v18  ;;  %11772 = vst [vmem:[#allocation13_spill] sm:$0xff] %v8823_v39  ;;  %v2766_v21 = vsub.f32 %v8805_v53, %v11773_v44  ;;  %v8844_v34 = vsub.f32 %v8774_v10, %v2538_v19  ;;  %v11540_v11 = vand.u32 4294901760, %v8829_v37  ;;  %v8850_v17 = vsub.f32 %v8788_v43, %v2541_v24 }
  0x8e   :  { %v2759_v28 = vsub.f32 %v8802_v3, %v11532_v0  ;;  %11776 = vst [vmem:[#allocation14_spill] sm:$0xff] %v8841_v57  ;;  %6998 = vmatpush3.bf16.msra.mxu1 %v6997_v62  ;;  %6960 = vmatprep.subr.bf16.mxu0 %v8823_v39  ;;  %v11537_v45 = vand.u32 4294901760, %v8826_v60  ;;  %v2493_v44 = vand.u32 4294901760, %v2290_v25  ;;  %v8855_v10 = vsub.f32 %v8793_v58, %v2490_v59 }
  0x8f   :  { %v2767_v46 = vand.u32 4294901760, %v2766_v21  ;;  %v2654_v9 = vsub.f32 %v8829_v37, %v11540_v11  ;;  %v11777_v43 = vand.u32 4294901760, %v8665_v36  ;;  %v11545_v27 = vand.u32 4294901760, %v8850_v17 }
  0x90   :  { %v2760_v0 = vand.u32 4294901760, %v2759_v28  ;;  %v2647_v62 = vsub.f32 %v8826_v60, %v11537_v45  ;;  %v11778_v28 = vand.u32 4294901760, %v8670_v20  ;;  %v11780_v58 = vand.u32 4294901760, %v8844_v34 }
  0x91   :  { %6962 = vmatpush3.bf16.msra.mxu0 %v8841_v57  ;;  %v11782_v45 = vand.u32 4294901760, %v8684_v2  ;;  %v11544_v11 = vand.u32 4294901760, %v8855_v10  ;;  %v2655_v39 = vand.u32 4294901760, %v2654_v9  ;;  %v2780_v20 = vsub.f32 %v8850_v17, %v11545_v27 }
  0x92   :  { %v8867_v21 = vpack.c.bf16 %v11778_v28, %v11777_v43  ;;  %v6999_v51 = vpack.c.bf16 %v2767_v46, %v2760_v0  ;;  %v2773_v57 = vsub.f32 %v8844_v34, %v11780_v58  ;;  %v2648_v36 = vand.u32 4294901760, %v2647_v62 }
  0x93   :  { %v8877_v42 = vpack.c.bf16 %v11782_v45, %v11781_v8  ;;  %v8884_v0 = vsub.f32 %v2290_v25, %v2493_v44  ;;  %v2661_v8 = vsub.f32 %v8855_v10, %v11544_v11  ;;  %v8890_v40 = vpack.c.bf16 %v2535_v12, %v2532_v30 }
  0x94   :  { %11779 = vst [vmem:[#allocation15_spill] sm:$0xff] %v8867_v21  ;;  %6964 = vmatprep.subr.bf16.mxu0 %v8867_v21  ;;  %7000 = vmatprep.subr.bf16.mxu1 %v6999_v51  ;;  %v2774_v46 = vand.u32 4294901760, %v2773_v57  ;;  %v7001_v2 = vpack.c.bf16 %v2655_v39, %v2648_v36  ;;  %v2781_v45 = vand.u32 4294901760, %v2780_v20  ;;  %v8894_v9 = vpack.c.bf16 %v2487_v49, %v2484_v4  ;;  %v2227_v36 = vld [vmem:[%s11482_s2] sm:$0xff]  ;;  %v9038_v4 = vld [vmem:[%s11480_s0 + $0x170] sm:$0xff] }
  0x95   :  { %11783 = vst [vmem:[#allocation16_spill] sm:$0xff] %v8877_v42  ;;  %6966 = vmatpush3.bf16.msra.mxu0 %v8877_v42  ;;  %11784 = vst [vmem:[#allocation17_spill] sm:$0xff] %v8890_v40  ;;  %v11543_v62 = vand.u32 4294901760, %v8884_v0  ;;  %v2662_v51 = vand.u32 4294901760, %v2661_v8  ;;  %v8900_v12 = vpack.c.bf16 %v2541_v24, %v2538_v19  ;;  %v8903_v43 = vpack.c.bf16 %v2493_v44, %v2490_v59  ;;  %v8988_v59 = vld [vmem:[%s11480_s0 + $0x1e0] sm:$0xff]  ;;  %v8993_v24 = vld [vmem:[%s11480_s0 + $0x1e8] sm:$0xff] }
  0x96   :  { %6968 = vmatprep.subr.bf16.mxu0 %v8890_v40  ;;  %11785 = vst [vmem:[#allocation18_spill] sm:$0xff] %v8894_v9  ;;  %7002 = vmatpush3.bf16.msra.mxu1 %v7001_v2  ;;  %v7003_v25 = vpack.c.bf16 %v2781_v45, %v2774_v46  ;;  %v7007_v49 = vpack.c.bf16 %v8343_v50, %v8338_v33  ;;  %v7779_v20 = vmov 1983009808   ;;  %v2242_v8 = vlaneseq  ;;  %v9004_v19 = vld [vmem:[%s11480_s0 + $0x168] sm:$0xff]  ;;  %11808 = vst [vmem:[#allocation29_spill] sm:$0xff] %v9038_v4 }
  0x97   :  { %v2668_v57 = vsub.f32 %v8884_v0, %v11543_v62  ;;  %11786 = vst [vmem:[#allocation19_spill] sm:$0xff] %v8900_v12  ;;  %11787 = vst [vmem:[#allocation20_spill] sm:$0xff] %v8903_v43  ;;  %v2240_v46 = vunpack.c.l.s4 %v7779_v20  ;;  %v11807_v44 = vpack.c.bf16 %v8650_v22, %v8645_v7 }
  0x98   :  { %7004 = vmatprep.subr.bf16.mxu1 %v7003_v25  ;;  %v2243_v45 = vshrl.u32 %v2242_v8, 7  ;;  %11801 = vst [vmem:[#allocation24_spill] sm:$0xff] %v9004_v19 }
  0x99   :  { %6970 = vmatpush3.bf16.msra.mxu0 %v8894_v9  ;;  %v2669_v30 = vand.u32 4294901760, %v2668_v57  ;;  %v2241_v2 = vunpack.c.0.s8 %v2240_v46 }
  0x9a   :  { %6972 = vmatprep.subr.bf16.mxu0 %v8900_v12 }
  0x9b   :  { %v7005_v39 = vpack.c.bf16 %v2669_v30, %v2662_v51  ;;  %v8925_v57 = vsub.s32 %v2241_v2, %v2243_v45 }
  0x9d   :  { %7006 = vmatpush3.bf16.msra.mxu1 %v7005_v39  ;;  %6974 = vmatpush3.bf16.msra.mxu0 %v8903_v43 }
  0x9e   :  { %7040 = vmatprep.subr.bf16.mxu1 %v8546_v1  ;;  %7008 = vmatprep.subr.bf16.mxu0 %v7007_v49 }
 0x114   :  { %v593_v25 = vpop.f32.mrb[0].mxu0 }
 0x115   :  { %v595_v51 = vpop.f32.mrb[1].mxu0 }
 0x116   :  { %v2237_v30 = vcombine.low %v593_v25, %v595_v51 }
 0x117   :  { %v1136_v39 = vpop.f32.mrb[0].mxu1 }
 0x118   :  { %v1138_v49 = vpop.f32.mrb[1].mxu1  ;;  %v2245_v62 = vrot.slane %v2237_v30, %v8925_v57 }
 0x119   :  { %v2238_v11 = vcombine.low %v1136_v39, %v1138_v49  ;;  %v7009_v49 = vpack.c.bf16 %v8393_v15, %v8377_v61 }
 0x11b   :  { %v2252_v27 = vrot.slane %v2238_v11, %v8925_v57 }
 0x11d   :  { %v2253_v20 = vcombine.low %v2245_v62, %v2252_v27 }
 0x11f   :  { %v2273_v58 = vmul.f32 %v2253_v20, %v2227_v36 }
 0x121   :  { %v2405_v46 = vcombine.high %v2273_v58, %v2273_v58  ;;  %v2412_v8 = vrot.slane %v2273_v58, %v8925_v57 }
 0x123   :  { %v8934_v2 = vrot.slane %v2405_v46, %v8925_v57  ;;  %v2420_v45 = vcombine.high %v2412_v8, %v2412_v8  ;;  %v8936_v25 = vand.u32 4294901760, %v2412_v8  ;;  %v7011_v46 = vpack.c.bf16 %v8403_v32, %v8398_v29 }
 0x125   :  { %11788 = vst [vmem:[#allocation21_spill] sm:$0xff] %v8934_v2  ;;  %11789 = vst [vmem:[#allocation22_spill] sm:$0xff] %v8936_v25  ;;  %v8938_v51 = vand.u32 4294901760, %v2420_v45  ;;  %v8941_v30 = vsub.f32 %v2412_v8, %v8936_v25  ;;  %v7013_v8 = vpack.c.bf16 %v8447_v52, %v8408_v54 }
 0x127   :  { %2784 = vmatprep.mubr.f32.mxu1 %v8938_v51  ;;  %v2544_v11 = vsub.f32 %v2420_v45, %v8938_v51  ;;  %v11546_v27 = vand.u32 4294901760, %v8941_v30  ;;  %v7015_v45 = vpack.c.bf16 %v8479_v41, %v8474_v47 }
 0x128   :  { %2786 = vmatmul.mubr.f32.vlgmr.msra.gmra.mrb[4].mxu1 %v8936_v25 }
 0x129   :  { %7042 = vmatpush3.bf16.msra.mxu1 %v8553_v14  ;;  %v2545_v62 = vand.u32 4294901760, %v2544_v11  ;;  %v2552_v58 = vsub.f32 %v8941_v30, %v11546_v27 }
 0x12a   :  { %7044 = vmatprep.subr.bf16.mxu1 %v8584_v16 }
 0x12b   :  { %3028 = vmatprep.mubr.f32.mxu1 %v2545_v62  ;;  %v2546_v36 = vsub.f32 %v2544_v11, %v2545_v62  ;;  %v2553_v20 = vand.u32 4294901760, %v2552_v58  ;;  %v7017_v62 = vpack.c.bf16 %v8519_v56, %v8514_v35  ;;  %v11790_v58 = vld [vmem:[#allocation13_spill] sm:$0xff] }
 0x12d   :  { %7046 = vmatpush3.bf16.msra.mxu1 %v8590_v5  ;;  %v2547_v39 = vand.u32 4294901760, %v2546_v36  ;;  %v11791_v36 = vld [vmem:[#allocation5_spill] sm:$0xff] }
 0x12e   :  { %7048 = vmatprep.subr.bf16.mxu1 %v8729_v13 }
 0x12f   :  { %2548 = vmatprep.mubr.f32.mxu0 %v2547_v39  ;;  %v11792_v39 = vld [vmem:[#allocation6_spill] sm:$0xff] }
 0x130   :  { %2554 = vmatmul.mubr.f32.vlgmr.msra.gmra.mrb[4].mxu0 %v2553_v20  ;;  %v8978_v20 = vld [vmem:[%s11480_s0 + $0x158] sm:$0xff] }
 0x131   :  { %7010 = vmatpush3.bf16.msra.mxu0 %v7009_v49  ;;  %7050 = vmatpush3.bf16.msra.mxu1 %v8745_v63  ;;  %v7019_v49 = vpack.c.bf16 %v11792_v39, %v11791_v36  ;;  %11794 = vst [vmem:[#allocation6_spill] sm:$0xff] %v8978_v20  ;;  %v11803_v25 = vand.u32 4294901760, %v8978_v20 }
 0x132   :  { %2921 = vmatprep.mubr.f32.mxu0 %v2544_v11  ;;  %7012 = vmatprep.subr.bf16.mxu0 %v7011_v46  ;;  %v8973_v11 = vld [vmem:[%s11480_s0 + $0x150] sm:$0xff] }
 0x133   :  { %7052 = vmatprep.subr.bf16.mxu1 %v8780_v55  ;;  %11793 = vst [vmem:[#allocation5_spill] sm:$0xff] %v8973_v11  ;;  %v11795_v46 = vld [vmem:[#allocation14_spill] sm:$0xff]  ;;  %v11551_v27 = vand.u32 4294901760, %v8973_v11  ;;  %v9017_v2 = vsub.f32 %v8978_v20, %v11803_v25  ;;  %v9043_v20 = vld [vmem:[%s11480_s0 + $0x178] sm:$0xff]  ;;  %v11811_v25 = vand.u32 4294901760, %v8993_v24 }
 0x134   :  { %11809 = vst [vmem:[#allocation30_spill] sm:$0xff] %v9043_v20 }
 0x135   :  { %7014 = vmatpush3.bf16.msra.mxu0 %v7013_v8  ;;  %7054 = vmatpush3.bf16.msra.mxu1 %v8799_v18  ;;  %v11796_v8 = vld [vmem:[#allocation7_spill] sm:$0xff]  ;;  %11804 = vst [vmem:[#allocation26_spill] sm:$0xff] %v9017_v2 }
 0x136   :  { %7016 = vmatprep.subr.bf16.mxu0 %v7015_v45  ;;  %7056 = vmatprep.subr.bf16.mxu1 %v11790_v58  ;;  %v11797_v45 = vld [vmem:[#allocation8_spill] sm:$0xff]  ;;  %11798 = vst [vmem:[#allocation7_spill] sm:$0xff] %v8988_v59  ;;  %v11812_v58 = vpack.c.bf16 %v8660_v31, %v8655_v48 }
 0x137   :  { %v7021_v28 = vpack.c.bf16 %v11797_v45, %v11796_v8  ;;  %11799 = vst [vmem:[#allocation8_spill] sm:$0xff] %v8993_v24 }
 0x139   :  { %7018 = vmatpush3.bf16.msra.mxu0 %v7017_v62  ;;  %7058 = vmatpush3.bf16.msra.mxu1 %v11795_v46  ;;  %v8999_v62 = vld [vmem:[%s11480_s0 + $0x160] sm:$0xff] }
 0x13a   :  { %7020 = vmatprep.subr.bf16.mxu0 %v7019_v49  ;;  %7060 = vmatprep.subr.bf16.mxu1 %v8867_v21  ;;  %11800 = vst [vmem:[#allocation23_spill] sm:$0xff] %v8999_v62  ;;  %v9012_v49 = vsub.f32 %v8973_v11, %v11551_v27  ;;  %v9022_v21 = vld [vmem:[%s11480_s0 + $0x1f0] sm:$0xff]  ;;  %v11810_v11 = vand.u32 4294901760, %v8988_v59  ;;  %v9082_v46 = vld [vmem:[%s11480_s0 + $0x100] sm:$0xff] }
 0x13b   :  { %11805 = vst [vmem:[#allocation27_spill] sm:$0xff] %v9022_v21 }
 0x13c   :  { %11802 = vst [vmem:[#allocation25_spill] sm:$0xff] %v9012_v49  ;;  %v9053_v27 = vsub.f32 %v8988_v59, %v11810_v11  ;;  %v11566_v18 = vand.u32 4294901760, %v9012_v49  ;;  %v11814_v59 = vand.u32 4294901760, %v8999_v62 }
 0x13d   :  { %7022 = vmatpush3.bf16.msra.mxu0 %v7021_v28  ;;  %7062 = vmatpush3.bf16.msra.mxu1 %v8877_v42  ;;  %v9027_v28 = vld [vmem:[%s11480_s0 + $0x1f8] sm:$0xff]  ;;  %v11815_v42 = vand.u32 4294901760, %v9004_v19 }
 0x13e   :  { %11806 = vst [vmem:[#allocation28_spill] sm:$0xff] %v9027_v28  ;;  %7024 = vmatprep.subr.bf16.mxu0 %v11807_v44  ;;  %7064 = vmatprep.subr.bf16.mxu1 %v8890_v40  ;;  %v9048_v44 = vld [vmem:[%s11480_s0 + $0x180] sm:$0xff]  ;;  %v9058_v40 = vsub.f32 %v8993_v24, %v11811_v25  ;;  %v11813_v25 = vpack.c.bf16 %v8704_v38, %v8699_v6  ;;  %v11816_v24 = vand.u32 4294901760, %v9017_v2  ;;  %v11819_v11 = vand.u32 4294901760, %v9027_v28 }
 0x13f   :  { %v9087_v22 = vsub.f32 %v8999_v62, %v11814_v59 }
 0x140   :  { %v9116_v2 = vsub.f32 %v9027_v28, %v11819_v11 }
 0x141   :  { %7026 = vmatpush3.bf16.msra.mxu0 %v11812_v58  ;;  %7066 = vmatpush3.bf16.msra.mxu1 %v8894_v9  ;;  %v9077_v58 = vld [vmem:[%s11480_s0 + $0x188] sm:$0xff]  ;;  %v11577_v59 = vand.u32 4294901760, %v9087_v22 }
 0x142   :  { %7028 = vmatprep.subr.bf16.mxu0 %v11813_v25  ;;  %7068 = vmatprep.subr.bf16.mxu1 %v8900_v12  ;;  %v9092_v25 = vsub.f32 %v9004_v19, %v11815_v42  ;;  %v9099_v12 = vpack.c.bf16 %v11816_v24, %v11566_v18  ;;  %v9104_v9 = vld [vmem:[%s11480_s0 + $0x108] sm:$0xff]  ;;  %v11818_v42 = vand.u32 4294901760, %v9022_v21  ;;  %v11820_v18 = vpack.c.bf16 %v8720_v23, %v8715_v26 }
 0x144   :  { %11817 = vst [vmem:[#allocation31_spill] sm:$0xff] %v9099_v12  ;;  %v9111_v19 = vsub.f32 %v9022_v21, %v11818_v42  ;;  %v1679_v24 = vpop.f32.mrb[2].mxu0  ;;  %v11821_v12 = vand.u32 4294901760, %v9038_v4  ;;  %v11823_v21 = vand.u32 4294901760, %v9043_v20  ;;  %v11576_v62 = vand.u32 4294901760, %v9092_v25 }
 0x145   :  { %7030 = vmatpush3.bf16.msra.mxu0 %v11820_v18  ;;  %7070 = vmatpush3.bf16.msra.mxu1 %v8903_v43  ;;  %v1681_v28 = vpop.f32.mrb[3].mxu0  ;;  %v11825_v18 = vpack.c.bf16 %v8805_v53, %v8802_v3 }
 0x146   :  { %v9127_v42 = vsub.f32 %v9038_v4, %v11821_v12  ;;  %v9132_v11 = vsub.f32 %v9043_v20, %v11823_v21  ;;  %7104 = vmatprep.subr.bf16.mxu1 %v8546_v1  ;;  %v2254_v49 = vcombine.low %v1679_v24, %v1681_v28  ;;  %v11826_v12 = vand.u32 4294901760, %v9053_v27  ;;  %v9156_v28 = vld [vmem:[%s11480_s0 + $0x190] sm:$0xff] }
 0x147   :  { %7032 = vmatprep.subr.bf16.mxu0 %v11825_v18  ;;  %v11827_v4 = vand.u32 4294901760, %v9058_v40  ;;  %v11829_v21 = vand.u32 4294901760, %v8338_v33  ;;  %v11830_v20 = vand.u32 4294901760, %v8343_v50  ;;  %v2222_v53 = vpop.f32.mrb[2].mxu1  ;;  %v11831_v1 = vand.u32 4294901760, %v8941_v30 }
 0x148   :  { %11822 = vst [vmem:[#allocation32_spill] sm:$0xff] %v9127_v42  ;;  %11824 = vst [vmem:[#allocation33_spill] sm:$0xff] %v9132_v11  ;;  %v2262_v33 = vrot.slane %v2254_v49, %v8925_v57  ;;  %v9165_v50 = vpack.c.bf16 %v11576_v62, %v11577_v59  ;;  %v9179_v49 = vld [vmem:[%s11480_s0 + $0x198] sm:$0xff]  ;;  %v11841_v18 = vand.u32 4294901760, %v9111_v19 }
 0x149   :  { %v9144_v43 = vpack.c.bf16 %v11827_v4, %v11826_v12  ;;  %v7071_v23 = vpack.c.bf16 %v11830_v20, %v11829_v21  ;;  %3032 = vmatmul.mubr.f32.vlgmr.msra.gmra.mrb[6].mxu1 %v11831_v1  ;;  %v2224_v12 = vpop.f32.mrb[3].mxu1  ;;  %v11833_v20 = vpack.c.bf16 %v8829_v37, %v8826_v60  ;;  %v11834_v21 = vand.u32 4294901760, %v9048_v44 }
 0x14a   :  { %11832 = vst [vmem:[#allocation35_spill] sm:$0xff] %v9165_v50  ;;  %7106 = vmatpush3.bf16.msra.mxu1 %v8553_v14  ;;  %v2255_v59 = vcombine.low %v2222_v53, %v2224_v12  ;;  %3302 = vmatprep.mubr.f32.mxu1 %v8938_v51  ;;  %v11836_v14 = vpack.c.bf16 %v8850_v17, %v8844_v34  ;;  %v11839_v4 = vand.u32 4294901760, %v9082_v46  ;;  %v11842_v53 = vand.u32 4294901760, %v9116_v2 }
 0x14b   :  { %11828 = vst [vmem:[#allocation34_spill] sm:$0xff] %v9144_v43  ;;  %7034 = vmatpush3.bf16.msra.mxu0 %v11833_v20  ;;  %v9174_v1 = vsub.f32 %v9048_v44, %v11834_v21  ;;  %v11837_v20 = vand.u32 4294901760, %v9077_v58  ;;  %7108 = vmatprep.subr.bf16.mxu1 %v8584_v16  ;;  %v11846_v43 = vand.u32 4294901760, %v9127_v42 }
 0x14c   :  { %7036 = vmatprep.subr.bf16.mxu0 %v11836_v14  ;;  %v9195_v24 = vsub.f32 %v9082_v46, %v11839_v4  ;;  %v9201_v12 = vpack.c.bf16 %v11842_v53, %v11841_v18  ;;  %v11844_v14 = vand.u32 4294901760, %v9104_v9  ;;  %v9213_v4 = vld [vmem:[%s11480_s0 + $0x110] sm:$0xff]  ;;  %v2269_v50 = vrot.slane %v2255_v59, %v8925_v57 }
 0x14d   :  { %11835 = vst [vmem:[#allocation36_spill] sm:$0xff] %v9174_v1  ;;  %v9190_v21 = vsub.f32 %v9077_v58, %v11837_v20  ;;  %v11847_v18 = vand.u32 4294901760, %v9132_v11  ;;  %v11849_v20 = vpack.c.bf16 %v8884_v0, %v8855_v10  ;;  %v11850_v59 = vand.u32 4294901760, %v8377_v61 }
 0x14e   :  { %11840 = vst [vmem:[#allocation38_spill] sm:$0xff] %v9195_v24  ;;  %11843 = vst [vmem:[#allocation39_spill] sm:$0xff] %v9201_v12  ;;  %v9207_v62 = vsub.f32 %v9104_v9, %v11844_v14  ;;  %v2228_v14 = vld [vmem:[%s11482_s2 + $0x8] sm:$0xff]  ;;  %7110 = vmatpush3.bf16.msra.mxu1 %v8590_v5  ;;  %v11851_v12 = vand.u32 4294901760, %v8393_v15  ;;  %v2270_v11 = vcombine.low %v2262_v33, %v2269_v50  ;;  %v11586_v5 = vand.u32 4294901760, %v9213_v4 }
 0x14f   :  { %11838 = vst [vmem:[#allocation37_spill] sm:$0xff] %v9190_v21  ;;  %v9220_v53 = vpack.c.bf16 %v11847_v18, %v11846_v43  ;;  %7038 = vmatpush3.bf16.msra.mxu0 %v11849_v20  ;;  %7112 = vmatprep.subr.bf16.mxu1 %v8729_v13  ;;  %v11852_v43 = vand.u32 4294901760, %v8398_v29  ;;  %v11853_v18 = vand.u32 4294901760, %v8403_v32  ;;  %v11583_v20 = vand.u32 4294901760, %v9190_v21  ;;  %v9252_v29 = vld [vmem:[%s11480_s0 + $0x118] sm:$0xff] }
 0x150   :  { %11845 = vst [vmem:[#allocation40_spill] sm:$0xff] %v9207_v62  ;;  %v7073_v42 = vpack.c.bf16 %v11851_v12, %v11850_v59  ;;  %7072 = vmatprep.subr.bf16.mxu0 %v7071_v23  ;;  %v11582_v61 = vand.u32 4294901760, %v9195_v24  ;;  %v11584_v15 = vand.u32 4294901760, %v9207_v62  ;;  %v11854_v33 = vand.u32 4294901760, %v9156_v28 }
 0x151   :  { %11848 = vst [vmem:[#allocation41_spill] sm:$0xff] %v9220_v53  ;;  %v7075_v16 = vpack.c.bf16 %v11853_v18, %v11852_v43  ;;  %v11585_v53 = vand.u32 4294901760, %v9174_v1  ;;  %v2274_v32 = vmul.f32 %v2270_v11, %v2228_v14  ;;  %v11856_v13 = vand.u32 4294901760, %v8408_v54  ;;  %v9272_v54 = vld [vmem:[%s11480_s0 + $0x1a0] sm:$0xff] }
 0x152   :  { %v9247_v23 = vsub.f32 %v9156_v28, %v11854_v33  ;;  %2924 = vmatmul.mubr.f32.vlgmr.msra.gmra.mrb[6].mxu0 %v8941_v30  ;;  %v11857_v50 = vand.u32 4294901760, %v8447_v52  ;;  %v11858_v59 = vand.u32 4294901760, %v9179_v49  ;;  %v11860_v18 = vand.u32 4294901760, %v8474_v47  ;;  %v9277_v52 = vld [vmem:[%s11480_s0 + $0x1a8] sm:$0xff]  ;;  %7114 = vmatpush3.bf16.msra.mxu1 %v8745_v63 }
 0x153   :  { %7074 = vmatpush3.bf16.msra.mxu0 %v7073_v42  ;;  %3198 = vmatprep.mubr.f32.mxu0 %v8938_v51  ;;  %v11861_v33 = vand.u32 4294901760, %v8479_v41  ;;  %v2422_v30 = vcombine.high %v2274_v32, %v2274_v32  ;;  %v9280_v42 = vrot.slane %v2274_v32, %v8925_v57  ;;  %v3537_v47 = vsub.f32 %v9174_v1, %v11585_v53 }
 0x154   :  { %11855 = vst [vmem:[#allocation42_spill] sm:$0xff] %v9247_v23  ;;  %v7077_v12 = vpack.c.bf16 %v11857_v50, %v11856_v13  ;;  %v9262_v43 = vsub.f32 %v9179_v49, %v11858_v59  ;;  %7076 = vmatprep.subr.bf16.mxu0 %v7075_v16  ;;  %v3544_v41 = vsub.f32 %v9190_v21, %v11583_v20  ;;  %v11589_v51 = vand.u32 4294901760, %v9252_v29 }
 0x155   :  { %v7079_v11 = vpack.c.bf16 %v11861_v33, %v11860_v18  ;;  %11862 = vst [vmem:[#allocation44_spill] sm:$0xff] %v9280_v42  ;;  %v9293_v14 = vsub.f32 %v9213_v4, %v11586_v5  ;;  %7116 = vmatprep.subr.bf16.mxu1 %v8780_v55  ;;  %v3425_v63 = vsub.f32 %v9195_v24, %v11582_v61  ;;  %v11588_v32 = vand.u32 4294901760, %v9247_v23 }
 0x156   :  { %11859 = vst [vmem:[#allocation43_spill] sm:$0xff] %v9262_v43  ;;  %v3432_v16 = vsub.f32 %v9207_v62, %v11584_v15  ;;  %v9304_v13 = vrot.slane %v2422_v30, %v8925_v57  ;;  %v11865_v50 = vand.u32 4294901760, %v8514_v35  ;;  %v11866_v59 = vand.u32 4294901760, %v8519_v56 }
 0x157   :  { %11863 = vst [vmem:[#allocation45_spill] sm:$0xff] %v9293_v14  ;;  %v11587_v55 = vand.u32 4294901760, %v9262_v43  ;;  %7078 = vmatpush3.bf16.msra.mxu0 %v7077_v12  ;;  %v11867_v20 = vand.u32 4294901760, %v11791_v36  ;;  %v11868_v15 = vand.u32 4294901760, %v11792_v39  ;;  %v11869_v57 = vand.u32 4294901760, %v11796_v8  ;;  %v9334_v36 = vld [vmem:[%s11480_s0 + $0x120] sm:$0xff] }
 0x158   :  { %11864 = vst [vmem:[#allocation46_spill] sm:$0xff] %v9304_v13  ;;  %v7081_v18 = vpack.c.bf16 %v11866_v59, %v11865_v50  ;;  %v11870_v30 = vand.u32 4294901760, %v11797_v45  ;;  %v11871_v56 = vand.u32 4294901760, %v8645_v7  ;;  %v11872_v50 = vld [vmem:[#allocation9_spill] sm:$0xff]  ;;  %v11874_v33 = vand.u32 4294901760, %v8655_v48  ;;  %v11876_v39 = vld [vmem:[#allocation11_spill] sm:$0xff]  ;;  %7080 = vmatprep.subr.bf16.mxu0 %v7079_v11 }
 0x159   :  { %v7083_v53 = vpack.c.bf16 %v11868_v15, %v11867_v20  ;;  %v11873_v59 = vand.u32 4294901760, %v11872_v50  ;;  %v11875_v61 = vand.u32 4294901760, %v8660_v31  ;;  %7118 = vmatpush3.bf16.msra.mxu1 %v11876_v39  ;;  %v3538_v8 = vand.u32 4294901760, %v3537_v47  ;;  %v9346_v31 = vld [vmem:[%s11480_s0 + $0x128] sm:$0xff]  ;;  %v9351_v20 = vld [vmem:[%s11480_s0 + $0x1b0] sm:$0xff] }
 0x15a   :  { %v7085_v35 = vpack.c.bf16 %v11870_v30, %v11869_v57  ;;  %v3545_v45 = vand.u32 4294901760, %v3544_v41  ;;  %v11590_v7 = vand.u32 4294901760, %v9293_v14  ;;  %v9341_v48 = vsub.f32 %v9252_v29, %v11589_v51  ;;  %v11886_v39 = vld [vmem:[#allocation10_spill] sm:$0xff] }
 0x15b   :  { %v7087_v5 = vpack.c.bf16 %v11873_v59, %v11871_v56  ;;  %v9329_v12 = vpack.c.bf16 %v11875_v61, %v11874_v33  ;;  %v11878_v61 = vld [vmem:[#allocation13_spill] sm:$0xff]  ;;  %v11879_v15 = vand.u32 4294901760, %v8699_v6  ;;  %v11880_v11 = vand.u32 4294901760, %v8704_v38  ;;  %7082 = vmatpush3.bf16.msra.mxu0 %v7081_v18 }
 0x15c   :  { %11877 = vst [vmem:[#allocation9_spill] sm:$0xff] %v9341_v48  ;;  %7120 = vmatprep.subr.bf16.mxu1 %v11878_v61  ;;  %v3426_v41 = vand.u32 4294901760, %v3425_v63  ;;  %v3433_v33 = vand.u32 4294901760, %v3432_v16  ;;  %v3551_v57 = vsub.f32 %v9247_v23, %v11588_v32  ;;  %v3558_v30 = vsub.f32 %v9262_v43, %v11587_v55  ;;  %v9378_v16 = vld [vmem:[%s11480_s0 + $0x1b8] sm:$0xff]  ;;  %v11891_v63 = vld [vmem:[#allocation14_spill] sm:$0xff]  ;;  %7084 = vmatprep.subr.bf16.mxu0 %v7083_v53  ;;  %v11895_v53 = vld [vmem:[#allocation21_spill] sm:$0xff] }
 0x15d   :  { %v7091_v47 = vpack.c.bf16 %v11880_v11, %v11879_v15  ;;  %v11881_v56 = vand.u32 4294901760, %v9272_v54  ;;  %v11883_v6 = vand.u32 4294901760, %v9277_v52  ;;  %v11885_v59 = vand.u32 4294901760, %v8715_v26  ;;  %7122 = vmatpush3.bf16.msra.mxu1 %v11891_v63  ;;  %v9423_v63 = vld [vmem:[%s11480_s0 + $0x138] sm:$0xff] }
 0x15e   :  { %v11887_v61 = vand.u32 4294901760, %v11886_v39  ;;  %v11888_v11 = vand.u32 4294901760, %v8802_v3  ;;  %v11592_v32 = vand.u32 4294901760, %v9346_v31  ;;  %v11591_v51 = vand.u32 4294901760, %v9351_v20  ;;  %v11914_v43 = vld [vmem:[#allocation19_spill] sm:$0xff] }
 0x15f   :  { %v9367_v50 = vsub.f32 %v9272_v54, %v11881_v56  ;;  %v9372_v38 = vsub.f32 %v9277_v52, %v11883_v6  ;;  %v11889_v56 = vld [vmem:[#allocation12_spill] sm:$0xff]  ;;  %v9395_v18 = vpack.c.bf16 %v3545_v45, %v3538_v8  ;;  %v11892_v26 = vand.u32 4294901760, %v8826_v60  ;;  %7086 = vmatpush3.bf16.msra.mxu0 %v7085_v35 }
 0x160   :  { %v9384_v15 = vpack.c.bf16 %v11887_v61, %v11885_v59  ;;  %v11890_v55 = vand.u32 4294901760, %v11889_v56  ;;  %v11893_v59 = vand.u32 4294901760, %v8829_v37  ;;  %v9406_v3 = vsub.f32 %v9293_v14, %v11590_v7  ;;  %v11894_v61 = vld [vmem:[#allocation15_spill] sm:$0xff]  ;;  %7088 = vmatprep.subr.bf16.mxu0 %v7087_v5  ;;  %v11906_v5 = vld [vmem:[#allocation17_spill] sm:$0xff] }
 0x161   :  { %11882 = vst [vmem:[#allocation11_spill] sm:$0xff] %v9367_v50  ;;  %11884 = vst [vmem:[#allocation13_spill] sm:$0xff] %v9372_v38  ;;  %7124 = vmatprep.subr.bf16.mxu1 %v11894_v61  ;;  %v2421_v8 = vcombine.high %v11895_v53, %v11895_v53  ;;  %v3552_v45 = vand.u32 4294901760, %v3551_v57  ;;  %v9418_v37 = vld [vmem:[%s11480_s0 + $0x130] sm:$0xff]  ;;  %v3559_v56 = vand.u32 4294901760, %v3558_v30  ;;  %v9440_v61 = vld [vmem:[%s11480_s0 + $0x1c8] sm:$0xff]  ;;  %v9462_v35 = vsub.f32 %v9351_v20, %v11591_v51 }
 0x162   :  { %v9390_v6 = vpack.c.bf16 %v11890_v55, %v11888_v11  ;;  %v9401_v39 = vpack.c.bf16 %v11893_v59, %v11892_v26  ;;  %v9410_v11 = vpack.c.bf16 %v3433_v33, %v3426_v41  ;;  %v11896_v26 = vand.u32 4294901760, %v9334_v36  ;;  %v9435_v59 = vld [vmem:[%s11480_s0 + $0x1c0] sm:$0xff] }
 0x163   :  { %v11898_v30 = vand.u32 4294901760, %v8844_v34  ;;  %v11899_v7 = vand.u32 4294901760, %v8850_v17  ;;  %v11901_v41 = vand.u32 4294901760, %v8884_v0  ;;  %v9457_v55 = vsub.f32 %v9346_v31, %v11592_v32  ;;  %11903 = vst [vmem:[#allocation14_spill] sm:$0xff] %v9462_v35  ;;  %v11904_v34 = vld [vmem:[#allocation16_spill] sm:$0xff]  ;;  %7090 = vmatpush3.bf16.msra.mxu0 %v9329_v12 }
 0x164   :  { %v9430_v57 = vsub.f32 %v9334_v36, %v11896_v26  ;;  %v11900_v26 = vand.u32 4294901760, %v8855_v10  ;;  %7126 = vmatpush3.bf16.msra.mxu1 %v11904_v34  ;;  %v3440_v17 = vand.u32 4294901760, %v9406_v3  ;;  %v11905_v10 = vand.u32 4294901760, %v9341_v48  ;;  %7092 = vmatprep.subr.bf16.mxu0 %v7091_v47 }
 0x165   :  { %v9446_v33 = vpack.c.bf16 %v11899_v7, %v11898_v30  ;;  %11902 = vst [vmem:[#allocation12_spill] sm:$0xff] %v9457_v55  ;;  %v9474_v30 = vld [vmem:[%s11480_s0 + $0x140] sm:$0xff]  ;;  %7128 = vmatprep.subr.bf16.mxu1 %v11906_v5  ;;  %v9482_v3 = vand.u32 4294901760, %v2421_v8  ;;  %v11907_v34 = vand.u32 4294901760, %v9378_v16  ;;  %v9499_v5 = vld [vmem:[%s11480_s0 + $0x1d8] sm:$0xff]  ;;  %v7171_v7 = vpack.c.bf16 %v3559_v56, %v3552_v45  ;;  %v11910_v56 = vld [vmem:[#allocation18_spill] sm:$0xff] }
 0x166   :  { %11897 = vst [vmem:[#allocation10_spill] sm:$0xff] %v9430_v57  ;;  %v9452_v60 = vpack.c.bf16 %v11901_v41, %v11900_v26  ;;  %v3446_v0 = vsub.f32 %v9341_v48, %v11905_v10  ;;  %v9479_v26 = vld [vmem:[%s11480_s0 + $0x148] sm:$0xff]  ;;  %v9494_v41 = vld [vmem:[%s11480_s0 + $0x1d0] sm:$0xff]  ;;  %v11908_v13 = vand.u32 4294901760, %v9367_v50  ;;  %v11909_v42 = vand.u32 4294901760, %v9372_v38 }
 0x167   :  { %v9487_v10 = vsub.f32 %v9378_v16, %v11907_v34  ;;  %v9528_v45 = vsub.f32 %v2421_v8, %v9482_v3  ;;  %v11917_v32 = vand.u32 4294901760, %v9440_v61  ;;  %7094 = vmatpush3.bf16.msra.mxu0 %v9384_v15  ;;  %v11920_v47 = vand.u32 4294901760, %v9457_v55 }
 0x168   :  { %v3565_v34 = vsub.f32 %v9367_v50, %v11908_v13  ;;  %v3572_v51 = vsub.f32 %v9372_v38, %v11909_v42  ;;  %7130 = vmatpush3.bf16.msra.mxu1 %v11910_v56  ;;  %v11911_v13 = vand.u32 4294901760, %v9418_v37  ;;  %v11912_v42 = vand.u32 4294901760, %v9423_v63  ;;  %7096 = vmatprep.subr.bf16.mxu0 %v9390_v6 }
 0x169   :  { %7132 = vmatprep.subr.bf16.mxu1 %v11914_v43  ;;  %v11915_v56 = vand.u32 4294901760, %v9435_v59  ;;  %v3447_v48 = vand.u32 4294901760, %v3446_v0  ;;  %v11919_v43 = vand.u32 4294901760, %v9430_v57  ;;  %v3460_v23 = vsub.f32 %v9457_v55, %v11920_v47 }
 0x16a   :  { %v9517_v50 = vsub.f32 %v9418_v37, %v11911_v13  ;;  %v9522_v12 = vsub.f32 %v9423_v63, %v11912_v42  ;;  %v9539_v42 = vsub.f32 %v9440_v61, %v11917_v32  ;;  %v3566_v38 = vand.u32 4294901760, %v3565_v34 }
 0x16b   :  { %v9534_v13 = vsub.f32 %v9435_v59, %v11915_v56  ;;  %v3573_v14 = vand.u32 4294901760, %v3572_v51  ;;  %v3453_v8 = vsub.f32 %v9430_v57, %v11919_v43  ;;  %v11921_v56 = vand.u32 4294901760, %v9462_v35  ;;  %v11926_v43 = vld [vmem:[#allocation20_spill] sm:$0xff]  ;;  %7098 = vmatpush3.bf16.msra.mxu0 %v9401_v39 }
 0x16c   :  { %11913 = vst [vmem:[#allocation15_spill] sm:$0xff] %v9522_v12  ;;  %11918 = vst [vmem:[#allocation17_spill] sm:$0xff] %v9539_v42  ;;  %v11922_v32 = vand.u32 4294901760, %v9474_v30  ;;  %v11924_v51 = vand.u32 4294901760, %v9479_v26  ;;  %7134 = vmatpush3.bf16.msra.mxu1 %v11926_v43  ;;  %v11930_v6 = vand.u32 4294901760, %v9487_v10  ;;  %v11625_v15 = vand.u32 4294901760, %v9539_v42  ;;  %7100 = vmatprep.subr.bf16.mxu0 %v9446_v33 }
 0x16d   :  { %11916 = vst [vmem:[#allocation16_spill] sm:$0xff] %v9534_v13  ;;  %v3579_v62 = vsub.f32 %v9462_v35, %v11921_v56  ;;  %v11927_v56 = vand.u32 4294901760, %v9494_v41  ;;  %7168 = vmatprep.subr.bf16.mxu1 %v9395_v18  ;;  %v7173_v57 = vpack.c.bf16 %v3447_v48, %v3440_v17  ;;  %v11932_v24 = vand.u32 4294901760, %v9077_v58  ;;  %v11933_v18 = vld [vmem:[#allocation22_spill] sm:$0xff] }
 0x16e   :  { %v9554_v0 = vsub.f32 %v9474_v30, %v11922_v32  ;;  %v9559_v34 = vsub.f32 %v9479_v26, %v11924_v51  ;;  %v11928_v32 = vand.u32 4294901760, %v9499_v5  ;;  %v3586_v43 = vsub.f32 %v9487_v10, %v11930_v6 }
 0x16f   :  { %v9568_v35 = vsub.f32 %v9494_v41, %v11927_v56  ;;  %v11931_v56 = vand.u32 4294901760, %v9048_v44  ;;  %v3454_v1 = vand.u32 4294901760, %v3453_v8  ;;  %3304 = vmatmul.mubr.f32.vlgmr.msra.gmra.mrb[8].mxu1 %v11933_v18  ;;  %v3461_v51 = vand.u32 4294901760, %v3460_v23  ;;  %7102 = vmatpush3.bf16.msra.mxu0 %v9452_v60 }
 0x170   :  { %11923 = vst [vmem:[#allocation18_spill] sm:$0xff] %v9554_v0  ;;  %11925 = vst [vmem:[#allocation19_spill] sm:$0xff] %v9559_v34  ;;  %v9573_v55 = vsub.f32 %v9499_v5, %v11928_v32  ;;  %v7175_v32 = vpack.c.bf16 %v3573_v14, %v3566_v38  ;;  %v3580_v53 = vand.u32 4294901760, %v3579_v62  ;;  %v11624_v6 = vand.u32 4294901760, %v9554_v0  ;;  %7170 = vmatpush3.bf16.msra.mxu1 %v9410_v11 }
 0x171   :  { %v9586_v21 = vpack.c.bf16 %v11932_v24, %v11931_v56  ;;  %v11623_v47 = vand.u32 4294901760, %v9559_v34  ;;  %3646 = vmatprep.mubr.f32.mxu1 %v9482_v3  ;;  %v11934_v44 = vand.u32 4294901760, %v9517_v50  ;;  %v11935_v24 = vand.u32 4294901760, %v9522_v12  ;;  %7172 = vmatprep.subr.bf16.mxu1 %v7171_v7 }
 0x172   :  { %11929 = vst [vmem:[#allocation20_spill] sm:$0xff] %v9573_v55  ;;  %v11621_v48 = vand.u32 4294901760, %v9568_v35  ;;  %v11622_v62 = vand.u32 4294901760, %v9573_v55  ;;  %v11936_v23 = vand.u32 4294901760, %v9528_v45  ;;  %v3587_v39 = vand.u32 4294901760, %v3586_v43  ;;  %3200 = vmatmul.mubr.f32.vlgmr.msra.gmra.mrb[8].mxu0 %v11933_v18 }
 0x173   :  { %v3467_v58 = vsub.f32 %v9517_v50, %v11934_v44  ;;  %v3474_v14 = vsub.f32 %v9522_v12, %v11935_v24  ;;  %v11937_v11 = vand.u32 4294901760, %v9534_v13  ;;  %v3600_v8 = vsub.f32 %v9539_v42, %v11625_v15  ;;  %7136 = vmatprep.subr.bf16.mxu0 %v9586_v21  ;;  %v9870_v15 = vld [vmem:[%s11480_s0 + $0x268] sm:$0xff] }
 0x174   :  { %v3408_v38 = vsub.f32 %v9528_v45, %v11936_v23  ;;  %v11938_v56 = vand.u32 4294901760, %v9082_v46  ;;  %v11939_v44 = vand.u32 4294901760, %v9104_v9  ;;  %v7177_v33 = vpack.c.bf16 %v3461_v51, %v3454_v1  ;;  %7174 = vmatpush3.bf16.msra.mxu1 %v7173_v57 }
 0x175   :  { %v3593_v17 = vsub.f32 %v9534_v13, %v11937_v11  ;;  %v11940_v7 = vand.u32 4294901760, %v9156_v28  ;;  %v11941_v43 = vand.u32 4294901760, %v9179_v49  ;;  %v3481_v11 = vsub.f32 %v9554_v0, %v11624_v6  ;;  %7176 = vmatprep.subr.bf16.mxu1 %v7175_v32  ;;  %v9830_v6 = vld [vmem:[%s11480_s0 + $0x258] sm:$0xff] }
 0x176   :  { %v9616_v24 = vpack.c.bf16 %v11939_v44, %v11938_v56  ;;  %v3488_v46 = vsub.f32 %v9559_v34, %v11623_v47  ;;  %v3468_v9 = vand.u32 4294901760, %v3467_v58  ;;  %v3475_v60 = vand.u32 4294901760, %v3474_v14  ;;  %v9825_v47 = vld [vmem:[%s11480_s0 + $0x250] sm:$0xff] }
 0x177   :  { %v9623_v23 = vpack.c.bf16 %v11941_v43, %v11940_v7  ;;  %v3607_v28 = vsub.f32 %v9568_v35, %v11621_v48  ;;  %v3614_v1 = vsub.f32 %v9573_v55, %v11622_v62  ;;  %v3409_v49 = vand.u32 4294901760, %v3408_v38  ;;  %v11944_v48 = vld [vmem:[#allocation25_spill] sm:$0xff] }
 0x178   :  { %v7179_v51 = vpack.c.bf16 %v3587_v39, %v3580_v53  ;;  %v3594_v56 = vand.u32 4294901760, %v3593_v17  ;;  %v3601_v44 = vand.u32 4294901760, %v3600_v8  ;;  %v11942_v57 = vand.u32 4294901760, %v9213_v4  ;;  %7138 = vmatpush3.bf16.msra.mxu0 %v9616_v24  ;;  %v11946_v53 = vld [vmem:[#allocation26_spill] sm:$0xff]  ;;  %7178 = vmatpush3.bf16.msra.mxu1 %v7177_v33 }
 0x179   :  { %v11943_v58 = vand.u32 4294901760, %v9252_v29  ;;  %3410 = vmatprep.mubr.f32.mxu0 %v3409_v49  ;;  %v3482_v7 = vand.u32 4294901760, %v3481_v11  ;;  %v3489_v43 = vand.u32 4294901760, %v3488_v46  ;;  %v11945_v62 = vand.u32 4294901760, %v11944_v48  ;;  %7140 = vmatprep.subr.bf16.mxu0 %v9623_v23 }
 0x17a   :  { %v11947_v38 = vand.u32 4294901760, %v11946_v53  ;;  %v7181_v4 = vpack.c.bf16 %v3475_v60, %v3468_v9  ;;  %v11948_v29 = vand.u32 4294901760, %v9272_v54  ;;  %v11949_v18 = vand.u32 4294901760, %v9277_v52  ;;  %7180 = vmatprep.subr.bf16.mxu1 %v7179_v51 }
 0x17b   :  { %v9643_v14 = vpack.c.bf16 %v11943_v58, %v11942_v57  ;;  %v3495_v32 = vsub.f32 %v11944_v48, %v11945_v62  ;;  %v3608_v8 = vand.u32 4294901760, %v3607_v28  ;;  %v3615_v11 = vand.u32 4294901760, %v3614_v1 }
 0x17c   :  { %v3502_v39 = vsub.f32 %v11946_v53, %v11947_v38  ;;  %v9657_v17 = vpack.c.bf16 %v11949_v18, %v11948_v29  ;;  %v7183_v46 = vpack.c.bf16 %v3601_v44, %v3594_v56  ;;  %v11950_v62 = vand.u32 4294901760, %v9053_v27  ;;  %7182 = vmatpush3.bf16.msra.mxu1 %v7181_v4 }
 0x17d   :  { %v11951_v57 = vand.u32 4294901760, %v9058_v40  ;;  %v11952_v9 = vand.u32 4294901760, %v9334_v36  ;;  %v11953_v54 = vand.u32 4294901760, %v9346_v31  ;;  %7142 = vmatpush3.bf16.msra.mxu0 %v9643_v14  ;;  %v7185_v52 = vpack.c.bf16 %v3489_v43, %v3482_v7 }
 0x17e   :  { %v3621_v49 = vsub.f32 %v9053_v27, %v11950_v62  ;;  %v11954_v28 = vand.u32 4294901760, %v9351_v20  ;;  %v11955_v1 = vand.u32 4294901760, %v9378_v16  ;;  %v3496_v56 = vand.u32 4294901760, %v3495_v32  ;;  %7144 = vmatprep.subr.bf16.mxu0 %v9657_v17  ;;  %7184 = vmatprep.subr.bf16.mxu1 %v7183_v46 }
 0x17f   :  { %v3628_v33 = vsub.f32 %v9058_v40, %v11951_v57  ;;  %v9669_v60 = vpack.c.bf16 %v11953_v54, %v11952_v9  ;;  %v3503_v44 = vand.u32 4294901760, %v3502_v39  ;;  %v7187_v58 = vpack.c.bf16 %v3615_v11, %v3608_v8  ;;  %v11965_v9 = vld [vmem:[#allocation32_spill] sm:$0xff] }
 0x180   :  { %v9676_v51 = vpack.c.bf16 %v11955_v1, %v11954_v28  ;;  %v11956_v36 = vand.u32 4294901760, %v9087_v22  ;;  %v11957_v38 = vand.u32 4294901760, %v9092_v25  ;;  %v3622_v20 = vand.u32 4294901760, %v3621_v49  ;;  %7186 = vmatpush3.bf16.msra.mxu1 %v7185_v52  ;;  %v11967_v28 = vld [vmem:[#allocation33_spill] sm:$0xff] }
 0x181   :  { %v3629_v43 = vand.u32 4294901760, %v3628_v33  ;;  %v11958_v16 = vand.u32 4294901760, %v9111_v19  ;;  %v11959_v39 = vand.u32 4294901760, %v9116_v2  ;;  %7146 = vmatpush3.bf16.msra.mxu0 %v9669_v60  ;;  %v11960_v29 = vand.u32 4294901760, %v9418_v37  ;;  %7188 = vmatprep.subr.bf16.mxu1 %v7187_v58 }
 0x182   :  { %v3509_v31 = vsub.f32 %v9087_v22, %v11956_v36  ;;  %v3516_v7 = vsub.f32 %v9092_v25, %v11957_v38  ;;  %v11961_v18 = vand.u32 4294901760, %v9423_v63  ;;  %v7189_v11 = vpack.c.bf16 %v3503_v44, %v3496_v56  ;;  %7148 = vmatprep.subr.bf16.mxu0 %v9676_v51 }
 0x183   :  { %v3635_v32 = vsub.f32 %v9111_v19, %v11958_v16  ;;  %v3642_v4 = vsub.f32 %v9116_v2, %v11959_v39  ;;  %v11962_v46 = vand.u32 4294901760, %v9435_v59  ;;  %v11963_v62 = vand.u32 4294901760, %v9440_v61  ;;  %v11975_v16 = vld [vmem:[#allocation21_spill] sm:$0xff] }
 0x184   :  { %v9696_v8 = vpack.c.bf16 %v11961_v18, %v11960_v29  ;;  %v3510_v57 = vand.u32 4294901760, %v3509_v31  ;;  %v3517_v33 = vand.u32 4294901760, %v3516_v7  ;;  %v11966_v54 = vand.u32 4294901760, %v11965_v9  ;;  %7190 = vmatpush3.bf16.msra.mxu1 %v7189_v11  ;;  %v11982_v18 = vld [vmem:[#allocation7_spill] sm:$0xff] }
 0x185   :  { %v9702_v49 = vpack.c.bf16 %v11963_v62, %v11962_v46  ;;  %v11968_v63 = vand.u32 4294901760, %v11967_v28  ;;  %v7191_v56 = vpack.c.bf16 %v3629_v43, %v3622_v20  ;;  %v3636_v59 = vand.u32 4294901760, %v3635_v32  ;;  %v11984_v46 = vld [vmem:[#allocation8_spill] sm:$0xff] }
 0x186   :  { %v3523_v37 = vsub.f32 %v11965_v9, %v11966_v54  ;;  %v3643_v44 = vand.u32 4294901760, %v3642_v4  ;;  %7150 = vmatpush3.bf16.msra.mxu0 %v9696_v8  ;;  %v11969_v61 = vand.u32 4294901760, %v9474_v30  ;;  %v11970_v52 = vand.u32 4294901760, %v9479_v26  ;;  %v11977_v26 = vld [vmem:[#allocation5_spill] sm:$0xff]  ;;  %v11987_v54 = vld [vmem:[#allocation23_spill] sm:$0xff] }
 0x187   :  { %11964 = vst [vmem:[#allocation22_spill] sm:$0xff] %v9702_v49  ;;  %v3530_v1 = vsub.f32 %v11967_v28, %v11968_v63  ;;  %v11972_v31 = vand.u32 4294901760, %v9494_v41  ;;  %v11973_v38 = vand.u32 4294901760, %v9499_v5  ;;  %7152 = vmatprep.subr.bf16.mxu0 %v9702_v49  ;;  %v7193_v58 = vpack.c.bf16 %v3517_v33, %v3510_v57  ;;  %7192 = vmatprep.subr.bf16.mxu1 %v7191_v56  ;;  %v11979_v41 = vld [vmem:[#allocation6_spill] sm:$0xff]  ;;  %v11989_v63 = vld [vmem:[#allocation24_spill] sm:$0xff] }
 0x188   :  { %v9716_v36 = vpack.c.bf16 %v11970_v52, %v11969_v61  ;;  %v3524_v20 = vand.u32 4294901760, %v3523_v37  ;;  %v9726_v32 = vand.u32 4294901760, %v11975_v16  ;;  %v7195_v30 = vpack.c.bf16 %v3643_v44, %v3636_v59  ;;  %v11991_v44 = vld [vmem:[#allocation27_spill] sm:$0xff]  ;;  %v11993_v52 = vld [vmem:[#allocation28_spill] sm:$0xff]  ;;  %12017 = vst [vmem:[#allocation23_spill] sm:$0xff] %v9825_v47  ;;  %12018 = vst [vmem:[#allocation24_spill] sm:$0xff] %v9830_v6 }
 0x189   :  { %v9722_v7 = vpack.c.bf16 %v11973_v38, %v11972_v31  ;;  %v3531_v43 = vand.u32 4294901760, %v3530_v1  ;;  %v11978_v39 = vand.u32 4294901760, %v11977_v26  ;;  %v11980_v4 = vand.u32 4294901760, %v11979_v41  ;;  %7194 = vmatpush3.bf16.msra.mxu1 %v7193_v58  ;;  %v11995_v58 = vld [vmem:[#allocation29_spill] sm:$0xff]  ;;  %v12000_v41 = vld [vmem:[#allocation36_spill] sm:$0xff] }
 0x18a   :  { %11971 = vst [vmem:[#allocation25_spill] sm:$0xff] %v9716_v36  ;;  %11976 = vst [vmem:[#allocation32_spill] sm:$0xff] %v9726_v32  ;;  %7154 = vmatpush3.bf16.msra.mxu0 %v9716_v36  ;;  %v11983_v11 = vand.u32 4294901760, %v11982_v18  ;;  %v11985_v62 = vand.u32 4294901760, %v11984_v46  ;;  %v9744_v33 = vsub.f32 %v11975_v16, %v9726_v32  ;;  %7196 = vmatprep.subr.bf16.mxu1 %v7195_v30  ;;  %v11988_v37 = vand.u32 4294901760, %v11987_v54  ;;  %v12002_v18 = vld [vmem:[#allocation38_spill] sm:$0xff] }
 0x18b   :  { %11974 = vst [vmem:[#allocation26_spill] sm:$0xff] %v9722_v7  ;;  %v9733_v5 = vpack.c.bf16 %v11980_v4, %v11978_v39  ;;  %7156 = vmatprep.subr.bf16.mxu0 %v9722_v7  ;;  %v7197_v29 = vpack.c.bf16 %v3531_v43, %v3524_v20  ;;  %v11990_v1 = vand.u32 4294901760, %v11989_v63  ;;  %v11992_v61 = vand.u32 4294901760, %v11991_v44  ;;  %v11997_v43 = vld [vmem:[#allocation30_spill] sm:$0xff]  ;;  %v12001_v4 = vld [vmem:[#allocation37_spill] sm:$0xff] }
 0x18c   :  { %v9740_v57 = vpack.c.bf16 %v11985_v62, %v11983_v11  ;;  %v11626_v59 = vand.u32 4294901760, %v9744_v33  ;;  %v11994_v31 = vand.u32 4294901760, %v11993_v52  ;;  %v11996_v20 = vand.u32 4294901760, %v11995_v58  ;;  %v12003_v11 = vld [vmem:[#allocation40_spill] sm:$0xff]  ;;  %v12004_v54 = vld [vmem:[#allocation42_spill] sm:$0xff]  ;;  %v12007_v44 = vld [vmem:[#allocation9_spill] sm:$0xff] }
 0x18d   :  { %11981 = vst [vmem:[#allocation33_spill] sm:$0xff] %v9733_v5  ;;  %v9751_v56 = vpack.c.bf16 %v11990_v1, %v11988_v37  ;;  %7198 = vmatpush3.bf16.msra.mxu1 %v7197_v29  ;;  %v11998_v16 = vand.u32 4294901760, %v11997_v43  ;;  %v11999_v26 = vand.u32 4294901760, %v9528_v45  ;;  %v7199_v29 = vpack.c.bf16 %v12001_v4, %v12000_v41  ;;  %v12005_v37 = vld [vmem:[#allocation43_spill] sm:$0xff]  ;;  %v12006_v1 = vld [vmem:[#allocation45_spill] sm:$0xff]  ;;  %12023 = vst [vmem:[#allocation30_spill] sm:$0xff] %v9870_v15 }
 0x18e   :  { %11986 = vst [vmem:[#allocation21_spill] sm:$0xff] %v9740_v57  ;;  %7158 = vmatpush3.bf16.msra.mxu0 %v9733_v5  ;;  %7232 = vmatprep.subr.bf16.mxu1 %v9586_v21  ;;  %v9760_v38 = vpack.c.bf16 %v11994_v31, %v11992_v61  ;;  %v3414_v39 = vsub.f32 %v9744_v33, %v11626_v59  ;;  %v12008_v52 = vld [vmem:[#allocation11_spill] sm:$0xff]  ;;  %v12009_v31 = vld [vmem:[#allocation13_spill] sm:$0xff] }
 0x18f   :  { %7160 = vmatprep.subr.bf16.mxu0 %v9740_v57  ;;  %v9768_v30 = vpack.c.bf16 %v11998_v16, %v11996_v20  ;;  %v7201_v46 = vpack.c.bf16 %v12003_v11, %v12002_v18  ;;  %v7203_v63 = vpack.c.bf16 %v12005_v37, %v12004_v54  ;;  %v7205_v61 = vpack.c.bf16 %v12007_v44, %v12006_v1  ;;  %v9796_v20 = vld [vmem:[%s11480_s0 + $0x240] sm:$0xff]  ;;  %v9801_v43 = vld [vmem:[%s11480_s0 + $0x248] sm:$0xff] }
 0x190   :  { %3648 = vmatmul.mubr.f32.vlgmr.msra.gmra.mrb[10].mxu1 %v9726_v32  ;;  %v3415_v62 = vand.u32 4294901760, %v3414_v39  ;;  %v7207_v58 = vpack.c.bf16 %v12009_v31, %v12008_v52  ;;  %12010 = vst [vmem:[#allocation5_spill] sm:$0xff] %v9796_v20  ;;  %12011 = vst [vmem:[#allocation6_spill] sm:$0xff] %v9801_v43  ;;  %v12013_v16 = vld [vmem:[#allocation12_spill] sm:$0xff]  ;;  %v11630_v39 = vand.u32 4294901760, %v9796_v20  ;;  %v12019_v32 = vand.u32 4294901760, %v9801_v43 }
 0x191   :  { %7234 = vmatpush3.bf16.msra.mxu1 %v9616_v24  ;;  %3890 = vmatprep.mubr.f32.mxu1 %v11999_v26  ;;  %v7215_v59 = vpack.c.bf16 %v9539_v42, %v9534_v13 }
 0x192   :  { %7162 = vmatpush3.bf16.msra.mxu0 %v9751_v56  ;;  %7236 = vmatprep.subr.bf16.mxu1 %v9623_v23 }
 0x193   :  { %7164 = vmatprep.subr.bf16.mxu0 %v9760_v38 }
 0x195   :  { %7238 = vmatpush3.bf16.msra.mxu1 %v9643_v14 }
 0x196   :  { %7166 = vmatpush3.bf16.msra.mxu0 %v9768_v30  ;;  %7240 = vmatprep.subr.bf16.mxu1 %v9657_v17 }
 0x197   :  { %7200 = vmatprep.subr.bf16.mxu0 %v7199_v29  ;;  %v9839_v29 = vsub.f32 %v9796_v20, %v11630_v39  ;;  %v9854_v39 = vld [vmem:[%s11480_s0 + $0x2e0] sm:$0xff] }
 0x198   :  { %12020 = vst [vmem:[#allocation27_spill] sm:$0xff] %v9854_v39 }
 0x199   :  { %3416 = vmatmul.mubr.f32.vlgmr.msra.gmra.mrb[10].mxu0 %v3415_v62  ;;  %7242 = vmatpush3.bf16.msra.mxu1 %v9669_v60  ;;  %v9816_v62 = vld [vmem:[%s11480_s0 + $0x2d8] sm:$0xff]  ;;  %v12032_v13 = vand.u32 4294901760, %v9839_v29 }
 0x19a   :  { %7202 = vmatpush3.bf16.msra.mxu0 %v7201_v46  ;;  %3783 = vmatprep.mubr.f32.mxu0 %v9528_v45  ;;  %v12012_v45 = vld [vmem:[#allocation10_spill] sm:$0xff]  ;;  %12015 = vst [vmem:[#allocation8_spill] sm:$0xff] %v9816_v62 }
 0x19b   :  { %7204 = vmatprep.subr.bf16.mxu0 %v7203_v63  ;;  %7244 = vmatprep.subr.bf16.mxu1 %v9676_v51  ;;  %v7209_v26 = vpack.c.bf16 %v12013_v16, %v12012_v45  ;;  %v9811_v46 = vld [vmem:[%s11480_s0 + $0x2d0] sm:$0xff] }
 0x19c   :  { %12014 = vst [vmem:[#allocation7_spill] sm:$0xff] %v9811_v46  ;;  %v12016_v63 = vld [vmem:[#allocation14_spill] sm:$0xff]  ;;  %v12024_v20 = vand.u32 4294901760, %v9811_v46 }
 0x19d   :  { %7246 = vmatpush3.bf16.msra.mxu1 %v9696_v8 }
 0x19e   :  { %7206 = vmatpush3.bf16.msra.mxu0 %v7205_v61  ;;  %v7211_v61 = vpack.c.bf16 %v9487_v10, %v12016_v63  ;;  %7248 = vmatprep.subr.bf16.mxu1 %v9702_v49  ;;  %v9844_v49 = vsub.f32 %v9801_v43, %v12019_v32  ;;  %v9859_v32 = vld [vmem:[%s11480_s0 + $0x2e8] sm:$0xff]  ;;  %v7219_v43 = vpack.c.bf16 %v9573_v55, %v9568_v35  ;;  %v9893_v55 = vld [vmem:[%s11480_s0 + $0x2f0] sm:$0xff] }
 0x19f   :  { %7208 = vmatprep.subr.bf16.mxu0 %v7207_v58  ;;  %v7213_v58 = vpack.c.bf16 %v9522_v12, %v9517_v50  ;;  %12021 = vst [vmem:[#allocation28_spill] sm:$0xff] %v9859_v32  ;;  %12026 = vst [vmem:[#allocation36_spill] sm:$0xff] %v9893_v55 }
 0x1a0   :  { %v12033_v12 = vand.u32 4294901760, %v9844_v49 }
 0x1a1   :  { %7250 = vmatpush3.bf16.msra.mxu1 %v9716_v36  ;;  %v12025_v36 = vand.u32 4294901760, %v9816_v62 }
 0x1a2   :  { %7210 = vmatpush3.bf16.msra.mxu0 %v7209_v26  ;;  %7252 = vmatprep.subr.bf16.mxu1 %v9722_v7  ;;  %v7217_v26 = vpack.c.bf16 %v9559_v34, %v9554_v0  ;;  %v9879_v7 = vsub.f32 %v9811_v46, %v12024_v20  ;;  %v9898_v20 = vld [vmem:[%s11480_s0 + $0x2f8] sm:$0xff]  ;;  %v12029_v0 = vand.u32 4294901760, %v9830_v6  ;;  %v12038_v46 = vand.u32 4294901760, %v9870_v15 }
 0x1a3   :  { %7212 = vmatprep.subr.bf16.mxu0 %v7211_v61  ;;  %v9865_v61 = vld [vmem:[%s11480_s0 + $0x260] sm:$0xff]  ;;  %v9884_v42 = vsub.f32 %v9816_v62, %v12025_v36  ;;  %12027 = vst [vmem:[#allocation37_spill] sm:$0xff] %v9898_v20  ;;  %v12028_v36 = vand.u32 4294901760, %v9825_v47  ;;  %v9916_v62 = vld [vmem:[%s11480_s0 + $0x270] sm:$0xff] }
 0x1a4   :  { %12022 = vst [vmem:[#allocation29_spill] sm:$0xff] %v9865_v61  ;;  %v9909_v34 = vsub.f32 %v9830_v6, %v12029_v0  ;;  %12030 = vst [vmem:[#allocation38_spill] sm:$0xff] %v9916_v62  ;;  %v7221_v0 = vpack.c.bf16 %v11946_v53, %v11944_v48  ;;  %v9932_v6 = vpack.c.bf16 %v12033_v12, %v12032_v13  ;;  %v12035_v48 = vand.u32 4294901760, %v9854_v39 }
 0x1a5   :  { %7254 = vmatpush3.bf16.msra.mxu1 %v9733_v5  ;;  %v12037_v5 = vand.u32 4294901760, %v9865_v61  ;;  %v7225_v12 = vpack.c.bf16 %v9092_v25, %v9087_v22  ;;  %v12046_v25 = vand.u32 4294901760, %v9916_v62 }
 0x1a6   :  { %7214 = vmatpush3.bf16.msra.mxu0 %v7213_v58  ;;  %v9904_v58 = vsub.f32 %v9825_v47, %v12028_v36  ;;  %7256 = vmatprep.subr.bf16.mxu1 %v9740_v57  ;;  %v7223_v36 = vpack.c.bf16 %v9058_v40, %v9053_v27  ;;  %12034 = vst [vmem:[#allocation42_spill] sm:$0xff] %v9932_v6  ;;  %v11649_v47 = vand.u32 4294901760, %v9879_v7  ;;  %v12036_v40 = vand.u32 4294901760, %v9859_v32 }
 0x1a7   :  { %7216 = vmatprep.subr.bf16.mxu0 %v7215_v59  ;;  %v9921_v59 = vld [vmem:[%s11480_s0 + $0x278] sm:$0xff]  ;;  %v9941_v53 = vsub.f32 %v9854_v39, %v12035_v48  ;;  %v9956_v48 = vsub.f32 %v9865_v61, %v12037_v5  ;;  %v12042_v57 = vand.u32 4294901760, %v9898_v20 }
 0x1a8   :  { %12031 = vst [vmem:[#allocation40_spill] sm:$0xff] %v9921_v59  ;;  %v9946_v27 = vsub.f32 %v9859_v32, %v12036_v40  ;;  %v9961_v40 = vsub.f32 %v9870_v15, %v12038_v46  ;;  %v12043_v6 = vand.u32 4294901760, %v9904_v58  ;;  %v12044_v15 = vand.u32 4294901760, %v9909_v34 }
 0x1a9   :  { %7258 = vmatpush3.bf16.msra.mxu1 %v9751_v56  ;;  %v9980_v46 = vsub.f32 %v9898_v20, %v12042_v57 }
 0x1aa   :  { %7218 = vmatpush3.bf16.msra.mxu0 %v7217_v26  ;;  %7260 = vmatprep.subr.bf16.mxu1 %v9760_v38  ;;  %v12041_v26 = vand.u32 4294901760, %v9893_v55  ;;  %v9986_v61 = vpack.c.bf16 %v12044_v15, %v12043_v6  ;;  %v11650_v22 = vand.u32 4294901760, %v9946_v27  ;;  %v11653_v15 = vand.u32 4294901760, %v9956_v48 }
 0x1ab   :  { %7220 = vmatprep.subr.bf16.mxu0 %v7219_v43  ;;  %v12039_v43 = vand.u32 4294901760, %v9884_v42  ;;  %v11652_v6 = vand.u32 4294901760, %v9961_v40 }
 0x1ac   :  { %v9975_v5 = vsub.f32 %v9893_v55, %v12041_v26  ;;  %12045 = vst [vmem:[#allocation45_spill] sm:$0xff] %v9986_v61  ;;  %v9993_v26 = vsub.f32 %v9916_v62, %v12046_v25  ;;  %v10009_v25 = vld [vmem:[%s11480_s0 + $0x280] sm:$0xff]  ;;  %v10042_v61 = vld [vmem:[%s11480_s0 + $0x208] sm:$0xff] }
 0x1ad   :  { %v9968_v13 = vpack.c.bf16 %v12039_v43, %v11649_v47  ;;  %v11651_v43 = vand.u32 4294901760, %v9941_v53  ;;  %v12047_v47 = vand.u32 4294901760, %v9921_v59  ;;  %7262 = vmatpush3.bf16.msra.mxu1 %v9768_v30  ;;  %v12109_v62 = vld [vmem:[#allocation21_spill] sm:$0xff] }
 0x1ae   :  { %7222 = vmatpush3.bf16.msra.mxu0 %v7221_v0  ;;  %7296 = vmatprep.subr.bf16.mxu1 %v9586_v21  ;;  %v7227_v0 = vpack.c.bf16 %v9116_v2, %v9111_v19  ;;  %v10025_v19 = vld [vmem:[%s11480_s0 + $0x200] sm:$0xff]  ;;  %v11654_v21 = vand.u32 4294901760, %v9993_v26 }
 0x1af   :  { %12040 = vst [vmem:[#allocation43_spill] sm:$0xff] %v9968_v13  ;;  %v9998_v57 = vsub.f32 %v9921_v59, %v12047_v47  ;;  %7224 = vmatprep.subr.bf16.mxu0 %v7223_v36  ;;  %v10015_v47 = vpack.c.bf16 %v11650_v22, %v11651_v43  ;;  %v10020_v36 = vld [vmem:[%s11480_s0 + $0x288] sm:$0xff]  ;;  %v10033_v22 = vpack.c.bf16 %v11652_v6, %v11653_v15  ;;  %v12050_v43 = vand.u32 4294901760, %v9744_v33 }
 0x1b0   :  { %v12051_v6 = vand.u32 4294901760, %v12000_v41  ;;  %v12054_v15 = vand.u32 4294901760, %v9980_v46  ;;  %v11656_v2 = vand.u32 4294901760, %v10025_v19 }
 0x1b1   :  { %12048 = vst [vmem:[#allocation9_spill] sm:$0xff] %v10015_v47  ;;  %12049 = vst [vmem:[#allocation11_spill] sm:$0xff] %v10033_v22  ;;  %3894 = vmatmul.mubr.f32.vlgmr.msra.gmra.mrb[12].mxu1 %v12050_v43  ;;  %v7229_v47 = vpack.c.bf16 %v11967_v28, %v11965_v9  ;;  %v11660_v9 = vand.u32 4294901760, %v10009_v25  ;;  %v12053_v28 = vand.u32 4294901760, %v9975_v5  ;;  %v12056_v41 = vand.u32 4294901760, %v9998_v57 }
 0x1b2   :  { %7226 = vmatpush3.bf16.msra.mxu0 %v7225_v12  ;;  %7298 = vmatpush3.bf16.msra.mxu1 %v9616_v24  ;;  %v12052_v12 = vand.u32 4294901760, %v12001_v4  ;;  %v11657_v24 = vand.u32 4294901760, %v10020_v36 }
 0x1b3   :  { %4164 = vmatprep.mubr.f32.mxu1 %v9482_v3  ;;  %v10057_v22 = vpack.c.bf16 %v12054_v15, %v12053_v28  ;;  %7228 = vmatprep.subr.bf16.mxu0 %v7227_v0  ;;  %v10066_v4 = vpack.c.bf16 %v12056_v41, %v11654_v21  ;;  %v12059_v15 = vand.u32 4294901760, %v12003_v11  ;;  %v10081_v28 = vld [vmem:[%s11480_s0 + $0x298] sm:$0xff]  ;;  %v10091_v11 = vsub.f32 %v10009_v25, %v11660_v9 }
 0x1b4   :  { %v7263_v43 = vpack.c.bf16 %v12052_v12, %v12051_v6  ;;  %7300 = vmatprep.subr.bf16.mxu1 %v9623_v23  ;;  %v11655_v6 = vand.u32 4294901760, %v10042_v61  ;;  %v12058_v12 = vand.u32 4294901760, %v12002_v18  ;;  %v10076_v23 = vld [vmem:[%s11480_s0 + $0x290] sm:$0xff]  ;;  %v12061_v18 = vand.u32 4294901760, %v12005_v37 }
 0x1b5   :  { %12055 = vst [vmem:[#allocation13_spill] sm:$0xff] %v10057_v22  ;;  %12057 = vst [vmem:[#allocation10_spill] sm:$0xff] %v10066_v4  ;;  %v11658_v37 = vand.u32 4294901760, %v10076_v23  ;;  %v12069_v21 = vand.u32 4294901760, %v12009_v31  ;;  %v10144_v31 = vld [vmem:[%s11480_s0 + $0x2a8] sm:$0xff]  ;;  %v12096_v4 = vand.u32 4294901760, %v9568_v35 }
 0x1b6   :  { %7230 = vmatpush3.bf16.msra.mxu0 %v7229_v47  ;;  %v7265_v0 = vpack.c.bf16 %v12059_v15, %v12058_v12  ;;  %7302 = vmatpush3.bf16.msra.mxu1 %v9643_v14  ;;  %v12060_v47 = vand.u32 4294901760, %v12004_v54  ;;  %12062 = vst [vmem:[#allocation12_spill] sm:$0xff] %v10091_v11  ;;  %v10097_v12 = vsub.f32 %v10020_v36, %v11657_v24  ;;  %v12067_v15 = vand.u32 4294901760, %v12007_v44  ;;  %v10136_v44 = vld [vmem:[%s11480_s0 + $0x2a0] sm:$0xff] }
 0x1b7   :  { %7264 = vmatprep.subr.bf16.mxu0 %v7263_v43  ;;  %7304 = vmatprep.subr.bf16.mxu1 %v9657_v17  ;;  %v10102_v14 = vsub.f32 %v10025_v19, %v11656_v2  ;;  %v10108_v54 = vsub.f32 %v10042_v61, %v11655_v6  ;;  %v11659_v17 = vand.u32 4294901760, %v10081_v28  ;;  %v12066_v43 = vand.u32 4294901760, %v12006_v1  ;;  %v10131_v1 = vld [vmem:[%s11480_s0 + $0x218] sm:$0xff]  ;;  %v10275_v35 = vld [vmem:[%s11480_s0 + $0x2c0] sm:$0xff] }
 0x1b8   :  { %v7267_v41 = vpack.c.bf16 %v12061_v18, %v12060_v47  ;;  %12063 = vst [vmem:[#allocation14_spill] sm:$0xff] %v10097_v12  ;;  %v12068_v18 = vand.u32 4294901760, %v12008_v52 }
 0x1b9   :  { %12064 = vst [vmem:[#allocation47_spill] sm:$0xff] %v10102_v14  ;;  %3786 = vmatmul.mubr.f32.vlgmr.msra.gmra.mrb[12].mxu0 %v9744_v33  ;;  %12065 = vst [vmem:[#allocation48_spill] sm:$0xff] %v10108_v54  ;;  %v7269_v47 = vpack.c.bf16 %v12067_v15, %v12066_v43  ;;  %v10120_v33 = vld [vmem:[%s11480_s0 + $0x210] sm:$0xff]  ;;  %v11662_v52 = vand.u32 4294901760, %v10102_v14  ;;  %v12072_v15 = vand.u32 4294901760, %v12012_v45  ;;  %v12076_v43 = vand.u32 4294901760, %v9517_v50 }
 0x1ba   :  { %7266 = vmatpush3.bf16.msra.mxu0 %v7265_v0  ;;  %4060 = vmatprep.mubr.f32.mxu0 %v9482_v3  ;;  %v7271_v0 = vpack.c.bf16 %v12069_v21, %v12068_v18  ;;  %v11661_v3 = vand.u32 4294901760, %v10091_v11  ;;  %v12073_v18 = vand.u32 4294901760, %v12013_v16  ;;  %v12079_v50 = vld [vmem:[#allocation22_spill] sm:$0xff] }
 0x1bb   :  { %7306 = vmatpush3.bf16.msra.mxu1 %v9669_v60  ;;  %7268 = vmatprep.subr.bf16.mxu0 %v7267_v41  ;;  %v11663_v60 = vand.u32 4294901760, %v10097_v12  ;;  %v10150_v41 = vsub.f32 %v10076_v23, %v11658_v37  ;;  %v12074_v37 = vand.u32 4294901760, %v12016_v63  ;;  %v12080_v63 = vld [vmem:[#allocation16_spill] sm:$0xff]  ;;  %v10202_v2 = vsub.f32 %v10102_v14, %v11662_v52 }
 0x1bc   :  { %7308 = vmatprep.subr.bf16.mxu1 %v9676_v51  ;;  %v10155_v51 = vsub.f32 %v10081_v28, %v11659_v17  ;;  %v7273_v6 = vpack.c.bf16 %v12073_v18, %v12072_v15  ;;  %v12075_v17 = vand.u32 4294901760, %v9487_v10  ;;  %v4399_v16 = vsub.f32 %v10091_v11, %v11661_v3  ;;  %v10185_v10 = vld [vmem:[%s11480_s0 + $0x228] sm:$0xff] }
 0x1bd   :  { %12070 = vst [vmem:[#allocation49_spill] sm:$0xff] %v10150_v41  ;;  %v4406_v24 = vsub.f32 %v10097_v12, %v11663_v60  ;;  %v12093_v52 = vand.u32 4294901760, %v10136_v44  ;;  %v12101_v12 = vld [vmem:[#allocation26_spill] sm:$0xff]  ;;  %v12107_v11 = vld [vmem:[#allocation33_spill] sm:$0xff] }
 0x1be   :  { %12071 = vst [vmem:[#allocation50_spill] sm:$0xff] %v10155_v51  ;;  %7270 = vmatpush3.bf16.msra.mxu0 %v7269_v47  ;;  %v7275_v9 = vpack.c.bf16 %v12075_v17, %v12074_v37  ;;  %v12077_v47 = vld [vmem:[#allocation15_spill] sm:$0xff]  ;;  %v12081_v37 = vand.u32 4294901760, %v12080_v63  ;;  %v12082_v17 = vld [vmem:[#allocation17_spill] sm:$0xff]  ;;  %v12088_v63 = vand.u32 4294901760, %v10108_v54 }
 0x1bf   :  { %7310 = vmatpush3.bf16.msra.mxu1 %v9696_v8  ;;  %7272 = vmatprep.subr.bf16.mxu0 %v7271_v0  ;;  %v12078_v21 = vand.u32 4294901760, %v12077_v47  ;;  %v10180_v8 = vld [vmem:[%s11480_s0 + $0x220] sm:$0xff]  ;;  %v12083_v0 = vand.u32 4294901760, %v12082_v17  ;;  %v12086_v47 = vld [vmem:[#allocation19_spill] sm:$0xff]  ;;  %v10234_v60 = vsub.f32 %v10136_v44, %v12093_v52  ;;  %v4407_v17 = vand.u32 4294901760, %v4406_v24  ;;  %v10280_v52 = vld [vmem:[%s11480_s0 + $0x2c8] sm:$0xff] }
 0x1c0   :  { %7312 = vmatprep.subr.bf16.mxu1 %v12079_v50  ;;  %v12087_v3 = vand.u32 4294901760, %v12086_v47  ;;  %v10207_v50 = vld [vmem:[%s11480_s0 + $0x2b0] sm:$0xff]  ;;  %v12091_v47 = vand.u32 4294901760, %v10131_v1  ;;  %v12103_v24 = vand.u32 4294901760, %v10150_v41 }
 0x1c1   :  { %v7277_v45 = vpack.c.bf16 %v12078_v21, %v12076_v43  ;;  %v7279_v21 = vpack.c.bf16 %v12083_v0, %v12081_v37  ;;  %v12084_v43 = vld [vmem:[#allocation18_spill] sm:$0xff]  ;;  %v10212_v37 = vsub.f32 %v10108_v54, %v12088_v63  ;;  %v12089_v0 = vand.u32 4294901760, %v10120_v33  ;;  %12094 = vst [vmem:[#allocation16_spill] sm:$0xff] %v10234_v60 }
 0x1c2   :  { %v12085_v18 = vand.u32 4294901760, %v12084_v43  ;;  %7274 = vmatpush3.bf16.msra.mxu0 %v7273_v6  ;;  %v10229_v63 = vsub.f32 %v10131_v1, %v12091_v47  ;;  %v12097_v6 = vld [vmem:[#allocation20_spill] sm:$0xff]  ;;  %v4400_v54 = vand.u32 4294901760, %v4399_v16  ;;  %v12099_v47 = vand.u32 4294901760, %v10144_v31 }
 0x1c3   :  { %v10219_v43 = vsub.f32 %v10120_v33, %v12089_v0  ;;  %7276 = vmatprep.subr.bf16.mxu0 %v7275_v9  ;;  %v12098_v22 = vand.u32 4294901760, %v12097_v6  ;;  %v4288_v0 = vand.u32 4294901760, %v10202_v2  ;;  %v4413_v2 = vsub.f32 %v10150_v41, %v12103_v24 }
 0x1c4   :  { %v7281_v15 = vpack.c.bf16 %v12087_v3, %v12085_v18  ;;  %v10224_v18 = vld [vmem:[%s11480_s0 + $0x2b8] sm:$0xff]  ;;  %12092 = vst [vmem:[#allocation22_spill] sm:$0xff] %v10229_v63  ;;  %v12095_v3 = vld [vmem:[#allocation25_spill] sm:$0xff]  ;;  %v10246_v14 = vsub.f32 %v10144_v31, %v12099_v47  ;;  %v12104_v16 = vand.u32 4294901760, %v10155_v51  ;;  %v12105_v41 = vand.u32 4294901760, %v10180_v8 }
 0x1c5   :  { %12090 = vst [vmem:[#allocation15_spill] sm:$0xff] %v10219_v43  ;;  %7314 = vmatpush3.bf16.msra.mxu1 %v12095_v3  ;;  %v7283_v13 = vpack.c.bf16 %v12098_v22, %v12096_v4  ;;  %v12102_v3 = vld [vmem:[#allocation44_spill] sm:$0xff]  ;;  %v10257_v22 = vld [vmem:[%s11480_s0 + $0x230] sm:$0xff]  ;;  %v12106_v47 = vand.u32 4294901760, %v10185_v10  ;;  %v7359_v55 = vpack.c.bf16 %v4407_v17, %v4400_v54  ;;  %v12111_v24 = vand.u32 4294901760, %v10219_v43 }
 0x1c6   :  { %12100 = vst [vmem:[#allocation17_spill] sm:$0xff] %v10246_v14  ;;  %7316 = vmatprep.subr.bf16.mxu1 %v12101_v12  ;;  %v2437_v9 = vcombine.high %v12102_v3, %v12102_v3  ;;  %v10262_v4 = vld [vmem:[%s11480_s0 + $0x238] sm:$0xff]  ;;  %v4295_v12 = vand.u32 4294901760, %v10212_v37  ;;  %v4420_v6 = vsub.f32 %v10155_v51, %v12104_v16  ;;  %7278 = vmatpush3.bf16.msra.mxu0 %v7277_v45  ;;  %v12108_v45 = vand.u32 4294901760, %v10207_v50 }
 0x1c7   :  { %v10287_v16 = vsub.f32 %v10180_v8, %v12105_v41  ;;  %v10292_v51 = vsub.f32 %v10185_v10, %v12106_v47  ;;  %7280 = vmatprep.subr.bf16.mxu0 %v7279_v21  ;;  %v12110_v47 = vand.u32 4294901760, %v10224_v18  ;;  %v4301_v41 = vsub.f32 %v10219_v43, %v12111_v24  ;;  %v12122_v43 = vld [vmem:[#allocation34_spill] sm:$0xff] }
 0x1c8   :  { %v10299_v37 = vsub.f32 %v10207_v50, %v12108_v45  ;;  %v10304_v20 = vand.u32 4294901760, %v2437_v9  ;;  %v4414_v45 = vand.u32 4294901760, %v4413_v2  ;;  %v4421_v32 = vand.u32 4294901760, %v4420_v6 }
 0x1c9   :  { %7318 = vmatpush3.bf16.msra.mxu1 %v12107_v11  ;;  %v10309_v11 = vsub.f32 %v10224_v18, %v12110_v47  ;;  %v12113_v3 = vand.u32 4294901760, %v10234_v60  ;;  %v12114_v54 = vand.u32 4294901760, %v10246_v14  ;;  %v12115_v2 = vand.u32 4294901760, %v10257_v22 }
 0x1ca   :  { %7320 = vmatprep.subr.bf16.mxu1 %v12109_v62  ;;  %7282 = vmatpush3.bf16.msra.mxu0 %v7281_v15  ;;  %v12112_v62 = vand.u32 4294901760, %v10229_v63  ;;  %v7361_v59 = vpack.c.bf16 %v4295_v12, %v4288_v0  ;;  %v4302_v21 = vand.u32 4294901760, %v4301_v41  ;;  %v12125_v41 = vld [vmem:[#allocation32_spill] sm:$0xff] }
 0x1cb   :  { %v4427_v47 = vsub.f32 %v10234_v60, %v12113_v3  ;;  %7284 = vmatprep.subr.bf16.mxu0 %v7283_v13  ;;  %v4434_v17 = vsub.f32 %v10246_v14, %v12114_v54  ;;  %v10332_v6 = vsub.f32 %v10257_v22, %v12115_v2  ;;  %v12116_v3 = vand.u32 4294901760, %v10262_v4  ;;  %v12119_v14 = vld [vmem:[#allocation31_spill] sm:$0xff] }
 0x1cc   :  { %v4308_v39 = vsub.f32 %v10229_v63, %v12112_v62  ;;  %v12117_v62 = vand.u32 4294901760, %v10275_v35  ;;  %v12118_v2 = vand.u32 4294901760, %v10280_v52  ;;  %v12120_v60 = vand.u32 4294901760, %v10287_v16 }
 0x1cd   :  { %7322 = vmatpush3.bf16.msra.mxu1 %v9751_v56  ;;  %v10337_v24 = vsub.f32 %v10262_v4, %v12116_v3  ;;  %v10341_v56 = vsub.f32 %v2437_v9, %v10304_v20  ;;  %v7363_v3 = vpack.c.bf16 %v4421_v32, %v4414_v45  ;;  %v4428_v9 = vand.u32 4294901760, %v4427_v47  ;;  %v12126_v45 = vld [vmem:[#allocation35_spill] sm:$0xff] }
 0x1ce   :  { %7324 = vmatprep.subr.bf16.mxu1 %v9760_v38  ;;  %v10347_v54 = vsub.f32 %v10275_v35, %v12117_v62  ;;  %v10352_v15 = vsub.f32 %v10280_v52, %v12118_v2  ;;  %7286 = vmatpush3.bf16.msra.mxu0 %v12119_v14  ;;  %v4309_v38 = vand.u32 4294901760, %v4308_v39  ;;  %v4315_v13 = vsub.f32 %v10287_v16, %v12120_v60 }
 0x1cf   :  { %v12121_v63 = vand.u32 4294901760, %v10292_v51  ;;  %7288 = vmatprep.subr.bf16.mxu0 %v12122_v43  ;;  %v4435_v2 = vand.u32 4294901760, %v4434_v17  ;;  %v12123_v32 = vand.u32 4294901760, %v10299_v37  ;;  %v11690_v39 = vand.u32 4294901760, %v10332_v6 }
 0x1d0   :  { %v12124_v12 = vand.u32 4294901760, %v10309_v11  ;;  %v7365_v47 = vpack.c.bf16 %v4309_v38, %v4302_v21  ;;  %v12127_v17 = vand.u32 4294901760, %v10009_v25  ;;  %v4316_v60 = vand.u32 4294901760, %v4315_v13  ;;  %v12130_v25 = vld [vmem:[#allocation39_spill] sm:$0xff] }
 0x1d1   :  { %v4322_v62 = vsub.f32 %v10292_v51, %v12121_v63  ;;  %7326 = vmatpush3.bf16.msra.mxu1 %v9768_v30  ;;  %v4441_v0 = vsub.f32 %v10299_v37, %v12123_v32  ;;  %v12128_v32 = vand.u32 4294901760, %v10020_v36  ;;  %v4329_v43 = vsub.f32 %v10332_v6, %v11690_v39 }
 0x1d2   :  { %7360 = vmatprep.subr.bf16.mxu1 %v7359_v55  ;;  %v4448_v63 = vsub.f32 %v10309_v11, %v12124_v12  ;;  %7290 = vmatpush3.bf16.msra.mxu0 %v12126_v45  ;;  %v7367_v12 = vpack.c.bf16 %v4435_v2, %v4428_v9  ;;  %v12129_v45 = vand.u32 4294901760, %v10337_v24  ;;  %v12131_v36 = vand.u32 4294901760, %v10341_v56 }
 0x1d3   :  { %v10380_v55 = vpack.c.bf16 %v12128_v32, %v12127_v17  ;;  %v4323_v14 = vand.u32 4294901760, %v4322_v62  ;;  %v4442_v30 = vand.u32 4294901760, %v4441_v0  ;;  %7292 = vmatprep.subr.bf16.mxu0 %v12130_v25  ;;  %v12132_v38 = vand.u32 4294901760, %v10347_v54 }
 0x1d4   :  { %4166 = vmatmul.mubr.f32.vlgmr.msra.gmra.mrb[14].mxu1 %v12125_v41  ;;  %v4336_v21 = vsub.f32 %v10337_v24, %v12129_v45  ;;  %v4270_v13 = vsub.f32 %v10341_v56, %v12131_v36  ;;  %v12133_v62 = vand.u32 4294901760, %v10352_v15  ;;  %v12134_v0 = vand.u32 4294901760, %v10025_v19 }
 0x1d5   :  { %7362 = vmatpush3.bf16.msra.mxu1 %v7361_v59  ;;  %4508 = vmatprep.mubr.f32.mxu1 %v10304_v20  ;;  %v4449_v59 = vand.u32 4294901760, %v4448_v63  ;;  %v4455_v9 = vsub.f32 %v10347_v54, %v12132_v38  ;;  %v12135_v17 = vand.u32 4294901760, %v10042_v61  ;;  %v7369_v45 = vpack.c.bf16 %v4323_v14, %v4316_v60 }
 0x1d6   :  { %7364 = vmatprep.subr.bf16.mxu1 %v7363_v3  ;;  %v4462_v2 = vsub.f32 %v10352_v15, %v12133_v62  ;;  %v12136_v3 = vld [vmem:[#allocation41_spill] sm:$0xff]  ;;  %v12137_v25 = vand.u32 4294901760, %v10076_v23  ;;  %v12138_v63 = vand.u32 4294901760, %v10081_v28  ;;  %v12139_v38 = vand.u32 4294901760, %v9839_v29 }
 0x1d7   :  { %v10403_v32 = vpack.c.bf16 %v12135_v17, %v12134_v0  ;;  %7294 = vmatpush3.bf16.msra.mxu0 %v12136_v3  ;;  %v12140_v62 = vand.u32 4294901760, %v9844_v49  ;;  %v4330_v61 = vand.u32 4294901760, %v4329_v43  ;;  %v4337_v0 = vand.u32 4294901760, %v4336_v21 }
 0x1d8   :  { %v10410_v36 = vpack.c.bf16 %v12138_v63, %v12137_v25  ;;  %v4343_v39 = vsub.f32 %v9839_v29, %v12139_v38  ;;  %7328 = vmatprep.subr.bf16.mxu0 %v10380_v55  ;;  %v12141_v14 = vand.u32 4294901760, %v9879_v7  ;;  %v12142_v28 = vand.u32 4294901760, %v9884_v42 }
 0x1d9   :  { %v4350_v19 = vsub.f32 %v9844_v49, %v12140_v62  ;;  %7366 = vmatpush3.bf16.msra.mxu1 %v7365_v47  ;;  %v4271_v17 = vand.u32 4294901760, %v4270_v13  ;;  %v7371_v3 = vpack.c.bf16 %v4449_v59, %v4442_v30  ;;  %v4456_v25 = vand.u32 4294901760, %v4455_v9 }
 0x1da   :  { %v4469_v23 = vsub.f32 %v9879_v7, %v12141_v14  ;;  %v4476_v60 = vsub.f32 %v9884_v42, %v12142_v28  ;;  %7368 = vmatprep.subr.bf16.mxu1 %v7367_v12  ;;  %v4463_v63 = vand.u32 4294901760, %v4462_v2  ;;  %4062 = vmatmul.mubr.f32.vlgmr.msra.gmra.mrb[14].mxu0 %v12125_v41  ;;  %v12143_v47 = vand.u32 4294901760, %v10120_v33 }
 0x1db   :  { %v12144_v43 = vand.u32 4294901760, %v10131_v1  ;;  %7330 = vmatpush3.bf16.msra.mxu0 %v10403_v32  ;;  %4272 = vmatprep.mubr.f32.mxu0 %v4271_v17  ;;  %v4344_v38 = vand.u32 4294901760, %v4343_v39  ;;  %v4351_v62 = vand.u32 4294901760, %v4350_v19  ;;  %v12145_v14 = vand.u32 4294901760, %v9904_v58 }
 0x1dc   :  { %v12146_v30 = vand.u32 4294901760, %v9909_v34  ;;  %7332 = vmatprep.subr.bf16.mxu0 %v10410_v36  ;;  %v7373_v33 = vpack.c.bf16 %v4337_v0, %v4330_v61  ;;  %v12147_v1 = vand.u32 4294901760, %v10136_v44  ;;  %v12148_v41 = vand.u32 4294901760, %v10144_v31 }
 0x1dd   :  { %v10430_v21 = vpack.c.bf16 %v12144_v43, %v12143_v47  ;;  %v4357_v12 = vsub.f32 %v9904_v58, %v12145_v14  ;;  %7370 = vmatpush3.bf16.msra.mxu1 %v7369_v45  ;;  %v4470_v39 = vand.u32 4294901760, %v4469_v23  ;;  %v4477_v9 = vand.u32 4294901760, %v4476_v60 }
 0x1de   :  { %v4364_v13 = vsub.f32 %v9909_v34, %v12146_v30  ;;  %v10444_v59 = vpack.c.bf16 %v12148_v41, %v12147_v1  ;;  %7372 = vmatprep.subr.bf16.mxu1 %v7371_v3  ;;  %v7375_v2 = vpack.c.bf16 %v4463_v63, %v4456_v25  ;;  %v12149_v19 = vand.u32 4294901760, %v9941_v53 }
 0x1df   :  { %v12150_v17 = vand.u32 4294901760, %v9946_v27  ;;  %v12151_v61 = vand.u32 4294901760, %v10180_v8  ;;  %v12152_v44 = vand.u32 4294901760, %v10185_v10  ;;  %7334 = vmatpush3.bf16.msra.mxu0 %v10430_v21  ;;  %v7377_v31 = vpack.c.bf16 %v4351_v62, %v4344_v38 }
 0x1e0   :  { %v4483_v28 = vsub.f32 %v9941_v53, %v12149_v19  ;;  %v12153_v23 = vand.u32 4294901760, %v10207_v50  ;;  %v12154_v60 = vand.u32 4294901760, %v10224_v18  ;;  %v4358_v25 = vand.u32 4294901760, %v4357_v12  ;;  %7336 = vmatprep.subr.bf16.mxu0 %v10444_v59 }
 0x1e1   :  { %v4490_v45 = vsub.f32 %v9946_v27, %v12150_v17  ;;  %v10456_v0 = vpack.c.bf16 %v12152_v44, %v12151_v61  ;;  %v4365_v63 = vand.u32 4294901760, %v4364_v13  ;;  %7374 = vmatpush3.bf16.msra.mxu1 %v7373_v33  ;;  %v7379_v47 = vpack.c.bf16 %v4477_v9, %v4470_v39 }
 0x1e2   :  { %v10463_v3 = vpack.c.bf16 %v12154_v60, %v12153_v23  ;;  %v12155_v8 = vand.u32 4294901760, %v9956_v48  ;;  %v12156_v43 = vand.u32 4294901760, %v9961_v40  ;;  %7376 = vmatprep.subr.bf16.mxu1 %v7375_v2  ;;  %v4484_v50 = vand.u32 4294901760, %v4483_v28  ;;  %v12167_v23 = vld [vmem:[#allocation6_spill] sm:$0xff] }
 0x1e3   :  { %v4491_v62 = vand.u32 4294901760, %v4490_v45  ;;  %v12157_v18 = vand.u32 4294901760, %v9975_v5  ;;  %v12158_v12 = vand.u32 4294901760, %v9980_v46  ;;  %7338 = vmatpush3.bf16.msra.mxu0 %v10456_v0  ;;  %v12159_v13 = vand.u32 4294901760, %v10257_v22 }
 0x1e4   :  { %v4371_v10 = vsub.f32 %v9956_v48, %v12155_v8  ;;  %v4378_v38 = vsub.f32 %v9961_v40, %v12156_v43  ;;  %v12160_v33 = vand.u32 4294901760, %v10262_v4  ;;  %v7381_v41 = vpack.c.bf16 %v4365_v63, %v4358_v25  ;;  %7340 = vmatprep.subr.bf16.mxu0 %v10463_v3  ;;  %v12169_v63 = vld [vmem:[#allocation7_spill] sm:$0xff] }
 0x1e5   :  { %v4497_v14 = vsub.f32 %v9975_v5, %v12157_v18  ;;  %v4504_v30 = vsub.f32 %v9980_v46, %v12158_v12  ;;  %v12161_v39 = vand.u32 4294901760, %v10275_v35  ;;  %v12162_v9 = vand.u32 4294901760, %v10280_v52  ;;  %7378 = vmatpush3.bf16.msra.mxu1 %v7377_v31  ;;  %v12165_v52 = vld [vmem:[#allocation5_spill] sm:$0xff]  ;;  %v12174_v18 = vld [vmem:[#allocation44_spill] sm:$0xff] }
 0x1e6   :  { %v10483_v1 = vpack.c.bf16 %v12160_v33, %v12159_v13  ;;  %v4372_v19 = vand.u32 4294901760, %v4371_v10  ;;  %v4379_v28 = vand.u32 4294901760, %v4378_v38  ;;  %v12163_v17 = vand.u32 4294901760, %v9993_v26  ;;  %7380 = vmatprep.subr.bf16.mxu1 %v7379_v47  ;;  %v12171_v10 = vld [vmem:[#allocation8_spill] sm:$0xff] }
 0x1e7   :  { %v10489_v2 = vpack.c.bf16 %v12162_v9, %v12161_v39  ;;  %v12164_v4 = vand.u32 4294901760, %v9998_v57  ;;  %v7383_v61 = vpack.c.bf16 %v4491_v62, %v4484_v50  ;;  %v4498_v35 = vand.u32 4294901760, %v4497_v14  ;;  %v12178_v33 = vld [vmem:[#allocation24_spill] sm:$0xff] }
 0x1e8   :  { %v4385_v22 = vsub.f32 %v9993_v26, %v12163_v17  ;;  %v4505_v44 = vand.u32 4294901760, %v4504_v30  ;;  %7342 = vmatpush3.bf16.msra.mxu0 %v10483_v1  ;;  %v12166_v31 = vand.u32 4294901760, %v12165_v52  ;;  %v12168_v60 = vand.u32 4294901760, %v12167_v23  ;;  %v12176_v30 = vld [vmem:[#allocation23_spill] sm:$0xff]  ;;  %v12183_v17 = vld [vmem:[#allocation28_spill] sm:$0xff] }
 0x1e9   :  { %v4392_v45 = vsub.f32 %v9998_v57, %v12164_v4  ;;  %v12170_v8 = vand.u32 4294901760, %v12169_v63  ;;  %v12172_v43 = vand.u32 4294901760, %v12171_v10  ;;  %7382 = vmatpush3.bf16.msra.mxu1 %v7381_v41  ;;  %7344 = vmatprep.subr.bf16.mxu0 %v10489_v2  ;;  %v7385_v47 = vpack.c.bf16 %v4379_v28, %v4372_v19  ;;  %v12181_v19 = vld [vmem:[#allocation27_spill] sm:$0xff] }
 0x1ea   :  { %v10503_v25 = vpack.c.bf16 %v12168_v60, %v12166_v31  ;;  %v4386_v50 = vand.u32 4294901760, %v4385_v22  ;;  %v10513_v14 = vand.u32 4294901760, %v12174_v18  ;;  %7384 = vmatprep.subr.bf16.mxu1 %v7383_v61  ;;  %v7387_v12 = vpack.c.bf16 %v4505_v44, %v4498_v35  ;;  %v12185_v61 = vld [vmem:[#allocation29_spill] sm:$0xff]  ;;  %v12187_v44 = vld [vmem:[#allocation30_spill] sm:$0xff]  ;;  %v12189_v60 = vld [vmem:[#allocation36_spill] sm:$0xff] }
 0x1eb   :  { %v10509_v38 = vpack.c.bf16 %v12172_v43, %v12170_v8  ;;  %v4393_v62 = vand.u32 4294901760, %v4392_v45  ;;  %v12177_v13 = vand.u32 4294901760, %v12176_v30  ;;  %v12179_v39 = vand.u32 4294901760, %v12178_v33  ;;  %v12191_v8 = vld [vmem:[#allocation37_spill] sm:$0xff]  ;;  %v12198_v33 = vld [vmem:[#allocation12_spill] sm:$0xff] }
 0x1ec   :  { %12175 = vst [vmem:[#allocation19_spill] sm:$0xff] %v10513_v14  ;;  %7346 = vmatpush3.bf16.msra.mxu0 %v10503_v25  ;;  %v12182_v28 = vand.u32 4294901760, %v12181_v19  ;;  %v12184_v22 = vand.u32 4294901760, %v12183_v17  ;;  %v10531_v45 = vsub.f32 %v12174_v18, %v10513_v14  ;;  %v12186_v35 = vand.u32 4294901760, %v12185_v61  ;;  %v12200_v19 = vld [vmem:[#allocation47_spill] sm:$0xff]  ;;  %v12202_v61 = vld [vmem:[#allocation49_spill] sm:$0xff] }
 0x1ed   :  { %12173 = vst [vmem:[#allocation18_spill] sm:$0xff] %v10509_v38  ;;  %v10520_v9 = vpack.c.bf16 %v12179_v39, %v12177_v13  ;;  %7386 = vmatpush3.bf16.msra.mxu1 %v7385_v47  ;;  %7348 = vmatprep.subr.bf16.mxu0 %v10509_v38  ;;  %v7389_v41 = vpack.c.bf16 %v4393_v62, %v4386_v50  ;;  %v12188_v52 = vand.u32 4294901760, %v12187_v44  ;;  %v12190_v63 = vand.u32 4294901760, %v12189_v60  ;;  %v12193_v47 = vld [vmem:[#allocation38_spill] sm:$0xff]  ;;  %v12195_v62 = vld [vmem:[#allocation40_spill] sm:$0xff] }
 0x1ee   :  { %v10527_v4 = vpack.c.bf16 %v12184_v22, %v12182_v28  ;;  %7388 = vmatprep.subr.bf16.mxu1 %v7387_v12  ;;  %v11691_v23 = vand.u32 4294901760, %v10531_v45  ;;  %v12192_v10 = vand.u32 4294901760, %v12191_v8  ;;  %v12194_v50 = vand.u32 4294901760, %v12193_v47  ;;  %v12199_v39 = vld [vmem:[#allocation14_spill] sm:$0xff]  ;;  %v12201_v28 = vld [vmem:[#allocation48_spill] sm:$0xff] }
 0x1ef   :  { %12180 = vst [vmem:[#allocation25_spill] sm:$0xff] %v10520_v9  ;;  %v10538_v31 = vpack.c.bf16 %v12188_v52, %v12186_v35  ;;  %v12196_v18 = vand.u32 4294901760, %v12195_v62  ;;  %v12197_v30 = vand.u32 4294901760, %v10341_v56  ;;  %v7393_v17 = vpack.c.bf16 %v12201_v28, %v12200_v19  ;;  %v12203_v35 = vld [vmem:[#allocation50_spill] sm:$0xff]  ;;  %v12204_v52 = vld [vmem:[#allocation15_spill] sm:$0xff]  ;;  %v12206_v8 = vld [vmem:[#allocation16_spill] sm:$0xff] }
 0x1f0   :  { %7350 = vmatpush3.bf16.msra.mxu0 %v10520_v9  ;;  %v10547_v43 = vpack.c.bf16 %v12192_v10, %v12190_v63  ;;  %v4276_v13 = vsub.f32 %v10531_v45, %v11691_v23  ;;  %v7395_v44 = vpack.c.bf16 %v12203_v35, %v12202_v61  ;;  %v12205_v60 = vld [vmem:[#allocation22_spill] sm:$0xff]  ;;  %v12207_v10 = vld [vmem:[#allocation17_spill] sm:$0xff] }
 0x1f1   :  { %7390 = vmatpush3.bf16.msra.mxu1 %v7389_v41  ;;  %7352 = vmatprep.subr.bf16.mxu0 %v10527_v4  ;;  %v10555_v12 = vpack.c.bf16 %v12196_v18, %v12194_v50  ;;  %v7391_v41 = vpack.c.bf16 %v12199_v39, %v12198_v33  ;;  %v7397_v63 = vpack.c.bf16 %v12205_v60, %v12204_v52  ;;  %v10590_v62 = vld [vmem:[%s11480_s0 + $0x350] sm:$0xff]  ;;  %v10595_v18 = vld [vmem:[%s11480_s0 + $0x358] sm:$0xff] }
 0x1f2   :  { %7424 = vmatprep.subr.bf16.mxu1 %v10380_v55  ;;  %v4277_v22 = vand.u32 4294901760, %v4276_v13  ;;  %v7399_v47 = vpack.c.bf16 %v12207_v10, %v12206_v8  ;;  %v7401_v50 = vpack.c.bf16 %v10292_v51, %v10287_v16  ;;  %12208 = vst [vmem:[#allocation20_spill] sm:$0xff] %v10590_v62  ;;  %12209 = vst [vmem:[#allocation26_spill] sm:$0xff] %v10595_v18 }
 0x1f3   :  { %v7407_v13 = vpack.c.bf16 %v10352_v15, %v10347_v54 }
 0x1f4   :  { %4510 = vmatmul.mubr.f32.vlgmr.msra.gmra.mrb[16].mxu1 %v10513_v14  ;;  %7354 = vmatpush3.bf16.msra.mxu0 %v10538_v31  ;;  %v10632_v14 = vld [vmem:[%s11480_s0 + $0x370] sm:$0xff] }
 0x1f5   :  { %7426 = vmatpush3.bf16.msra.mxu1 %v10403_v32  ;;  %4752 = vmatprep.mubr.f32.mxu1 %v12197_v30  ;;  %v7405_v30 = vpack.c.bf16 %v10337_v24, %v10332_v6  ;;  %12214 = vst [vmem:[#allocation32_spill] sm:$0xff] %v10632_v14 }
 0x1f6   :  { %7356 = vmatprep.subr.bf16.mxu0 %v10547_v43  ;;  %7428 = vmatprep.subr.bf16.mxu1 %v10410_v36 }
 0x1f8   :  { %7358 = vmatpush3.bf16.msra.mxu0 %v10555_v12 }
 0x1f9   :  { %7430 = vmatpush3.bf16.msra.mxu1 %v10430_v21  ;;  %7392 = vmatprep.subr.bf16.mxu0 %v7391_v41  ;;  %v7411_v41 = vpack.c.bf16 %v9884_v42, %v9879_v7  ;;  %v12217_v42 = vand.u32 4294901760, %v10595_v18 }
 0x1fa   :  { %7432 = vmatprep.subr.bf16.mxu1 %v10444_v59 }
 0x1fb   :  { %4278 = vmatmul.mubr.f32.vlgmr.msra.gmra.mrb[16].mxu0 %v4277_v22  ;;  %v5978_v22 = vpop.f32.mrb[4].mxu1  ;;  %v10648_v7 = vsub.f32 %v10595_v18, %v12217_v42  ;;  %v7415_v42 = vpack.c.bf16 %v9946_v27, %v9941_v53 }
 0x1fc   :  { %7394 = vmatpush3.bf16.msra.mxu0 %v7393_v17  ;;  %4645 = vmatprep.mubr.f32.mxu0 %v10341_v56  ;;  %v7403_v56 = vpack.c.bf16 %v10309_v11, %v10299_v37  ;;  %v7409_v17 = vpack.c.bf16 %v9844_v49, %v9839_v29 }
 0x1fd   :  { %7434 = vmatpush3.bf16.msra.mxu1 %v10456_v0  ;;  %7396 = vmatprep.subr.bf16.mxu0 %v7395_v44  ;;  %v10608_v44 = vld [vmem:[%s11480_s0 + $0x360] sm:$0xff] }
 0x1fe   :  { %7436 = vmatprep.subr.bf16.mxu1 %v10463_v3  ;;  %12210 = vst [vmem:[#allocation33_spill] sm:$0xff] %v10608_v44  ;;  %v11697_v29 = vand.u32 4294901760, %v10608_v44 }
 0x200   :  { %7398 = vmatpush3.bf16.msra.mxu0 %v7397_v63  ;;  %v10613_v63 = vld [vmem:[%s11480_s0 + $0x368] sm:$0xff] }
 0x201   :  { %7438 = vmatpush3.bf16.msra.mxu1 %v10483_v1  ;;  %7400 = vmatprep.subr.bf16.mxu0 %v7399_v47  ;;  %12211 = vst [vmem:[#allocation21_spill] sm:$0xff] %v10613_v63  ;;  %v5979_v47 = vpop.f32.mrb[5].mxu1 }
 0x202   :  { %7440 = vmatprep.subr.bf16.mxu1 %v10489_v2  ;;  %v5980_v23 = vadd.f32 %v5979_v47, %v5978_v22 }
 0x204   :  { %7402 = vmatpush3.bf16.msra.mxu0 %v7401_v50  ;;  %v10618_v50 = vld [vmem:[%s11480_s0 + $0x3f0] sm:$0xff] }
 0x205   :  { %7442 = vmatpush3.bf16.msra.mxu1 %v10503_v25  ;;  %7404 = vmatprep.subr.bf16.mxu0 %v7403_v56  ;;  %12212 = vst [vmem:[#allocation31_spill] sm:$0xff] %v10618_v50  ;;  %v10623_v56 = vld [vmem:[%s11480_s0 + $0x3f8] sm:$0xff] }
 0x206   :  { %7444 = vmatprep.subr.bf16.mxu1 %v10509_v38  ;;  %12213 = vst [vmem:[#allocation34_spill] sm:$0xff] %v10623_v56  ;;  %v10637_v38 = vld [vmem:[%s11480_s0 + $0x378] sm:$0xff] }
 0x207   :  { %12215 = vst [vmem:[#allocation35_spill] sm:$0xff] %v10637_v38 }
 0x208   :  { %7406 = vmatpush3.bf16.msra.mxu0 %v7405_v30  ;;  %v12216_v30 = vand.u32 4294901760, %v10590_v62 }
 0x209   :  { %7446 = vmatpush3.bf16.msra.mxu1 %v10520_v9  ;;  %7408 = vmatprep.subr.bf16.mxu0 %v7407_v13  ;;  %v11701_v13 = vand.u32 4294901760, %v10623_v56  ;;  %v10667_v9 = vsub.f32 %v10608_v44, %v11697_v29  ;;  %v12220_v29 = vand.u32 4294901760, %v10632_v14 }
 0x20a   :  { %v10643_v49 = vsub.f32 %v10590_v62, %v12216_v30  ;;  %7448 = vmatprep.subr.bf16.mxu1 %v10527_v4  ;;  %v7413_v62 = vpack.c.bf16 %v9909_v34, %v9904_v58  ;;  %v5943_v34 = vpop.f32.mrb[4].mxu0  ;;  %v12219_v58 = vand.u32 4294901760, %v10618_v50 }
 0x20b   :  { %v10683_v27 = vsub.f32 %v10623_v56, %v11701_v13  ;;  %v10688_v47 = vsub.f32 %v10632_v14, %v12220_v29  ;;  %v7417_v13 = vpack.c.bf16 %v9961_v40, %v9956_v48  ;;  %v10707_v29 = vld [vmem:[%s11480_s0 + $0x380] sm:$0xff] }
 0x20c   :  { %7410 = vmatpush3.bf16.msra.mxu0 %v7409_v17  ;;  %v12218_v17 = vand.u32 4294901760, %v10613_v63  ;;  %v10678_v53 = vsub.f32 %v10618_v50, %v12219_v58  ;;  %v12223_v58 = vand.u32 4294901760, %v10648_v7 }
 0x20d   :  { %7450 = vmatpush3.bf16.msra.mxu1 %v10538_v31  ;;  %7412 = vmatprep.subr.bf16.mxu0 %v7411_v41  ;;  %v5944_v41 = vpop.f32.mrb[5].mxu0  ;;  %v12233_v18 = vand.u32 4294901760, %v10683_v27 }
 0x20e   :  { %v10672_v30 = vsub.f32 %v10613_v63, %v12218_v17  ;;  %7452 = vmatprep.subr.bf16.mxu1 %v10547_v43  ;;  %v12221_v17 = vand.u32 4294901760, %v10637_v38  ;;  %v12222_v63 = vand.u32 4294901760, %v10643_v49  ;;  %v5945_v44 = vadd.f32 %v5944_v41, %v5943_v34  ;;  %v10726_v41 = vld [vmem:[%s11480_s0 + $0x300] sm:$0xff] }
 0x210   :  { %v10693_v22 = vsub.f32 %v10637_v38, %v12221_v17  ;;  %v10699_v50 = vpack.c.bf16 %v12223_v58, %v12222_v63  ;;  %7414 = vmatpush3.bf16.msra.mxu0 %v7413_v62  ;;  %v10712_v17 = vld [vmem:[%s11480_s0 + $0x388] sm:$0xff]  ;;  %v10718_v40 = vadd.f32 %v5980_v23, %v5945_v44  ;;  %v10736_v23 = vld [vmem:[%s11480_s0 + $0x390] sm:$0xff]  ;;  %v12227_v38 = vand.u32 4294901760, %v10672_v30 }
 0x211   :  { %7454 = vmatpush3.bf16.msra.mxu1 %v10555_v12  ;;  %7416 = vmatprep.subr.bf16.mxu0 %v7415_v42  ;;  %v12225_v63 = vld [vmem:[#allocation46_spill] sm:$0xff]  ;;  %v7419_v42 = vpack.c.bf16 %v9980_v46, %v9975_v5  ;;  %v7421_v5 = vpack.c.bf16 %v9998_v57, %v9993_v26  ;;  %v10745_v46 = vld [vmem:[%s11480_s0 + $0x398] sm:$0xff]  ;;  %v12229_v44 = vand.u32 4294901760, %v10531_v45  ;;  %v12230_v26 = vand.u32 4294901760, %v12198_v33 }
 0x212   :  { %12224 = vst [vmem:[#allocation39_spill] sm:$0xff] %v10699_v50  ;;  %v2438_v34 = vcombine.high %v12225_v63, %v12225_v63  ;;  %7488 = vmatprep.subr.bf16.mxu1 %v10380_v55  ;;  %v10731_v58 = vld [vmem:[%s11480_s0 + $0x308] sm:$0xff]  ;;  %v12226_v50 = vand.u32 4294901760, %v10667_v9  ;;  %v12231_v57 = vand.u32 4294901760, %v12199_v39  ;;  %v12232_v62 = vand.u32 4294901760, %v10678_v53 }
 0x213   :  { %v12240_v33 = vand.u32 4294901760, %v12202_v61 }
 0x214   :  { %v10753_v14 = vpack.c.bf16 %v12227_v38, %v12226_v50  ;;  %4756 = vmatmul.mubr.f32.vlgmr.msra.gmra.mrb[18].mxu1 %v12229_v44  ;;  %7418 = vmatpush3.bf16.msra.mxu0 %v7417_v13  ;;  %v7455_v55 = vpack.c.bf16 %v12231_v57, %v12230_v26  ;;  %v10767_v63 = vpack.c.bf16 %v12233_v18, %v12232_v62  ;;  %v10777_v50 = vld [vmem:[%s11480_s0 + $0x310] sm:$0xff]  ;;  %v10782_v18 = vld [vmem:[%s11480_s0 + $0x318] sm:$0xff]  ;;  %v12236_v13 = vand.u32 4294901760, %v10693_v22 }
 0x215   :  { %7490 = vmatpush3.bf16.msra.mxu1 %v10403_v32  ;;  %5026 = vmatprep.mubr.f32.mxu1 %v10304_v20  ;;  %v12235_v32 = vand.u32 4294901760, %v10688_v47  ;;  %v11708_v44 = vand.u32 4294901760, %v10745_v46  ;;  %v12238_v26 = vand.u32 4294901760, %v12200_v19  ;;  %v12239_v57 = vand.u32 4294901760, %v12201_v28 }
 0x216   :  { %12228 = vst [vmem:[#allocation41_spill] sm:$0xff] %v10753_v14  ;;  %12234 = vst [vmem:[#allocation5_spill] sm:$0xff] %v10767_v63  ;;  %7420 = vmatprep.subr.bf16.mxu0 %v7419_v42  ;;  %7492 = vmatprep.subr.bf16.mxu1 %v10410_v36  ;;  %v12241_v38 = vand.u32 4294901760, %v12203_v35  ;;  %v10800_v56 = vand.u32 4294901760, %v2438_v34  ;;  %v12244_v36 = vand.u32 4294901760, %v10712_v17  ;;  %v11707_v28 = vand.u32 4294901760, %v10777_v50 }
 0x217   :  { %v10788_v62 = vpack.c.bf16 %v12236_v13, %v12235_v32  ;;  %v7457_v39 = vpack.c.bf16 %v12239_v57, %v12238_v26  ;;  %v12242_v32 = vand.u32 4294901760, %v10707_v29  ;;  %v11706_v61 = vand.u32 4294901760, %v10782_v18  ;;  %v11006_v14 = vld [vmem:[%s11480_s0 + $0x3c8] sm:$0xff] }
 0x218   :  { %v7459_v48 = vpack.c.bf16 %v12241_v38, %v12240_v33  ;;  %7422 = vmatpush3.bf16.msra.mxu0 %v7421_v5  ;;  %v10810_v19 = vsub.f32 %v10712_v17, %v12244_v36  ;;  %v12246_v35 = vand.u32 4294901760, %v10726_v41  ;;  %v12248_v38 = vand.u32 4294901760, %v10731_v58  ;;  %v10844_v36 = vld [vmem:[%s11480_s0 + $0x3a0] sm:$0xff] }
 0x219   :  { %12237 = vst [vmem:[#allocation6_spill] sm:$0xff] %v10788_v62  ;;  %v10805_v42 = vsub.f32 %v10707_v29, %v12242_v32  ;;  %7494 = vmatpush3.bf16.msra.mxu1 %v10430_v21  ;;  %7456 = vmatprep.subr.bf16.mxu0 %v7455_v55  ;;  %v12250_v13 = vand.u32 4294901760, %v10736_v23  ;;  %v10834_v21 = vsub.f32 %v10745_v46, %v11708_v44  ;;  %v12253_v55 = vand.u32 4294901760, %v12204_v52 }
 0x21a   :  { %12245 = vst [vmem:[#allocation8_spill] sm:$0xff] %v10810_v19  ;;  %v10818_v5 = vsub.f32 %v10726_v41, %v12246_v35  ;;  %v10823_v33 = vsub.f32 %v10731_v58, %v12248_v38  ;;  %7496 = vmatprep.subr.bf16.mxu1 %v10444_v59  ;;  %v12254_v57 = vand.u32 4294901760, %v12205_v60  ;;  %v10849_v59 = vld [vmem:[%s11480_s0 + $0x3a8] sm:$0xff]  ;;  %v10852_v35 = vsub.f32 %v2438_v34, %v10800_v56  ;;  %v10870_v34 = vld [vmem:[%s11480_s0 + $0x320] sm:$0xff] }
 0x21b   :  { %12243 = vst [vmem:[#allocation7_spill] sm:$0xff] %v10805_v42  ;;  %v10828_v26 = vsub.f32 %v10736_v23, %v12250_v13  ;;  %12252 = vst [vmem:[#allocation27_spill] sm:$0xff] %v10834_v21  ;;  %4648 = vmatmul.mubr.f32.vlgmr.msra.gmra.mrb[18].mxu0 %v10531_v45  ;;  %v11710_v45 = vand.u32 4294901760, %v10805_v42  ;;  %v11709_v52 = vand.u32 4294901760, %v10810_v19  ;;  %v10860_v60 = vsub.f32 %v10777_v50, %v11707_v28 }
 0x21c   :  { %12247 = vst [vmem:[#allocation44_spill] sm:$0xff] %v10818_v5  ;;  %12249 = vst [vmem:[#allocation23_spill] sm:$0xff] %v10823_v33  ;;  %v7461_v32 = vpack.c.bf16 %v12254_v57, %v12253_v55  ;;  %7458 = vmatpush3.bf16.msra.mxu0 %v7457_v39  ;;  %4922 = vmatprep.mubr.f32.mxu0 %v10304_v20  ;;  %v10865_v38 = vsub.f32 %v10782_v18, %v11706_v61  ;;  %v12258_v20 = vand.u32 4294901760, %v12206_v8 }
 0x21d   :  { %12251 = vst [vmem:[#allocation24_spill] sm:$0xff] %v10828_v26  ;;  %12255 = vst [vmem:[#allocation28_spill] sm:$0xff] %v10852_v35  ;;  %7498 = vmatpush3.bf16.msra.mxu1 %v10456_v0  ;;  %7460 = vmatprep.subr.bf16.mxu0 %v7459_v48  ;;  %v12259_v39 = vand.u32 4294901760, %v12207_v10  ;;  %v11711_v55 = vand.u32 4294901760, %v10818_v5  ;;  %v11712_v28 = vand.u32 4294901760, %v10834_v21  ;;  %v11713_v44 = vand.u32 4294901760, %v10844_v36 }
 0x21e   :  { %12256 = vst [vmem:[#allocation29_spill] sm:$0xff] %v10860_v60  ;;  %12257 = vst [vmem:[#allocation30_spill] sm:$0xff] %v10865_v38  ;;  %7500 = vmatprep.subr.bf16.mxu1 %v10463_v3  ;;  %v12260_v48 = vand.u32 4294901760, %v10287_v16  ;;  %v12261_v8 = vand.u32 4294901760, %v10292_v51  ;;  %v11714_v61 = vand.u32 4294901760, %v10870_v34  ;;  %v5261_v3 = vsub.f32 %v10805_v42, %v11710_v45 }
 0x21f   :  { %v7463_v13 = vpack.c.bf16 %v12259_v39, %v12258_v20  ;;  %v12262_v20 = vand.u32 4294901760, %v10299_v37  ;;  %v12263_v39 = vand.u32 4294901760, %v10309_v11  ;;  %v5268_v0 = vsub.f32 %v10810_v19, %v11709_v52  ;;  %v10904_v37 = vld [vmem:[%s11480_s0 + $0x328] sm:$0xff]  ;;  %v10909_v11 = vld [vmem:[%s11480_s0 + $0x3b0] sm:$0xff] }
 0x220   :  { %v7465_v10 = vpack.c.bf16 %v12261_v8, %v12260_v48  ;;  %7462 = vmatpush3.bf16.msra.mxu0 %v7461_v32  ;;  %v10914_v32 = vld [vmem:[%s11480_s0 + $0x3b8] sm:$0xff]  ;;  %v5149_v48 = vsub.f32 %v10818_v5, %v11711_v55  ;;  %v12264_v8 = vand.u32 4294901760, %v10823_v33  ;;  %v12266_v51 = vand.u32 4294901760, %v10332_v6 }
 0x221   :  { %v7467_v57 = vpack.c.bf16 %v12263_v39, %v12262_v20  ;;  %7502 = vmatpush3.bf16.msra.mxu1 %v10483_v1  ;;  %7464 = vmatprep.subr.bf16.mxu0 %v7463_v13  ;;  %v12265_v39 = vand.u32 4294901760, %v10828_v26  ;;  %v12267_v1 = vand.u32 4294901760, %v10337_v24  ;;  %v5282_v55 = vsub.f32 %v10834_v21, %v11712_v28  ;;  %v12284_v21 = vld [vmem:[#allocation25_spill] sm:$0xff] }
 0x222   :  { %v5156_v20 = vsub.f32 %v10823_v33, %v12264_v8  ;;  %7504 = vmatprep.subr.bf16.mxu1 %v10489_v2  ;;  %v10938_v8 = vsub.f32 %v10844_v36, %v11713_v44  ;;  %v10949_v6 = vsub.f32 %v10870_v34, %v11714_v61  ;;  %v12273_v28 = vand.u32 4294901760, %v10352_v15  ;;  %v10967_v15 = vld [vmem:[%s11480_s0 + $0x330] sm:$0xff] }
 0x223   :  { %v5275_v52 = vsub.f32 %v10828_v26, %v12265_v39  ;;  %v7469_v13 = vpack.c.bf16 %v12267_v1, %v12266_v51  ;;  %v12269_v39 = vand.u32 4294901760, %v10849_v59  ;;  %v12272_v1 = vand.u32 4294901760, %v10347_v54  ;;  %v6048_v54 = vpop.f32.mrb[6].mxu1 }
 0x224   :  { %12268 = vst [vmem:[#allocation36_spill] sm:$0xff] %v10938_v8  ;;  %12271 = vst [vmem:[#allocation38_spill] sm:$0xff] %v10949_v6  ;;  %7466 = vmatpush3.bf16.msra.mxu0 %v7465_v10  ;;  %v5262_v16 = vand.u32 4294901760, %v5261_v3  ;;  %v12275_v62 = vand.u32 4294901760, %v10865_v38  ;;  %v5269_v24 = vand.u32 4294901760, %v5268_v0  ;;  %v5150_v51 = vand.u32 4294901760, %v5149_v48 }
 0x225   :  { %v10943_v45 = vsub.f32 %v10849_v59, %v12269_v39  ;;  %v7471_v44 = vpack.c.bf16 %v12273_v28, %v12272_v1  ;;  %v12274_v39 = vand.u32 4294901760, %v10860_v60  ;;  %7506 = vmatpush3.bf16.msra.mxu1 %v10503_v25  ;;  %7468 = vmatprep.subr.bf16.mxu0 %v7467_v57  ;;  %v5157_v10 = vand.u32 4294901760, %v5156_v20  ;;  %v12276_v28 = vld [vmem:[#allocation18_spill] sm:$0xff]  ;;  %v10985_v0 = vld [vmem:[%s11480_s0 + $0x3c0] sm:$0xff] }
 0x226   :  { %v5170_v61 = vsub.f32 %v10865_v38, %v12275_v62  ;;  %v5276_v63 = vand.u32 4294901760, %v5275_v52  ;;  %7508 = vmatprep.subr.bf16.mxu1 %v12276_v28  ;;  %v5283_v3 = vand.u32 4294901760, %v5282_v55  ;;  %v12277_v25 = vand.u32 4294901760, %v10852_v35  ;;  %v10980_v52 = vld [vmem:[%s11480_s0 + $0x338] sm:$0xff]  ;;  %v6049_v55 = vpop.f32.mrb[7].mxu1 }
 0x227   :  { %12270 = vst [vmem:[#allocation37_spill] sm:$0xff] %v10943_v45  ;;  %v5163_v2 = vsub.f32 %v10860_v60, %v12274_v39  ;;  %v12278_v20 = vand.u32 4294901760, %v10904_v37  ;;  %v12280_v28 = vand.u32 4294901760, %v10909_v11  ;;  %v12282_v62 = vand.u32 4294901760, %v10914_v32 }
 0x228   :  { %v10975_v57 = vsub.f32 %v10852_v35, %v12277_v25  ;;  %v11008_v48 = vadd.f32 %v6049_v55, %v6048_v54  ;;  %7470 = vmatpush3.bf16.msra.mxu0 %v7469_v13  ;;  %v5171_v38 = vand.u32 4294901760, %v5170_v61  ;;  %v11725_v60 = vand.u32 4294901760, %v10967_v15  ;;  %v11019_v54 = vld [vmem:[%s11480_s0 + $0x340] sm:$0xff]  ;;  %v11024_v61 = vld [vmem:[%s11480_s0 + $0x348] sm:$0xff] }
 0x229   :  { %v10991_v39 = vsub.f32 %v10904_v37, %v12278_v20  ;;  %v10996_v25 = vsub.f32 %v10909_v11, %v12280_v28  ;;  %v11001_v1 = vsub.f32 %v10914_v32, %v12282_v62  ;;  %v5164_v20 = vand.u32 4294901760, %v5163_v2  ;;  %7510 = vmatpush3.bf16.msra.mxu1 %v12284_v21  ;;  %7472 = vmatprep.subr.bf16.mxu0 %v7471_v44  ;;  %v6013_v62 = vpop.f32.mrb[6].mxu0 }
 0x22a   :  { %v7551_v28 = vpack.c.bf16 %v5269_v24, %v5262_v16  ;;  %v11012_v26 = vpack.c.bf16 %v5157_v10, %v5150_v51  ;;  %7512 = vmatprep.subr.bf16.mxu1 %v10527_v4  ;;  %v11027_v44 = vpack.c.bf16 %v5283_v3, %v5276_v63  ;;  %v12285_v21 = vand.u32 4294901760, %v10938_v8  ;;  %v11039_v51 = vld [vmem:[%s11480_s0 + $0x3d0] sm:$0xff]  ;;  %v11044_v4 = vld [vmem:[%s11480_s0 + $0x3d8] sm:$0xff] }
 0x22b   :  { %12279 = vst [vmem:[#allocation40_spill] sm:$0xff] %v10991_v39  ;;  %12281 = vst [vmem:[#allocation12_spill] sm:$0xff] %v10996_v25  ;;  %v12286_v13 = vand.u32 4294901760, %v10943_v45  ;;  %v12289_v63 = vand.u32 4294901760, %v10949_v6  ;;  %v11055_v24 = vpack.c.bf16 %v5171_v38, %v5164_v20  ;;  %v11060_v33 = vsub.f32 %v10967_v15, %v11725_v60  ;;  %v12291_v3 = vld [vmem:[#allocation43_spill] sm:$0xff] }
 0x22c   :  { %12283 = vst [vmem:[#allocation14_spill] sm:$0xff] %v11001_v1  ;;  %v5289_v16 = vsub.f32 %v10938_v8, %v12285_v21  ;;  %12287 = vst [vmem:[#allocation47_spill] sm:$0xff] %v11039_v51  ;;  %v12292_v55 = vand.u32 4294901760, %v10980_v52  ;;  %v12293_v38 = vand.u32 4294901760, %v10985_v0  ;;  %v6014_v8 = vpop.f32.mrb[7].mxu0  ;;  %v12297_v60 = vand.u32 4294901760, %v10991_v39 }
 0x22d   :  { %v5296_v2 = vsub.f32 %v10943_v45, %v12286_v13  ;;  %12288 = vst [vmem:[#allocation48_spill] sm:$0xff] %v11044_v4  ;;  %v11049_v10 = vsub.f32 %v10949_v6, %v12289_v63  ;;  %v12290_v13 = vld [vmem:[#allocation42_spill] sm:$0xff]  ;;  %7514 = vmatpush3.bf16.msra.mxu1 %v10538_v31  ;;  %v12294_v31 = vand.u32 4294901760, %v10707_v29  ;;  %v12296_v45 = vand.u32 4294901760, %v11006_v14 }
 0x22e   :  { %7474 = vmatpush3.bf16.msra.mxu0 %v12290_v13  ;;  %v11069_v21 = vsub.f32 %v10980_v52, %v12292_v55  ;;  %v11074_v20 = vsub.f32 %v10985_v0, %v12293_v38  ;;  %7516 = vmatprep.subr.bf16.mxu1 %v10547_v43  ;;  %v5290_v55 = vand.u32 4294901760, %v5289_v16  ;;  %v5184_v43 = vsub.f32 %v10991_v39, %v12297_v60  ;;  %v12300_v60 = vld [vmem:[#allocation45_spill] sm:$0xff] }
 0x22f   :  { %7476 = vmatprep.subr.bf16.mxu0 %v12291_v3  ;;  %v12295_v3 = vand.u32 4294901760, %v10712_v17  ;;  %v5297_v6 = vand.u32 4294901760, %v5296_v2  ;;  %v11088_v38 = vsub.f32 %v11006_v14, %v12296_v45  ;;  %v5178_v13 = vand.u32 4294901760, %v11049_v10  ;;  %v11103_v45 = vld [vmem:[%s11480_s0 + $0x3e0] sm:$0xff]  ;;  %v11108_v2 = vld [vmem:[%s11480_s0 + $0x3e8] sm:$0xff]  ;;  %s7780_s0 = smov [#allocation2]  }
 0x230   :  { %v12298_v29 = vand.u32 4294901760, %v10996_v25  ;;  %v6015_v10 = vadd.f32 %v6014_v8, %v6013_v62  ;;  %v12303_v39 = vld [vmem:[#allocation9_spill] sm:$0xff]  ;;  %v11750_v8 = vand.u32 4294901760, %v11108_v2  ;;  %v5185_v19 = vand.u32 4294901760, %v5184_v43  ;;  %s5903_s28 = sshll.u32 %s7780_s0, 4  ;;  %s5904_s28 = int_to_ptr.vmem [resolvable:$true] %s5903_s28 }
 0x231   :  { %v11083_v63 = vpack.c.bf16 %v12295_v3, %v12294_v31  ;;  %v12299_v31 = vand.u32 4294901760, %v11001_v1  ;;  %7518 = vmatpush3.bf16.msra.mxu1 %v10555_v12  ;;  %v11748_v12 = vand.u32 4294901760, %v11088_v38  ;;  %v7559_v62 = vpack.c.bf16 %v5297_v6, %v5290_v55  ;;  %s7754_s29 = scalar_lea.vmem %s5904_s28, 32  ;;  %p7759_p1 = scmp.lt.s32.totalorder %s5904_s28, %s5904_s28 }
 0x232   :  { %v5303_v17 = vsub.f32 %v10996_v25, %v12298_v29  ;;  %7478 = vmatpush3.bf16.msra.mxu0 %v12300_v60  ;;  %v12301_v29 = vand.u32 4294901760, %v11019_v54  ;;  %v12304_v60 = vand.u32 4294901760, %v11039_v51  ;;  %7552 = vmatprep.subr.bf16.mxu1 %v7551_v28  ;;  %v12309_v6 = vand.u32 4294901760, %v11069_v21  ;;  %p7755_p0 = scmp.ne.s32.totalorder %s5904_s28, %s7754_s29  ;;  %p7760_p2 = scmp.lt.s32.totalorder %s7754_s29, %s7754_s29 }
 0x233   :  { %v5310_v16 = vsub.f32 %v11001_v1, %v12299_v31  ;;  %v12302_v31 = vand.u32 4294901760, %v11024_v61  ;;  %7480 = vmatprep.subr.bf16.mxu0 %v12303_v39  ;;  %v11749_v39 = vand.u32 4294901760, %v11103_v45  ;;  %v7561_v28 = vpack.c.bf16 %v5185_v19, %v5178_v13 }
 0x234   :  { %v11115_v25 = vsub.f32 %v11019_v54, %v12301_v29  ;;  %v11129_v3 = vsub.f32 %v11039_v51, %v12304_v60  ;;  %v12305_v29 = vand.u32 4294901760, %v11044_v4  ;;  %v5304_v42 = vand.u32 4294901760, %v5303_v17  ;;  %v12306_v60 = vld [vmem:[#allocation19_spill] sm:$0xff]  ;;  %p7761_p3 = por %p7760_p2, %p7759_p1 }
 0x235   :  { %v11120_v1 = vsub.f32 %v11024_v61, %v12302_v31  ;;  %v2926_v31 = vadd.f32 %v6015_v10, %v10718_v40  ;;  %v5311_v35 = vand.u32 4294901760, %v5310_v16  ;;  %5028 = vmatmul.mubr.f32.vlgmr.msra.gmra.mrb[20].mxu1 %v12306_v60  ;;  %v12307_v51 = vld [vmem:[#allocation11_spill] sm:$0xff]  ;;  %v5198_v55 = vsub.f32 %v11069_v21, %v12309_v6 }
 0x236   :  { %v11134_v5 = vsub.f32 %v11044_v4, %v12305_v29  ;;  %7482 = vmatpush3.bf16.msra.mxu0 %v12307_v51  ;;  %v12308_v29 = vand.u32 4294901760, %v11060_v33  ;;  %7554 = vmatpush3.bf16.msra.mxu1 %v11012_v26  ;;  %v12310_v51 = vand.u32 4294901760, %v11074_v20  ;;  %v5324_v26 = vsub.f32 %v11088_v38, %v11748_v12  ;;  %p7762_p4 = pnand %p7761_p3, %p7755_p0 }
 0x237   :  { %v11148_v10 = vadd.f32 %v11008_v48, %v2926_v31  ;;  %5370 = vmatprep.mubr.f32.mxu1 %v10800_v56  ;;  %7556 = vmatprep.subr.bf16.mxu1 %v11027_v44  ;;  %v11168_v48 = vsub.f32 %v11103_v45, %v11749_v39  ;;  %v11173_v31 = vsub.f32 %v11108_v2, %v11750_v8  ;;  %v12312_v6 = vand.u32 4294901760, %v10726_v41  ;;  %v12316_v39 = vld [vmem:[#allocation10_spill] sm:$0xff] }
 0x238   :  { %v5191_v4 = vsub.f32 %v11060_v33, %v12308_v29  ;;  %v5317_v43 = vsub.f32 %v11074_v20, %v12310_v51  ;;  %v12311_v29 = vld [vmem:[#allocation13_spill] sm:$0xff]  ;;  %v12313_v51 = vand.u32 4294901760, %v10731_v58  ;;  %v5133_v44 = vand.u32 4294901760, %v10975_v57 }
 0x239   :  { %7484 = vmatprep.subr.bf16.mxu0 %v12311_v29  ;;  %v12314_v12 = vand.u32 4294901760, %v10736_v23  ;;  %v12315_v16 = vand.u32 4294901760, %v10745_v46  ;;  %v7563_v40 = vpack.c.bf16 %v5311_v35, %v5304_v42  ;;  %v12317_v8 = vand.u32 4294901760, %v11115_v25 }
 0x23a   :  { %v11179_v29 = vpack.c.bf16 %v12313_v51, %v12312_v6  ;;  %7486 = vmatpush3.bf16.msra.mxu0 %v12316_v39  ;;  %v12318_v58 = vand.u32 4294901760, %v11120_v1  ;;  %7558 = vmatpush3.bf16.msra.mxu1 %v11055_v24  ;;  %v5192_v23 = vand.u32 4294901760, %v5191_v4  ;;  %v5199_v46 = vand.u32 4294901760, %v5198_v55 }
 0x23b   :  { %v11186_v17 = vpack.c.bf16 %v12315_v16, %v12314_v12  ;;  %v5205_v41 = vsub.f32 %v11115_v25, %v12317_v8  ;;  %7520 = vmatprep.subr.bf16.mxu0 %v11083_v63  ;;  %v12319_v57 = vand.u32 4294901760, %v11129_v3  ;;  %v12320_v42 = vand.u32 4294901760, %v11134_v5  ;;  %7560 = vmatprep.subr.bf16.mxu1 %v7559_v62 }
 0x23c   :  { %v5212_v6 = vsub.f32 %v11120_v1, %v12318_v58  ;;  %v5318_v35 = vand.u32 4294901760, %v5317_v43  ;;  %v5325_v13 = vand.u32 4294901760, %v5324_v26  ;;  %v5344_v8 = vand.u32 4294901760, %v11168_v48 }
 0x23d   :  { %v5331_v12 = vsub.f32 %v11129_v3, %v12319_v57  ;;  %v5338_v19 = vsub.f32 %v11134_v5, %v12320_v42  ;;  %v5351_v39 = vand.u32 4294901760, %v11173_v31  ;;  %4924 = vmatmul.mubr.f32.vlgmr.msra.gmra.mrb[20].mxu0 %v12306_v60  ;;  %v12321_v24 = vand.u32 4294901760, %v10777_v50 }
 0x23e   :  { %v12322_v4 = vand.u32 4294901760, %v10782_v18  ;;  %7522 = vmatpush3.bf16.msra.mxu0 %v11179_v29  ;;  %5134 = vmatprep.mubr.f32.mxu0 %v5133_v44  ;;  %v5206_v16 = vand.u32 4294901760, %v5205_v41  ;;  %v5213_v51 = vand.u32 4294901760, %v5212_v6  ;;  %v12323_v62 = vand.u32 4294901760, %v10643_v49 }
 0x23f   :  { %v12324_v26 = vand.u32 4294901760, %v10648_v7  ;;  %7562 = vmatpush3.bf16.msra.mxu1 %v7561_v28  ;;  %7524 = vmatprep.subr.bf16.mxu0 %v11186_v17  ;;  %v7565_v50 = vpack.c.bf16 %v5199_v46, %v5192_v23  ;;  %v12325_v18 = vand.u32 4294901760, %v10844_v36  ;;  %v12326_v60 = vand.u32 4294901760, %v10849_v59 }
 0x240   :  { %v11210_v55 = vpack.c.bf16 %v12322_v4, %v12321_v24  ;;  %v5219_v43 = vsub.f32 %v10643_v49, %v12323_v62  ;;  %v5332_v44 = vand.u32 4294901760, %v5331_v12  ;;  %v5339_v41 = vand.u32 4294901760, %v5338_v19  ;;  %7564 = vmatprep.subr.bf16.mxu1 %v7563_v40 }
 0x241   :  { %v5226_v58 = vsub.f32 %v10648_v7, %v12324_v26  ;;  %v11224_v57 = vpack.c.bf16 %v12326_v60, %v12325_v18  ;;  %v7567_v6 = vpack.c.bf16 %v5325_v13, %v5318_v35  ;;  %v5345_v42 = vsub.f32 %v11168_v48, %v5344_v8 }
 0x242   :  { %v5352_v28 = vsub.f32 %v11173_v31, %v5351_v39  ;;  %v12327_v23 = vand.u32 4294901760, %v10870_v34  ;;  %v12328_v36 = vand.u32 4294901760, %v10904_v37  ;;  %7526 = vmatpush3.bf16.msra.mxu0 %v11210_v55  ;;  %v7569_v59 = vpack.c.bf16 %v5213_v51, %v5206_v16 }
 0x243   :  { %v12329_v40 = vand.u32 4294901760, %v10909_v11  ;;  %v12330_v12 = vand.u32 4294901760, %v10914_v32  ;;  %v5220_v35 = vand.u32 4294901760, %v5219_v43  ;;  %v5227_v13 = vand.u32 4294901760, %v5226_v58  ;;  %7566 = vmatpush3.bf16.msra.mxu1 %v7565_v50  ;;  %7528 = vmatprep.subr.bf16.mxu0 %v11224_v57 }
 0x244   :  { %v11236_v46 = vpack.c.bf16 %v12328_v36, %v12327_v23  ;;  %v7571_v24 = vpack.c.bf16 %v5339_v41, %v5332_v44  ;;  %v12331_v34 = vand.u32 4294901760, %v10667_v9  ;;  %v12332_v4 = vand.u32 4294901760, %v10672_v30  ;;  %7568 = vmatprep.subr.bf16.mxu1 %v7567_v6 }
 0x245   :  { %v11243_v19 = vpack.c.bf16 %v12330_v12, %v12329_v40  ;;  %v5346_v11 = vand.u32 4294901760, %v5345_v42  ;;  %v5353_v51 = vand.u32 4294901760, %v5352_v28  ;;  %v12333_v32 = vand.u32 4294901760, %v10678_v53 }
 0x246   :  { %v5233_v37 = vsub.f32 %v10667_v9, %v12331_v34  ;;  %v5240_v16 = vsub.f32 %v10672_v30, %v12332_v4  ;;  %v12334_v43 = vand.u32 4294901760, %v10683_v27  ;;  %7530 = vmatpush3.bf16.msra.mxu0 %v11236_v46  ;;  %v12335_v58 = vand.u32 4294901760, %v10967_v15 }
 0x247   :  { %v5359_v62 = vsub.f32 %v10678_v53, %v12333_v32  ;;  %v12336_v50 = vand.u32 4294901760, %v10980_v52  ;;  %v7573_v60 = vpack.c.bf16 %v5227_v13, %v5220_v35  ;;  %v12337_v44 = vand.u32 4294901760, %v10985_v0  ;;  %7570 = vmatpush3.bf16.msra.mxu1 %v7569_v59  ;;  %7532 = vmatprep.subr.bf16.mxu0 %v11243_v19 }
 0x248   :  { %v5366_v26 = vsub.f32 %v10683_v27, %v12334_v43  ;;  %v12338_v41 = vand.u32 4294901760, %v11006_v14  ;;  %v5234_v42 = vand.u32 4294901760, %v5233_v37  ;;  %v5241_v28 = vand.u32 4294901760, %v5240_v16  ;;  %7572 = vmatprep.subr.bf16.mxu1 %v7571_v24  ;;  %v6118_v14 = vpop.f32.mrb[8].mxu1  ;;  %v12343_v37 = vld [vmem:[#allocation47_spill] sm:$0xff]  ;;  %v12345_v16 = vld [vmem:[#allocation48_spill] sm:$0xff] }
 0x249   :  { %v11263_v18 = vpack.c.bf16 %v12336_v50, %v12335_v58  ;;  %v12339_v23 = vand.u32 4294901760, %v10688_v47  ;;  %v12340_v52 = vand.u32 4294901760, %v10693_v22  ;;  %v7575_v40 = vpack.c.bf16 %v5353_v51, %v5346_v11  ;;  %v6119_v35 = vpop.f32.mrb[9].mxu1  ;;  %v12347_v24 = vld [vmem:[#allocation46_spill] sm:$0xff]  ;;  %v12348_v58 = vld [vmem:[#allocation20_spill] sm:$0xff] }
 0x24a   :  { %v11269_v6 = vpack.c.bf16 %v12338_v41, %v12337_v44  ;;  %v5360_v0 = vand.u32 4294901760, %v5359_v62  ;;  %v5367_v12 = vand.u32 4294901760, %v5366_v26  ;;  %v12341_v59 = vand.u32 4294901760, %v11019_v54  ;;  %v12350_v44 = vld [vmem:[#allocation26_spill] sm:$0xff] }
 0x24b   :  { %v5247_v15 = vsub.f32 %v10688_v47, %v12339_v23  ;;  %v5254_v36 = vsub.f32 %v10693_v22, %v12340_v52  ;;  %7534 = vmatpush3.bf16.msra.mxu0 %v11263_v18  ;;  %v12342_v13 = vand.u32 4294901760, %v11024_v61  ;;  %v12344_v4 = vand.u32 4294901760, %v12343_v37  ;;  %7574 = vmatpush3.bf16.msra.mxu1 %v7573_v60  ;;  %v12358_v37 = vld [vmem:[#allocation31_spill] sm:$0xff] }
 0x24c   :  { %v12346_v32 = vand.u32 4294901760, %v12345_v16  ;;  %v11292_v11 = vand.u32 4294901760, %v12347_v24  ;;  %v6120_v51 = vadd.f32 %v6119_v35, %v6118_v14  ;;  %7536 = vmatprep.subr.bf16.mxu0 %v11269_v6  ;;  %v7577_v62 = vpack.c.bf16 %v5241_v28, %v5234_v42  ;;  %7576 = vmatprep.subr.bf16.mxu1 %v7575_v40  ;;  %v12356_v35 = vld [vmem:[#allocation21_spill] sm:$0xff]  ;;  %v12360_v16 = vld [vmem:[#allocation34_spill] sm:$0xff] }
 0x24d   :  { %v11283_v34 = vpack.c.bf16 %v12342_v13, %v12341_v59  ;;  %v5248_v26 = vand.u32 4294901760, %v5247_v15  ;;  %v5255_v54 = vand.u32 4294901760, %v5254_v36  ;;  %v7579_v61 = vpack.c.bf16 %v5367_v12, %v5360_v0  ;;  %v6083_v36 = vpop.f32.mrb[8].mxu0  ;;  %v12354_v12 = vld [vmem:[#allocation33_spill] sm:$0xff] }
 0x24e   :  { %v11289_v43 = vpack.c.bf16 %v12346_v32, %v12344_v4  ;;  %v12349_v50 = vand.u32 4294901760, %v12348_v58  ;;  %v12351_v41 = vand.u32 4294901760, %v12350_v44  ;;  %v12352_v60 = vand.u32 4294901760, %v11103_v45  ;;  %v6084_v40 = vpop.f32.mrb[9].mxu0 }
 0x24f   :  { %7538 = vmatpush3.bf16.msra.mxu0 %v11283_v34  ;;  %7578 = vmatpush3.bf16.msra.mxu1 %v7577_v62  ;;  %v7581_v52 = vpack.c.bf16 %v5255_v54, %v5248_v26  ;;  %v12353_v42 = vand.u32 4294901760, %v11108_v2  ;;  %v11311_v15 = vsub.f32 %v12347_v24, %v11292_v11  ;;  %v6085_v0 = vadd.f32 %v6084_v40, %v6083_v36  ;;  %v12362_v62 = vld [vmem:[#allocation32_spill] sm:$0xff]  ;;  %v12364_v54 = vld [vmem:[#allocation35_spill] sm:$0xff] }
 0x250   :  { %v11300_v23 = vpack.c.bf16 %v12351_v41, %v12349_v50  ;;  %7540 = vmatprep.subr.bf16.mxu0 %v11289_v43  ;;  %7580 = vmatprep.subr.bf16.mxu1 %v7579_v61  ;;  %v12355_v14 = vand.u32 4294901760, %v12354_v12  ;;  %v12357_v59 = vand.u32 4294901760, %v12356_v35  ;;  %v12359_v4 = vand.u32 4294901760, %v12358_v37  ;;  %v12370_v36 = vld [vmem:[#allocation44_spill] sm:$0xff] }
 0x251   :  { %v11307_v28 = vpack.c.bf16 %v12353_v42, %v12352_v60  ;;  %v5137_v45 = vand.u32 4294901760, %v11311_v15  ;;  %v3202_v2 = vadd.f32 %v6085_v0, %v11148_v10  ;;  %v12361_v32 = vand.u32 4294901760, %v12360_v16  ;;  %v12366_v10 = vld [vmem:[#allocation28_spill] sm:$0xff]  ;;  %v12377_v16 = vld [vmem:[#allocation37_spill] sm:$0xff] }
 0x252   :  { %v11318_v13 = vpack.c.bf16 %v12357_v59, %v12355_v14  ;;  %v12363_v26 = vand.u32 4294901760, %v12362_v62  ;;  %v12365_v61 = vand.u32 4294901760, %v12364_v54  ;;  %v12367_v44 = vand.u32 4294901760, %v12366_v10  ;;  %v12369_v60 = vld [vmem:[#allocation8_spill] sm:$0xff]  ;;  %v12373_v14 = vld [vmem:[#allocation27_spill] sm:$0xff]  ;;  %v12374_v59 = vld [vmem:[#allocation29_spill] sm:$0xff] }
 0x253   :  { %7542 = vmatpush3.bf16.msra.mxu0 %v11300_v23  ;;  %7582 = vmatpush3.bf16.msra.mxu1 %v7581_v52  ;;  %v11328_v24 = vpack.c.bf16 %v12361_v32, %v12359_v4  ;;  %v3306_v50 = vadd.f32 %v6120_v51, %v3202_v2  ;;  %v5138_v41 = vsub.f32 %v11311_v15, %v5137_v45  ;;  %v12368_v52 = vld [vmem:[#allocation7_spill] sm:$0xff]  ;;  %v12372_v12 = vld [vmem:[#allocation24_spill] sm:$0xff]  ;;  %v12375_v2 = vld [vmem:[#allocation30_spill] sm:$0xff] }
 0x254   :  { %7544 = vmatprep.subr.bf16.mxu0 %v11307_v28  ;;  %7616 = vmatprep.subr.bf16.mxu1 %v11083_v63  ;;  %v11336_v58 = vpack.c.bf16 %v12365_v61, %v12363_v26  ;;  %v7583_v42 = vpack.c.bf16 %v12369_v60, %v12368_v52  ;;  %v12371_v51 = vld [vmem:[#allocation23_spill] sm:$0xff]  ;;  %v7587_v35 = vpack.c.bf16 %v12373_v14, %v12372_v12  ;;  %v12376_v4 = vld [vmem:[#allocation36_spill] sm:$0xff]  ;;  %v12378_v62 = vld [vmem:[#allocation38_spill] sm:$0xff] }
 0x255   :  { %v7585_v40 = vpack.c.bf16 %v12371_v51, %v12370_v36  ;;  %v5139_v0 = vand.u32 4294901760, %v5138_v41  ;;  %v7589_v37 = vpack.c.bf16 %v12375_v2, %v12374_v59  ;;  %v7591_v32 = vpack.c.bf16 %v12377_v16, %v12376_v4  ;;  %v12379_v26 = vld [vmem:[#allocation40_spill] sm:$0xff] }
 0x256   :  { %5372 = vmatmul.mubr.f32.vlgmr.msra.gmra.mrb[22].mxu1 %v11292_v11  ;;  %v7593_v54 = vpack.c.bf16 %v12379_v26, %v12378_v62  ;;  %v12380_v61 = vld [vmem:[#allocation12_spill] sm:$0xff]  ;;  %v7597_v41 = vpack.c.bf16 %v11069_v21, %v11060_v33 }
 0x257   :  { %7546 = vmatpush3.bf16.msra.mxu0 %v11318_v13  ;;  %7618 = vmatpush3.bf16.msra.mxu1 %v11179_v29 }
 0x258   :  { %5614 = vmatprep.mubr.f32.mxu1 %v12367_v44  ;;  %7548 = vmatprep.subr.bf16.mxu0 %v11328_v24 }
 0x259   :  { %7620 = vmatprep.subr.bf16.mxu1 %v11186_v17 }
 0x25b   :  { %7550 = vmatpush3.bf16.msra.mxu0 %v11336_v58  ;;  %7622 = vmatpush3.bf16.msra.mxu1 %v11210_v55 }
 0x25c   :  { %7584 = vmatprep.subr.bf16.mxu0 %v7583_v42  ;;  %7624 = vmatprep.subr.bf16.mxu1 %v11224_v57  ;;  %v7599_v42 = vpack.c.bf16 %v11088_v38, %v11074_v20 }
 0x25e   :  { %5140 = vmatmul.mubr.f32.vlgmr.msra.gmra.mrb[22].mxu0 %v5139_v0 }
 0x25f   :  { %7586 = vmatpush3.bf16.msra.mxu0 %v7585_v40  ;;  %5507 = vmatprep.mubr.f32.mxu0 %v12366_v10  ;;  %v12381_v10 = vld [vmem:[#allocation14_spill] sm:$0xff] }
 0x260   :  { %7626 = vmatpush3.bf16.msra.mxu1 %v11236_v46  ;;  %7588 = vmatprep.subr.bf16.mxu0 %v7587_v35  ;;  %v7595_v44 = vpack.c.bf16 %v12381_v10, %v12380_v61  ;;  %v7601_v35 = vpack.c.bf16 %v11120_v1, %v11115_v25 }
 0x261   :  { %7628 = vmatprep.subr.bf16.mxu1 %v11243_v19 }
 0x263   :  { %7590 = vmatpush3.bf16.msra.mxu0 %v7589_v37  ;;  %v6188_v40 = vpop.f32.mrb[10].mxu1 }
 0x264   :  { %7630 = vmatpush3.bf16.msra.mxu1 %v11263_v18  ;;  %7592 = vmatprep.subr.bf16.mxu0 %v7591_v32  ;;  %v6189_v0 = vpop.f32.mrb[11].mxu1  ;;  %v7603_v32 = vpack.c.bf16 %v11134_v5, %v11129_v3 }
 0x265   :  { %7632 = vmatprep.subr.bf16.mxu1 %v11269_v6  ;;  %v6190_v37 = vadd.f32 %v6189_v0, %v6188_v40  ;;  %v7609_v0 = vpack.c.bf16 %v10672_v30, %v10667_v9  ;;  %v12382_v9 = vand.u32 4294901760, %v12368_v52  ;;  %v12383_v30 = vand.u32 4294901760, %v12369_v60 }
 0x266   :  { %v12391_v60 = vand.u32 4294901760, %v12377_v16 }
 0x267   :  { %7594 = vmatpush3.bf16.msra.mxu0 %v7593_v54  ;;  %v7605_v54 = vpack.c.bf16 %v10648_v7, %v10643_v49  ;;  %v7611_v49 = vpack.c.bf16 %v10683_v27, %v10678_v53  ;;  %v7613_v7 = vpack.c.bf16 %v10693_v22, %v10688_v47  ;;  %v12384_v53 = vand.u32 4294901760, %v12370_v36 }
 0x268   :  { %7634 = vmatpush3.bf16.msra.mxu1 %v11283_v34  ;;  %7596 = vmatprep.subr.bf16.mxu0 %v7595_v44  ;;  %v7607_v44 = vpack.c.bf16 %v11173_v31, %v11168_v48  ;;  %v12385_v27 = vand.u32 4294901760, %v12371_v51  ;;  %v12386_v22 = vand.u32 4294901760, %v12372_v12  ;;  %v12387_v47 = vand.u32 4294901760, %v12373_v14  ;;  %v12406_v48 = vld [vmem:[#allocation5_spill] sm:$0xff]  ;;  %v12407_v31 = vld [vmem:[#allocation6_spill] sm:$0xff] }
 0x269   :  { %7636 = vmatprep.subr.bf16.mxu1 %v11289_v43  ;;  %v12394_v51 = vand.u32 4294901760, %v12380_v61  ;;  %v12396_v14 = vand.u32 4294901760, %v11060_v33  ;;  %v12401_v33 = vand.u32 4294901760, %v11120_v1  ;;  %v7671_v1 = vpack.c.bf16 %v5351_v39, %v5344_v8 }
 0x26b   :  { %7598 = vmatpush3.bf16.msra.mxu0 %v7597_v41 }
 0x26c   :  { %7638 = vmatpush3.bf16.msra.mxu1 %v11300_v23  ;;  %7600 = vmatprep.subr.bf16.mxu0 %v7599_v42  ;;  %v6153_v41 = vpop.f32.mrb[10].mxu0 }
 0x26d   :  { %7640 = vmatprep.subr.bf16.mxu1 %v11307_v28  ;;  %v6154_v40 = vpop.f32.mrb[11].mxu0 }
 0x26e   :  { %v6155_v42 = vadd.f32 %v6154_v40, %v6153_v41 }
 0x26f   :  { %7602 = vmatpush3.bf16.msra.mxu0 %v7601_v35 }
 0x270   :  { %7642 = vmatpush3.bf16.msra.mxu1 %v11318_v13  ;;  %7604 = vmatprep.subr.bf16.mxu0 %v7603_v32  ;;  %v3418_v35 = vadd.f32 %v6155_v42, %v3306_v50  ;;  %v12389_v50 = vand.u32 4294901760, %v12375_v2  ;;  %v12398_v2 = vand.u32 4294901760, %v11074_v20  ;;  %v12403_v20 = vand.u32 4294901760, %v11134_v5 }
 0x271   :  { %7644 = vmatprep.subr.bf16.mxu1 %v11328_v24 }
 0x272   :  { %v3650_v32 = vadd.f32 %v6190_v37, %v3418_v35 }
 0x273   :  { %7606 = vmatpush3.bf16.msra.mxu0 %v7605_v54 }
 0x274   :  { %7646 = vmatpush3.bf16.msra.mxu1 %v11336_v58  ;;  %7608 = vmatprep.subr.bf16.mxu0 %v7607_v44 }
 0x275   :  { %7680 = vmatprep.subr.bf16.mxu1 %v11083_v63  ;;  %v7647_v63 = vpack.c.bf16 %v12383_v30, %v12382_v9 }
 0x277   :  { %5618 = vmatmul.mubr.f32.vlgmr.msra.gmra.mrb[24].mxu1 %v5137_v45  ;;  %7610 = vmatpush3.bf16.msra.mxu0 %v7609_v0  ;;  %v7649_v45 = vpack.c.bf16 %v12385_v27, %v12384_v53 }
 0x278   :  { %7682 = vmatpush3.bf16.msra.mxu1 %v11179_v29  ;;  %5888 = vmatprep.mubr.f32.mxu1 %v10800_v56  ;;  %v7651_v29 = vpack.c.bf16 %v12387_v47, %v12386_v22 }
 0x279   :  { %7612 = vmatprep.subr.bf16.mxu0 %v7611_v49  ;;  %7684 = vmatprep.subr.bf16.mxu1 %v11186_v17  ;;  %v12388_v17 = vand.u32 4294901760, %v12374_v59 }
 0x27b   :  { %7614 = vmatpush3.bf16.msra.mxu0 %v7613_v7  ;;  %v7653_v52 = vpack.c.bf16 %v12389_v50, %v12388_v17 }
 0x27c   :  { %7686 = vmatpush3.bf16.msra.mxu1 %v11210_v55  ;;  %7648 = vmatprep.subr.bf16.mxu0 %v7647_v63  ;;  %v12390_v55 = vand.u32 4294901760, %v12376_v4 }
 0x27d   :  { %7688 = vmatprep.subr.bf16.mxu1 %v11224_v57  ;;  %v12392_v57 = vand.u32 4294901760, %v12378_v62 }
 0x27e   :  { %5510 = vmatmul.mubr.f32.vlgmr.msra.gmra.mrb[24].mxu0 %v11311_v15  ;;  %v7655_v36 = vpack.c.bf16 %v12391_v60, %v12390_v55 }
 0x27f   :  { %7650 = vmatpush3.bf16.msra.mxu0 %v7649_v45  ;;  %5784 = vmatprep.mubr.f32.mxu0 %v10800_v56  ;;  %v12393_v56 = vand.u32 4294901760, %v12379_v26 }
 0x280   :  { %7690 = vmatpush3.bf16.msra.mxu1 %v11236_v46  ;;  %7652 = vmatprep.subr.bf16.mxu0 %v7651_v29  ;;  %v12395_v46 = vand.u32 4294901760, %v12381_v10 }
 0x281   :  { %7692 = vmatprep.subr.bf16.mxu1 %v11243_v19  ;;  %v7657_v15 = vpack.c.bf16 %v12393_v56, %v12392_v57  ;;  %v12397_v19 = vand.u32 4294901760, %v11069_v21 }
 0x282   :  { %v7659_v12 = vpack.c.bf16 %v12395_v46, %v12394_v51 }
 0x283   :  { %7654 = vmatpush3.bf16.msra.mxu0 %v7653_v52  ;;  %v7661_v59 = vpack.c.bf16 %v12397_v19, %v12396_v14 }
 0x284   :  { %7694 = vmatpush3.bf16.msra.mxu1 %v11263_v18  ;;  %7656 = vmatprep.subr.bf16.mxu0 %v7655_v36  ;;  %v12399_v18 = vand.u32 4294901760, %v11088_v38  ;;  %v6258_v16 = vpop.f32.mrb[12].mxu1 }
 0x285   :  { %7696 = vmatprep.subr.bf16.mxu1 %v11269_v6  ;;  %v6259_v62 = vpop.f32.mrb[13].mxu1  ;;  %v12400_v6 = vand.u32 4294901760, %v11115_v25 }
 0x286   :  { %v7663_v4 = vpack.c.bf16 %v12399_v18, %v12398_v2  ;;  %v6260_v21 = vadd.f32 %v6259_v62, %v6258_v16 }
 0x287   :  { %7658 = vmatpush3.bf16.msra.mxu0 %v7657_v15  ;;  %v7665_v26 = vpack.c.bf16 %v12401_v33, %v12400_v6 }
 0x288   :  { %7698 = vmatpush3.bf16.msra.mxu1 %v11283_v34  ;;  %7660 = vmatprep.subr.bf16.mxu0 %v7659_v12  ;;  %v12402_v34 = vand.u32 4294901760, %v11129_v3  ;;  %v12404_v3 = vld [vmem:[#allocation39_spill] sm:$0xff] }
 0x289   :  { %7700 = vmatprep.subr.bf16.mxu1 %v11289_v43 }
 0x28a   :  { %v7667_v38 = vpack.c.bf16 %v12403_v20, %v12402_v34 }
 0x28b   :  { %7662 = vmatpush3.bf16.msra.mxu0 %v7661_v59 }
 0x28c   :  { %7702 = vmatpush3.bf16.msra.mxu1 %v11300_v23  ;;  %7664 = vmatprep.subr.bf16.mxu0 %v7663_v4  ;;  %v6223_v25 = vpop.f32.mrb[12].mxu0 }
 0x28d   :  { %7704 = vmatprep.subr.bf16.mxu1 %v11307_v28  ;;  %v6224_v43 = vpop.f32.mrb[13].mxu0  ;;  %v12405_v28 = vld [vmem:[#allocation41_spill] sm:$0xff] }
 0x28e   :  { %v6225_v23 = vadd.f32 %v6224_v43, %v6223_v25 }
 0x28f   :  { %7666 = vmatpush3.bf16.msra.mxu0 %v7665_v26 }
 0x290   :  { %7706 = vmatpush3.bf16.msra.mxu1 %v11318_v13  ;;  %7668 = vmatprep.subr.bf16.mxu0 %v7667_v38  ;;  %v3788_v5 = vadd.f32 %v6225_v23, %v3650_v32 }
 0x291   :  { %7708 = vmatprep.subr.bf16.mxu1 %v11328_v24 }
 0x292   :  { %v3896_v13 = vadd.f32 %v6260_v21, %v3788_v5 }
 0x293   :  { %7670 = vmatpush3.bf16.msra.mxu0 %v12404_v3 }
 0x294   :  { %7710 = vmatpush3.bf16.msra.mxu1 %v11336_v58  ;;  %7672 = vmatprep.subr.bf16.mxu0 %v7671_v1 }
 0x297   :  { %5890 = vmatmul.mubr.f32.vlgmr.msra.gmra.mrb[26].mxu1 %v11292_v11  ;;  %7674 = vmatpush3.bf16.msra.mxu0 %v12405_v28 }
 0x298   :  { %7676 = vmatprep.subr.bf16.mxu0 %v12406_v48 }
 0x29b   :  { %7678 = vmatpush3.bf16.msra.mxu0 %v12407_v31 }
 0x29e   :  { %5786 = vmatmul.mubr.f32.vlgmr.msra.gmra.mrb[26].mxu0 %v11292_v11 }
 0x2a7   :  { %v6328_v8 = vpop.f32.mrb[14].mxu1 }
 0x2a8   :  { %v6329_v39 = vpop.f32.mrb[15].mxu1 }
 0x2a9   :  { %v6330_v24 = vadd.f32 %v6329_v39, %v6328_v8 }
 0x2ad   :  { %v6293_v61 = vpop.f32.mrb[14].mxu0 }
 0x2ae   :  { %v6294_v10 = vpop.f32.mrb[15].mxu0 }
 0x2af   :  { %v6295_v37 = vadd.f32 %v6294_v10, %v6293_v61 }
 0x2b1   :  { %v4064_v58 = vadd.f32 %v6295_v37, %v3896_v13 }
 0x2b3   :  { %v4168_v54 = vadd.f32 %v6330_v24, %v4064_v58 }
 0x2c7   :  { %v6398_v44 = vpop.f32.mrb[16].mxu1 }
 0x2c8   :  { %v6399_v41 = vpop.f32.mrb[17].mxu1 }
 0x2c9   :  { %v6400_v40 = vadd.f32 %v6399_v41, %v6398_v44 }
 0x2ce   :  { %v6363_v42 = vpop.f32.mrb[16].mxu0 }
 0x2cf   :  { %v6364_v0 = vpop.f32.mrb[17].mxu0 }
 0x2d0   :  { %v6365_v35 = vadd.f32 %v6364_v0, %v6363_v42 }
 0x2d2   :  { %v4280_v49 = vadd.f32 %v6365_v35, %v4168_v54 }
 0x2d4   :  { %v4512_v7 = vadd.f32 %v6400_v40, %v4280_v49 }
 0x2e7   :  { %v6468_v32 = vpop.f32.mrb[18].mxu1 }
 0x2e8   :  { %v6469_v9 = vpop.f32.mrb[19].mxu1 }
 0x2e9   :  { %v6470_v30 = vadd.f32 %v6469_v9, %v6468_v32 }
 0x2ee   :  { %v6433_v11 = vpop.f32.mrb[18].mxu0 }
 0x2ef   :  { %v6434_v63 = vpop.f32.mrb[19].mxu0 }
 0x2f0   :  { %v6435_v53 = vadd.f32 %v6434_v63, %v6433_v11 }
 0x2f2   :  { %v4650_v27 = vadd.f32 %v6435_v53, %v4512_v7 }
 0x2f4   :  { %v4758_v45 = vadd.f32 %v6470_v30, %v4650_v27 }
 0x308   :  { %v6538_v22 = vpop.f32.mrb[20].mxu1 }
 0x309   :  { %v6539_v47 = vpop.f32.mrb[21].mxu1 }
 0x30a   :  { %v6540_v29 = vadd.f32 %v6539_v47, %v6538_v22 }
 0x310   :  { %v6503_v17 = vpop.f32.mrb[20].mxu0 }
 0x311   :  { %v6504_v50 = vpop.f32.mrb[21].mxu0 }
 0x312   :  { %v6505_v52 = vadd.f32 %v6504_v50, %v6503_v17 }
 0x314   :  { %v4926_v55 = vadd.f32 %v6505_v52, %v4758_v45 }
 0x316   :  { %v5030_v60 = vadd.f32 %v6540_v29, %v4926_v55 }
 0x329   :  { %v6608_v36 = vpop.f32.mrb[22].mxu1 }
 0x32a   :  { %v6609_v57 = vpop.f32.mrb[23].mxu1 }
 0x32b   :  { %v6610_v56 = vadd.f32 %v6609_v57, %v6608_v36 }
 0x331   :  { %v6573_v15 = vpop.f32.mrb[22].mxu0 }
 0x332   :  { %v6574_v51 = vpop.f32.mrb[23].mxu0 }
 0x333   :  { %v6575_v46 = vadd.f32 %v6574_v51, %v6573_v15 }
 0x335   :  { %v5142_v12 = vadd.f32 %v6575_v46, %v5030_v60 }
 0x337   :  { %v5374_v14 = vadd.f32 %v6610_v56, %v5142_v12 }
 0x34a   :  { %v6678_v19 = vpop.f32.mrb[24].mxu1 }
 0x34b   :  { %v6679_v59 = vpop.f32.mrb[25].mxu1 }
 0x34c   :  { %v6680_v2 = vadd.f32 %v6679_v59, %v6678_v19 }
 0x351   :  { %v6643_v18 = vpop.f32.mrb[24].mxu0 }
 0x352   :  { %v6644_v4 = vpop.f32.mrb[25].mxu0 }
 0x353   :  { %v6645_v16 = vadd.f32 %v6644_v4, %v6643_v18 }
 0x355   :  { %v5512_v62 = vadd.f32 %v6645_v16, %v5374_v14 }
 0x357   :  { %v5620_v6 = vadd.f32 %v6680_v2, %v5512_v62 }
 0x36a   :  { %v6748_v33 = vpop.f32.mrb[26].mxu1 }
 0x36b   :  { %v6749_v26 = vpop.f32.mrb[27].mxu1 }
 0x36c   :  { %v6750_v21 = vadd.f32 %v6749_v26, %v6748_v33 }
 0x371   :  { %v6713_v34 = vpop.f32.mrb[26].mxu0 }
 0x372   :  { %v6714_v20 = vpop.f32.mrb[27].mxu0 }
 0x373   :  { %v6715_v38 = vadd.f32 %v6714_v20, %v6713_v34 }
 0x375   :  { %v5788_v1 = vadd.f32 %v6715_v38, %v5620_v6 }
 0x377   :  { %v5892_v25 = vadd.f32 %v6750_v21, %v5788_v1 }
 0x379   :  { %5896 = vst.msk [vmem:[#allocation2] sm:$0x3] %vm5895_vm1, %v5892_v25 }
 0x37a   :  { %7765 = shalt.err (!%p7762_p4)
}
 0x37b   :  { %s7766_s6 = scalar_lea.hbm %s11484_s4, 32 }
 0x37c   :  { %p7767_p5 = scmp.ne.s32.totalorder %s11484_s4, %s7766_s6  ;;  %p7770_p6 = scmp.lt.u32.totalorder %s7766_s6, %s11484_s4 }
 0x37e   :  { %p7772_p7 = pnand %p7770_p6, %p7767_p5 }
 0x380   :  { %7775 = shalt.err (!%p7772_p7)
}
 0x381   :  { %5906 = dma.vmem_to_hbm [thread:$0]  %s5904_s28, 32, %s11484_s4, [#allocation3]  }
 0x382   :  { %7776 = dma.done.wait [#allocation3], 32  }
 0x383   :  { %7777 = vsyncadd [#allocation3], 4294967264 }
 0x384   :  { %5910 = vsyncpa [#allocation3], 1 }

</bundles_post_ra>
